<compile_context>
chip_gen: v5e
topology: v5e:2x2
jax: 0.10.0
libtpu: 0.0.40
codegen_flags: <defaults>
</compile_context>

<pallas_src>
import jax
import jax.numpy as jnp
from jax.experimental import pallas as pl
from jax.experimental.pallas import tpu as pltpu


_H = 28                      # spatial size hard-coded by the fc layer (28*28*15 -> 10)
_WP = 32                     # padded canonical width/height (28 + 2*2)
_FLAT = _WP * _WP            # 1024 flat canonical positions per channel
_BASE = 2 * _WP + 2          # flat index of output pixel (0, 0) = 66
_WIN = (_H - 1) * _WP + _H   # flat window covering all valid outputs = 892
_C1, _C2, _NCLS = 10, 15, 10
_B = 8                       # samples per grid step


def _fused_cnn_kernel(x_ref, w1_ref, b1_ref, w2_ref, b2_ref, wfc_ref, bfc_ref,
                      gmask_ref, bdmask_ref, fold_ref,
                      o_ref, a1_ref, a90_ref, xs_ref):
    """modelCNN forward for a block of _B samples, entirely in VMEM."""
    f32 = jnp.float32

    # Zero the canonical-buffer borders once per grid step.  The per-sample
    # writes below only touch [_BASE, _BASE+_WIN), so the borders stay zero for
    # every sample in this step (and we never rely on cross-step persistence,
    # which keeps this correct under megacore sharding).
    a1_ref[:, 0:_BASE] = jnp.zeros((_C1, _BASE), f32)
    a1_ref[:, _BASE + _WIN:_FLAT] = jnp.zeros((_C1, _FLAT - _BASE - _WIN), f32)

    # Hoist tiny loop-invariant operands out of the per-sample loop.
    b1v = b1_ref[...]        # (10, 1)
    b2v = b2_ref[...]        # (15, 1)
    bfcv = bfc_ref[...]      # (1, 10)
    gmaskv = gmask_ref[...]  # (1, _WIN) 0/1 gutter mask

    def body(b, carry):
        # Stage this sample's zero-padded, flattened input row into VMEM scratch
        # so all 25 conv1 tap slices below are plain static slices.
        xs_ref[...] = x_ref[pl.ds(b, 1), :]                     # (1, 1024)

        # ---- conv1: 5x5, pad 2, 1 -> 10.  25 shifted broadcast-FMAs (VPU). ----
        acc1 = jnp.zeros((_C1, _WIN), f32)
        for kh in range(5):
            for kw in range(5):
                t = kh * 5 + kw
                s = _WP * kh + kw                               # lane offset of this tap
                acc1 = acc1 + w1_ref[:, t:t + 1] * xs_ref[:, s:s + _WIN]
        acc1 = jnp.maximum(acc1 + b1v, 0.0) * gmaskv            # ReLU + gutter zeroing
        a1_ref[:, _BASE:_BASE + _WIN] = acc1

        # ---- conv2: 3x3, pad 1, 10 -> 15.  Gather the 9 shifted windows into a
        #      (90, 892) scratch, then ONE (15,90)@(90,892) MXU dot. ----
        for kh in range(3):
            for kw in range(3):
                t = kh * 3 + kw
                s = _WP * kh + kw + (_WP + 1)                   # 33 .. 99
                a90_ref[t * _C1:(t + 1) * _C1, :] = a1_ref[:, s:s + _WIN]
        acc2 = jnp.dot(w2_ref[...], a90_ref[...], preferred_element_type=f32)
        acc2 = jnp.maximum(acc2 + b2v, 0.0)                     # (15, 892)

        # ---- fc: one lane-dense (15,892)@(892,150) matmul.  The true logits are
        #      the block-diagonal (1,10) sub-blocks of p; select them with a 0/1
        #      mask, reduce over sublanes (XLU), then fold 150 lanes -> 10 with a
        #      tiny 0/1 matmul.  Gutter window columns hit zero weight rows. ----
        p = jnp.dot(acc2, wfc_ref[...], preferred_element_type=f32)     # (15, 150)
        srow = jnp.sum(p * bdmask_ref[...], axis=0, keepdims=True)      # (1, 150)
        logits = jnp.dot(srow, fold_ref[...], preferred_element_type=f32) + bfcv
        o_ref[pl.ds(b, 1), :] = logits.astype(o_ref.dtype)
        return carry

    jax.lax.fori_loop(0, x_ref.shape[0], body, 0)


def init_params(key):
    """PyTorch-layout parameters (Conv: (Cout, Cin, kh, kw); Linear: (out, in))."""
    k1, k2, k3, k4, k5, k6 = jax.random.split(key, 6)
    f32 = jnp.float32
    w1 = jax.random.normal(k1, (_C1, 1, 5, 5), f32) * (2.0 / 25) ** 0.5
    b1 = jax.random.normal(k2, (_C1,), f32) * 0.01
    w2 = jax.random.normal(k3, (_C2, _C1, 3, 3), f32) * (2.0 / 90) ** 0.5
    b2 = jax.random.normal(k4, (_C2,), f32) * 0.01
    wfc = jax.random.normal(k5, (_NCLS, _H * _H * _C2), f32) * (1.0 / (_H * _H * _C2)) ** 0.5
    bfc = jax.random.normal(k6, (_NCLS,), f32) * 0.01
    return dict(w1=w1, b1=b1, w2=w2, b2=b2, wfc=wfc, bfc=bfc)


def pack_params(params):
    """One-time repack of PyTorch-layout weights into the kernel's layouts."""
    w1 = params["w1"].astype(jnp.float32)
    w2 = params["w2"].astype(jnp.float32)
    wfc = params["wfc"].astype(jnp.float32)
    # conv1 weight (10, 25): column t = kh*5 + kw (Cin = 1)
    w1p = w1.reshape(_C1, 25)
    # conv2 weight (15, 90): column = (kh*3 + kw)*10 + cin
    w2p = jnp.transpose(w2, (0, 2, 3, 1)).reshape(_C2, 9 * _C1)
    # fc weight in canonical window layout (892, 150): row k = 32*h + w, col = c*10 + j.
    # Rows for w in [28, 32) are zero, so conv2's gutter-column garbage is ignored.
    wfc4 = wfc.reshape(_NCLS, _C2, _H, _H)
    wfc4 = jnp.pad(wfc4, ((0, 0), (0, 0), (0, 0), (0, _WP - _H)))   # (10, 15, 28, 32)
    wfc_canon = jnp.transpose(wfc4.reshape(_NCLS, _C2, _H * _WP), (2, 1, 0))
    wfc_canon = wfc_canon.reshape(_H * _WP, _C2 * _NCLS)[:_WIN]     # (892, 150)
    # Constant masks (resident kernel inputs, built once).
    flat = jnp.arange(_WIN, dtype=jnp.int32) + _BASE
    col = flat % _WP
    gmask = ((col >= 2) & (col < 2 + _H)).astype(jnp.float32).reshape(1, _WIN)
    xidx = jnp.arange(_C2 * _NCLS, dtype=jnp.int32)
    bdmask = (xidx[None, :] // _NCLS ==
              jnp.arange(_C2, dtype=jnp.int32)[:, None]).astype(jnp.float32)   # (15, 150)
    fold = jnp.tile(jnp.eye(_NCLS, dtype=jnp.float32), (_C2, 1))               # (150, 10)
    return dict(
        w1p=w1p,
        b1c=params["b1"].astype(jnp.float32).reshape(_C1, 1),
        w2p=w2p,
        b2c=params["b2"].astype(jnp.float32).reshape(_C2, 1),
        wfc_canon=wfc_canon,
        bfc_row=params["bfc"].astype(jnp.float32).reshape(1, _NCLS),
        gmask=gmask,
        bdmask=bdmask,
        fold=fold,
    )


@jax.jit
def model_cnn_forward(packed, x_nchw):
    n = x_nchw.shape[0]
    assert x_nchw.shape[1:] == (1, _H, _H), "fc layer hard-codes 1x28x28 inputs"
    # canonicalize the input: zero-pad to 32x32 and flatten (row stride 32)
    x = x_nchw.astype(jnp.float32).reshape(n, _H, _H)
    x = jnp.pad(x, ((0, 0), (2, 2), (2, 2)))             # (n, 32, 32)
    x = x.reshape(n, _FLAT)                              # (n, 1024)
    # pad the batch to a multiple of the per-step block size
    n_pad = pl.cdiv(n, _B) * _B
    if n_pad != n:
        x = jnp.pad(x, ((0, n_pad - n), (0, 0)))

    out = pl.pallas_call(
        _fused_cnn_kernel,
        out_shape=jax.ShapeDtypeStruct((n_pad, _NCLS), jnp.float32),
        grid=(n_pad // _B,),
        in_specs=[
            pl.BlockSpec((_B, _FLAT), lambda i: (i, 0)),            # x, _B samples
            pl.BlockSpec((_C1, 25), lambda i: (0, 0)),              # conv1 weight
            pl.BlockSpec((_C1, 1), lambda i: (0, 0)),               # conv1 bias
            pl.BlockSpec((_C2, 9 * _C1), lambda i: (0, 0)),         # conv2 weight
            pl.BlockSpec((_C2, 1), lambda i: (0, 0)),               # conv2 bias
            pl.BlockSpec((_WIN, _C2 * _NCLS), lambda i: (0, 0)),    # fc weight
            pl.BlockSpec((1, _NCLS), lambda i: (0, 0)),             # fc bias
            pl.BlockSpec((1, _WIN), lambda i: (0, 0)),              # gutter mask
            pl.BlockSpec((_C2, _C2 * _NCLS), lambda i: (0, 0)),     # block-diag mask
            pl.BlockSpec((_C2 * _NCLS, _NCLS), lambda i: (0, 0)),   # 150->10 fold
        ],
        out_specs=pl.BlockSpec((_B, _NCLS), lambda i: (i, 0)),
        scratch_shapes=[
            pltpu.VMEM((_C1, _FLAT), jnp.float32),     # padded conv1 activation
            pltpu.VMEM((9 * _C1, _WIN), jnp.float32),  # conv2 shifted-window matrix
            pltpu.VMEM((1, _FLAT), jnp.float32),       # staged per-sample input
        ],
        compiler_params=pltpu.CompilerParams(
            dimension_semantics=("parallel",),
        ),
    )(x, packed["w1p"], packed["b1c"], packed["w2p"], packed["b2c"],
      packed["wfc_canon"], packed["bfc_row"], packed["gmask"],
      packed["bdmask"], packed["fold"])
    return out[:n]


def reference_forward(params, x_nchw):
    """Pure-JAX/XLA reference matching the PyTorch module."""
    x = x_nchw.astype(jnp.float32)
    y = jax.lax.conv_general_dilated(
        x, params["w1"], (1, 1), ((2, 2), (2, 2)),
        dimension_numbers=("NCHW", "OIHW", "NCHW"),
        precision=jax.lax.Precision.HIGHEST)
    y = jnp.maximum(y + params["b1"].reshape(1, -1, 1, 1), 0.0)
    y = jax.lax.conv_general_dilated(
        y, params["w2"], (1, 1), ((1, 1), (1, 1)),
        dimension_numbers=("NCHW", "OIHW", "NCHW"),
        precision=jax.lax.Precision.HIGHEST)
    y = jnp.maximum(y + params["b2"].reshape(1, -1, 1, 1), 0.0)
    y = y.reshape(y.shape[0], -1)
    return jnp.dot(y, params["wfc"].T,
                   precision=jax.lax.Precision.HIGHEST) + params["bfc"]


if __name__ == "__main__":
    key = jax.random.PRNGKey(0)
    pkey, xkey = jax.random.split(key)
    params = init_params(pkey)
    packed = pack_params(params)

    # The fc layer hard-codes 28*28*15 features, so the input must be (N, 1, 28, 28).
    x = jax.random.normal(xkey, (2, 1, _H, _H), jnp.float32)

    y = model_cnn_forward(packed, x)
    y = jax.block_until_ready(y)
    assert y.shape == (2, _NCLS) and y.dtype == jnp.float32

    y_ref = reference_forward(params, x)
    assert jnp.allclose(y, y_ref, atol=2e-3, rtol=2e-3), (
        f"max abs err {jnp.max(jnp.abs(y - y_ref))}")

    print("KERNEL_OK")
</pallas_src>

<mosaic_0001>
module attributes {stable_mosaic.version = 11 : i64} {
  func.func @_fused_cnn_kernel(%arg0: i32, %arg1: memref<8x1024xf32, #tpu.memory_space<vmem>>, %arg2: memref<10x25xf32, #tpu.memory_space<vmem>>, %arg3: memref<10x1xf32, #tpu.memory_space<vmem>>, %arg4: memref<15x90xf32, #tpu.memory_space<vmem>>, %arg5: memref<15x1xf32, #tpu.memory_space<vmem>>, %arg6: memref<892x150xf32, #tpu.memory_space<vmem>>, %arg7: memref<1x10xf32, #tpu.memory_space<vmem>>, %arg8: memref<1x892xf32, #tpu.memory_space<vmem>>, %arg9: memref<15x150xf32, #tpu.memory_space<vmem>>, %arg10: memref<150x10xf32, #tpu.memory_space<vmem>>, %arg11: memref<8x10xf32, #tpu.memory_space<vmem>>, %arg12: memref<10x1024xf32, #tpu.memory_space<vmem>>, %arg13: memref<90x892xf32, #tpu.memory_space<vmem>>, %arg14: memref<1x1024xf32, #tpu.memory_space<vmem>>) attributes {dimension_semantics = [#tpu.dimension_semantics<parallel>], iteration_bounds = array<i64: 1>, scalar_prefetch = 0 : i64, scratch_operands = 3 : i64, tpu.core_type = #tpu.core_type<tc>, window_params = [{transform_indices = @transform_0, window_bounds = array<i64: 8, 1024>}, {pipeline_mode = #tpu.pipeline_mode<synchronous>, transform_indices = @transform_1, window_bounds = array<i64: 10, 25>}, {pipeline_mode = #tpu.pipeline_mode<synchronous>, transform_indices = @transform_2, window_bounds = array<i64: 10, 1>}, {pipeline_mode = #tpu.pipeline_mode<synchronous>, transform_indices = @transform_3, window_bounds = array<i64: 15, 90>}, {pipeline_mode = #tpu.pipeline_mode<synchronous>, transform_indices = @transform_4, window_bounds = array<i64: 15, 1>}, {pipeline_mode = #tpu.pipeline_mode<synchronous>, transform_indices = @transform_5, window_bounds = array<i64: 892, 150>}, {pipeline_mode = #tpu.pipeline_mode<synchronous>, transform_indices = @transform_6, window_bounds = array<i64: 1, 10>}, {pipeline_mode = #tpu.pipeline_mode<synchronous>, transform_indices = @transform_7, window_bounds = array<i64: 1, 892>}, {pipeline_mode = #tpu.pipeline_mode<synchronous>, transform_indices = @transform_8, window_bounds = array<i64: 15, 150>}, {pipeline_mode = #tpu.pipeline_mode<synchronous>, transform_indices = @transform_9, window_bounds = array<i64: 150, 10>}, {transform_indices = @transform_10, window_bounds = array<i64: 8, 10>}]} {
    %cst = arith.constant 0.000000e+00 : f32
    %0 = vector.broadcast %cst : f32 to vector<10x66xf32>
    %c0 = arith.constant 0 : index
    %c0_0 = arith.constant 0 : index
    %1 = vector.load %arg12[%c0, %c0_0] : memref<10x1024xf32, #tpu.memory_space<vmem>>, vector<10x66xf32>
    tpu.vector_store %arg12[%c0, %c0_0], %0 {strides = array<i32>} : memref<10x1024xf32, #tpu.memory_space<vmem>>, vector<10x66xf32>,
    %cst_1 = arith.constant 0.000000e+00 : f32
    %2 = vector.broadcast %cst_1 : f32 to vector<10x66xf32>
    %c0_2 = arith.constant 0 : index
    %c958 = arith.constant 958 : index
    %3 = vector.load %arg12[%c0_2, %c958] : memref<10x1024xf32, #tpu.memory_space<vmem>>, vector<10x66xf32>
    tpu.vector_store %arg12[%c0_2, %c958], %2 {strides = array<i32>} : memref<10x1024xf32, #tpu.memory_space<vmem>>, vector<10x66xf32>,
    %c0_3 = arith.constant 0 : index
    %c0_4 = arith.constant 0 : index
    %4 = vector.load %arg3[%c0_3, %c0_4] : memref<10x1xf32, #tpu.memory_space<vmem>>, vector<10x1xf32>
    %c0_5 = arith.constant 0 : index
    %c0_6 = arith.constant 0 : index
    %5 = vector.load %arg5[%c0_5, %c0_6] : memref<15x1xf32, #tpu.memory_space<vmem>>, vector<15x1xf32>
    %c0_7 = arith.constant 0 : index
    %c0_8 = arith.constant 0 : index
    %6 = vector.load %arg7[%c0_7, %c0_8] : memref<1x10xf32, #tpu.memory_space<vmem>>, vector<1x10xf32>
    %c0_9 = arith.constant 0 : index
    %c0_10 = arith.constant 0 : index
    %7 = vector.load %arg8[%c0_9, %c0_10] : memref<1x892xf32, #tpu.memory_space<vmem>>, vector<1x892xf32>
    %c0_i32 = arith.constant 0 : i32
    %c8_i32 = arith.constant 8 : i32
    %8 = arith.addi %c0_i32, %c8_i32 : i32
    %c1_i32 = arith.constant 1 : i32
    scf.for %arg15 = %c0_i32 to %8 step %c1_i32  : i32 {
      %9 = arith.index_cast %arg15 : i32 to index
      %c0_12 = arith.constant 0 : index
      %10 = vector.load %arg1[%9, %c0_12] : memref<8x1024xf32, #tpu.memory_space<vmem>>, vector<1x1024xf32>
      %c0_13 = arith.constant 0 : index
      %c0_14 = arith.constant 0 : index
      %11 = vector.load %arg14[%c0_13, %c0_14] : memref<1x1024xf32, #tpu.memory_space<vmem>>, vector<1x1024xf32>
      tpu.vector_store %arg14[%c0_13, %c0_14], %10 {strides = array<i32>} : memref<1x1024xf32, #tpu.memory_space<vmem>>, vector<1x1024xf32>,
      %cst_15 = arith.constant 0.000000e+00 : f32
      %12 = vector.broadcast %cst_15 : f32 to vector<10x892xf32>
      %c0_16 = arith.constant 0 : index
      %c0_17 = arith.constant 0 : index
      %13 = vector.load %arg2[%c0_16, %c0_17] : memref<10x25xf32, #tpu.memory_space<vmem>>, vector<10x1xf32>
      %c0_18 = arith.constant 0 : index
      %c0_19 = arith.constant 0 : index
      %14 = vector.load %arg14[%c0_18, %c0_19] : memref<1x1024xf32, #tpu.memory_space<vmem>>, vector<1x892xf32>
      %15 = vector.broadcast %13 : vector<10x1xf32> to vector<10x892xf32>
      %16 = vector.broadcast %14 : vector<1x892xf32> to vector<10x892xf32>
      %17 = arith.mulf %15, %16 : vector<10x892xf32>
      %18 = arith.addf %12, %17 : vector<10x892xf32>
      %c0_20 = arith.constant 0 : index
      %c1 = arith.constant 1 : index
      %19 = vector.load %arg2[%c0_20, %c1] : memref<10x25xf32, #tpu.memory_space<vmem>>, vector<10x1xf32>
      %c0_21 = arith.constant 0 : index
      %c1_22 = arith.constant 1 : index
      %20 = vector.load %arg14[%c0_21, %c1_22] : memref<1x1024xf32, #tpu.memory_space<vmem>>, vector<1x892xf32>
      %21 = vector.broadcast %19 : vector<10x1xf32> to vector<10x892xf32>
      %22 = vector.broadcast %20 : vector<1x892xf32> to vector<10x892xf32>
      %23 = arith.mulf %21, %22 : vector<10x892xf32>
      %24 = arith.addf %18, %23 : vector<10x892xf32>
      %c0_23 = arith.constant 0 : index
      %c2 = arith.constant 2 : index
      %25 = vector.load %arg2[%c0_23, %c2] : memref<10x25xf32, #tpu.memory_space<vmem>>, vector<10x1xf32>
      %c0_24 = arith.constant 0 : index
      %c2_25 = arith.constant 2 : index
      %26 = vector.load %arg14[%c0_24, %c2_25] : memref<1x1024xf32, #tpu.memory_space<vmem>>, vector<1x892xf32>
      %27 = vector.broadcast %25 : vector<10x1xf32> to vector<10x892xf32>
      %28 = vector.broadcast %26 : vector<1x892xf32> to vector<10x892xf32>
      %29 = arith.mulf %27, %28 : vector<10x892xf32>
      %30 = arith.addf %24, %29 : vector<10x892xf32>
      %c0_26 = arith.constant 0 : index
      %c3 = arith.constant 3 : index
      %31 = vector.load %arg2[%c0_26, %c3] : memref<10x25xf32, #tpu.memory_space<vmem>>, vector<10x1xf32>
      %c0_27 = arith.constant 0 : index
      %c3_28 = arith.constant 3 : index
      %32 = vector.load %arg14[%c0_27, %c3_28] : memref<1x1024xf32, #tpu.memory_space<vmem>>, vector<1x892xf32>
      %33 = vector.broadcast %31 : vector<10x1xf32> to vector<10x892xf32>
      %34 = vector.broadcast %32 : vector<1x892xf32> to vector<10x892xf32>
      %35 = arith.mulf %33, %34 : vector<10x892xf32>
      %36 = arith.addf %30, %35 : vector<10x892xf32>
      %c0_29 = arith.constant 0 : index
      %c4 = arith.constant 4 : index
      %37 = vector.load %arg2[%c0_29, %c4] : memref<10x25xf32, #tpu.memory_space<vmem>>, vector<10x1xf32>
      %c0_30 = arith.constant 0 : index
      %c4_31 = arith.constant 4 : index
      %38 = vector.load %arg14[%c0_30, %c4_31] : memref<1x1024xf32, #tpu.memory_space<vmem>>, vector<1x892xf32>
      %39 = vector.broadcast %37 : vector<10x1xf32> to vector<10x892xf32>
      %40 = vector.broadcast %38 : vector<1x892xf32> to vector<10x892xf32>
      %41 = arith.mulf %39, %40 : vector<10x892xf32>
      %42 = arith.addf %36, %41 : vector<10x892xf32>
      %c0_32 = arith.constant 0 : index
      %c5 = arith.constant 5 : index
      %43 = vector.load %arg2[%c0_32, %c5] : memref<10x25xf32, #tpu.memory_space<vmem>>, vector<10x1xf32>
      %c0_33 = arith.constant 0 : index
      %c32 = arith.constant 32 : index
      %44 = vector.load %arg14[%c0_33, %c32] : memref<1x1024xf32, #tpu.memory_space<vmem>>, vector<1x892xf32>
      %45 = vector.broadcast %43 : vector<10x1xf32> to vector<10x892xf32>
      %46 = vector.broadcast %44 : vector<1x892xf32> to vector<10x892xf32>
      %47 = arith.mulf %45, %46 : vector<10x892xf32>
      %48 = arith.addf %42, %47 : vector<10x892xf32>
      %c0_34 = arith.constant 0 : index
      %c6 = arith.constant 6 : index
      %49 = vector.load %arg2[%c0_34, %c6] : memref<10x25xf32, #tpu.memory_space<vmem>>, vector<10x1xf32>
      %c0_35 = arith.constant 0 : index
      %c33 = arith.constant 33 : index
      %50 = vector.load %arg14[%c0_35, %c33] : memref<1x1024xf32, #tpu.memory_space<vmem>>, vector<1x892xf32>
      %51 = vector.broadcast %49 : vector<10x1xf32> to vector<10x892xf32>
      %52 = vector.broadcast %50 : vector<1x892xf32> to vector<10x892xf32>
      %53 = arith.mulf %51, %52 : vector<10x892xf32>
      %54 = arith.addf %48, %53 : vector<10x892xf32>
      %c0_36 = arith.constant 0 : index
      %c7 = arith.constant 7 : index
      %55 = vector.load %arg2[%c0_36, %c7] : memref<10x25xf32, #tpu.memory_space<vmem>>, vector<10x1xf32>
      %c0_37 = arith.constant 0 : index
      %c34 = arith.constant 34 : index
      %56 = vector.load %arg14[%c0_37, %c34] : memref<1x1024xf32, #tpu.memory_space<vmem>>, vector<1x892xf32>
      %57 = vector.broadcast %55 : vector<10x1xf32> to vector<10x892xf32>
      %58 = vector.broadcast %56 : vector<1x892xf32> to vector<10x892xf32>
      %59 = arith.mulf %57, %58 : vector<10x892xf32>
      %60 = arith.addf %54, %59 : vector<10x892xf32>
      %c0_38 = arith.constant 0 : index
      %c8 = arith.constant 8 : index
      %61 = vector.load %arg2[%c0_38, %c8] : memref<10x25xf32, #tpu.memory_space<vmem>>, vector<10x1xf32>
      %c0_39 = arith.constant 0 : index
      %c35 = arith.constant 35 : index
      %62 = vector.load %arg14[%c0_39, %c35] : memref<1x1024xf32, #tpu.memory_space<vmem>>, vector<1x892xf32>
      %63 = vector.broadcast %61 : vector<10x1xf32> to vector<10x892xf32>
      %64 = vector.broadcast %62 : vector<1x892xf32> to vector<10x892xf32>
      %65 = arith.mulf %63, %64 : vector<10x892xf32>
      %66 = arith.addf %60, %65 : vector<10x892xf32>
      %c0_40 = arith.constant 0 : index
      %c9 = arith.constant 9 : index
      %67 = vector.load %arg2[%c0_40, %c9] : memref<10x25xf32, #tpu.memory_space<vmem>>, vector<10x1xf32>
      %c0_41 = arith.constant 0 : index
      %c36 = arith.constant 36 : index
      %68 = vector.load %arg14[%c0_41, %c36] : memref<1x1024xf32, #tpu.memory_space<vmem>>, vector<1x892xf32>
      %69 = vector.broadcast %67 : vector<10x1xf32> to vector<10x892xf32>
      %70 = vector.broadcast %68 : vector<1x892xf32> to vector<10x892xf32>
      %71 = arith.mulf %69, %70 : vector<10x892xf32>
      %72 = arith.addf %66, %71 : vector<10x892xf32>
      %c0_42 = arith.constant 0 : index
      %c10 = arith.constant 10 : index
      %73 = vector.load %arg2[%c0_42, %c10] : memref<10x25xf32, #tpu.memory_space<vmem>>, vector<10x1xf32>
      %c0_43 = arith.constant 0 : index
      %c64 = arith.constant 64 : index
      %74 = vector.load %arg14[%c0_43, %c64] : memref<1x1024xf32, #tpu.memory_space<vmem>>, vector<1x892xf32>
      %75 = vector.broadcast %73 : vector<10x1xf32> to vector<10x892xf32>
      %76 = vector.broadcast %74 : vector<1x892xf32> to vector<10x892xf32>
      %77 = arith.mulf %75, %76 : vector<10x892xf32>
      %78 = arith.addf %72, %77 : vector<10x892xf32>
      %c0_44 = arith.constant 0 : index
      %c11 = arith.constant 11 : index
      %79 = vector.load %arg2[%c0_44, %c11] : memref<10x25xf32, #tpu.memory_space<vmem>>, vector<10x1xf32>
      %c0_45 = arith.constant 0 : index
      %c65 = arith.constant 65 : index
      %80 = vector.load %arg14[%c0_45, %c65] : memref<1x1024xf32, #tpu.memory_space<vmem>>, vector<1x892xf32>
      %81 = vector.broadcast %79 : vector<10x1xf32> to vector<10x892xf32>
      %82 = vector.broadcast %80 : vector<1x892xf32> to vector<10x892xf32>
      %83 = arith.mulf %81, %82 : vector<10x892xf32>
      %84 = arith.addf %78, %83 : vector<10x892xf32>
      %c0_46 = arith.constant 0 : index
      %c12 = arith.constant 12 : index
      %85 = vector.load %arg2[%c0_46, %c12] : memref<10x25xf32, #tpu.memory_space<vmem>>, vector<10x1xf32>
      %c0_47 = arith.constant 0 : index
      %c66 = arith.constant 66 : index
      %86 = vector.load %arg14[%c0_47, %c66] : memref<1x1024xf32, #tpu.memory_space<vmem>>, vector<1x892xf32>
      %87 = vector.broadcast %85 : vector<10x1xf32> to vector<10x892xf32>
      %88 = vector.broadcast %86 : vector<1x892xf32> to vector<10x892xf32>
      %89 = arith.mulf %87, %88 : vector<10x892xf32>
      %90 = arith.addf %84, %89 : vector<10x892xf32>
      %c0_48 = arith.constant 0 : index
      %c13 = arith.constant 13 : index
      %91 = vector.load %arg2[%c0_48, %c13] : memref<10x25xf32, #tpu.memory_space<vmem>>, vector<10x1xf32>
      %c0_49 = arith.constant 0 : index
      %c67 = arith.constant 67 : index
      %92 = vector.load %arg14[%c0_49, %c67] : memref<1x1024xf32, #tpu.memory_space<vmem>>, vector<1x892xf32>
      %93 = vector.broadcast %91 : vector<10x1xf32> to vector<10x892xf32>
      %94 = vector.broadcast %92 : vector<1x892xf32> to vector<10x892xf32>
      %95 = arith.mulf %93, %94 : vector<10x892xf32>
      %96 = arith.addf %90, %95 : vector<10x892xf32>
      %c0_50 = arith.constant 0 : index
      %c14 = arith.constant 14 : index
      %97 = vector.load %arg2[%c0_50, %c14] : memref<10x25xf32, #tpu.memory_space<vmem>>, vector<10x1xf32>
      %c0_51 = arith.constant 0 : index
      %c68 = arith.constant 68 : index
      %98 = vector.load %arg14[%c0_51, %c68] : memref<1x1024xf32, #tpu.memory_space<vmem>>, vector<1x892xf32>
      %99 = vector.broadcast %97 : vector<10x1xf32> to vector<10x892xf32>
      %100 = vector.broadcast %98 : vector<1x892xf32> to vector<10x892xf32>
      %101 = arith.mulf %99, %100 : vector<10x892xf32>
      %102 = arith.addf %96, %101 : vector<10x892xf32>
      %c0_52 = arith.constant 0 : index
      %c15 = arith.constant 15 : index
      %103 = vector.load %arg2[%c0_52, %c15] : memref<10x25xf32, #tpu.memory_space<vmem>>, vector<10x1xf32>
      %c0_53 = arith.constant 0 : index
      %c96 = arith.constant 96 : index
      %104 = vector.load %arg14[%c0_53, %c96] : memref<1x1024xf32, #tpu.memory_space<vmem>>, vector<1x892xf32>
      %105 = vector.broadcast %103 : vector<10x1xf32> to vector<10x892xf32>
      %106 = vector.broadcast %104 : vector<1x892xf32> to vector<10x892xf32>
      %107 = arith.mulf %105, %106 : vector<10x892xf32>
      %108 = arith.addf %102, %107 : vector<10x892xf32>
      %c0_54 = arith.constant 0 : index
      %c16 = arith.constant 16 : index
      %109 = vector.load %arg2[%c0_54, %c16] : memref<10x25xf32, #tpu.memory_space<vmem>>, vector<10x1xf32>
      %c0_55 = arith.constant 0 : index
      %c97 = arith.constant 97 : index
      %110 = vector.load %arg14[%c0_55, %c97] : memref<1x1024xf32, #tpu.memory_space<vmem>>, vector<1x892xf32>
      %111 = vector.broadcast %109 : vector<10x1xf32> to vector<10x892xf32>
      %112 = vector.broadcast %110 : vector<1x892xf32> to vector<10x892xf32>
      %113 = arith.mulf %111, %112 : vector<10x892xf32>
      %114 = arith.addf %108, %113 : vector<10x892xf32>
      %c0_56 = arith.constant 0 : index
      %c17 = arith.constant 17 : index
      %115 = vector.load %arg2[%c0_56, %c17] : memref<10x25xf32, #tpu.memory_space<vmem>>, vector<10x1xf32>
      %c0_57 = arith.constant 0 : index
      %c98 = arith.constant 98 : index
      %116 = vector.load %arg14[%c0_57, %c98] : memref<1x1024xf32, #tpu.memory_space<vmem>>, vector<1x892xf32>
      %117 = vector.broadcast %115 : vector<10x1xf32> to vector<10x892xf32>
      %118 = vector.broadcast %116 : vector<1x892xf32> to vector<10x892xf32>
      %119 = arith.mulf %117, %118 : vector<10x892xf32>
      %120 = arith.addf %114, %119 : vector<10x892xf32>
      %c0_58 = arith.constant 0 : index
      %c18 = arith.constant 18 : index
      %121 = vector.load %arg2[%c0_58, %c18] : memref<10x25xf32, #tpu.memory_space<vmem>>, vector<10x1xf32>
      %c0_59 = arith.constant 0 : index
      %c99 = arith.constant 99 : index
      %122 = vector.load %arg14[%c0_59, %c99] : memref<1x1024xf32, #tpu.memory_space<vmem>>, vector<1x892xf32>
      %123 = vector.broadcast %121 : vector<10x1xf32> to vector<10x892xf32>
      %124 = vector.broadcast %122 : vector<1x892xf32> to vector<10x892xf32>
      %125 = arith.mulf %123, %124 : vector<10x892xf32>
      %126 = arith.addf %120, %125 : vector<10x892xf32>
      %c0_60 = arith.constant 0 : index
      %c19 = arith.constant 19 : index
      %127 = vector.load %arg2[%c0_60, %c19] : memref<10x25xf32, #tpu.memory_space<vmem>>, vector<10x1xf32>
      %c0_61 = arith.constant 0 : index
      %c100 = arith.constant 100 : index
      %128 = vector.load %arg14[%c0_61, %c100] : memref<1x1024xf32, #tpu.memory_space<vmem>>, vector<1x892xf32>
      %129 = vector.broadcast %127 : vector<10x1xf32> to vector<10x892xf32>
      %130 = vector.broadcast %128 : vector<1x892xf32> to vector<10x892xf32>
      %131 = arith.mulf %129, %130 : vector<10x892xf32>
      %132 = arith.addf %126, %131 : vector<10x892xf32>
      %c0_62 = arith.constant 0 : index
      %c20 = arith.constant 20 : index
      %133 = vector.load %arg2[%c0_62, %c20] : memref<10x25xf32, #tpu.memory_space<vmem>>, vector<10x1xf32>
      %c0_63 = arith.constant 0 : index
      %c128 = arith.constant 128 : index
      %134 = vector.load %arg14[%c0_63, %c128] : memref<1x1024xf32, #tpu.memory_space<vmem>>, vector<1x892xf32>
      %135 = vector.broadcast %133 : vector<10x1xf32> to vector<10x892xf32>
      %136 = vector.broadcast %134 : vector<1x892xf32> to vector<10x892xf32>
      %137 = arith.mulf %135, %136 : vector<10x892xf32>
      %138 = arith.addf %132, %137 : vector<10x892xf32>
      %c0_64 = arith.constant 0 : index
      %c21 = arith.constant 21 : index
      %139 = vector.load %arg2[%c0_64, %c21] : memref<10x25xf32, #tpu.memory_space<vmem>>, vector<10x1xf32>
      %c0_65 = arith.constant 0 : index
      %c129 = arith.constant 129 : index
      %140 = vector.load %arg14[%c0_65, %c129] : memref<1x1024xf32, #tpu.memory_space<vmem>>, vector<1x892xf32>
      %141 = vector.broadcast %139 : vector<10x1xf32> to vector<10x892xf32>
      %142 = vector.broadcast %140 : vector<1x892xf32> to vector<10x892xf32>
      %143 = arith.mulf %141, %142 : vector<10x892xf32>
      %144 = arith.addf %138, %143 : vector<10x892xf32>
      %c0_66 = arith.constant 0 : index
      %c22 = arith.constant 22 : index
      %145 = vector.load %arg2[%c0_66, %c22] : memref<10x25xf32, #tpu.memory_space<vmem>>, vector<10x1xf32>
      %c0_67 = arith.constant 0 : index
      %c130 = arith.constant 130 : index
      %146 = vector.load %arg14[%c0_67, %c130] : memref<1x1024xf32, #tpu.memory_space<vmem>>, vector<1x892xf32>
      %147 = vector.broadcast %145 : vector<10x1xf32> to vector<10x892xf32>
      %148 = vector.broadcast %146 : vector<1x892xf32> to vector<10x892xf32>
      %149 = arith.mulf %147, %148 : vector<10x892xf32>
      %150 = arith.addf %144, %149 : vector<10x892xf32>
      %c0_68 = arith.constant 0 : index
      %c23 = arith.constant 23 : index
      %151 = vector.load %arg2[%c0_68, %c23] : memref<10x25xf32, #tpu.memory_space<vmem>>, vector<10x1xf32>
      %c0_69 = arith.constant 0 : index
      %c131 = arith.constant 131 : index
      %152 = vector.load %arg14[%c0_69, %c131] : memref<1x1024xf32, #tpu.memory_space<vmem>>, vector<1x892xf32>
      %153 = vector.broadcast %151 : vector<10x1xf32> to vector<10x892xf32>
      %154 = vector.broadcast %152 : vector<1x892xf32> to vector<10x892xf32>
      %155 = arith.mulf %153, %154 : vector<10x892xf32>
      %156 = arith.addf %150, %155 : vector<10x892xf32>
      %c0_70 = arith.constant 0 : index
      %c24 = arith.constant 24 : index
      %157 = vector.load %arg2[%c0_70, %c24] : memref<10x25xf32, #tpu.memory_space<vmem>>, vector<10x1xf32>
      %c0_71 = arith.constant 0 : index
      %c132 = arith.constant 132 : index
      %158 = vector.load %arg14[%c0_71, %c132] : memref<1x1024xf32, #tpu.memory_space<vmem>>, vector<1x892xf32>
      %159 = vector.broadcast %157 : vector<10x1xf32> to vector<10x892xf32>
      %160 = vector.broadcast %158 : vector<1x892xf32> to vector<10x892xf32>
      %161 = arith.mulf %159, %160 : vector<10x892xf32>
      %162 = arith.addf %156, %161 : vector<10x892xf32>
      %163 = vector.broadcast %4 : vector<10x1xf32> to vector<10x892xf32>
      %164 = arith.addf %162, %163 : vector<10x892xf32>
      %cst_72 = arith.constant 0.000000e+00 : f32
      %165 = vector.broadcast %cst_72 : f32 to vector<10x892xf32>
      %166 = arith.maximumf %164, %165 : vector<10x892xf32>
      %167 = vector.broadcast %7 : vector<1x892xf32> to vector<10x892xf32>
      %168 = arith.mulf %166, %167 : vector<10x892xf32>
      %c0_73 = arith.constant 0 : index
      %c66_74 = arith.constant 66 : index
      %169 = vector.load %arg12[%c0_73, %c66_74] : memref<10x1024xf32, #tpu.memory_space<vmem>>, vector<10x892xf32>
      tpu.vector_store %arg12[%c0_73, %c66_74], %168 {strides = array<i32>} : memref<10x1024xf32, #tpu.memory_space<vmem>>, vector<10x892xf32>,
      %c0_75 = arith.constant 0 : index
      %c33_76 = arith.constant 33 : index
      %170 = vector.load %arg12[%c0_75, %c33_76] : memref<10x1024xf32, #tpu.memory_space<vmem>>, vector<10x892xf32>
      %c0_77 = arith.constant 0 : index
      %c0_78 = arith.constant 0 : index
      %171 = vector.load %arg13[%c0_77, %c0_78] : memref<90x892xf32, #tpu.memory_space<vmem>>, vector<10x892xf32>
      tpu.vector_store %arg13[%c0_77, %c0_78], %170 {strides = array<i32>} : memref<90x892xf32, #tpu.memory_space<vmem>>, vector<10x892xf32>,
      %c0_79 = arith.constant 0 : index
      %c34_80 = arith.constant 34 : index
      %172 = vector.load %arg12[%c0_79, %c34_80] : memref<10x1024xf32, #tpu.memory_space<vmem>>, vector<10x892xf32>
      %c10_81 = arith.constant 10 : index
      %c0_82 = arith.constant 0 : index
      %173 = vector.load %arg13[%c10_81, %c0_82] : memref<90x892xf32, #tpu.memory_space<vmem>>, vector<10x892xf32>
      tpu.vector_store %arg13[%c10_81, %c0_82], %172 {strides = array<i32>} : memref<90x892xf32, #tpu.memory_space<vmem>>, vector<10x892xf32>,
      %c0_83 = arith.constant 0 : index
      %c35_84 = arith.constant 35 : index
      %174 = vector.load %arg12[%c0_83, %c35_84] : memref<10x1024xf32, #tpu.memory_space<vmem>>, vector<10x892xf32>
      %c20_85 = arith.constant 20 : index
      %c0_86 = arith.constant 0 : index
      %175 = vector.load %arg13[%c20_85, %c0_86] : memref<90x892xf32, #tpu.memory_space<vmem>>, vector<10x892xf32>
      tpu.vector_store %arg13[%c20_85, %c0_86], %174 {strides = array<i32>} : memref<90x892xf32, #tpu.memory_space<vmem>>, vector<10x892xf32>,
      %c0_87 = arith.constant 0 : index
      %c65_88 = arith.constant 65 : index
      %176 = vector.load %arg12[%c0_87, %c65_88] : memref<10x1024xf32, #tpu.memory_space<vmem>>, vector<10x892xf32>
      %c30 = arith.constant 30 : index
      %c0_89 = arith.constant 0 : index
      %177 = vector.load %arg13[%c30, %c0_89] : memref<90x892xf32, #tpu.memory_space<vmem>>, vector<10x892xf32>
      tpu.vector_store %arg13[%c30, %c0_89], %176 {strides = array<i32>} : memref<90x892xf32, #tpu.memory_space<vmem>>, vector<10x892xf32>,
      %c0_90 = arith.constant 0 : index
      %c66_91 = arith.constant 66 : index
      %178 = vector.load %arg12[%c0_90, %c66_91] : memref<10x1024xf32, #tpu.memory_space<vmem>>, vector<10x892xf32>
      %c40 = arith.constant 40 : index
      %c0_92 = arith.constant 0 : index
      %179 = vector.load %arg13[%c40, %c0_92] : memref<90x892xf32, #tpu.memory_space<vmem>>, vector<10x892xf32>
      tpu.vector_store %arg13[%c40, %c0_92], %178 {strides = array<i32>} : memref<90x892xf32, #tpu.memory_space<vmem>>, vector<10x892xf32>,
      %c0_93 = arith.constant 0 : index
      %c67_94 = arith.constant 67 : index
      %180 = vector.load %arg12[%c0_93, %c67_94] : memref<10x1024xf32, #tpu.memory_space<vmem>>, vector<10x892xf32>
      %c50 = arith.constant 50 : index
      %c0_95 = arith.constant 0 : index
      %181 = vector.load %arg13[%c50, %c0_95] : memref<90x892xf32, #tpu.memory_space<vmem>>, vector<10x892xf32>
      tpu.vector_store %arg13[%c50, %c0_95], %180 {strides = array<i32>} : memref<90x892xf32, #tpu.memory_space<vmem>>, vector<10x892xf32>,
      %c0_96 = arith.constant 0 : index
      %c97_97 = arith.constant 97 : index
      %182 = vector.load %arg12[%c0_96, %c97_97] : memref<10x1024xf32, #tpu.memory_space<vmem>>, vector<10x892xf32>
      %c60 = arith.constant 60 : index
      %c0_98 = arith.constant 0 : index
      %183 = vector.load %arg13[%c60, %c0_98] : memref<90x892xf32, #tpu.memory_space<vmem>>, vector<10x892xf32>
      tpu.vector_store %arg13[%c60, %c0_98], %182 {strides = array<i32>} : memref<90x892xf32, #tpu.memory_space<vmem>>, vector<10x892xf32>,
      %c0_99 = arith.constant 0 : index
      %c98_100 = arith.constant 98 : index
      %184 = vector.load %arg12[%c0_99, %c98_100] : memref<10x1024xf32, #tpu.memory_space<vmem>>, vector<10x892xf32>
      %c70 = arith.constant 70 : index
      %c0_101 = arith.constant 0 : index
      %185 = vector.load %arg13[%c70, %c0_101] : memref<90x892xf32, #tpu.memory_space<vmem>>, vector<10x892xf32>
      tpu.vector_store %arg13[%c70, %c0_101], %184 {strides = array<i32>} : memref<90x892xf32, #tpu.memory_space<vmem>>, vector<10x892xf32>,
      %c0_102 = arith.constant 0 : index
      %c99_103 = arith.constant 99 : index
      %186 = vector.load %arg12[%c0_102, %c99_103] : memref<10x1024xf32, #tpu.memory_space<vmem>>, vector<10x892xf32>
      %c80 = arith.constant 80 : index
      %c0_104 = arith.constant 0 : index
      %187 = vector.load %arg13[%c80, %c0_104] : memref<90x892xf32, #tpu.memory_space<vmem>>, vector<10x892xf32>
      tpu.vector_store %arg13[%c80, %c0_104], %186 {strides = array<i32>} : memref<90x892xf32, #tpu.memory_space<vmem>>, vector<10x892xf32>,
      %c0_105 = arith.constant 0 : index
      %c0_106 = arith.constant 0 : index
      %188 = vector.load %arg4[%c0_105, %c0_106] : memref<15x90xf32, #tpu.memory_space<vmem>>, vector<15x90xf32>
      %c0_107 = arith.constant 0 : index
      %c0_108 = arith.constant 0 : index
      %189 = vector.load %arg13[%c0_107, %c0_108] : memref<90x892xf32, #tpu.memory_space<vmem>>, vector<90x892xf32>
      %cst_109 = arith.constant dense<0.000000e+00> : vector<15x892xf32>
      %190 = tpu.matmul %188, %189, %cst_109 {dimension_numbers = #tpu.dot_dimension_numbers<[1], [0], [0], [1], [0, 0, 1, 1], [], []>} : vector<15x90xf32>, vector<90x892xf32>, vector<15x892xf32> -> vector<15x892xf32>
      %191 = vector.broadcast %5 : vector<15x1xf32> to vector<15x892xf32>
      %192 = arith.addf %190, %191 : vector<15x892xf32>
      %cst_110 = arith.constant 0.000000e+00 : f32
      %193 = vector.broadcast %cst_110 : f32 to vector<15x892xf32>
      %194 = arith.maximumf %192, %193 : vector<15x892xf32>
      %c0_111 = arith.constant 0 : index
      %c0_112 = arith.constant 0 : index
      %195 = vector.load %arg6[%c0_111, %c0_112] : memref<892x150xf32, #tpu.memory_space<vmem>>, vector<892x150xf32>
      %cst_113 = arith.constant dense<0.000000e+00> : vector<15x150xf32>
      %196 = tpu.matmul %194, %195, %cst_113 {dimension_numbers = #tpu.dot_dimension_numbers<[1], [0], [0], [1], [0, 0, 1, 1], [], []>} : vector<15x892xf32>, vector<892x150xf32>, vector<15x150xf32> -> vector<15x150xf32>
      %c0_114 = arith.constant 0 : index
      %c0_115 = arith.constant 0 : index
      %197 = vector.load %arg9[%c0_114, %c0_115] : memref<15x150xf32, #tpu.memory_space<vmem>>, vector<15x150xf32>
      %198 = arith.mulf %196, %197 : vector<15x150xf32>
      %cst_116 = arith.constant dense<0.000000e+00> : vector<150xf32>
      %199 = vector.multi_reduction <add>, %198, %cst_116 [0] : vector<15x150xf32> to vector<150xf32>
      %200 = vector.shape_cast %199 : vector<150xf32> to vector<1x150xf32>
      %c0_117 = arith.constant 0 : index
      %c0_118 = arith.constant 0 : index
      %201 = vector.load %arg10[%c0_117, %c0_118] : memref<150x10xf32, #tpu.memory_space<vmem>>, vector<150x10xf32>
      %cst_119 = arith.constant dense<0.000000e+00> : vector<1x10xf32>
      %202 = tpu.matmul %200, %201, %cst_119 {dimension_numbers = #tpu.dot_dimension_numbers<[1], [0], [0], [1], [0, 0, 1, 1], [], []>} : vector<1x150xf32>, vector<150x10xf32>, vector<1x10xf32> -> vector<1x10xf32>
      %203 = arith.addf %202, %6 : vector<1x10xf32>
      %204 = arith.index_cast %arg15 : i32 to index
      %c0_120 = arith.constant 0 : index
      %205 = vector.load %arg11[%204, %c0_120] : memref<8x10xf32, #tpu.memory_space<vmem>>, vector<1x10xf32>
      tpu.vector_store %arg11[%204, %c0_120], %203 {strides = array<i32>} : memref<8x10xf32, #tpu.memory_space<vmem>>, vector<1x10xf32>,
    }
    %c8_i32_11 = arith.constant 8 : i32
    return
  }
  func.func @transform_0(%arg0: i32) -> (i32, i32) {
    %c0_i32 = arith.constant 0 : i32
    %c0_i32_0 = arith.constant 0 : i32
    return %arg0, %c0_i32 : i32, i32
  }
  func.func @transform_1(%arg0: i32) -> (i32, i32) {
    %c0_i32 = arith.constant 0 : i32
    %c0_i32_0 = arith.constant 0 : i32
    %c0_i32_1 = arith.constant 0 : i32
    return %c0_i32, %c0_i32_0 : i32, i32
  }
  func.func @transform_2(%arg0: i32) -> (i32, i32) {
    %c0_i32 = arith.constant 0 : i32
    %c0_i32_0 = arith.constant 0 : i32
    %c0_i32_1 = arith.constant 0 : i32
    return %c0_i32, %c0_i32_0 : i32, i32
  }
  func.func @transform_3(%arg0: i32) -> (i32, i32) {
    %c0_i32 = arith.constant 0 : i32
    %c0_i32_0 = arith.constant 0 : i32
    %c0_i32_1 = arith.constant 0 : i32
    return %c0_i32, %c0_i32_0 : i32, i32
  }
  func.func @transform_4(%arg0: i32) -> (i32, i32) {
    %c0_i32 = arith.constant 0 : i32
    %c0_i32_0 = arith.constant 0 : i32
    %c0_i32_1 = arith.constant 0 : i32
    return %c0_i32, %c0_i32_0 : i32, i32
  }
  func.func @transform_5(%arg0: i32) -> (i32, i32) {
    %c0_i32 = arith.constant 0 : i32
    %c0_i32_0 = arith.constant 0 : i32
    %c0_i32_1 = arith.constant 0 : i32
    return %c0_i32, %c0_i32_0 : i32, i32
  }
  func.func @transform_6(%arg0: i32) -> (i32, i32) {
    %c0_i32 = arith.constant 0 : i32
    %c0_i32_0 = arith.constant 0 : i32
    %c0_i32_1 = arith.constant 0 : i32
    return %c0_i32, %c0_i32_0 : i32, i32
  }
  func.func @transform_7(%arg0: i32) -> (i32, i32) {
    %c0_i32 = arith.constant 0 : i32
    %c0_i32_0 = arith.constant 0 : i32
    %c0_i32_1 = arith.constant 0 : i32
    return %c0_i32, %c0_i32_0 : i32, i32
  }
  func.func @transform_8(%arg0: i32) -> (i32, i32) {
    %c0_i32 = arith.constant 0 : i32
    %c0_i32_0 = arith.constant 0 : i32
    %c0_i32_1 = arith.constant 0 : i32
    return %c0_i32, %c0_i32_0 : i32, i32
  }
  func.func @transform_9(%arg0: i32) -> (i32, i32) {
    %c0_i32 = arith.constant 0 : i32
    %c0_i32_0 = arith.constant 0 : i32
    %c0_i32_1 = arith.constant 0 : i32
    return %c0_i32, %c0_i32_0 : i32, i32
  }
  func.func @transform_10(%arg0: i32) -> (i32, i32) {
    %c0_i32 = arith.constant 0 : i32
    %c0_i32_0 = arith.constant 0 : i32
    return %arg0, %c0_i32 : i32, i32
  }
}

</mosaic_0001>

<bundles_post_ra>
// kernel: model_cnn_forward.1
= control target key start
LH: loop header
LB: loop body
LE: loop exit
PB: predicated region body
PF: predicated region fallthrough
CT: control target
= control target key end

     0   :  { %vm10190_vm0 = vcmask 539648   ;;  %vm37_vm1 = vcmask 533504   ;;  %vm39_vm2 = vcmask 1048048   ;;  %v5163_v0 = vmov 0.0   ;;  %s5295_s24 = smov 0   ;;  %s9952_s0 = inlined_call_operand.vmem [shape: f32[8,1024], index: 0, kind: input, shape index: {}]   ;;  %s9953_s1 = inlined_call_operand.vmem [shape: f32[10,25], index: 1, kind: input, shape index: {}]   ;;  %s9954_s2 = inlined_call_operand.vmem [shape: f32[10,1], index: 2, kind: input, shape index: {}]   ;;  %s9955_s3 = inlined_call_operand.vmem [shape: f32[15,90], index: 3, kind: input, shape index: {}]   ;;  %s9956_s4 = inlined_call_operand.vmem [shape: f32[15,1], index: 4, kind: input, shape index: {}]   ;;  %s9957_s5 = inlined_call_operand.vmem [shape: f32[892,150], index: 5, kind: input, shape index: {}]   ;;  %s9958_s6 = inlined_call_operand.vmem [shape: f32[1,10], index: 6, kind: input, shape index: {}]   ;;  %s9959_s7 = inlined_call_operand.vmem [shape: f32[1,892], index: 7, kind: input, shape index: {}]   ;;  %s9960_s8 = inlined_call_operand.vmem [shape: f32[15,150], index: 8, kind: input, shape index: {}]   ;;  %s9961_s9 = inlined_call_operand.vmem [shape: f32[150,10], index: 9, kind: input, shape index: {}]   ;;  %s9962_s10 = inlined_call_operand.vmem [shape: f32[8,10], index: 10, kind: output, shape index: {}]  }
   0x1   :  { %36 = vst.msk [vmem:[#allocation2] sm:$0xff] %vm10190_vm0, %v5163_v0  ;;  %vm41_vm3 = vcmask 1041904   ;;  %v5268_v1 = vld [vmem:[%s9954_s2] sm:$0xff]  ;;  %v5273_v2 = vld [vmem:[%s9954_s2 + $0x8] sm:$0x3] }
   0x2   :  { %10226 = vst [vmem:[#allocation5_spill] sm:$0xff] %v5268_v1  ;;  %v5278_v3 = vld [vmem:[%s9956_s4] sm:$0xff]  ;;  %v5283_v4 = vld [vmem:[%s9956_s4 + $0x8] sm:$0x7f] }
   0x3   :  { %10227 = vst [vmem:[#allocation6_spill] sm:$0xff] %v5273_v2  ;;  %v5288_v5 = vld [vmem:[%s9958_s6] sm:$0x1] }
   0x4   :  { %10228 = vst [vmem:[#allocation7_spill] sm:$0xff] %v5278_v3  ;;  %v5293_v6 = vld [vmem:[%s9959_s7] sm:$0x7f] }
   0x5   :  { %38 = vst.msk [vmem:[#allocation2 + $0x40] sm:$0x3] %vm37_vm1, %v5163_v0 }
   0x6   :  { %10229 = vst [vmem:[#allocation8_spill] sm:$0xff] %v5283_v4 }
   0x7   :  { %10230 = vst [vmem:[#allocation9_spill] sm:$0xff] %v5288_v5 }
   0x8   :  { %40 = vst.msk [vmem:[#allocation2 + $0x38] sm:$0xff] %vm39_vm2, %v5163_v0 }
   0x9   :  { %10231 = vst [vmem:[#allocation10_spill] sm:$0xff] %v5293_v6 }
   0xa   :  { %42 = vst.msk [vmem:[#allocation2 + $0x78] sm:$0x3] %vm41_vm3, %v5163_v0 }
   0xb LB: > { %v5303_v7 = vld [vmem:[%s9953_s1] sm:$0xff]  ;;  %v5164_v8 = vmov 1   ;;  %v5165_v9 = vmov 2   ;;  %v5166_v10 = vmov 3   ;;  %v5311_v11 = vld [vmem:[%s9953_s1 + $0x8] sm:$0x3]  ;;  %s5161_s24 = sphi %s5295_s24, %s54_s24  }
   0xc   : > { %5101 = vset.pattern.permute.xlu1 %v5164_v8  ;;  %5102 = vset.pattern.permute.xlu0 %v5165_v9  ;;  %s55_s26 = sshra.s32 %s5161_s24, 3  ;;  %s58_s27 = sand.u32 7, %s5161_s24  ;;  %v5170_v60 = vmov 4   ;;  %vm187_vm4 = vcmask 1039360   ;;  %vm292_vm5 = vcmask 1031168   ;;  %vm397_vm6 = vcmask 1022976  }
   0xd   : > { %124 = vperm.xlu1 %5101, %v5303_v7   ;;  %229 = vperm.xlu0 %5102, %v5303_v7   ;;  %s5046_s28 = sshll.u32 %s55_s26, 6  ;;  %s5167_s13 = smov 127   ;;  %vm10213_vm7 = vcmask 1014784   ;;  %vm649_vm8 = vcmask 785408   ;;  %vm10212_vm9 = vcmask 777216   ;;  %vm879_vm10 = vcmask 769024  }
   0xe   : > { %5104 = vset.pattern.permute.xlu2 %v5166_v10  ;;  %s61_s29 = sadd.s32 %s5046_s28, %s58_s27  ;;  %s5168_s14 = smov 126   ;;  %vm994_vm11 = vcmask 760832   ;;  %vm1109_vm12 = vcmask 752640   ;;  %vm1224_vm13 = vcmask 523264   ;;  %vm1339_vm14 = vcmask 515072  }
   0xf   : > { %334 = vperm.xlu2 %5104, %v5303_v7   ;;  %s62_s12 = scalar_lea.vmem %s9952_s0, %s61_s29  ;;  %s5169_s15 = smov 125   ;;  %vm1454_vm15 = vcmask 506880   ;;  %vm1569_vm1 = vcmask 498688   ;;  %vm10192_vm2 = vcmask 490496   ;;  %vm10191_vm3 = vcmask 261120  }
  0x10   : > { %v63_v12 = vld [vmem:[%s62_s12] ss:$8 sm:$0xf]  ;;  %s5172_s16 = smov 124   ;;  %s5173_s17 = smov 96   ;;  %vm10193_vm0 = vcmask 252928  }
  0x11   : > { %v64_v13 = vld [vmem:[%s62_s12] ss:$8 sm:$0xf0]  ;;  %s5175_s18 = smov 95   ;;  %s5177_s19 = smov 94  }
  0x12   : > { %v5321_v14 = vor.u32 %v64_v13, %v63_v12  ;;  %s5179_s20 = smov 93   ;;  %s5181_s21 = smov 92  }
  0x13   : > { %s5183_s22 = smov 64   ;;  %s5185_s6 = smov 63  }
  0x14   : > { %66 = vst [vmem:[#allocation4] sm:$0xff] %v5321_v14  ;;  %s5187_s7 = smov 62   ;;  %s5189_s26 = smov 61  }
  0x15   : > { %128 = vperm.xlu1 %5101, %v5311_v11   ;;  %5105 = vset.pattern.permute.xlu0 %v5166_v10  ;;  %s5191_s27 = smov 60   ;;  %s5193_s28 = smov 32  }
  0x16   : > { %338 = vperm.xlu0 %5105, %v5311_v11   ;;  %s5195_s29 = smov 31   ;;  %s5197_s30 = smov 30  }
  0x17   : > { %5107 = vset.pattern.permute.xlu2 %v5170_v60  ;;  %s5199_s11 = smov 29   ;;  %s5201_s12 = smov 28  }
  0x1b   : > { %v69_v15 = vld [vmem:[#allocation4] sm:$0x7f] }
  0x1c   : > { %v5324_v16 = vperm.slane %v69_v15, 3  ;;  %v5326_v17 = vperm.slane %v69_v15, 2  ;;  %v5328_v18 = vperm.slane %v69_v15, 0  ;;  %v5336_v23 = vperm.slane %v69_v15, 6 }
  0x1d   : > { %5103 = vset.pattern.permute.xlu1 %v5165_v9  ;;  %v5338_v24 = vperm.slane %v69_v15, 5  ;;  %v5340_v25 = vperm.slane %v69_v15, 1  ;;  %v5348_v30 = vperm.slane %v69_v15, 4 }
  0x1e   : > { %233 = vperm.xlu1 %5103, %v5311_v11   ;;  %10232 = vst [vmem:[#allocation11_spill] sm:$0xff] %v5324_v16 }
  0x1f   : > { %10233 = vst [vmem:[#allocation12_spill] sm:$0xff] %v5326_v17 }
  0x20   : > { %10234 = vst [vmem:[#allocation13_spill] sm:$0xff] %v5328_v18 }
  0x21   : > { %10235 = vst [vmem:[#allocation14_spill] sm:$0xff] %v5336_v23 }
  0x22   : > { %10236 = vst [vmem:[#allocation15_spill] sm:$0xff] %v5338_v24 }
  0x23   : > { %10237 = vst [vmem:[#allocation16_spill] sm:$0xff] %v5340_v25 }
  0x24   : > { %10238 = vst [vmem:[#allocation17_spill] sm:$0xff] %v5348_v30 }
  0x26   : > { %5106 = vset.pattern.permute.xlu1 %v5170_v60 }
  0x69   : > { %v335_v51 = vpop.permute.xlu2 %334 }
  0x6a   : > { %v345_v52 = vmul.f32 %v335_v51, %v5348_v30  ;;  %v341_v56 = vmul.f32 %v335_v51, %v5328_v18  ;;  %v343_v61 = vmul.f32 %v335_v51, %v5326_v17  ;;  %v346_v0 = vmul.f32 %v335_v51, %v5338_v24 }
  0x6b   : > { %v342_v8 = vmul.f32 %v335_v51, %v5340_v25  ;;  %v344_v12 = vmul.f32 %v335_v51, %v5324_v16 }
  0x7f   : > { %v125_v19 = vpop.permute.xlu1 %124  ;;  %v230_v37 = vpop.permute.xlu0 %229 }
  0x80   : > { %v134_v20 = vmul.f32 %v125_v19, %v5324_v16  ;;  %v133_v21 = vmul.f32 %v125_v19, %v5326_v17  ;;  %v131_v22 = vmul.f32 %v125_v19, %v5328_v18  ;;  %v137_v26 = vmul.f32 %v125_v19, %v5336_v23 }
  0x81   : > { %v136_v27 = vmul.f32 %v125_v19, %v5338_v24  ;;  %v132_v28 = vmul.f32 %v125_v19, %v5340_v25  ;;  %v135_v33 = vmul.f32 %v125_v19, %v5348_v30  ;;  %v237_v38 = vmul.f32 %v230_v37, %v5340_v25 }
  0x82   : > { %165 = vrot.lane.b32.xlu1 %v134_v20, %s5167_s13  ;;  %163 = vrot.lane.b32.xlu0 %v133_v21, %s5167_s13  ;;  %v239_v39 = vmul.f32 %v230_v37, %v5324_v16  ;;  %v240_v41 = vmul.f32 %v230_v37, %v5348_v30  ;;  %v242_v42 = vmul.f32 %v230_v37, %v5336_v23 }
  0x83   : > { %159 = vrot.lane.b32.xlu2 %v131_v22, %s5167_s13  ;;  %v236_v47 = vmul.f32 %v230_v37, %v5328_v18  ;;  %v238_v50 = vmul.f32 %v230_v37, %v5326_v17  ;;  %v241_v54 = vmul.f32 %v230_v37, %v5338_v24  ;;  %v347_v19 = vmul.f32 %v335_v51, %v5336_v23 }
  0x87   : > { %v129_v29 = vpop.permute.xlu1 %128 }
  0x88   : > { %v140_v31 = vmul.f32 %v129_v29, %v5326_v17  ;;  %v139_v32 = vmul.f32 %v129_v29, %v5340_v25  ;;  %v143_v34 = vmul.f32 %v129_v29, %v5338_v24  ;;  %v142_v35 = vmul.f32 %v129_v29, %v5348_v30  ;;  %v339_v55 = vpop.permute.xlu0 %338 }
  0x89   : > { %v138_v36 = vmul.f32 %v129_v29, %v5328_v18  ;;  %v141_v40 = vmul.f32 %v129_v29, %v5324_v16  ;;  %v144_v43 = vmul.f32 %v129_v29, %v5336_v23  ;;  %v348_v57 = vmul.f32 %v339_v55, %v5328_v18 }
  0x8a   : > { %171 = vrot.lane.b32.xlu1 %v137_v26, %s5167_s13  ;;  %169 = vrot.lane.b32.xlu0 %v136_v27, %s5167_s13  ;;  %v351_v59 = vmul.f32 %v339_v55, %v5324_v16  ;;  %v354_v63 = vmul.f32 %v339_v55, %v5336_v23  ;;  %v349_v10 = vmul.f32 %v339_v55, %v5340_v25 }
  0x8b   : > { %161 = vrot.lane.b32.xlu2 %v132_v28, %s5167_s13  ;;  %v352_v15 = vmul.f32 %v339_v55, %v5348_v30  ;;  %v350_v21 = vmul.f32 %v339_v55, %v5326_v17  ;;  %v353_v27 = vmul.f32 %v339_v55, %v5338_v24  ;;  %v5489_v55 = vperm.slane %v5321_v14, 2 }
  0x90   : > { %v234_v44 = vpop.permute.xlu1 %233 }
  0x91   : > { %v245_v45 = vmul.f32 %v234_v44, %v5326_v17  ;;  %v243_v46 = vmul.f32 %v234_v44, %v5328_v18  ;;  %v248_v48 = vmul.f32 %v234_v44, %v5338_v24  ;;  %v246_v49 = vmul.f32 %v234_v44, %v5324_v16 }
  0x92   : > { %177 = vrot.lane.b32.xlu1 %v140_v31, %s5167_s13  ;;  %175 = vrot.lane.b32.xlu0 %v139_v32, %s5167_s13  ;;  %v249_v53 = vmul.f32 %v234_v44, %v5336_v23  ;;  %v244_v58 = vmul.f32 %v234_v44, %v5340_v25  ;;  %v247_v62 = vmul.f32 %v234_v44, %v5348_v30 }
  0x93   : > { %167 = vrot.lane.b32.xlu2 %v135_v33, %s5167_s13 }
  0x9a   : > { %183 = vrot.lane.b32.xlu1 %v143_v34, %s5167_s13  ;;  %181 = vrot.lane.b32.xlu0 %v142_v35, %s5167_s13 }
  0x9b   : > { %173 = vrot.lane.b32.xlu2 %v138_v36, %s5167_s13 }
  0xa2   : > { %266 = vrot.lane.b32.xlu1 %v237_v38, %s5168_s14  ;;  %270 = vrot.lane.b32.xlu0 %v239_v39, %s5168_s14 }
  0xa3   : > { %179 = vrot.lane.b32.xlu2 %v141_v40, %s5167_s13 }
  0xaa   : > { %272 = vrot.lane.b32.xlu1 %v240_v41, %s5168_s14  ;;  %276 = vrot.lane.b32.xlu0 %v242_v42, %s5168_s14 }
  0xab   : > { %185 = vrot.lane.b32.xlu2 %v144_v43, %s5167_s13 }
  0xb2   : > { %282 = vrot.lane.b32.xlu0 %v245_v45, %s5168_s14  ;;  %278 = vrot.lane.b32.xlu1 %v243_v46, %s5168_s14 }
  0xb3   : > { %264 = vrot.lane.b32.xlu2 %v236_v47, %s5168_s14 }
  0xba   : > { %288 = vrot.lane.b32.xlu0 %v248_v48, %s5168_s14  ;;  %284 = vrot.lane.b32.xlu1 %v246_v49, %s5168_s14 }
  0xbb   : > { %268 = vrot.lane.b32.xlu2 %v238_v50, %s5168_s14 }
  0xc2   : > { %290 = vrot.lane.b32.xlu1 %v249_v53, %s5168_s14  ;;  %377 = vrot.lane.b32.xlu0 %v345_v52, %s5169_s15  ;;  %v5483_v53 = vperm.slane %v5321_v14, 0 }
  0xc3   : > { %274 = vrot.lane.b32.xlu2 %v241_v54, %s5168_s14  ;;  %v5486_v54 = vperm.slane %v5321_v14, 1 }
  0xca   : > { %369 = vrot.lane.b32.xlu1 %v341_v56, %s5169_s15  ;;  %383 = vrot.lane.b32.xlu0 %v348_v57, %s5169_s15  ;;  %v5171_v56 = vmov 5  }
  0xcb   : > { %280 = vrot.lane.b32.xlu2 %v244_v58, %s5168_s14  ;;  %5109 = vset.pattern.permute.xlu0 %v5171_v56 }
  0xd2   : > { %373 = vrot.lane.b32.xlu1 %v343_v61, %s5169_s15  ;;  %389 = vrot.lane.b32.xlu0 %v351_v59, %s5169_s15 }
  0xd3   : > { %286 = vrot.lane.b32.xlu2 %v247_v62, %s5168_s14 }
  0xda   : > { %379 = vrot.lane.b32.xlu1 %v346_v0, %s5169_s15  ;;  %395 = vrot.lane.b32.xlu0 %v354_v63, %s5169_s15  ;;  %v5502_v63 = vperm.slane %v5321_v14, 3  ;;  %v5505_v0 = vperm.slane %v5321_v14, 4 }
  0xdb   : > { %371 = vrot.lane.b32.xlu2 %v342_v8, %s5169_s15  ;;  %v5508_v8 = vperm.slane %v5321_v14, 5 }
  0xdd   : > { %v5410_v9 = vpop.permute.xlu2 %159 }
  0xde   : > { %10239 = vst [vmem:[#allocation18_spill] sm:$0xff] %v5410_v9 }
  0xe2   : > { %385 = vrot.lane.b32.xlu1 %v349_v10, %s5169_s15 }
  0xe3   : > { %375 = vrot.lane.b32.xlu2 %v344_v12, %s5169_s15 }
  0xe5   : > { %v5416_v13 = vpop.permute.xlu2 %161 }
  0xe6   : > { %10240 = vst [vmem:[#allocation19_spill] sm:$0xff] %v5416_v13 }
  0xea   : > { %391 = vrot.lane.b32.xlu1 %v352_v15, %s5169_s15 }
  0xeb   : > { %381 = vrot.lane.b32.xlu2 %v347_v19, %s5169_s15 }
  0xed   : > { %v5422_v20 = vpop.permute.xlu2 %167 }
  0xee   : > { %10241 = vst [vmem:[#allocation20_spill] sm:$0xff] %v5422_v20 }
  0xf2   : > { %440 = vperm.xlu1 %5106, %v5303_v7  }
  0xf3   : > { %387 = vrot.lane.b32.xlu2 %v350_v21, %s5169_s15 }
  0xf4   : > { %v5427_v22 = vpop.permute.xlu1 %165  ;;  %v5491_v58 = vpop.permute.xlu0 %163 }
  0xf5   : > { %10242 = vst [vmem:[#allocation21_spill] sm:$0xff] %v5427_v22  ;;  %v5429_v26 = vpop.permute.xlu2 %173 }
  0xf6   : > { %10243 = vst [vmem:[#allocation22_spill] sm:$0xff] %v5429_v26 }
  0xf7   : > { %10264 = vst [vmem:[#allocation43_spill] sm:$0xff] %v5491_v58 }
  0xfb   : > { %393 = vrot.lane.b32.xlu2 %v353_v27, %s5169_s15  ;;  %v5519_v27 = vperm.slane %v5321_v14, 6 }
  0xfc   : > { %v5433_v28 = vpop.permute.xlu1 %171  ;;  %v5513_v19 = vpop.permute.xlu0 %169 }
  0xfd   : > { %v5435_v29 = vpop.permute.xlu2 %179  ;;  %10266 = vst [vmem:[#allocation45_spill] sm:$0xff] %v5513_v19 }
  0xfe   : > { %10244 = vst [vmem:[#allocation23_spill] sm:$0xff] %v5435_v29 }
 0x103   : > { %444 = vperm.xlu2 %5107, %v5311_v11  }
 0x104   : > { %v5438_v31 = vpop.permute.xlu1 %177 }
 0x105   : > { %10245 = vst [vmem:[#allocation24_spill] sm:$0xff] %v5438_v31  ;;  %v5440_v32 = vpop.permute.xlu2 %185 }
 0x106   : > { %10246 = vst [vmem:[#allocation25_spill] sm:$0xff] %v5440_v32 }
 0x10b   : > { %5108 = vset.pattern.permute.xlu2 %v5171_v56 }
 0x10c   : > { %v5442_v33 = vpop.permute.xlu1 %183 }
 0x10d   : > { %10247 = vst [vmem:[#allocation26_spill] sm:$0xff] %v5442_v33  ;;  %v5444_v34 = vpop.permute.xlu2 %264 }
 0x10e   : > { %10248 = vst [vmem:[#allocation27_spill] sm:$0xff] %v5444_v34 }
 0x114   : > { %v5446_v35 = vpop.permute.xlu1 %266 }
 0x115   : > { %10249 = vst [vmem:[#allocation28_spill] sm:$0xff] %v5446_v35  ;;  %v5448_v36 = vpop.permute.xlu2 %268 }
 0x116   : > { %10250 = vst [vmem:[#allocation29_spill] sm:$0xff] %v5448_v36 }
 0x11c   : > { %v5450_v37 = vpop.permute.xlu1 %272 }
 0x11d   : > { %10251 = vst [vmem:[#allocation30_spill] sm:$0xff] %v5450_v37  ;;  %v5452_v38 = vpop.permute.xlu2 %274 }
 0x124   : > { %v5454_v39 = vpop.permute.xlu1 %278 }
 0x125   : > { %10252 = vst [vmem:[#allocation31_spill] sm:$0xff] %v5454_v39  ;;  %v5456_v40 = vpop.permute.xlu2 %280 }
 0x126   : > { %10253 = vst [vmem:[#allocation32_spill] sm:$0xff] %v5456_v40 }
 0x12c   : > { %v5458_v41 = vpop.permute.xlu1 %284 }
 0x12d   : > { %10254 = vst [vmem:[#allocation33_spill] sm:$0xff] %v5458_v41  ;;  %v5462_v43 = vpop.permute.xlu2 %286 }
 0x12e   : > { %10256 = vst [vmem:[#allocation35_spill] sm:$0xff] %v5462_v43 }
 0x134   : > { %v5460_v42 = vpop.permute.xlu1 %290 }
 0x135   : > { %10255 = vst [vmem:[#allocation34_spill] sm:$0xff] %v5460_v42  ;;  %v5466_v45 = vpop.permute.xlu2 %371 }
 0x136   : > { %10258 = vst [vmem:[#allocation37_spill] sm:$0xff] %v5466_v45 }
 0x13c   : > { %v5464_v44 = vpop.permute.xlu1 %369 }
 0x13d   : > { %10257 = vst [vmem:[#allocation36_spill] sm:$0xff] %v5464_v44  ;;  %v5470_v47 = vpop.permute.xlu2 %375 }
 0x13e   : > { %10260 = vst [vmem:[#allocation39_spill] sm:$0xff] %v5470_v47 }
 0x144   : > { %v5468_v46 = vpop.permute.xlu1 %373 }
 0x145   : > { %10259 = vst [vmem:[#allocation38_spill] sm:$0xff] %v5468_v46  ;;  %v5474_v49 = vpop.permute.xlu2 %381 }
 0x14c   : > { %v5472_v48 = vpop.permute.xlu1 %379 }
 0x14d   : > { %v5480_v52 = vpop.permute.xlu2 %387 }
 0x14e   : > { %10263 = vst [vmem:[#allocation42_spill] sm:$0xff] %v5480_v52 }
 0x154   : > { %v5476_v50 = vpop.permute.xlu1 %385 }
 0x155   : > { %10261 = vst [vmem:[#allocation40_spill] sm:$0xff] %v5476_v50  ;;  %v5498_v62 = vpop.permute.xlu2 %393 }
 0x156   : > { %10265 = vst [vmem:[#allocation44_spill] sm:$0xff] %v5498_v62 }
 0x15c   : > { %v5478_v51 = vpop.permute.xlu1 %391 }
 0x15d   : > { %10262 = vst [vmem:[#allocation41_spill] sm:$0xff] %v5478_v51  ;;  %v445_v21 = vpop.permute.xlu2 %444 }
 0x15e   : > { %v469_v56 = vmul.f32 %v5483_v53, %v445_v21 }
 0x164   : > { %v441_v57 = vpop.permute.xlu1 %440 }
 0x165   : > { %v463_v59 = vmul.f32 %v5486_v54, %v441_v57  ;;  %v462_v60 = vmul.f32 %v5483_v53, %v441_v57  ;;  %v464_v61 = vmul.f32 %v5489_v55, %v441_v57  ;;  %v466_v10 = vmul.f32 %v5505_v0, %v441_v57 }
 0x166   : > { %v465_v12 = vmul.f32 %v5502_v63, %v441_v57  ;;  %v467_v15 = vmul.f32 %v5508_v8, %v441_v57 }
 0x167   : > { %492 = vrot.lane.b32.xlu1 %v463_v59, %s5172_s16  ;;  %490 = vrot.lane.b32.xlu0 %v462_v60, %s5172_s16  ;;  %v470_v59 = vmul.f32 %v5486_v54, %v445_v21  ;;  %v468_v60 = vmul.f32 %v5519_v27, %v441_v57 }
 0x168   : > { %494 = vrot.lane.b32.xlu2 %v464_v61, %s5172_s16  ;;  %v5527_v61 = vpop.permute.xlu0 %175 }
 0x169   : > { %10267 = vst [vmem:[#allocation46_spill] sm:$0xff] %v5527_v61 }
 0x16f   : > { %498 = vrot.lane.b32.xlu1 %v466_v10, %s5172_s16  ;;  %496 = vrot.lane.b32.xlu0 %v465_v12, %s5172_s16  ;;  %v471_v10 = vmul.f32 %v5489_v55, %v445_v21  ;;  %v472_v12 = vmul.f32 %v5502_v63, %v445_v21 }
 0x170   : > { %500 = vrot.lane.b32.xlu2 %v467_v15, %s5172_s16  ;;  %v473_v15 = vmul.f32 %v5505_v0, %v445_v21  ;;  %v5535_v57 = vpop.permute.xlu0 %181 }
 0x171   : > { %10268 = vst [vmem:[#allocation47_spill] sm:$0xff] %v5535_v57 }
 0x177   : > { %502 = vrot.lane.b32.xlu0 %v468_v60, %s5172_s16  ;;  %504 = vrot.lane.b32.xlu1 %v469_v56, %s5172_s16  ;;  %v474_v56 = vmul.f32 %v5508_v8, %v445_v21 }
 0x178   : > { %506 = vrot.lane.b32.xlu2 %v470_v59, %s5172_s16  ;;  %v475_v59 = vmul.f32 %v5519_v27, %v445_v21  ;;  %v5542_v60 = vpop.permute.xlu0 %270 }
 0x179   : > { %10269 = vst [vmem:[#allocation48_spill] sm:$0xff] %v5542_v60 }
 0x17f   : > { %508 = vrot.lane.b32.xlu0 %v471_v10, %s5172_s16  ;;  %510 = vrot.lane.b32.xlu1 %v472_v12, %s5172_s16 }
 0x180   : > { %512 = vrot.lane.b32.xlu2 %v473_v15, %s5172_s16  ;;  %v5545_v10 = vpop.permute.xlu0 %276 }
 0x187   : > { %514 = vrot.lane.b32.xlu0 %v474_v56, %s5172_s16  ;;  %516 = vrot.lane.b32.xlu1 %v475_v59, %s5172_s16 }
 0x188   : > { %561 = vperm.xlu2 %5108, %v5303_v7   ;;  %v5547_v12 = vpop.permute.xlu0 %282 }
 0x189   : > { %10270 = vst [vmem:[#allocation49_spill] sm:$0xff] %v5547_v12 }
 0x18f   : > { %565 = vperm.xlu0 %5109, %v5311_v11  }
 0x190   : > { %v5549_v15 = vpop.permute.xlu0 %288 }
 0x191   : > { %10271 = vst [vmem:[#allocation50_spill] sm:$0xff] %v5549_v15 }
 0x198   : > { %v5551_v5 = vpop.permute.xlu0 %377 }
 0x199   : > { %10272 = vst [vmem:[#allocation51_spill] sm:$0xff] %v5551_v5 }
 0x1a0   : > { %v5553_v4 = vpop.permute.xlu0 %383 }
 0x1a1   : > { %10273 = vst [vmem:[#allocation52_spill] sm:$0xff] %v5553_v4  ;;  %v5575_v4 = vperm.slane %v5321_v14, 7  ;;  %v5174_v14 = vmov 6  }
 0x1a2   : > { %5110 = vset.pattern.permute.xlu0 %v5174_v14  ;;  %5111 = vset.pattern.permute.xlu1 %v5174_v14 }
 0x1a8   : > { %v5557_v56 = vpop.permute.xlu0 %389 }
 0x1a9   : > { %10275 = vst [vmem:[#allocation54_spill] sm:$0xff] %v5557_v56 }
 0x1b0   : > { %v5561_v3 = vpop.permute.xlu0 %395 }
 0x1b1   : > { %10276 = vst [vmem:[#allocation55_spill] sm:$0xff] %v5561_v3 }
 0x1c2   : > { %v5555_v21 = vpop.permute.xlu2 %494 }
 0x1c3   : > { %10274 = vst [vmem:[#allocation53_spill] sm:$0xff] %v5555_v21 }
 0x1ca   : > { %v5559_v59 = vpop.permute.xlu2 %500 }
 0x1d2   : > { %v5563_v6 = vpop.permute.xlu2 %506 }
 0x1d3   : > { %10277 = vst [vmem:[#allocation56_spill] sm:$0xff] %v5563_v6 }
 0x1d9   : > { %v5565_v16 = vpop.permute.xlu0 %490 }
 0x1da   : > { %10278 = vst [vmem:[#allocation57_spill] sm:$0xff] %v5565_v16  ;;  %v5567_v17 = vpop.permute.xlu2 %512 }
 0x1db   : > { %10279 = vst [vmem:[#allocation58_spill] sm:$0xff] %v5567_v17 }
 0x1e1   : > { %v5569_v30 = vpop.permute.xlu0 %496 }
 0x1e2   : > { %10280 = vst [vmem:[#allocation59_spill] sm:$0xff] %v5569_v30  ;;  %v562_v25 = vpop.permute.xlu2 %561 }
 0x1e3   : > { %v589_v18 = vmul.f32 %v5505_v0, %v562_v25  ;;  %v586_v51 = vmul.f32 %v5486_v54, %v562_v25  ;;  %v585_v21 = vmul.f32 %v5483_v53, %v562_v25  ;;  %v592_v6 = vmul.f32 %v5575_v4, %v562_v25 }
 0x1e4   : > { %v588_v30 = vmul.f32 %v5502_v63, %v562_v25  ;;  %v587_v16 = vmul.f32 %v5489_v55, %v562_v25 }
 0x1e5   : > { %625 = vrot.lane.b32.xlu0 %v589_v18, %s5173_s17  ;;  %619 = vrot.lane.b32.xlu2 %v586_v51, %s5173_s17  ;;  %v591_v51 = vmul.f32 %v5519_v27, %v562_v25 }
 0x1e6   : > { %617 = vrot.lane.b32.xlu1 %v585_v21, %s5173_s17  ;;  %v590_v21 = vmul.f32 %v5508_v8, %v562_v25 }
 0x1e9   : > { %v5580_v17 = vpop.permute.xlu0 %502 }
 0x1ed   : > { %631 = vrot.lane.b32.xlu0 %v592_v6, %s5173_s17  ;;  %623 = vrot.lane.b32.xlu2 %v588_v30, %s5173_s17 }
 0x1ee   : > { %621 = vrot.lane.b32.xlu1 %v587_v16, %s5173_s17 }
 0x1f1   : > { %v5588_v18 = vpop.permute.xlu0 %508 }
 0x1f2   : > { %10281 = vst [vmem:[#allocation60_spill] sm:$0xff] %v5588_v18 }
 0x1f5   : > { %629 = vrot.lane.b32.xlu2 %v591_v51, %s5173_s17 }
 0x1f6   : > { %627 = vrot.lane.b32.xlu1 %v590_v21, %s5173_s17 }
 0x1f9   : > { %v5594_v50 = vpop.permute.xlu0 %514 }
 0x1fa   : > { %10282 = vst [vmem:[#allocation61_spill] sm:$0xff] %v5594_v50 }
 0x201   : > { %v566_v6 = vpop.permute.xlu0 %565 }
 0x202   : > { %v595_v30 = vmul.f32 %v5489_v55, %v566_v6  ;;  %v594_v16 = vmul.f32 %v5486_v54, %v566_v6  ;;  %v593_v52 = vmul.f32 %v5483_v53, %v566_v6  ;;  %v598_v25 = vmul.f32 %v5508_v8, %v566_v6 }
 0x203   : > { %v597_v14 = vmul.f32 %v5505_v0, %v566_v6  ;;  %v596_v51 = vmul.f32 %v5502_v63, %v566_v6  ;;  %v600_v21 = vmul.f32 %v5575_v4, %v566_v6 }
 0x204   : > { %637 = vrot.lane.b32.xlu0 %v595_v30, %s5173_s17  ;;  %635 = vrot.lane.b32.xlu2 %v594_v16, %s5173_s17  ;;  %v599_v30 = vmul.f32 %v5519_v27, %v566_v6 }
 0x205   : > { %633 = vrot.lane.b32.xlu1 %v593_v52, %s5173_s17  ;;  %v5614_v52 = vpop.permute.xlu1 %492 }
 0x206   : > { %10283 = vst [vmem:[#allocation62_spill] sm:$0xff] %v5614_v52 }
 0x20c   : > { %643 = vrot.lane.b32.xlu0 %v598_v25, %s5173_s17  ;;  %641 = vrot.lane.b32.xlu2 %v597_v14, %s5173_s17 }
 0x20d   : > { %639 = vrot.lane.b32.xlu1 %v596_v51, %s5173_s17  ;;  %v5616_v16 = vpop.permute.xlu1 %498 }
 0x20e   : > { %10284 = vst [vmem:[#allocation63_spill] sm:$0xff] %v5616_v16 }
 0x214   : > { %693 = vperm.xlu0 %5110, %v5303_v7   ;;  %647 = vrot.lane.b32.xlu2 %v600_v21, %s5173_s17 }
 0x215   : > { %645 = vrot.lane.b32.xlu1 %v599_v30, %s5173_s17  ;;  %v5618_v25 = vpop.permute.xlu1 %504 }
 0x216   : > { %10285 = vst [vmem:[#allocation64_spill] sm:$0xff] %v5618_v25 }
 0x21d   : > { %697 = vperm.xlu1 %5111, %v5311_v11   ;;  %v5620_v14 = vpop.permute.xlu1 %510 }
 0x21e   : > { %10286 = vst [vmem:[#allocation65_spill] sm:$0xff] %v5620_v14 }
 0x225   : > { %v5622_v51 = vpop.permute.xlu1 %516 }
 0x226   : > { %10287 = vst [vmem:[#allocation66_spill] sm:$0xff] %v5622_v51 }
 0x257   : > { %v5626_v6 = vpop.permute.xlu0 %625 }
 0x258   : > { %v5624_v18 = vpop.permute.xlu1 %617  ;;  %10289 = vst [vmem:[#allocation68_spill] sm:$0xff] %v5626_v6 }
 0x259   : > { %10288 = vst [vmem:[#allocation67_spill] sm:$0xff] %v5624_v18 }
 0x25f   : > { %v5630_v21 = vpop.permute.xlu0 %631 }
 0x260   : > { %v5628_v50 = vpop.permute.xlu1 %621 }
 0x261   : > { %10290 = vst [vmem:[#allocation69_spill] sm:$0xff] %v5628_v50 }
 0x268   : > { %v5632_v30 = vpop.permute.xlu1 %627 }
 0x276   : > { %v5634_v56 = vpop.permute.xlu0 %637 }
 0x277   : > { %10291 = vst [vmem:[#allocation70_spill] sm:$0xff] %v5634_v56  ;;  %v5636_v52 = vpop.permute.xlu1 %633 }
 0x278   : > { %10292 = vst [vmem:[#allocation71_spill] sm:$0xff] %v5636_v52  ;;  %v5176_v52 = vmov 7  }
 0x279   : > { %5112 = vset.pattern.permute.xlu1 %v5176_v52  ;;  %5113 = vset.pattern.permute.xlu2 %v5176_v52 }
 0x27e   : > { %v5638_v16 = vpop.permute.xlu0 %643 }
 0x27f   : > { %10293 = vst [vmem:[#allocation72_spill] sm:$0xff] %v5638_v16  ;;  %v5640_v25 = vpop.permute.xlu1 %639 }
 0x280   : > { %10294 = vst [vmem:[#allocation73_spill] sm:$0xff] %v5640_v25 }
 0x286   : > { %v694_v14 = vpop.permute.xlu0 %693 }
 0x287   : > { %v703_v51 = vmul.f32 %v694_v14, %v5502_v63  ;;  %v700_v18 = vmul.f32 %v694_v14, %v5483_v53  ;;  %v701_v6 = vmul.f32 %v694_v14, %v5486_v54  ;;  %v5647_v50 = vpop.permute.xlu1 %645  ;;  %v706_v25 = vmul.f32 %v694_v14, %v5519_v27 }
 0x288   : > { %10295 = vst [vmem:[#allocation74_spill] sm:$0xff] %v5647_v50  ;;  %v702_v56 = vmul.f32 %v694_v14, %v5489_v55  ;;  %v704_v16 = vmul.f32 %v694_v14, %v5505_v0  ;;  %v707_v50 = vmul.f32 %v694_v14, %v5575_v4 }
 0x289   : > { %738 = vrot.lane.b32.xlu0 %v703_v51, %s5175_s18  ;;  %732 = vrot.lane.b32.xlu2 %v700_v18, %s5175_s18 }
 0x28a   : > { %734 = vrot.lane.b32.xlu1 %v701_v6, %s5175_s18  ;;  %v705_v6 = vmul.f32 %v694_v14, %v5508_v8 }
 0x28f   : > { %v698_v18 = vpop.permute.xlu1 %697 }
 0x290   : > { %v709_v51 = vmul.f32 %v698_v18, %v5486_v54  ;;  %v712_v52 = vmul.f32 %v698_v18, %v5505_v0  ;;  %v711_v14 = vmul.f32 %v698_v18, %v5502_v63 }
 0x291   : > { %744 = vrot.lane.b32.xlu0 %v706_v25, %s5175_s18  ;;  %736 = vrot.lane.b32.xlu2 %v702_v56, %s5175_s18  ;;  %v708_v25 = vmul.f32 %v698_v18, %v5483_v53  ;;  %v710_v56 = vmul.f32 %v698_v18, %v5489_v55 }
 0x292   : > { %740 = vrot.lane.b32.xlu1 %v704_v16, %s5175_s18  ;;  %v715_v16 = vmul.f32 %v698_v18, %v5575_v4 }
 0x299   : > { %742 = vrot.lane.b32.xlu2 %v705_v6, %s5175_s18  ;;  %750 = vrot.lane.b32.xlu0 %v709_v51, %s5175_s18  ;;  %v713_v51 = vmul.f32 %v698_v18, %v5508_v8  ;;  %v5678_v6 = vpop.permute.xlu2 %619 }
 0x29a   : > { %746 = vrot.lane.b32.xlu1 %v707_v50, %s5175_s18  ;;  %v714_v50 = vmul.f32 %v698_v18, %v5519_v27  ;;  %10296 = vst [vmem:[#allocation75_spill] sm:$0xff] %v5678_v6 }
 0x2a1   : > { %756 = vrot.lane.b32.xlu0 %v712_v52, %s5175_s18  ;;  %748 = vrot.lane.b32.xlu2 %v708_v25, %s5175_s18  ;;  %v5680_v52 = vpop.permute.xlu2 %623 }
 0x2a2   : > { %752 = vrot.lane.b32.xlu1 %v710_v56, %s5175_s18  ;;  %10297 = vst [vmem:[#allocation76_spill] sm:$0xff] %v5680_v52 }
 0x2a9   : > { %762 = vrot.lane.b32.xlu0 %v715_v16, %s5175_s18  ;;  %754 = vrot.lane.b32.xlu2 %v711_v14, %s5175_s18  ;;  %v5682_v25 = vpop.permute.xlu2 %629 }
 0x2aa   : > { %758 = vrot.lane.b32.xlu1 %v713_v51, %s5175_s18 }
 0x2b1   : > { %760 = vrot.lane.b32.xlu2 %v714_v50, %s5175_s18  ;;  %v5684_v56 = vpop.permute.xlu2 %635 }
 0x2b2   : > { %808 = vperm.xlu1 %5112, %v5303_v7   ;;  %10298 = vst [vmem:[#allocation77_spill] sm:$0xff] %v5684_v56 }
 0x2b9   : > { %812 = vperm.xlu2 %5113, %v5311_v11   ;;  %v5686_v16 = vpop.permute.xlu2 %641 }
 0x2ba   : > { %10299 = vst [vmem:[#allocation78_spill] sm:$0xff] %v5686_v16 }
 0x2c1   : > { %v5688_v14 = vpop.permute.xlu2 %647 }
 0x2c2   : > { %10300 = vst [vmem:[#allocation79_spill] sm:$0xff] %v5688_v14 }
 0x2e3   : > { %v5690_v51 = vpop.permute.xlu2 %732 }
 0x2e4   : > { %10301 = vst [vmem:[#allocation80_spill] sm:$0xff] %v5690_v51 }
 0x2eb   : > { %v5694_v50 = vpop.permute.xlu2 %736 }
 0x2ec   : > { %10303 = vst [vmem:[#allocation82_spill] sm:$0xff] %v5694_v50 }
 0x2f3   : > { %v5698_v47 = vpop.permute.xlu2 %742 }
 0x2fb   : > { %v5702_v52 = vpop.permute.xlu2 %748 }
 0x2fc   : > { %v5692_v18 = vpop.permute.xlu1 %734  ;;  %10305 = vst [vmem:[#allocation84_spill] sm:$0xff] %v5702_v52 }
 0x2fd   : > { %10302 = vst [vmem:[#allocation81_spill] sm:$0xff] %v5692_v18 }
 0x303   : > { %v5708_v16 = vpop.permute.xlu2 %754 }
 0x304   : > { %v5696_v46 = vpop.permute.xlu1 %740  ;;  %10308 = vst [vmem:[#allocation87_spill] sm:$0xff] %v5708_v16 }
 0x305   : > { %10304 = vst [vmem:[#allocation83_spill] sm:$0xff] %v5696_v46 }
 0x30b   : > { %v5715_v46 = vpop.permute.xlu2 %760 }
 0x30c   : > { %v5700_v6 = vpop.permute.xlu1 %746  ;;  %10309 = vst [vmem:[#allocation88_spill] sm:$0xff] %v5715_v46 }
 0x314   : > { %v5704_v5 = vpop.permute.xlu1 %752 }
 0x315   : > { %10306 = vst [vmem:[#allocation85_spill] sm:$0xff] %v5704_v5  ;;  %v5178_v5 = vmov 8  }
 0x316   : > { %5114 = vset.pattern.permute.xlu1 %v5178_v5  ;;  %5115 = vset.pattern.permute.xlu2 %v5178_v5 }
 0x31c   : > { %v5706_v56 = vpop.permute.xlu1 %758 }
 0x31d   : > { %10307 = vst [vmem:[#allocation86_spill] sm:$0xff] %v5706_v56 }
 0x324   : > { %v809_v14 = vpop.permute.xlu1 %808 }
 0x325   : > { %v817_v51 = vmul.f32 %v809_v14, %v5489_v55  ;;  %v816_v18 = vmul.f32 %v809_v14, %v5486_v54  ;;  %v815_v50 = vmul.f32 %v809_v14, %v5483_v53  ;;  %v820_v16 = vmul.f32 %v809_v14, %v5508_v8 }
 0x326   : > { %v819_v52 = vmul.f32 %v809_v14, %v5505_v0  ;;  %v818_v56 = vmul.f32 %v809_v14, %v5502_v63  ;;  %v821_v46 = vmul.f32 %v809_v14, %v5519_v27 }
 0x327   : > { %851 = vrot.lane.b32.xlu2 %v817_v51, %s5177_s19  ;;  %849 = vrot.lane.b32.xlu1 %v816_v18, %s5177_s19  ;;  %v813_v51 = vpop.permute.xlu2 %812 }
 0x328   : > { %847 = vrot.lane.b32.xlu0 %v815_v50, %s5177_s19  ;;  %v823_v18 = vmul.f32 %v813_v51, %v5483_v53  ;;  %v822_v50 = vmul.f32 %v809_v14, %v5575_v4  ;;  %v826_v5 = vmul.f32 %v813_v51, %v5502_v63  ;;  %v828_v14 = vmul.f32 %v813_v51, %v5508_v8 }
 0x32f   : > { %857 = vrot.lane.b32.xlu2 %v820_v16, %s5177_s19  ;;  %855 = vrot.lane.b32.xlu1 %v819_v52, %s5177_s19  ;;  %v825_v16 = vmul.f32 %v813_v51, %v5489_v55  ;;  %v824_v52 = vmul.f32 %v813_v51, %v5486_v54 }
 0x330   : > { %853 = vrot.lane.b32.xlu0 %v818_v56, %s5177_s19  ;;  %v829_v56 = vmul.f32 %v813_v51, %v5519_v27 }
 0x337   : > { %863 = vrot.lane.b32.xlu2 %v823_v18, %s5177_s19  ;;  %861 = vrot.lane.b32.xlu1 %v822_v50, %s5177_s19  ;;  %v827_v18 = vmul.f32 %v813_v51, %v5505_v0 }
 0x338   : > { %859 = vrot.lane.b32.xlu0 %v821_v46, %s5177_s19  ;;  %v830_v46 = vmul.f32 %v813_v51, %v5575_v4 }
 0x33f   : > { %869 = vrot.lane.b32.xlu2 %v826_v5, %s5177_s19  ;;  %867 = vrot.lane.b32.xlu1 %v825_v16, %s5177_s19 }
 0x340   : > { %865 = vrot.lane.b32.xlu0 %v824_v52, %s5177_s19 }
 0x347   : > { %875 = vrot.lane.b32.xlu2 %v829_v56, %s5177_s19  ;;  %873 = vrot.lane.b32.xlu1 %v828_v14, %s5177_s19 }
 0x348   : > { %871 = vrot.lane.b32.xlu0 %v827_v18, %s5177_s19 }
 0x34f   : > { %923 = vperm.xlu1 %5114, %v5303_v7   ;;  %927 = vperm.xlu2 %5115, %v5311_v11  }
 0x350   : > { %877 = vrot.lane.b32.xlu0 %v830_v46, %s5177_s19 }
 0x381   : > { %v5748_v5 = vpop.permute.xlu2 %851 }
 0x382   : > { %10311 = vst [vmem:[#allocation90_spill] sm:$0xff] %v5748_v5 }
 0x389   : > { %v5752_v52 = vpop.permute.xlu2 %857 }
 0x391   : > { %v5756_v14 = vpop.permute.xlu2 %863 }
 0x392   : > { %10313 = vst [vmem:[#allocation92_spill] sm:$0xff] %v5756_v14  ;;  %v5180_v14 = vmov 9  }
 0x393   : > { %5116 = vset.pattern.permute.xlu1 %v5180_v14  ;;  %5117 = vset.pattern.permute.xlu2 %v5180_v14 }
 0x399   : > { %v5746_v50 = vpop.permute.xlu1 %849  ;;  %v5762_v44 = vpop.permute.xlu2 %869 }
 0x39a   : > { %10310 = vst [vmem:[#allocation89_spill] sm:$0xff] %v5746_v50 }
 0x39b   : > { %10316 = vst [vmem:[#allocation95_spill] sm:$0xff] %v5762_v44 }
 0x3a1   : > { %v5750_v16 = vpop.permute.xlu1 %855 }
 0x3a2   : > { %10312 = vst [vmem:[#allocation91_spill] sm:$0xff] %v5750_v16  ;;  %v5769_v16 = vpop.permute.xlu2 %875 }
 0x3a3   : > { %10317 = vst [vmem:[#allocation96_spill] sm:$0xff] %v5769_v16 }
 0x3a9   : > { %v5754_v56 = vpop.permute.xlu1 %861 }
 0x3b1   : > { %v5758_v18 = vpop.permute.xlu1 %867 }
 0x3b2   : > { %10314 = vst [vmem:[#allocation93_spill] sm:$0xff] %v5758_v18 }
 0x3b9   : > { %v5760_v51 = vpop.permute.xlu1 %873 }
 0x3ba   : > { %10315 = vst [vmem:[#allocation94_spill] sm:$0xff] %v5760_v51 }
 0x3c1   : > { %v924_v45 = vpop.permute.xlu1 %923 }
 0x3c2   : > { %v932_v46 = vmul.f32 %v924_v45, %v5489_v55  ;;  %v931_v50 = vmul.f32 %v924_v45, %v5486_v54  ;;  %v930_v5 = vmul.f32 %v924_v45, %v5483_v53  ;;  %v935_v18 = vmul.f32 %v924_v45, %v5508_v8 }
 0x3c3   : > { %v934_v44 = vmul.f32 %v924_v45, %v5505_v0  ;;  %v933_v51 = vmul.f32 %v924_v45, %v5502_v63  ;;  %v936_v16 = vmul.f32 %v924_v45, %v5519_v27 }
 0x3c4   : > { %966 = vrot.lane.b32.xlu2 %v932_v46, %s5179_s20  ;;  %964 = vrot.lane.b32.xlu1 %v931_v50, %s5179_s20  ;;  %v928_v50 = vpop.permute.xlu2 %927 }
 0x3c5   : > { %962 = vrot.lane.b32.xlu0 %v930_v5, %s5179_s20  ;;  %v938_v46 = vmul.f32 %v928_v50, %v5483_v53  ;;  %v937_v5 = vmul.f32 %v924_v45, %v5575_v4  ;;  %v941_v14 = vmul.f32 %v928_v50, %v5502_v63  ;;  %v944_v45 = vmul.f32 %v928_v50, %v5519_v27 }
 0x3cc   : > { %972 = vrot.lane.b32.xlu2 %v935_v18, %s5179_s20  ;;  %970 = vrot.lane.b32.xlu1 %v934_v44, %s5179_s20  ;;  %v940_v18 = vmul.f32 %v928_v50, %v5489_v55  ;;  %v939_v44 = vmul.f32 %v928_v50, %v5486_v54 }
 0x3cd   : > { %968 = vrot.lane.b32.xlu0 %v933_v51, %s5179_s20  ;;  %v943_v51 = vmul.f32 %v928_v50, %v5508_v8 }
 0x3d4   : > { %978 = vrot.lane.b32.xlu2 %v938_v46, %s5179_s20  ;;  %976 = vrot.lane.b32.xlu1 %v937_v5, %s5179_s20  ;;  %v942_v46 = vmul.f32 %v928_v50, %v5505_v0 }
 0x3d5   : > { %974 = vrot.lane.b32.xlu0 %v936_v16, %s5179_s20  ;;  %v945_v16 = vmul.f32 %v928_v50, %v5575_v4 }
 0x3dc   : > { %984 = vrot.lane.b32.xlu2 %v941_v14, %s5179_s20  ;;  %982 = vrot.lane.b32.xlu1 %v940_v18, %s5179_s20 }
 0x3dd   : > { %980 = vrot.lane.b32.xlu0 %v939_v44, %s5179_s20 }
 0x3e4   : > { %990 = vrot.lane.b32.xlu2 %v944_v45, %s5179_s20  ;;  %988 = vrot.lane.b32.xlu1 %v943_v51, %s5179_s20 }
 0x3e5   : > { %986 = vrot.lane.b32.xlu0 %v942_v46, %s5179_s20 }
 0x3ec   : > { %1038 = vperm.xlu1 %5116, %v5303_v7   ;;  %1042 = vperm.xlu2 %5117, %v5311_v11  }
 0x3ed   : > { %992 = vrot.lane.b32.xlu0 %v945_v16, %s5179_s20 }
 0x41e   : > { %v5802_v14 = vpop.permute.xlu2 %966 }
 0x41f   : > { %10319 = vst [vmem:[#allocation98_spill] sm:$0xff] %v5802_v14 }
 0x426   : > { %v5806_v44 = vpop.permute.xlu2 %972 }
 0x42e   : > { %v5810_v51 = vpop.permute.xlu2 %978 }
 0x42f   : > { %10321 = vst [vmem:[#allocation100_spill] sm:$0xff] %v5810_v51  ;;  %v5182_v51 = vmov 10  }
 0x430   : > { %5118 = vset.pattern.permute.xlu1 %v5182_v51  ;;  %5119 = vset.pattern.permute.xlu2 %v5182_v51 }
 0x436   : > { %v5800_v5 = vpop.permute.xlu1 %964  ;;  %v5816_v62 = vpop.permute.xlu2 %984 }
 0x437   : > { %10318 = vst [vmem:[#allocation97_spill] sm:$0xff] %v5800_v5 }
 0x438   : > { %10324 = vst [vmem:[#allocation103_spill] sm:$0xff] %v5816_v62 }
 0x43e   : > { %v5804_v18 = vpop.permute.xlu1 %970 }
 0x43f   : > { %10320 = vst [vmem:[#allocation99_spill] sm:$0xff] %v5804_v18  ;;  %v5823_v18 = vpop.permute.xlu2 %990 }
 0x440   : > { %10325 = vst [vmem:[#allocation104_spill] sm:$0xff] %v5823_v18 }
 0x446   : > { %v5808_v45 = vpop.permute.xlu1 %976 }
 0x44e   : > { %v5812_v46 = vpop.permute.xlu1 %982 }
 0x44f   : > { %10322 = vst [vmem:[#allocation101_spill] sm:$0xff] %v5812_v46 }
 0x456   : > { %v5814_v50 = vpop.permute.xlu1 %988 }
 0x457   : > { %10323 = vst [vmem:[#allocation102_spill] sm:$0xff] %v5814_v50 }
 0x45e   : > { %v1039_v3 = vpop.permute.xlu1 %1038 }
 0x45f   : > { %v1047_v16 = vmul.f32 %v1039_v3, %v5489_v55  ;;  %v1046_v5 = vmul.f32 %v1039_v3, %v5486_v54  ;;  %v1045_v14 = vmul.f32 %v1039_v3, %v5483_v53  ;;  %v1050_v46 = vmul.f32 %v1039_v3, %v5508_v8 }
 0x460   : > { %v1049_v62 = vmul.f32 %v1039_v3, %v5505_v0  ;;  %v1048_v50 = vmul.f32 %v1039_v3, %v5502_v63  ;;  %v1051_v18 = vmul.f32 %v1039_v3, %v5519_v27 }
 0x461   : > { %1081 = vrot.lane.b32.xlu2 %v1047_v16, %s5181_s21  ;;  %1079 = vrot.lane.b32.xlu1 %v1046_v5, %s5181_s21  ;;  %v1043_v5 = vpop.permute.xlu2 %1042 }
 0x462   : > { %1077 = vrot.lane.b32.xlu0 %v1045_v14, %s5181_s21  ;;  %v1053_v16 = vmul.f32 %v1043_v5, %v5483_v53  ;;  %v1052_v14 = vmul.f32 %v1039_v3, %v5575_v4  ;;  %v1056_v51 = vmul.f32 %v1043_v5, %v5502_v63  ;;  %v1059_v3 = vmul.f32 %v1043_v5, %v5519_v27 }
 0x469   : > { %1087 = vrot.lane.b32.xlu2 %v1050_v46, %s5181_s21  ;;  %1085 = vrot.lane.b32.xlu1 %v1049_v62, %s5181_s21  ;;  %v1055_v46 = vmul.f32 %v1043_v5, %v5489_v55  ;;  %v1054_v62 = vmul.f32 %v1043_v5, %v5486_v54 }
 0x46a   : > { %1083 = vrot.lane.b32.xlu0 %v1048_v50, %s5181_s21  ;;  %v1058_v50 = vmul.f32 %v1043_v5, %v5508_v8 }
 0x471   : > { %1093 = vrot.lane.b32.xlu2 %v1053_v16, %s5181_s21  ;;  %1091 = vrot.lane.b32.xlu1 %v1052_v14, %s5181_s21  ;;  %v1057_v16 = vmul.f32 %v1043_v5, %v5505_v0 }
 0x472   : > { %1089 = vrot.lane.b32.xlu0 %v1051_v18, %s5181_s21  ;;  %v1060_v18 = vmul.f32 %v1043_v5, %v5575_v4 }
 0x479   : > { %1099 = vrot.lane.b32.xlu2 %v1056_v51, %s5181_s21  ;;  %1097 = vrot.lane.b32.xlu1 %v1055_v46, %s5181_s21 }
 0x47a   : > { %1095 = vrot.lane.b32.xlu0 %v1054_v62, %s5181_s21 }
 0x481   : > { %1105 = vrot.lane.b32.xlu2 %v1059_v3, %s5181_s21  ;;  %1103 = vrot.lane.b32.xlu1 %v1058_v50, %s5181_s21 }
 0x482   : > { %1101 = vrot.lane.b32.xlu0 %v1057_v16, %s5181_s21 }
 0x489   : > { %1153 = vperm.xlu1 %5118, %v5303_v7   ;;  %1157 = vperm.xlu2 %5119, %v5311_v11  }
 0x48a   : > { %1107 = vrot.lane.b32.xlu0 %v1060_v18, %s5181_s21 }
 0x4bb   : > { %v5856_v51 = vpop.permute.xlu2 %1081 }
 0x4bc   : > { %10327 = vst [vmem:[#allocation106_spill] sm:$0xff] %v5856_v51 }
 0x4c3   : > { %v5860_v62 = vpop.permute.xlu2 %1087 }
 0x4cb   : > { %v5864_v50 = vpop.permute.xlu2 %1093 }
 0x4cc   : > { %10329 = vst [vmem:[#allocation108_spill] sm:$0xff] %v5864_v50  ;;  %v5184_v50 = vmov 11  }
 0x4cd   : > { %5120 = vset.pattern.permute.xlu1 %v5184_v50  ;;  %5121 = vset.pattern.permute.xlu2 %v5184_v50 }
 0x4d3   : > { %v5854_v14 = vpop.permute.xlu1 %1079  ;;  %v5870_v7 = vpop.permute.xlu2 %1099 }
 0x4d4   : > { %10326 = vst [vmem:[#allocation105_spill] sm:$0xff] %v5854_v14 }
 0x4d5   : > { %10332 = vst [vmem:[#allocation111_spill] sm:$0xff] %v5870_v7 }
 0x4db   : > { %v5858_v46 = vpop.permute.xlu1 %1085 }
 0x4dc   : > { %10328 = vst [vmem:[#allocation107_spill] sm:$0xff] %v5858_v46  ;;  %v5877_v46 = vpop.permute.xlu2 %1105 }
 0x4dd   : > { %10333 = vst [vmem:[#allocation112_spill] sm:$0xff] %v5877_v46 }
 0x4e3   : > { %v5862_v3 = vpop.permute.xlu1 %1091 }
 0x4eb   : > { %v5866_v16 = vpop.permute.xlu1 %1097 }
 0x4ec   : > { %10330 = vst [vmem:[#allocation109_spill] sm:$0xff] %v5866_v16 }
 0x4f3   : > { %v5868_v5 = vpop.permute.xlu1 %1103 }
 0x4f4   : > { %10331 = vst [vmem:[#allocation110_spill] sm:$0xff] %v5868_v5 }
 0x4fb   : > { %v1154_v11 = vpop.permute.xlu1 %1153 }
 0x4fc   : > { %v1162_v18 = vmul.f32 %v1154_v11, %v5489_v55  ;;  %v1161_v14 = vmul.f32 %v1154_v11, %v5486_v54  ;;  %v1160_v51 = vmul.f32 %v1154_v11, %v5483_v53  ;;  %v1165_v16 = vmul.f32 %v1154_v11, %v5508_v8 }
 0x4fd   : > { %v1164_v7 = vmul.f32 %v1154_v11, %v5505_v0  ;;  %v1163_v5 = vmul.f32 %v1154_v11, %v5502_v63  ;;  %v1166_v46 = vmul.f32 %v1154_v11, %v5519_v27 }
 0x4fe   : > { %1196 = vrot.lane.b32.xlu2 %v1162_v18, %s5183_s22  ;;  %1194 = vrot.lane.b32.xlu1 %v1161_v14, %s5183_s22  ;;  %v1158_v14 = vpop.permute.xlu2 %1157 }
 0x4ff   : > { %1192 = vrot.lane.b32.xlu0 %v1160_v51, %s5183_s22  ;;  %v1168_v18 = vmul.f32 %v1158_v14, %v5483_v53  ;;  %v1167_v51 = vmul.f32 %v1154_v11, %v5575_v4  ;;  %v1171_v50 = vmul.f32 %v1158_v14, %v5502_v63  ;;  %v1173_v11 = vmul.f32 %v1158_v14, %v5508_v8 }
 0x506   : > { %1202 = vrot.lane.b32.xlu2 %v1165_v16, %s5183_s22  ;;  %1200 = vrot.lane.b32.xlu1 %v1164_v7, %s5183_s22  ;;  %v1170_v16 = vmul.f32 %v1158_v14, %v5489_v55  ;;  %v1169_v7 = vmul.f32 %v1158_v14, %v5486_v54 }
 0x507   : > { %1198 = vrot.lane.b32.xlu0 %v1163_v5, %s5183_s22  ;;  %v1174_v5 = vmul.f32 %v1158_v14, %v5519_v27 }
 0x50e   : > { %1208 = vrot.lane.b32.xlu2 %v1168_v18, %s5183_s22  ;;  %1206 = vrot.lane.b32.xlu1 %v1167_v51, %s5183_s22  ;;  %v1172_v18 = vmul.f32 %v1158_v14, %v5505_v0  ;;  %v5908_v51 = vld [vmem:[%s9953_s1] sm:$0xff] }
 0x50f   : > { %1204 = vrot.lane.b32.xlu0 %v1166_v46, %s5183_s22  ;;  %v1175_v46 = vmul.f32 %v1158_v14, %v5575_v4 }
 0x516   : > { %1214 = vrot.lane.b32.xlu2 %v1171_v50, %s5183_s22  ;;  %1212 = vrot.lane.b32.xlu1 %v1170_v16, %s5183_s22  ;;  %v5914_v50 = vld [vmem:[%s9953_s1 + $0x8] sm:$0x3] }
 0x517   : > { %1210 = vrot.lane.b32.xlu0 %v1169_v7, %s5183_s22 }
 0x51e   : > { %1220 = vrot.lane.b32.xlu2 %v1174_v5, %s5183_s22  ;;  %1218 = vrot.lane.b32.xlu1 %v1173_v11, %s5183_s22 }
 0x51f   : > { %1216 = vrot.lane.b32.xlu0 %v1172_v18, %s5183_s22 }
 0x526   : > { %1268 = vperm.xlu1 %5120, %v5908_v51   ;;  %1272 = vperm.xlu2 %5121, %v5914_v50  }
 0x527   : > { %1222 = vrot.lane.b32.xlu0 %v1175_v46, %s5183_s22 }
 0x558   : > { %v5920_v7 = vpop.permute.xlu2 %1196 }
 0x559   : > { %10335 = vst [vmem:[#allocation114_spill] sm:$0xff] %v5920_v7 }
 0x560   : > { %v5924_v5 = vpop.permute.xlu2 %1202 }
 0x568   : > { %v5928_v18 = vpop.permute.xlu2 %1208 }
 0x569   : > { %10337 = vst [vmem:[#allocation116_spill] sm:$0xff] %v5928_v18  ;;  %v5186_v18 = vmov 12  }
 0x56a   : > { %5122 = vset.pattern.permute.xlu1 %v5186_v18  ;;  %5123 = vset.pattern.permute.xlu2 %v5186_v18 }
 0x570   : > { %v5918_v16 = vpop.permute.xlu1 %1194  ;;  %v5934_v12 = vpop.permute.xlu2 %1214 }
 0x571   : > { %10334 = vst [vmem:[#allocation113_spill] sm:$0xff] %v5918_v16 }
 0x572   : > { %10340 = vst [vmem:[#allocation119_spill] sm:$0xff] %v5934_v12 }
 0x578   : > { %v5922_v14 = vpop.permute.xlu1 %1200 }
 0x579   : > { %10336 = vst [vmem:[#allocation115_spill] sm:$0xff] %v5922_v14  ;;  %v5941_v14 = vpop.permute.xlu2 %1220 }
 0x57a   : > { %10341 = vst [vmem:[#allocation120_spill] sm:$0xff] %v5941_v14 }
 0x580   : > { %v5926_v11 = vpop.permute.xlu1 %1206 }
 0x588   : > { %v5930_v43 = vpop.permute.xlu1 %1212 }
 0x589   : > { %10338 = vst [vmem:[#allocation117_spill] sm:$0xff] %v5930_v43 }
 0x590   : > { %v5932_v41 = vpop.permute.xlu1 %1218 }
 0x591   : > { %10339 = vst [vmem:[#allocation118_spill] sm:$0xff] %v5932_v41 }
 0x598   : > { %v1269_v1 = vpop.permute.xlu1 %1268 }
 0x599   : > { %v1277_v46 = vmul.f32 %v1269_v1, %v5489_v55  ;;  %v1276_v16 = vmul.f32 %v1269_v1, %v5486_v54  ;;  %v1275_v7 = vmul.f32 %v1269_v1, %v5483_v53  ;;  %v1280_v43 = vmul.f32 %v1269_v1, %v5508_v8 }
 0x59a   : > { %v1279_v12 = vmul.f32 %v1269_v1, %v5505_v0  ;;  %v1278_v41 = vmul.f32 %v1269_v1, %v5502_v63  ;;  %v1281_v14 = vmul.f32 %v1269_v1, %v5519_v27 }
 0x59b   : > { %1311 = vrot.lane.b32.xlu2 %v1277_v46, %s5185_s6  ;;  %1309 = vrot.lane.b32.xlu1 %v1276_v16, %s5185_s6  ;;  %v1273_v16 = vpop.permute.xlu2 %1272 }
 0x59c   : > { %1307 = vrot.lane.b32.xlu0 %v1275_v7, %s5185_s6  ;;  %v1283_v46 = vmul.f32 %v1273_v16, %v5483_v53  ;;  %v1282_v7 = vmul.f32 %v1269_v1, %v5575_v4  ;;  %v1286_v18 = vmul.f32 %v1273_v16, %v5502_v63  ;;  %v1289_v1 = vmul.f32 %v1273_v16, %v5519_v27 }
 0x5a3   : > { %1317 = vrot.lane.b32.xlu2 %v1280_v43, %s5185_s6  ;;  %1315 = vrot.lane.b32.xlu1 %v1279_v12, %s5185_s6  ;;  %v1285_v43 = vmul.f32 %v1273_v16, %v5489_v55  ;;  %v1284_v12 = vmul.f32 %v1273_v16, %v5486_v54 }
 0x5a4   : > { %1313 = vrot.lane.b32.xlu0 %v1278_v41, %s5185_s6  ;;  %v1288_v41 = vmul.f32 %v1273_v16, %v5508_v8 }
 0x5ab   : > { %1323 = vrot.lane.b32.xlu2 %v1283_v46, %s5185_s6  ;;  %1321 = vrot.lane.b32.xlu1 %v1282_v7, %s5185_s6  ;;  %v1287_v46 = vmul.f32 %v1273_v16, %v5505_v0 }
 0x5ac   : > { %1319 = vrot.lane.b32.xlu0 %v1281_v14, %s5185_s6  ;;  %v1290_v14 = vmul.f32 %v1273_v16, %v5575_v4 }
 0x5b3   : > { %1329 = vrot.lane.b32.xlu2 %v1286_v18, %s5185_s6  ;;  %1327 = vrot.lane.b32.xlu1 %v1285_v43, %s5185_s6 }
 0x5b4   : > { %1325 = vrot.lane.b32.xlu0 %v1284_v12, %s5185_s6 }
 0x5bb   : > { %1335 = vrot.lane.b32.xlu2 %v1289_v1, %s5185_s6  ;;  %1333 = vrot.lane.b32.xlu1 %v1288_v41, %s5185_s6 }
 0x5bc   : > { %1331 = vrot.lane.b32.xlu0 %v1287_v46, %s5185_s6 }
 0x5c3   : > { %1383 = vperm.xlu1 %5122, %v5908_v51   ;;  %1387 = vperm.xlu2 %5123, %v5914_v50  }
 0x5c4   : > { %1337 = vrot.lane.b32.xlu0 %v1290_v14, %s5185_s6 }
 0x5f5   : > { %v5974_v18 = vpop.permute.xlu2 %1311 }
 0x5f6   : > { %10343 = vst [vmem:[#allocation122_spill] sm:$0xff] %v5974_v18 }
 0x5fd   : > { %v5978_v12 = vpop.permute.xlu2 %1317 }
 0x5fe   : > { %10345 = vst [vmem:[#allocation124_spill] sm:$0xff] %v5978_v12 }
 0x605   : > { %v5982_v41 = vpop.permute.xlu2 %1323 }
 0x606   : > { %10346 = vst [vmem:[#allocation125_spill] sm:$0xff] %v5982_v41  ;;  %v5188_v41 = vmov 13  }
 0x607   : > { %5124 = vset.pattern.permute.xlu1 %v5188_v41  ;;  %5125 = vset.pattern.permute.xlu2 %v5188_v41 }
 0x60d   : > { %v5972_v7 = vpop.permute.xlu1 %1309  ;;  %v5988_v39 = vpop.permute.xlu2 %1329 }
 0x60e   : > { %10342 = vst [vmem:[#allocation121_spill] sm:$0xff] %v5972_v7 }
 0x60f   : > { %10349 = vst [vmem:[#allocation128_spill] sm:$0xff] %v5988_v39 }
 0x615   : > { %v5976_v43 = vpop.permute.xlu1 %1315 }
 0x616   : > { %10344 = vst [vmem:[#allocation123_spill] sm:$0xff] %v5976_v43  ;;  %v5995_v43 = vpop.permute.xlu2 %1335 }
 0x617   : > { %10350 = vst [vmem:[#allocation129_spill] sm:$0xff] %v5995_v43 }
 0x61d   : > { %v5980_v1 = vpop.permute.xlu1 %1321 }
 0x625   : > { %v5984_v46 = vpop.permute.xlu1 %1327 }
 0x626   : > { %10347 = vst [vmem:[#allocation126_spill] sm:$0xff] %v5984_v46 }
 0x62d   : > { %v5986_v16 = vpop.permute.xlu1 %1333 }
 0x62e   : > { %10348 = vst [vmem:[#allocation127_spill] sm:$0xff] %v5986_v16 }
 0x635   : > { %v1384_v40 = vpop.permute.xlu1 %1383 }
 0x636   : > { %v1392_v14 = vmul.f32 %v1384_v40, %v5489_v55  ;;  %v1391_v7 = vmul.f32 %v1384_v40, %v5486_v54  ;;  %v1390_v18 = vmul.f32 %v1384_v40, %v5483_v53  ;;  %v1395_v46 = vmul.f32 %v1384_v40, %v5508_v8 }
 0x637   : > { %v1394_v39 = vmul.f32 %v1384_v40, %v5505_v0  ;;  %v1393_v16 = vmul.f32 %v1384_v40, %v5502_v63  ;;  %v1396_v43 = vmul.f32 %v1384_v40, %v5519_v27 }
 0x638   : > { %1426 = vrot.lane.b32.xlu2 %v1392_v14, %s5187_s7  ;;  %1424 = vrot.lane.b32.xlu1 %v1391_v7, %s5187_s7  ;;  %v1388_v7 = vpop.permute.xlu2 %1387 }
 0x639   : > { %1422 = vrot.lane.b32.xlu0 %v1390_v18, %s5187_s7  ;;  %v1398_v14 = vmul.f32 %v1388_v7, %v5483_v53  ;;  %v1397_v18 = vmul.f32 %v1384_v40, %v5575_v4  ;;  %v1401_v41 = vmul.f32 %v1388_v7, %v5502_v63  ;;  %v1404_v40 = vmul.f32 %v1388_v7, %v5519_v27 }
 0x640   : > { %1432 = vrot.lane.b32.xlu2 %v1395_v46, %s5187_s7  ;;  %1430 = vrot.lane.b32.xlu1 %v1394_v39, %s5187_s7  ;;  %v1400_v46 = vmul.f32 %v1388_v7, %v5489_v55  ;;  %v1399_v39 = vmul.f32 %v1388_v7, %v5486_v54 }
 0x641   : > { %1428 = vrot.lane.b32.xlu0 %v1393_v16, %s5187_s7  ;;  %v1403_v16 = vmul.f32 %v1388_v7, %v5508_v8 }
 0x648   : > { %1438 = vrot.lane.b32.xlu2 %v1398_v14, %s5187_s7  ;;  %1436 = vrot.lane.b32.xlu1 %v1397_v18, %s5187_s7  ;;  %v1402_v14 = vmul.f32 %v1388_v7, %v5505_v0 }
 0x649   : > { %1434 = vrot.lane.b32.xlu0 %v1396_v43, %s5187_s7  ;;  %v1405_v43 = vmul.f32 %v1388_v7, %v5575_v4 }
 0x650   : > { %1444 = vrot.lane.b32.xlu2 %v1401_v41, %s5187_s7  ;;  %1442 = vrot.lane.b32.xlu1 %v1400_v46, %s5187_s7 }
 0x651   : > { %1440 = vrot.lane.b32.xlu0 %v1399_v39, %s5187_s7 }
 0x658   : > { %1450 = vrot.lane.b32.xlu2 %v1404_v40, %s5187_s7  ;;  %1448 = vrot.lane.b32.xlu1 %v1403_v16, %s5187_s7 }
 0x659   : > { %1446 = vrot.lane.b32.xlu0 %v1402_v14, %s5187_s7 }
 0x660   : > { %1498 = vperm.xlu1 %5124, %v5908_v51   ;;  %1502 = vperm.xlu2 %5125, %v5914_v50  }
 0x661   : > { %1452 = vrot.lane.b32.xlu0 %v1405_v43, %s5187_s7 }
 0x692   : > { %v6028_v41 = vpop.permute.xlu2 %1426 }
 0x693   : > { %10352 = vst [vmem:[#allocation131_spill] sm:$0xff] %v6028_v41 }
 0x69a   : > { %v6032_v39 = vpop.permute.xlu2 %1432 }
 0x69b   : > { %10354 = vst [vmem:[#allocation133_spill] sm:$0xff] %v6032_v39 }
 0x6a2   : > { %v6036_v16 = vpop.permute.xlu2 %1438 }
 0x6a3   : > { %10355 = vst [vmem:[#allocation134_spill] sm:$0xff] %v6036_v16 }
 0x6aa   : > { %v6026_v18 = vpop.permute.xlu1 %1424  ;;  %v6042_v37 = vpop.permute.xlu2 %1444 }
 0x6ab   : > { %10351 = vst [vmem:[#allocation130_spill] sm:$0xff] %v6026_v18 }
 0x6ac   : > { %10358 = vst [vmem:[#allocation137_spill] sm:$0xff] %v6042_v37 }
 0x6b2   : > { %v6030_v46 = vpop.permute.xlu1 %1430 }
 0x6b3   : > { %10353 = vst [vmem:[#allocation132_spill] sm:$0xff] %v6030_v46  ;;  %v6049_v46 = vpop.permute.xlu2 %1450 }
 0x6b4   : > { %10359 = vst [vmem:[#allocation138_spill] sm:$0xff] %v6049_v46 }
 0x6ba   : > { %v6034_v40 = vpop.permute.xlu1 %1436 }
 0x6c2   : > { %v6038_v14 = vpop.permute.xlu1 %1442 }
 0x6c3   : > { %10356 = vst [vmem:[#allocation135_spill] sm:$0xff] %v6038_v14  ;;  %v5190_v14 = vmov 14  }
 0x6c4   : > { %5126 = vset.pattern.permute.xlu1 %v5190_v14  ;;  %5127 = vset.pattern.permute.xlu2 %v5190_v14 }
 0x6ca   : > { %v6040_v7 = vpop.permute.xlu1 %1448 }
 0x6cb   : > { %10357 = vst [vmem:[#allocation136_spill] sm:$0xff] %v6040_v7 }
 0x6d2   : > { %v1499_v60 = vpop.permute.xlu1 %1498 }
 0x6d3   : > { %v1507_v43 = vmul.f32 %v1499_v60, %v5489_v55  ;;  %v1506_v18 = vmul.f32 %v1499_v60, %v5486_v54  ;;  %v1505_v41 = vmul.f32 %v1499_v60, %v5483_v53  ;;  %v1510_v37 = vmul.f32 %v1499_v60, %v5508_v8 }
 0x6d4   : > { %v1509_v16 = vmul.f32 %v1499_v60, %v5505_v0  ;;  %v1508_v7 = vmul.f32 %v1499_v60, %v5502_v63  ;;  %v1511_v46 = vmul.f32 %v1499_v60, %v5519_v27 }
 0x6d5   : > { %1541 = vrot.lane.b32.xlu2 %v1507_v43, %s5189_s26  ;;  %1539 = vrot.lane.b32.xlu1 %v1506_v18, %s5189_s26  ;;  %v1503_v18 = vpop.permute.xlu2 %1502 }
 0x6d6   : > { %1537 = vrot.lane.b32.xlu0 %v1505_v41, %s5189_s26  ;;  %v1513_v43 = vmul.f32 %v1503_v18, %v5483_v53  ;;  %v1512_v41 = vmul.f32 %v1499_v60, %v5575_v4  ;;  %v1516_v14 = vmul.f32 %v1503_v18, %v5502_v63  ;;  %v1519_v60 = vmul.f32 %v1503_v18, %v5519_v27 }
 0x6dd   : > { %1547 = vrot.lane.b32.xlu2 %v1510_v37, %s5189_s26  ;;  %1545 = vrot.lane.b32.xlu1 %v1509_v16, %s5189_s26  ;;  %v1515_v37 = vmul.f32 %v1503_v18, %v5489_v55  ;;  %v1514_v16 = vmul.f32 %v1503_v18, %v5486_v54 }
 0x6de   : > { %1543 = vrot.lane.b32.xlu0 %v1508_v7, %s5189_s26  ;;  %v1518_v7 = vmul.f32 %v1503_v18, %v5508_v8 }
 0x6e5   : > { %1553 = vrot.lane.b32.xlu2 %v1513_v43, %s5189_s26  ;;  %1551 = vrot.lane.b32.xlu1 %v1512_v41, %s5189_s26  ;;  %v1517_v43 = vmul.f32 %v1503_v18, %v5505_v0 }
 0x6e6   : > { %1549 = vrot.lane.b32.xlu0 %v1511_v46, %s5189_s26  ;;  %v1520_v46 = vmul.f32 %v1503_v18, %v5575_v4 }
 0x6ed   : > { %1559 = vrot.lane.b32.xlu2 %v1516_v14, %s5189_s26  ;;  %1557 = vrot.lane.b32.xlu1 %v1515_v37, %s5189_s26 }
 0x6ee   : > { %1555 = vrot.lane.b32.xlu0 %v1514_v16, %s5189_s26 }
 0x6f5   : > { %1565 = vrot.lane.b32.xlu2 %v1519_v60, %s5189_s26  ;;  %1563 = vrot.lane.b32.xlu1 %v1518_v7, %s5189_s26 }
 0x6f6   : > { %1561 = vrot.lane.b32.xlu0 %v1517_v43, %s5189_s26 }
 0x6fd   : > { %1613 = vperm.xlu1 %5126, %v5908_v51   ;;  %1617 = vperm.xlu2 %5127, %v5914_v50  }
 0x6fe   : > { %1567 = vrot.lane.b32.xlu0 %v1520_v46, %s5189_s26 }
 0x72f   : > { %v6082_v14 = vpop.permute.xlu2 %1541 }
 0x730   : > { %10361 = vst [vmem:[#allocation140_spill] sm:$0xff] %v6082_v14 }
 0x737   : > { %v6086_v16 = vpop.permute.xlu2 %1547 }
 0x738   : > { %10363 = vst [vmem:[#allocation142_spill] sm:$0xff] %v6086_v16 }
 0x73f   : > { %v6090_v7 = vpop.permute.xlu2 %1553 }
 0x740   : > { %10364 = vst [vmem:[#allocation143_spill] sm:$0xff] %v6090_v7 }
 0x747   : > { %v6080_v41 = vpop.permute.xlu1 %1539  ;;  %v6096_v2 = vpop.permute.xlu2 %1559 }
 0x748   : > { %10360 = vst [vmem:[#allocation139_spill] sm:$0xff] %v6080_v41 }
 0x749   : > { %10367 = vst [vmem:[#allocation146_spill] sm:$0xff] %v6096_v2 }
 0x74f   : > { %v6084_v37 = vpop.permute.xlu1 %1545 }
 0x750   : > { %10362 = vst [vmem:[#allocation141_spill] sm:$0xff] %v6084_v37  ;;  %v6103_v37 = vpop.permute.xlu2 %1565 }
 0x751   : > { %10368 = vst [vmem:[#allocation147_spill] sm:$0xff] %v6103_v37 }
 0x757   : > { %v6088_v60 = vpop.permute.xlu1 %1551 }
 0x75f   : > { %v6092_v43 = vpop.permute.xlu1 %1557 }
 0x760   : > { %10365 = vst [vmem:[#allocation144_spill] sm:$0xff] %v6092_v43  ;;  %v5192_v43 = vmov 15  }
 0x761   : > { %5128 = vset.pattern.permute.xlu1 %v5192_v43  ;;  %5129 = vset.pattern.permute.xlu2 %v5192_v43 }
 0x767   : > { %v6094_v18 = vpop.permute.xlu1 %1563 }
 0x768   : > { %10366 = vst [vmem:[#allocation145_spill] sm:$0xff] %v6094_v18 }
 0x76f   : > { %v1614_v36 = vpop.permute.xlu1 %1613 }
 0x770   : > { %v1622_v46 = vmul.f32 %v1614_v36, %v5489_v55  ;;  %v1621_v41 = vmul.f32 %v1614_v36, %v5486_v54  ;;  %v1620_v14 = vmul.f32 %v1614_v36, %v5483_v53  ;;  %v1625_v2 = vmul.f32 %v1614_v36, %v5508_v8 }
 0x771   : > { %v1624_v7 = vmul.f32 %v1614_v36, %v5505_v0  ;;  %v1623_v18 = vmul.f32 %v1614_v36, %v5502_v63  ;;  %v1627_v37 = vmul.f32 %v1614_v36, %v5575_v4  ;;  %v1626_v43 = vmul.f32 %v1614_v36, %v5519_v27 }
 0x772   : > { %1656 = vrot.lane.b32.xlu2 %v1622_v46, %s5191_s27  ;;  %1654 = vrot.lane.b32.xlu1 %v1621_v41, %s5191_s27  ;;  %v1618_v41 = vpop.permute.xlu2 %1617  ;;  %v6112_v46 = vpop.permute.xlu0 %738 }
 0x773   : > { %1652 = vrot.lane.b32.xlu0 %v1620_v14, %s5191_s27  ;;  %10369 = vst [vmem:[#allocation148_spill] sm:$0xff] %v6112_v46  ;;  %v1628_v14 = vmul.f32 %v1618_v41, %v5483_v53  ;;  %v1629_v46 = vmul.f32 %v1618_v41, %v5486_v54  ;;  %v1634_v36 = vmul.f32 %v1618_v41, %v5519_v27 }
 0x77a   : > { %1662 = vrot.lane.b32.xlu2 %v1625_v2, %s5191_s27  ;;  %1660 = vrot.lane.b32.xlu1 %v1624_v7, %s5191_s27  ;;  %v1631_v2 = vmul.f32 %v1618_v41, %v5502_v63  ;;  %v1630_v7 = vmul.f32 %v1618_v41, %v5489_v55 }
 0x77b   : > { %1658 = vrot.lane.b32.xlu0 %v1623_v18, %s5191_s27  ;;  %v6122_v18 = vpop.permute.xlu0 %744 }
 0x782   : > { %1668 = vrot.lane.b32.xlu2 %v1628_v14, %s5191_s27  ;;  %1666 = vrot.lane.b32.xlu1 %v1627_v37, %s5191_s27  ;;  %v1633_v37 = vmul.f32 %v1618_v41, %v5508_v8 }
 0x783   : > { %1664 = vrot.lane.b32.xlu0 %v1626_v43, %s5191_s27  ;;  %v6130_v14 = vpop.permute.xlu0 %750  ;;  %v1632_v43 = vmul.f32 %v1618_v41, %v5505_v0 }
 0x784   : > { %10370 = vst [vmem:[#allocation149_spill] sm:$0xff] %v6130_v14 }
 0x78a   : > { %1674 = vrot.lane.b32.xlu2 %v1631_v2, %s5191_s27  ;;  %1672 = vrot.lane.b32.xlu1 %v1630_v7, %s5191_s27  ;;  %v1635_v2 = vmul.f32 %v1618_v41, %v5575_v4 }
 0x78b   : > { %1670 = vrot.lane.b32.xlu0 %v1629_v46, %s5191_s27  ;;  %v6139_v46 = vpop.permute.xlu0 %756 }
 0x78c   : > { %10371 = vst [vmem:[#allocation150_spill] sm:$0xff] %v6139_v46 }
 0x792   : > { %1680 = vrot.lane.b32.xlu2 %v1634_v36, %s5191_s27  ;;  %1678 = vrot.lane.b32.xlu1 %v1633_v37, %s5191_s27 }
 0x793   : > { %1676 = vrot.lane.b32.xlu0 %v1632_v43, %s5191_s27  ;;  %v6160_v46 = vpop.permute.xlu0 %762 }
 0x794   : > { %10380 = vst [vmem:[#allocation159_spill] sm:$0xff] %v6160_v46 }
 0x79a   : > { %1728 = vperm.xlu1 %5128, %v5908_v51   ;;  %1732 = vperm.xlu2 %5129, %v5914_v50  }
 0x79b   : > { %1682 = vrot.lane.b32.xlu0 %v1635_v2, %s5191_s27 }
 0x7cc   : > { %v6144_v14 = vpop.permute.xlu2 %1656 }
 0x7cd   : > { %10373 = vst [vmem:[#allocation152_spill] sm:$0xff] %v6144_v14 }
 0x7d4   : > { %v6148_v36 = vpop.permute.xlu2 %1662 }
 0x7d5   : > { %10375 = vst [vmem:[#allocation154_spill] sm:$0xff] %v6148_v36 }
 0x7dc   : > { %v6152_v43 = vpop.permute.xlu2 %1668 }
 0x7dd   : > { %10376 = vst [vmem:[#allocation155_spill] sm:$0xff] %v6152_v43  ;;  %v6167_v43 = vpop.permute.xlu0 %847 }
 0x7de   : > { %10381 = vst [vmem:[#allocation160_spill] sm:$0xff] %v6167_v43 }
 0x7e4   : > { %v6142_v7 = vpop.permute.xlu1 %1654  ;;  %v6158_v57 = vpop.permute.xlu2 %1674 }
 0x7e5   : > { %10372 = vst [vmem:[#allocation151_spill] sm:$0xff] %v6142_v7 }
 0x7e6   : > { %10379 = vst [vmem:[#allocation158_spill] sm:$0xff] %v6158_v57  ;;  %v5194_v57 = vmov 16  }
 0x7e7   : > { %5130 = vset.pattern.permute.xlu1 %v5194_v57  ;;  %5131 = vset.pattern.permute.xlu2 %v5194_v57 }
 0x7ec   : > { %v6146_v34 = vpop.permute.xlu1 %1660 }
 0x7ed   : > { %10374 = vst [vmem:[#allocation153_spill] sm:$0xff] %v6146_v34 }
 0x7f4   : > { %v6150_v37 = vpop.permute.xlu1 %1666 }
 0x7fc   : > { %v6154_v41 = vpop.permute.xlu1 %1672 }
 0x7fd   : > { %10377 = vst [vmem:[#allocation156_spill] sm:$0xff] %v6154_v41  ;;  %v6169_v41 = vpop.permute.xlu2 %1680 }
 0x7fe   : > { %10382 = vst [vmem:[#allocation161_spill] sm:$0xff] %v6169_v41 }
 0x804   : > { %v6156_v35 = vpop.permute.xlu1 %1678 }
 0x805   : > { %10378 = vst [vmem:[#allocation157_spill] sm:$0xff] %v6156_v35 }
 0x80c   : > { %v1729_v2 = vpop.permute.xlu1 %1728 }
 0x80d   : > { %v1737_v7 = vmul.f32 %v1729_v2, %v5489_v55  ;;  %v1736_v14 = vmul.f32 %v1729_v2, %v5486_v54  ;;  %v1735_v34 = vmul.f32 %v1729_v2, %v5483_v53  ;;  %v1740_v35 = vmul.f32 %v1729_v2, %v5508_v8 }
 0x80e   : > { %v1739_v46 = vmul.f32 %v1729_v2, %v5505_v0  ;;  %v1738_v15 = vmul.f32 %v1729_v2, %v5502_v63  ;;  %v1742_v41 = vmul.f32 %v1729_v2, %v5575_v4  ;;  %v1741_v57 = vmul.f32 %v1729_v2, %v5519_v27 }
 0x80f   : > { %1771 = vrot.lane.b32.xlu2 %v1737_v7, %s5193_s28  ;;  %1769 = vrot.lane.b32.xlu1 %v1736_v14, %s5193_s28  ;;  %v1733_v14 = vpop.permute.xlu2 %1732  ;;  %v6178_v7 = vpop.permute.xlu0 %853 }
 0x810   : > { %1767 = vrot.lane.b32.xlu0 %v1735_v34, %s5193_s28  ;;  %10383 = vst [vmem:[#allocation162_spill] sm:$0xff] %v6178_v7  ;;  %v1743_v34 = vmul.f32 %v1733_v14, %v5483_v53  ;;  %v1744_v7 = vmul.f32 %v1733_v14, %v5486_v54  ;;  %v1749_v2 = vmul.f32 %v1733_v14, %v5519_v27 }
 0x817   : > { %1777 = vrot.lane.b32.xlu2 %v1740_v35, %s5193_s28  ;;  %1775 = vrot.lane.b32.xlu1 %v1739_v46, %s5193_s28  ;;  %v1746_v35 = vmul.f32 %v1733_v14, %v5502_v63  ;;  %v1745_v46 = vmul.f32 %v1733_v14, %v5489_v55 }
 0x818   : > { %1773 = vrot.lane.b32.xlu0 %v1738_v15, %s5193_s28  ;;  %v6188_v15 = vpop.permute.xlu0 %859 }
 0x81f   : > { %1783 = vrot.lane.b32.xlu2 %v1743_v34, %s5193_s28  ;;  %1781 = vrot.lane.b32.xlu1 %v1742_v41, %s5193_s28  ;;  %v1748_v41 = vmul.f32 %v1733_v14, %v5508_v8 }
 0x820   : > { %1779 = vrot.lane.b32.xlu0 %v1741_v57, %s5193_s28  ;;  %v6196_v34 = vpop.permute.xlu0 %865  ;;  %v1747_v57 = vmul.f32 %v1733_v14, %v5505_v0 }
 0x821   : > { %10384 = vst [vmem:[#allocation163_spill] sm:$0xff] %v6196_v34 }
 0x827   : > { %1789 = vrot.lane.b32.xlu2 %v1746_v35, %s5193_s28  ;;  %1787 = vrot.lane.b32.xlu1 %v1745_v46, %s5193_s28  ;;  %v1750_v35 = vmul.f32 %v1733_v14, %v5575_v4 }
 0x828   : > { %1785 = vrot.lane.b32.xlu0 %v1744_v7, %s5193_s28  ;;  %v6205_v7 = vpop.permute.xlu0 %871 }
 0x829   : > { %10385 = vst [vmem:[#allocation164_spill] sm:$0xff] %v6205_v7 }
 0x82f   : > { %1795 = vrot.lane.b32.xlu2 %v1749_v2, %s5193_s28  ;;  %1793 = vrot.lane.b32.xlu1 %v1748_v41, %s5193_s28 }
 0x830   : > { %1791 = vrot.lane.b32.xlu0 %v1747_v57, %s5193_s28  ;;  %v6208_v46 = vpop.permute.xlu0 %877 }
 0x831   : > { %10386 = vst [vmem:[#allocation165_spill] sm:$0xff] %v6208_v46 }
 0x837   : > { %1843 = vperm.xlu1 %5130, %v5908_v51   ;;  %1847 = vperm.xlu2 %5131, %v5914_v50  }
 0x838   : > { %1797 = vrot.lane.b32.xlu0 %v1750_v35, %s5193_s28  ;;  %v6210_v34 = vpop.permute.xlu0 %962 }
 0x839   : > { %10387 = vst [vmem:[#allocation166_spill] sm:$0xff] %v6210_v34 }
 0x840   : > { %v6212_v43 = vpop.permute.xlu0 %968 }
 0x841   : > { %10388 = vst [vmem:[#allocation167_spill] sm:$0xff] %v6212_v43 }
 0x848   : > { %v6220_v14 = vpop.permute.xlu0 %974 }
 0x850   : > { %v6226_v7 = vpop.permute.xlu0 %980 }
 0x851   : > { %10393 = vst [vmem:[#allocation172_spill] sm:$0xff] %v6226_v7 }
 0x858   : > { %v6232_v34 = vpop.permute.xlu0 %986 }
 0x859   : > { %10396 = vst [vmem:[#allocation175_spill] sm:$0xff] %v6232_v34 }
 0x869   : > { %v6216_v41 = vpop.permute.xlu2 %1771 }
 0x86a   : > { %10390 = vst [vmem:[#allocation169_spill] sm:$0xff] %v6216_v41  ;;  %v6238_v41 = vpop.permute.xlu0 %992 }
 0x86b   : > { %10399 = vst [vmem:[#allocation178_spill] sm:$0xff] %v6238_v41 }
 0x871   : > { %v6222_v42 = vpop.permute.xlu2 %1777 }
 0x872   : > { %10392 = vst [vmem:[#allocation171_spill] sm:$0xff] %v6222_v42 }
 0x879   : > { %v6228_v35 = vpop.permute.xlu2 %1783 }
 0x87a   : > { %10394 = vst [vmem:[#allocation173_spill] sm:$0xff] %v6228_v35  ;;  %v5196_v35 = vmov 17  }
 0x87b   : > { %5132 = vset.pattern.permute.xlu1 %v5196_v35  ;;  %5133 = vset.pattern.permute.xlu2 %v5196_v35 }
 0x881   : > { %v6214_v2 = vpop.permute.xlu1 %1769 }
 0x882   : > { %10389 = vst [vmem:[#allocation168_spill] sm:$0xff] %v6214_v2  ;;  %v6236_v2 = vpop.permute.xlu2 %1789 }
 0x883   : > { %10398 = vst [vmem:[#allocation177_spill] sm:$0xff] %v6236_v2  ;;  %v6248_v2 = vpop.permute.xlu0 %1077 }
 0x884   : > { %10401 = vst [vmem:[#allocation180_spill] sm:$0xff] %v6248_v2 }
 0x889   : > { %v6218_v57 = vpop.permute.xlu1 %1775 }
 0x88a   : > { %10391 = vst [vmem:[#allocation170_spill] sm:$0xff] %v6218_v57 }
 0x891   : > { %v6224_v26 = vpop.permute.xlu1 %1781 }
 0x899   : > { %v6230_v46 = vpop.permute.xlu1 %1787 }
 0x89a   : > { %10395 = vst [vmem:[#allocation174_spill] sm:$0xff] %v6230_v46  ;;  %v6245_v46 = vpop.permute.xlu2 %1795 }
 0x89b   : > { %10400 = vst [vmem:[#allocation179_spill] sm:$0xff] %v6245_v46 }
 0x8a1   : > { %v6234_v43 = vpop.permute.xlu1 %1793 }
 0x8a2   : > { %10397 = vst [vmem:[#allocation176_spill] sm:$0xff] %v6234_v43 }
 0x8a9   : > { %v1844_v57 = vpop.permute.xlu1 %1843 }
 0x8aa   : > { %v1852_v61 = vmul.f32 %v1844_v57, %v5489_v55  ;;  %v1851_v31 = vmul.f32 %v1844_v57, %v5486_v54  ;;  %v1850_v29 = vmul.f32 %v1844_v57, %v5483_v53  ;;  %v1855_v34 = vmul.f32 %v1844_v57, %v5508_v8 }
 0x8ab   : > { %v1854_v7 = vmul.f32 %v1844_v57, %v5505_v0  ;;  %v1853_v43 = vmul.f32 %v1844_v57, %v5502_v63  ;;  %v1857_v35 = vmul.f32 %v1844_v57, %v5575_v4  ;;  %v1856_v2 = vmul.f32 %v1844_v57, %v5519_v27 }
 0x8ac   : > { %1886 = vrot.lane.b32.xlu2 %v1852_v61, %s5195_s29  ;;  %1884 = vrot.lane.b32.xlu1 %v1851_v31, %s5195_s29  ;;  %v1848_v31 = vpop.permute.xlu2 %1847  ;;  %v6257_v61 = vpop.permute.xlu0 %1083 }
 0x8ad   : > { %1882 = vrot.lane.b32.xlu0 %v1850_v29, %s5195_s29  ;;  %v1858_v29 = vmul.f32 %v1848_v31, %v5483_v53  ;;  %10402 = vst [vmem:[#allocation181_spill] sm:$0xff] %v6257_v61  ;;  %v1864_v57 = vmul.f32 %v1848_v31, %v5519_v27 }
 0x8b4   : > { %1892 = vrot.lane.b32.xlu2 %v1855_v34, %s5195_s29  ;;  %1890 = vrot.lane.b32.xlu1 %v1854_v7, %s5195_s29  ;;  %v1861_v34 = vmul.f32 %v1848_v31, %v5502_v63  ;;  %v1860_v7 = vmul.f32 %v1848_v31, %v5489_v55  ;;  %v6267_v46 = vpop.permute.xlu0 %1089 }
 0x8b5   : > { %1888 = vrot.lane.b32.xlu0 %v1853_v43, %s5195_s29  ;;  %v1859_v43 = vmul.f32 %v1848_v31, %v5486_v54 }
 0x8bc   : > { %1898 = vrot.lane.b32.xlu2 %v1858_v29, %s5195_s29  ;;  %1896 = vrot.lane.b32.xlu1 %v1857_v35, %s5195_s29  ;;  %v1863_v29 = vmul.f32 %v1848_v31, %v5508_v8  ;;  %v6278_v35 = vpop.permute.xlu0 %1095 }
 0x8bd   : > { %1894 = vrot.lane.b32.xlu0 %v1856_v2, %s5195_s29  ;;  %v1862_v2 = vmul.f32 %v1848_v31, %v5505_v0  ;;  %10403 = vst [vmem:[#allocation182_spill] sm:$0xff] %v6278_v35 }
 0x8c4   : > { %1904 = vrot.lane.b32.xlu2 %v1861_v34, %s5195_s29  ;;  %1902 = vrot.lane.b32.xlu1 %v1860_v7, %s5195_s29  ;;  %v1865_v34 = vmul.f32 %v1848_v31, %v5575_v4  ;;  %v6284_v7 = vpop.permute.xlu0 %1101 }
 0x8c5   : > { %1900 = vrot.lane.b32.xlu0 %v1859_v43, %s5195_s29  ;;  %10404 = vst [vmem:[#allocation183_spill] sm:$0xff] %v6284_v7 }
 0x8cc   : > { %1910 = vrot.lane.b32.xlu2 %v1864_v57, %s5195_s29  ;;  %1908 = vrot.lane.b32.xlu1 %v1863_v29, %s5195_s29  ;;  %v6286_v43 = vpop.permute.xlu0 %1107 }
 0x8cd   : > { %1906 = vrot.lane.b32.xlu0 %v1862_v2, %s5195_s29  ;;  %10405 = vst [vmem:[#allocation184_spill] sm:$0xff] %v6286_v43 }
 0x8d4   : > { %1958 = vperm.xlu1 %5132, %v5908_v51   ;;  %1962 = vperm.xlu2 %5133, %v5914_v50   ;;  %v6288_v61 = vpop.permute.xlu0 %1192 }
 0x8d5   : > { %1912 = vrot.lane.b32.xlu0 %v1865_v34, %s5195_s29  ;;  %10406 = vst [vmem:[#allocation185_spill] sm:$0xff] %v6288_v61 }
 0x8dc   : > { %v6290_v57 = vpop.permute.xlu0 %1198 }
 0x8dd   : > { %10407 = vst [vmem:[#allocation186_spill] sm:$0xff] %v6290_v57 }
 0x8e4   : > { %v6292_v29 = vpop.permute.xlu0 %1204 }
 0x8ec   : > { %v6294_v2 = vpop.permute.xlu0 %1210 }
 0x8ed   : > { %10408 = vst [vmem:[#allocation187_spill] sm:$0xff] %v6294_v2 }
 0x8f4   : > { %v6296_v35 = vpop.permute.xlu0 %1216 }
 0x8f5   : > { %10409 = vst [vmem:[#allocation188_spill] sm:$0xff] %v6296_v35 }
 0x8fc   : > { %v6298_v31 = vpop.permute.xlu0 %1222 }
 0x8fd   : > { %10410 = vst [vmem:[#allocation189_spill] sm:$0xff] %v6298_v31 }
 0x904   : > { %v6304_v34 = vpop.permute.xlu0 %1307 }
 0x905   : > { %10413 = vst [vmem:[#allocation192_spill] sm:$0xff] %v6304_v34 }
 0x906   : > { %v6302_v58 = vpop.permute.xlu2 %1886 }
 0x907   : > { %10412 = vst [vmem:[#allocation191_spill] sm:$0xff] %v6302_v58 }
 0x90c   : > { %v6310_v61 = vpop.permute.xlu0 %1313 }
 0x90d   : > { %10416 = vst [vmem:[#allocation195_spill] sm:$0xff] %v6310_v61 }
 0x90e   : > { %v6308_v43 = vpop.permute.xlu2 %1892 }
 0x90f   : > { %10415 = vst [vmem:[#allocation194_spill] sm:$0xff] %v6308_v43 }
 0x914   : > { %v6318_v35 = vpop.permute.xlu0 %1319 }
 0x916   : > { %v6314_v22 = vpop.permute.xlu2 %1898 }
 0x917   : > { %10418 = vst [vmem:[#allocation197_spill] sm:$0xff] %v6314_v22  ;;  %v5198_v22 = vmov 18  }
 0x918   : > { %5134 = vset.pattern.permute.xlu1 %v5198_v22  ;;  %5135 = vset.pattern.permute.xlu2 %v5198_v22 }
 0x91c   : > { %v6324_v58 = vpop.permute.xlu0 %1325 }
 0x91d   : > { %10422 = vst [vmem:[#allocation201_spill] sm:$0xff] %v6324_v58 }
 0x91e   : > { %v6300_v41 = vpop.permute.xlu1 %1884 }
 0x91f   : > { %10411 = vst [vmem:[#allocation190_spill] sm:$0xff] %v6300_v41  ;;  %v6322_v41 = vpop.permute.xlu2 %1904 }
 0x920   : > { %10421 = vst [vmem:[#allocation200_spill] sm:$0xff] %v6322_v41 }
 0x924   : > { %v6334_v41 = vpop.permute.xlu0 %1331 }
 0x925   : > { %10424 = vst [vmem:[#allocation203_spill] sm:$0xff] %v6334_v41 }
 0x926   : > { %v6306_v7 = vpop.permute.xlu1 %1890 }
 0x927   : > { %10414 = vst [vmem:[#allocation193_spill] sm:$0xff] %v6306_v7 }
 0x92e   : > { %v6312_v57 = vpop.permute.xlu1 %1896 }
 0x92f   : > { %10417 = vst [vmem:[#allocation196_spill] sm:$0xff] %v6312_v57 }
 0x936   : > { %v6316_v2 = vpop.permute.xlu1 %1902 }
 0x937   : > { %10419 = vst [vmem:[#allocation198_spill] sm:$0xff] %v6316_v2  ;;  %v6331_v2 = vpop.permute.xlu2 %1910 }
 0x938   : > { %10423 = vst [vmem:[#allocation202_spill] sm:$0xff] %v6331_v2 }
 0x93e   : > { %v6320_v31 = vpop.permute.xlu1 %1908 }
 0x93f   : > { %10420 = vst [vmem:[#allocation199_spill] sm:$0xff] %v6320_v31 }
 0x946   : > { %v1959_v34 = vpop.permute.xlu1 %1958 }
 0x947   : > { %v1967_v7 = vmul.f32 %v1959_v34, %v5489_v55  ;;  %v1966_v20 = vmul.f32 %v1959_v34, %v5486_v54  ;;  %v1965_v61 = vmul.f32 %v1959_v34, %v5483_v53  ;;  %v1970_v58 = vmul.f32 %v1959_v34, %v5508_v8 }
 0x948   : > { %v1969_v31 = vmul.f32 %v1959_v34, %v5505_v0  ;;  %v1968_v9 = vmul.f32 %v1959_v34, %v5502_v63  ;;  %v1972_v22 = vmul.f32 %v1959_v34, %v5575_v4  ;;  %v1971_v41 = vmul.f32 %v1959_v34, %v5519_v27 }
 0x949   : > { %2001 = vrot.lane.b32.xlu2 %v1967_v7, %s5197_s30  ;;  %1999 = vrot.lane.b32.xlu1 %v1966_v20, %s5197_s30  ;;  %v1963_v20 = vpop.permute.xlu2 %1962  ;;  %v6343_v7 = vpop.permute.xlu0 %1337 }
 0x94a   : > { %1997 = vrot.lane.b32.xlu0 %v1965_v61, %s5197_s30  ;;  %v1973_v61 = vmul.f32 %v1963_v20, %v5483_v53  ;;  %10425 = vst [vmem:[#allocation204_spill] sm:$0xff] %v6343_v7  ;;  %v1974_v2 = vmul.f32 %v1963_v20, %v5486_v54  ;;  %v1979_v34 = vmul.f32 %v1963_v20, %v5519_v27 }
 0x951   : > { %2007 = vrot.lane.b32.xlu2 %v1970_v58, %s5197_s30  ;;  %2005 = vrot.lane.b32.xlu1 %v1969_v31, %s5197_s30  ;;  %v1976_v58 = vmul.f32 %v1963_v20, %v5502_v63  ;;  %v1975_v31 = vmul.f32 %v1963_v20, %v5489_v55 }
 0x952   : > { %2003 = vrot.lane.b32.xlu0 %v1968_v9, %s5197_s30  ;;  %v6352_v9 = vpop.permute.xlu0 %1422 }
 0x953   : > { %10426 = vst [vmem:[#allocation205_spill] sm:$0xff] %v6352_v9 }
 0x959   : > { %2013 = vrot.lane.b32.xlu2 %v1973_v61, %s5197_s30  ;;  %2011 = vrot.lane.b32.xlu1 %v1972_v22, %s5197_s30  ;;  %v1978_v61 = vmul.f32 %v1963_v20, %v5508_v8 }
 0x95a   : > { %2009 = vrot.lane.b32.xlu0 %v1971_v41, %s5197_s30  ;;  %v6360_v22 = vpop.permute.xlu0 %1428  ;;  %v1977_v41 = vmul.f32 %v1963_v20, %v5505_v0 }
 0x95b   : > { %10427 = vst [vmem:[#allocation206_spill] sm:$0xff] %v6360_v22 }
 0x961   : > { %2019 = vrot.lane.b32.xlu2 %v1976_v58, %s5197_s30  ;;  %2017 = vrot.lane.b32.xlu1 %v1975_v31, %s5197_s30  ;;  %v1980_v58 = vmul.f32 %v1963_v20, %v5575_v4 }
 0x962   : > { %2015 = vrot.lane.b32.xlu0 %v1974_v2, %s5197_s30  ;;  %v6369_v2 = vpop.permute.xlu0 %1434 }
 0x969   : > { %2025 = vrot.lane.b32.xlu2 %v1979_v34, %s5197_s30  ;;  %2023 = vrot.lane.b32.xlu1 %v1978_v61, %s5197_s30 }
 0x96a   : > { %2021 = vrot.lane.b32.xlu0 %v1977_v41, %s5197_s30  ;;  %v6372_v31 = vpop.permute.xlu0 %1440 }
 0x96b   : > { %10428 = vst [vmem:[#allocation207_spill] sm:$0xff] %v6372_v31 }
 0x971   : > { %2073 = vperm.xlu1 %5134, %v5908_v51   ;;  %2077 = vperm.xlu2 %5135, %v5914_v50  }
 0x972   : > { %2027 = vrot.lane.b32.xlu0 %v1980_v58, %s5197_s30  ;;  %v6374_v22 = vpop.permute.xlu0 %1446 }
 0x973   : > { %10429 = vst [vmem:[#allocation208_spill] sm:$0xff] %v6374_v22 }
 0x97a   : > { %v6376_v9 = vpop.permute.xlu0 %1452 }
 0x97b   : > { %10430 = vst [vmem:[#allocation209_spill] sm:$0xff] %v6376_v9 }
 0x982   : > { %v6378_v34 = vpop.permute.xlu0 %1537 }
 0x983   : > { %10431 = vst [vmem:[#allocation210_spill] sm:$0xff] %v6378_v34 }
 0x98a   : > { %v6380_v61 = vpop.permute.xlu0 %1543 }
 0x98b   : > { %10432 = vst [vmem:[#allocation211_spill] sm:$0xff] %v6380_v61 }
 0x992   : > { %v6382_v41 = vpop.permute.xlu0 %1549 }
 0x99a   : > { %v6384_v20 = vpop.permute.xlu0 %1555 }
 0x99b   : > { %10433 = vst [vmem:[#allocation212_spill] sm:$0xff] %v6384_v20 }
 0x9a2   : > { %v6390_v33 = vpop.permute.xlu0 %1561 }
 0x9a3   : > { %v6388_v13 = vpop.permute.xlu2 %2001  ;;  %10436 = vst [vmem:[#allocation215_spill] sm:$0xff] %v6390_v33 }
 0x9a4   : > { %10435 = vst [vmem:[#allocation214_spill] sm:$0xff] %v6388_v13 }
 0x9aa   : > { %v6396_v22 = vpop.permute.xlu0 %1567 }
 0x9ab   : > { %v6394_v31 = vpop.permute.xlu2 %2007  ;;  %10439 = vst [vmem:[#allocation218_spill] sm:$0xff] %v6396_v22 }
 0x9ac   : > { %10438 = vst [vmem:[#allocation217_spill] sm:$0xff] %v6394_v31 }
 0x9b2   : > { %v6400_v34 = vpop.permute.xlu0 %1652 }
 0x9b3   : > { %10441 = vst [vmem:[#allocation220_spill] sm:$0xff] %v6400_v34  ;;  %v6402_v61 = vpop.permute.xlu2 %2013 }
 0x9b4   : > { %10442 = vst [vmem:[#allocation221_spill] sm:$0xff] %v6402_v61 }
 0x9bb   : > { %v6386_v7 = vpop.permute.xlu1 %1999  ;;  %v6410_v13 = vpop.permute.xlu2 %2019 }
 0x9bc   : > { %10434 = vst [vmem:[#allocation213_spill] sm:$0xff] %v6386_v7  ;;  %v6408_v7 = vpop.permute.xlu0 %1658 }
 0x9bd   : > { %10445 = vst [vmem:[#allocation224_spill] sm:$0xff] %v6408_v7  ;;  %v5200_v7 = vmov 19  }
 0x9be   : > { %10446 = vst [vmem:[#allocation225_spill] sm:$0xff] %v6410_v13  ;;  %5136 = vset.pattern.permute.xlu1 %v5200_v7  ;;  %5137 = vset.pattern.permute.xlu2 %v5200_v7 }
 0x9c3   : > { %v6392_v58 = vpop.permute.xlu1 %2005 }
 0x9c4   : > { %10437 = vst [vmem:[#allocation216_spill] sm:$0xff] %v6392_v58  ;;  %v6417_v61 = vpop.permute.xlu0 %1664 }
 0x9cb   : > { %v6398_v9 = vpop.permute.xlu1 %2011 }
 0x9cc   : > { %10440 = vst [vmem:[#allocation219_spill] sm:$0xff] %v6398_v9 }
 0x9d3   : > { %v6404_v32 = vpop.permute.xlu1 %2017 }
 0x9d4   : > { %10443 = vst [vmem:[#allocation222_spill] sm:$0xff] %v6404_v32  ;;  %v6419_v32 = vpop.permute.xlu2 %2025 }
 0x9d5   : > { %10447 = vst [vmem:[#allocation226_spill] sm:$0xff] %v6419_v32 }
 0x9db   : > { %v6406_v20 = vpop.permute.xlu1 %2023 }
 0x9dc   : > { %10444 = vst [vmem:[#allocation223_spill] sm:$0xff] %v6406_v20 }
 0x9e3   : > { %v2074_v33 = vpop.permute.xlu1 %2073 }
 0x9e4   : > { %v2082_v58 = vmul.f32 %v2074_v33, %v5489_v55  ;;  %v2081_v31 = vmul.f32 %v2074_v33, %v5486_v54  ;;  %v2080_v22 = vmul.f32 %v2074_v33, %v5483_v53  ;;  %v2085_v13 = vmul.f32 %v2074_v33, %v5508_v8 }
 0x9e5   : > { %v2084_v34 = vmul.f32 %v2074_v33, %v5505_v0  ;;  %v2083_v20 = vmul.f32 %v2074_v33, %v5502_v63  ;;  %v2087_v32 = vmul.f32 %v2074_v33, %v5575_v4  ;;  %v2086_v7 = vmul.f32 %v2074_v33, %v5519_v27 }
 0x9e6   : > { %2116 = vrot.lane.b32.xlu2 %v2082_v58, %s5199_s11  ;;  %2114 = vrot.lane.b32.xlu1 %v2081_v31, %s5199_s11  ;;  %v2078_v31 = vpop.permute.xlu2 %2077  ;;  %v6428_v58 = vpop.permute.xlu0 %1670 }
 0x9e7   : > { %2112 = vrot.lane.b32.xlu0 %v2080_v22, %s5199_s11  ;;  %10448 = vst [vmem:[#allocation227_spill] sm:$0xff] %v6428_v58  ;;  %v2088_v22 = vmul.f32 %v2078_v31, %v5483_v53  ;;  %v2089_v58 = vmul.f32 %v2078_v31, %v5486_v54  ;;  %v2094_v33 = vmul.f32 %v2078_v31, %v5519_v27 }
 0x9ee   : > { %2122 = vrot.lane.b32.xlu2 %v2085_v13, %s5199_s11  ;;  %2120 = vrot.lane.b32.xlu1 %v2084_v34, %s5199_s11  ;;  %v2091_v13 = vmul.f32 %v2078_v31, %v5502_v63  ;;  %v2090_v34 = vmul.f32 %v2078_v31, %v5489_v55 }
 0x9ef   : > { %2118 = vrot.lane.b32.xlu0 %v2083_v20, %s5199_s11  ;;  %v6438_v20 = vpop.permute.xlu0 %1676 }
 0x9f0   : > { %10449 = vst [vmem:[#allocation228_spill] sm:$0xff] %v6438_v20 }
 0x9f6   : > { %2128 = vrot.lane.b32.xlu2 %v2088_v22, %s5199_s11  ;;  %2126 = vrot.lane.b32.xlu1 %v2087_v32, %s5199_s11  ;;  %v2093_v32 = vmul.f32 %v2078_v31, %v5508_v8 }
 0x9f7   : > { %2124 = vrot.lane.b32.xlu0 %v2086_v7, %s5199_s11  ;;  %v6446_v22 = vpop.permute.xlu0 %1682  ;;  %v2092_v7 = vmul.f32 %v2078_v31, %v5505_v0 }
 0x9f8   : > { %10450 = vst [vmem:[#allocation229_spill] sm:$0xff] %v6446_v22 }
 0x9fe   : > { %2134 = vrot.lane.b32.xlu2 %v2091_v13, %s5199_s11  ;;  %2132 = vrot.lane.b32.xlu1 %v2090_v34, %s5199_s11  ;;  %v2095_v13 = vmul.f32 %v2078_v31, %v5575_v4 }
 0x9ff   : > { %2130 = vrot.lane.b32.xlu0 %v2089_v58, %s5199_s11  ;;  %v6452_v20 = vpop.permute.xlu0 %1767 }
 0xa00   : > { %10451 = vst [vmem:[#allocation230_spill] sm:$0xff] %v6452_v20 }
 0xa06   : > { %2140 = vrot.lane.b32.xlu2 %v2094_v33, %s5199_s11  ;;  %2138 = vrot.lane.b32.xlu1 %v2093_v32, %s5199_s11 }
 0xa07   : > { %2136 = vrot.lane.b32.xlu0 %v2092_v7, %s5199_s11  ;;  %v6458_v58 = vpop.permute.xlu0 %1773 }
 0xa08   : > { %10452 = vst [vmem:[#allocation231_spill] sm:$0xff] %v6458_v58 }
 0xa0e   : > { %2188 = vperm.xlu1 %5136, %v5908_v51   ;;  %2192 = vperm.xlu2 %5137, %v5914_v50  }
 0xa0f   : > { %2142 = vrot.lane.b32.xlu0 %v2095_v13, %s5199_s11  ;;  %v6460_v34 = vpop.permute.xlu0 %1779 }
 0xa17   : > { %v6462_v22 = vpop.permute.xlu0 %1785 }
 0xa18   : > { %10453 = vst [vmem:[#allocation232_spill] sm:$0xff] %v6462_v22 }
 0xa1f   : > { %v6464_v33 = vpop.permute.xlu0 %1791 }
 0xa20   : > { %10454 = vst [vmem:[#allocation233_spill] sm:$0xff] %v6464_v33 }
 0xa27   : > { %v6466_v32 = vpop.permute.xlu0 %1797 }
 0xa28   : > { %10455 = vst [vmem:[#allocation234_spill] sm:$0xff] %v6466_v32 }
 0xa2f   : > { %v6468_v7 = vpop.permute.xlu0 %1882 }
 0xa30   : > { %10456 = vst [vmem:[#allocation235_spill] sm:$0xff] %v6468_v7 }
 0xa37   : > { %v6470_v20 = vpop.permute.xlu0 %1888 }
 0xa38   : > { %10457 = vst [vmem:[#allocation236_spill] sm:$0xff] %v6470_v20 }
 0xa3f   : > { %v6474_v51 = vpop.permute.xlu0 %1894 }
 0xa40   : > { %v6476_v50 = vpop.permute.xlu2 %2116 }
 0xa41   : > { %10459 = vst [vmem:[#allocation238_spill] sm:$0xff] %v6476_v50 }
 0xa47   : > { %v6480_v58 = vpop.permute.xlu0 %1900 }
 0xa48   : > { %10461 = vst [vmem:[#allocation240_spill] sm:$0xff] %v6480_v58  ;;  %v6482_v9 = vpop.permute.xlu2 %2122 }
 0xa49   : > { %10462 = vst [vmem:[#allocation241_spill] sm:$0xff] %v6482_v9 }
 0xa4f   : > { %v6486_v33 = vpop.permute.xlu0 %1906 }
 0xa50   : > { %10464 = vst [vmem:[#allocation243_spill] sm:$0xff] %v6486_v33  ;;  %v6488_v32 = vpop.permute.xlu2 %2128 }
 0xa51   : > { %10465 = vst [vmem:[#allocation244_spill] sm:$0xff] %v6488_v32 }
 0xa58   : > { %v6472_v31 = vpop.permute.xlu1 %2114  ;;  %v6496_v57 = vpop.permute.xlu2 %2134 }
 0xa59   : > { %10458 = vst [vmem:[#allocation237_spill] sm:$0xff] %v6472_v31  ;;  %v6494_v31 = vpop.permute.xlu0 %1912 }
 0xa5a   : > { %10468 = vst [vmem:[#allocation247_spill] sm:$0xff] %v6494_v31 }
 0xa5b   : > { %10469 = vst [vmem:[#allocation248_spill] sm:$0xff] %v6496_v57 }
 0xa60   : > { %v6478_v13 = vpop.permute.xlu1 %2120  ;;  %v6505_v33 = vpop.permute.xlu2 %2140 }
 0xa61   : > { %10460 = vst [vmem:[#allocation239_spill] sm:$0xff] %v6478_v13 }
 0xa62   : > { %10471 = vst [vmem:[#allocation250_spill] sm:$0xff] %v6505_v33 }
 0xa68   : > { %v6484_v22 = vpop.permute.xlu1 %2126 }
 0xa69   : > { %10463 = vst [vmem:[#allocation242_spill] sm:$0xff] %v6484_v22  ;;  %v6501_v22 = vpop.permute.xlu0 %1997 }
 0xa6a   : > { %10470 = vst [vmem:[#allocation249_spill] sm:$0xff] %v6501_v22 }
 0xa70   : > { %v6490_v7 = vpop.permute.xlu1 %2132 }
 0xa71   : > { %10466 = vst [vmem:[#allocation245_spill] sm:$0xff] %v6490_v7  ;;  %v6513_v22 = vpop.permute.xlu0 %2003 }
 0xa72   : > { %10472 = vst [vmem:[#allocation251_spill] sm:$0xff] %v6513_v22 }
 0xa78   : > { %v6492_v20 = vpop.permute.xlu1 %2138 }
 0xa79   : > { %10467 = vst [vmem:[#allocation246_spill] sm:$0xff] %v6492_v20 }
 0xa80   : > { %v2189_v50 = vpop.permute.xlu1 %2188 }
 0xa81   : > { %v2197_v13 = vmul.f32 %v2189_v50, %v5489_v55  ;;  %v2196_v58 = vmul.f32 %v2189_v50, %v5486_v54  ;;  %v2195_v9 = vmul.f32 %v2189_v50, %v5483_v53  ;;  %v2200_v57 = vmul.f32 %v2189_v50, %v5508_v8 }
 0xa82   : > { %v2199_v7 = vmul.f32 %v2189_v50, %v5505_v0  ;;  %v2198_v32 = vmul.f32 %v2189_v50, %v5502_v63  ;;  %v2201_v33 = vmul.f32 %v2189_v50, %v5519_v27 }
 0xa83   : > { %2231 = vrot.lane.b32.xlu2 %v2197_v13, %s5201_s12  ;;  %2229 = vrot.lane.b32.xlu1 %v2196_v58, %s5201_s12  ;;  %v2193_v13 = vpop.permute.xlu2 %2192  ;;  %v5202_v58 = vmov 21  }
 0xa84   : > { %2227 = vrot.lane.b32.xlu0 %v2195_v9, %s5201_s12  ;;  %v2203_v20 = vmul.f32 %v2193_v13, %v5483_v53  ;;  %v2202_v9 = vmul.f32 %v2189_v50, %v5575_v4  ;;  %v2204_v22 = vmul.f32 %v2193_v13, %v5486_v54  ;;  %v2207_v50 = vmul.f32 %v2193_v13, %v5505_v0 }
 0xa85   : > { %5140 = vset.pattern.permute.xlu0 %v5202_v58 }
 0xa8b   : > { %2237 = vrot.lane.b32.xlu2 %v2200_v57, %s5201_s12  ;;  %2235 = vrot.lane.b32.xlu1 %v2199_v7, %s5201_s12  ;;  %v6522_v57 = vpop.permute.xlu0 %2009  ;;  %v2206_v7 = vmul.f32 %v2193_v13, %v5502_v63 }
 0xa8c   : > { %2233 = vrot.lane.b32.xlu0 %v2198_v32, %s5201_s12  ;;  %v2205_v32 = vmul.f32 %v2193_v13, %v5489_v55  ;;  %v2210_v55 = vmul.f32 %v2193_v13, %v5575_v4  ;;  %v5154_v4 = vld [vmem:[%s9953_s1 + $0x8] sm:$0x3] }
 0xa93   : > { %2243 = vrot.lane.b32.xlu2 %v2203_v20, %s5201_s12  ;;  %2241 = vrot.lane.b32.xlu1 %v2202_v9, %s5201_s12  ;;  %v6530_v53 = vpop.permute.xlu0 %2015  ;;  %v2209_v20 = vmul.f32 %v2193_v13, %v5519_v27 }
 0xa94   : > { %2239 = vrot.lane.b32.xlu0 %v2201_v33, %s5201_s12  ;;  %10473 = vst [vmem:[#allocation252_spill] sm:$0xff] %v6530_v53  ;;  %v2208_v33 = vmul.f32 %v2193_v13, %v5508_v8  ;;  %v5153_v8 = vld [vmem:[%s9953_s1] sm:$0xff] }
 0xa95   : > { %v2302_v53 = vld [vmem:[#allocation4 + $0x1] sm:$0x7f] }
 0xa9b   : > { %2249 = vrot.lane.b32.xlu2 %v2206_v7, %s5201_s12  ;;  %2247 = vrot.lane.b32.xlu1 %v2205_v32, %s5201_s12  ;;  %v6538_v54 = vpop.permute.xlu0 %2021 }
 0xa9c   : > { %2245 = vrot.lane.b32.xlu0 %v2204_v22, %s5201_s12  ;;  %10474 = vst [vmem:[#allocation253_spill] sm:$0xff] %v6538_v54  ;;  %v5203_v22 = vmov 20  }
 0xa9d   : > { %5138 = vset.pattern.permute.xlu1 %v5203_v22  ;;  %5139 = vset.pattern.permute.xlu2 %v5203_v22 }
 0xaa3   : > { %2255 = vrot.lane.b32.xlu2 %v2209_v20, %s5201_s12  ;;  %2253 = vrot.lane.b32.xlu1 %v2208_v33, %s5201_s12  ;;  %v6542_v63 = vpop.permute.xlu0 %2027 }
 0xaa4   : > { %2251 = vrot.lane.b32.xlu0 %v2207_v50, %s5201_s12  ;;  %10475 = vst [vmem:[#allocation254_spill] sm:$0xff] %v6542_v63 }
 0xaab   : > { %v6547_v0 = vpop.permute.xlu0 %2112  ;;  %2304 = vperm.xlu1 %5138, %v5153_v8   ;;  %2308 = vperm.xlu2 %5139, %v5154_v4  }
 0xaac   : > { %2257 = vrot.lane.b32.xlu0 %v2210_v55, %s5201_s12  ;;  %10476 = vst [vmem:[#allocation255_spill] sm:$0xff] %v6547_v0  ;;  %v5204_v55 = vmov 22   ;;  %v6582_v0 = vperm.slane %v2302_v53, 0  ;;  %s4999_s12 = scalar_lea.vmem %s9962_s10, %s5161_s24  ;;  %s54_s24 = sadd.s32 1, %s5161_s24  }
 0xaad   : > { %p51_p0 = scmp.ge.s32.totalorder %s54_s24, 8  }
 0xaae   : > { %10491 = vst [vmem:[#allocation270_spill] sm:$0xff] %v6582_v0 }
 0xab3   : > { %v6549_v27 = vpop.permute.xlu0 %2118  ;;  %5141 = vset.pattern.permute.xlu1 %v5202_v58 }
 0xab4   : > { %2355 = vperm.xlu0 %5140, %v5153_v8   ;;  %10477 = vst [vmem:[#allocation256_spill] sm:$0xff] %v6549_v27  ;;  %2359 = vperm.xlu1 %5141, %v5154_v4  }
 0xabb   : > { %v6554_v13 = vpop.permute.xlu0 %2124 }
 0xabc   : > { %5142 = vset.pattern.permute.xlu0 %v5204_v55  ;;  %5143 = vset.pattern.permute.xlu1 %v5204_v55 }
 0xac3   : > { %v6556_v9 = vpop.permute.xlu0 %2130 }
 0xac4   : > { %10478 = vst [vmem:[#allocation257_spill] sm:$0xff] %v6556_v9 }
 0xacb   : > { %v6558_v7 = vpop.permute.xlu0 %2136 }
 0xacc   : > { %10479 = vst [vmem:[#allocation258_spill] sm:$0xff] %v6558_v7  ;;  %v5205_v7 = vmov 23  }
 0xacd   : > { %5144 = vset.pattern.permute.xlu2 %v5205_v7 }
 0xad3   : > { %v6560_v32 = vpop.permute.xlu0 %2142 }
 0xad4   : > { %10480 = vst [vmem:[#allocation259_spill] sm:$0xff] %v6560_v32  ;;  %v6594_v32 = vperm.slane %v2302_v53, 2 }
 0xad6   : > { %10494 = vst [vmem:[#allocation273_spill] sm:$0xff] %v6594_v32 }
 0xaf5   : > { %v6570_v27 = vpop.permute.xlu1 %2229 }
 0xaf6   : > { %v6562_v20 = vpop.permute.xlu0 %2227  ;;  %10485 = vst [vmem:[#allocation264_spill] sm:$0xff] %v6570_v27 }
 0xaf7   : > { %10481 = vst [vmem:[#allocation260_spill] sm:$0xff] %v6562_v20  ;;  %v6578_v20 = vperm.slane %v2302_v53, 3 }
 0xaf9   : > { %10489 = vst [vmem:[#allocation268_spill] sm:$0xff] %v6578_v20 }
 0xafd   : > { %v6574_v54 = vpop.permute.xlu1 %2235 }
 0xafe   : > { %v6564_v33 = vpop.permute.xlu0 %2233  ;;  %10487 = vst [vmem:[#allocation266_spill] sm:$0xff] %v6574_v54 }
 0xaff   : > { %10482 = vst [vmem:[#allocation261_spill] sm:$0xff] %v6564_v33  ;;  %v6580_v33 = vperm.slane %v2302_v53, 1 }
 0xb01   : > { %10490 = vst [vmem:[#allocation269_spill] sm:$0xff] %v6580_v33 }
 0xb05   : > { %v6584_v55 = vpop.permute.xlu1 %2241 }
 0xb06   : > { %v6566_v50 = vpop.permute.xlu0 %2239  ;;  %10492 = vst [vmem:[#allocation271_spill] sm:$0xff] %v6584_v55  ;;  %v5206_v55 = vmov 24  }
 0xb07   : > { %10483 = vst [vmem:[#allocation262_spill] sm:$0xff] %v6566_v50  ;;  %v5207_v50 = vmov 0  }
 0xb0d   : > { %v6596_v63 = vpop.permute.xlu1 %2247 }
 0xb0e   : > { %v6568_v22 = vpop.permute.xlu0 %2245  ;;  %10495 = vst [vmem:[#allocation274_spill] sm:$0xff] %v6596_v63 }
 0xb0f   : > { %10484 = vst [vmem:[#allocation263_spill] sm:$0xff] %v6568_v22 }
 0xb16   : > { %v6572_v58 = vpop.permute.xlu0 %2251 }
 0xb17   : > { %10486 = vst [vmem:[#allocation265_spill] sm:$0xff] %v6572_v58 }
 0xb1e   : > { %v6576_v9 = vpop.permute.xlu0 %2257 }
 0xb1f   : > { %10488 = vst [vmem:[#allocation267_spill] sm:$0xff] %v6576_v9  ;;  %v6592_v9 = vperm.slane %v2302_v53, 4 }
 0xb21   : > { %10493 = vst [vmem:[#allocation272_spill] sm:$0xff] %v6592_v9 }
 0xb26   : > { %v2356_v22 = vpop.permute.xlu0 %2355 }
 0xb27   : > { %v2365_v27 = vmul.f32 %v2356_v22, %v6578_v20  ;;  %v2363_v58 = vmul.f32 %v2356_v22, %v6580_v33  ;;  %v2362_v54 = vmul.f32 %v2356_v22, %v6582_v0  ;;  %v2366_v31 = vmul.f32 %v2356_v22, %v6592_v9 }
 0xb28   : > { %v2364_v20 = vmul.f32 %v2356_v22, %v6594_v32 }
 0xb29   : > { %2396 = vrot.lane.b32.xlu0 %v2365_v27, %s5167_s13  ;;  %2392 = vrot.lane.b32.xlu1 %v2363_v58, %s5167_s13  ;;  %v6602_v27 = vperm.slane %v2302_v53, 5 }
 0xb2a   : > { %2390 = vrot.lane.b32.xlu2 %v2362_v54, %s5167_s13  ;;  %v6605_v54 = vpop.permute.xlu1 %2253 }
 0xb2b   : > { %10496 = vst [vmem:[#allocation275_spill] sm:$0xff] %v6602_v27  ;;  %v2367_v58 = vmul.f32 %v2356_v22, %v6602_v27 }
 0xb2c   : > { %10497 = vst [vmem:[#allocation276_spill] sm:$0xff] %v6605_v54 }
 0xb31   : > { %2463 = vperm.xlu0 %5142, %v5154_v4   ;;  %2398 = vrot.lane.b32.xlu1 %v2366_v31, %s5167_s13  ;;  %v6610_v31 = vperm.slane %v2302_v53, 6 }
 0xb32   : > { %2394 = vrot.lane.b32.xlu2 %v2364_v20, %s5167_s13  ;;  %v6608_v63 = vpop.permute.xlu1 %2304 }
 0xb33   : > { %10498 = vst [vmem:[#allocation277_spill] sm:$0xff] %v6608_v63  ;;  %v2368_v20 = vmul.f32 %v2356_v22, %v6610_v31 }
 0xb34   : > { %10499 = vst [vmem:[#allocation278_spill] sm:$0xff] %v6610_v31 }
 0xb39   : > { %5147 = vset.pattern.permute.xlu0 %v5206_v55  ;;  %2459 = vperm.xlu1 %5143, %v5153_v8  }
 0xb3a   : > { %2400 = vrot.lane.b32.xlu2 %v2367_v58, %s5167_s13  ;;  %2668 = vperm.xlu0 %5147, %v5153_v8   ;;  %v6614_v54 = vpop.permute.xlu1 %2359 }
 0xb3b   : > { %v2369_v22 = vmul.f32 %v6614_v54, %v6582_v0 }
 0xb41   : > { %5145 = vset.pattern.permute.xlu1 %v5205_v7  ;;  %v2370_v7 = vmul.f32 %v6614_v54, %v6580_v33 }
 0xb42   : > { %5148 = vset.pattern.permute.xlu0 %v5207_v50  ;;  %2563 = vperm.xlu1 %5145, %v5153_v8  }
 0xb43   : > { %72 = vperm.xlu0 %5148, %v5153_v8   ;;  %2567 = vperm.xlu2 %5144, %v5154_v4   ;;  %v6619_v8 = vpop.permute.xlu2 %2231 }
 0xb44   : > { %10500 = vst [vmem:[#allocation279_spill] sm:$0xff] %v6619_v8 }
 0xb4a   : > { %2402 = vrot.lane.b32.xlu1 %v2368_v20, %s5167_s13 }
 0xb4b   : > { %77 = vperm.xlu0 %5148, %v5154_v4   ;;  %5146 = vset.pattern.permute.xlu2 %v5206_v55  ;;  %v6621_v53 = vpop.permute.xlu2 %2237  ;;  %v2371_v55 = vmul.f32 %v6614_v54, %v6594_v32 }
 0xb4c   : > { %2672 = vperm.xlu2 %5146, %v5154_v4   ;;  %5150 = vset.pattern.permute.xlu1 %v5207_v50  ;;  %10501 = vst [vmem:[#allocation280_spill] sm:$0xff] %v6621_v53 }
 0xb52   : > { %2406 = vrot.lane.b32.xlu1 %v2370_v7, %s5167_s13 }
 0xb53   : > { %v6628_v4 = vpop.permute.xlu2 %2243 }
 0xb54   : > { %5149 = vset.pattern.permute.xlu2 %v5207_v50  ;;  %10502 = vst [vmem:[#allocation281_spill] sm:$0xff] %v6628_v4 }
 0xb55   : > { %2404 = vrot.lane.b32.xlu2 %v2369_v22, %s5167_s13 }
 0xb5b   : > { %v6631_v58 = vpop.permute.xlu2 %2249 }
 0xb5c   : > { %10503 = vst [vmem:[#allocation282_spill] sm:$0xff] %v6631_v58 }
 0xb5d   : > { %2408 = vrot.lane.b32.xlu2 %v2371_v55, %s5167_s13 }
 0xb63   : > { %v6633_v20 = vpop.permute.xlu2 %2255 }
 0xb64   : > { %10504 = vst [vmem:[#allocation283_spill] sm:$0xff] %v6633_v20 }
 0xb6b   : > { %v6635_v50 = vpop.permute.xlu2 %2308 }
 0xb6c   : > { %10505 = vst [vmem:[#allocation284_spill] sm:$0xff] %v6635_v50 }
 0xb84   : > { %v6637_v7 = vpop.permute.xlu2 %2390 }
 0xb85   : > { %10506 = vst [vmem:[#allocation285_spill] sm:$0xff] %v6637_v7 }
 0xb8c   : > { %v6643_v22 = vpop.permute.xlu2 %2394 }
 0xb8d   : > { %10509 = vst [vmem:[#allocation288_spill] sm:$0xff] %v6643_v22 }
 0xb9b   : > { %v6639_v8 = vpop.permute.xlu0 %2396  ;;  %v6641_v63 = vpop.permute.xlu1 %2392 }
 0xb9c   : > { %10507 = vst [vmem:[#allocation286_spill] sm:$0xff] %v6639_v8  ;;  %v6657_v8 = vpop.permute.xlu2 %2400 }
 0xb9d   : > { %10508 = vst [vmem:[#allocation287_spill] sm:$0xff] %v6641_v63 }
 0xb9e   : > { %10511 = vst [vmem:[#allocation290_spill] sm:$0xff] %v6657_v8 }
 0xba3   : > { %v6645_v31 = vpop.permute.xlu0 %2463  ;;  %v6647_v53 = vpop.permute.xlu1 %2398 }
 0xba4   : > { %10510 = vst [vmem:[#allocation289_spill] sm:$0xff] %v6647_v53  ;;  %v2473_v55 = vmul.f32 %v6645_v31, %v6582_v0  ;;  %v2474_v58 = vmul.f32 %v6645_v31, %v6580_v33  ;;  %v2475_v50 = vmul.f32 %v6645_v31, %v6594_v32 }
 0xba6   : > { %2508 = vrot.lane.b32.xlu0 %v2473_v55, %s5168_s14  ;;  %2510 = vrot.lane.b32.xlu1 %v2474_v58, %s5168_s14  ;;  %v6673_v58 = vpop.permute.xlu2 %2567 }
 0xba7   : > { %2512 = vrot.lane.b32.xlu2 %v2475_v50, %s5168_s14  ;;  %10513 = vst [vmem:[#allocation292_spill] sm:$0xff] %v6673_v58  ;;  %v2578_v50 = vmul.f32 %v6673_v58, %v6580_v33  ;;  %v2579_v55 = vmul.f32 %v6673_v58, %v6594_v32  ;;  %v2577_v8 = vmul.f32 %v6673_v58, %v6582_v0 }
 0xbab   : > { %v6660_v22 = vpop.permute.xlu1 %2459 }
 0xbac   : > { %10512 = vst [vmem:[#allocation291_spill] sm:$0xff] %v6660_v22  ;;  %v6662_v53 = vpop.permute.xlu0 %2668  ;;  %v2467_v4 = vmul.f32 %v6660_v22, %v6580_v33  ;;  %v2466_v7 = vmul.f32 %v6660_v22, %v6582_v0  ;;  %v2468_v63 = vmul.f32 %v6660_v22, %v6594_v32 }
 0xbae   : > { %2496 = vrot.lane.b32.xlu1 %v2467_v4, %s5168_s14  ;;  %2494 = vrot.lane.b32.xlu0 %v2466_v7, %s5168_s14  ;;  %v193_v7 = vsel %vm187_vm4, %v5513_v19, %v5433_v28 }
 0xbaf   : > { %2498 = vrot.lane.b32.xlu2 %v2468_v63, %s5168_s14 }
 0xbb4   : > { %v6693_v58 = vpop.permute.xlu1 %2563 }
 0xbb5   : > { %v6681_v20 = vpop.permute.xlu0 %72  ;;  %v2572_v19 = vmul.f32 %v6693_v58, %v6594_v32  ;;  %v6719_v32 = vpop.permute.xlu2 %2672 }
 0xbb6   : > { %10514 = vst [vmem:[#allocation293_spill] sm:$0xff] %v6681_v20  ;;  %2614 = vrot.lane.b32.xlu1 %v2578_v50, %s5169_s15  ;;  %v100_v4 = vmul.f32 %v5338_v24, %v6681_v20  ;;  %v101_v63 = vmul.f32 %v5336_v23, %v6681_v20  ;;  %2612 = vrot.lane.b32.xlu0 %v2577_v8, %s5169_s15  ;;  %v6704_v23 = vld [vmem:[#allocation4 + $0x1] sm:$0xff] }
 0xbb7   : > { %2616 = vrot.lane.b32.xlu2 %v2579_v55, %s5169_s15  ;;  %v298_v24 = vsel %vm292_vm5, %v5452_v38, %v5545_v10  ;;  %v2571_v20 = vmul.f32 %v6693_v58, %v6580_v33 }
 0xbb8   : > { %v219_v22 = vadd.f32 %v193_v7, %v100_v4  ;;  %v220_v50 = vadd.f32 %v5433_v28, %v101_v63  ;;  %v403_v28 = vsel %vm397_vm6, %v5472_v48, %v5474_v49  ;;  %v2570_v4 = vmul.f32 %v6693_v58, %v6582_v0  ;;  %v10589_v0 = vld [vmem:[#allocation62_spill] sm:$0xff] }
 0xbba   : > { %v324_v55 = vadd.f32 %v298_v24, %v219_v22  ;;  %v325_v8 = vadd.f32 %v5545_v10, %v220_v50  ;;  %v524_v24 = vsel %vm10213_vm7, %v5559_v59, %v5580_v17  ;;  %v2677_v10 = vperm.slane %v6704_v23, 1 }
 0xbbc   : > { %v429_v63 = vadd.f32 %v403_v28, %v324_v55  ;;  %v430_v7 = vadd.f32 %v5474_v49, %v325_v8  ;;  %v2678_v55 = vperm.slane %v6704_v23, 2  ;;  %v656_v49 = vsel %vm649_vm8, %v5682_v25, %v5630_v21 }
 0xbbd   : > { %v2676_v8 = vperm.slane %v6704_v23, 0  ;;  %v2698_v21 = vmul.f32 %v2677_v10, %v6719_v32 }
 0xbbe   : > { %2600 = vrot.lane.b32.xlu1 %v2571_v20, %s5169_s15  ;;  %v550_v22 = vadd.f32 %v524_v24, %v429_v63  ;;  %v551_v50 = vadd.f32 %v5580_v17, %v430_v7  ;;  %v655_v20 = vsel %vm649_vm8, %v5632_v30, %v5682_v25  ;;  %2598 = vrot.lane.b32.xlu0 %v2570_v4, %s5169_s15 }
 0xbbf   : > { %2602 = vrot.lane.b32.xlu2 %v2572_v19, %s5169_s15  ;;  %v770_v19 = vsel %vm10212_vm9, %v5698_v47, %v6122_v18  ;;  %v771_v63 = vsel %vm10212_vm9, %v6122_v18, %v5700_v6  ;;  %v2699_v4 = vmul.f32 %v2678_v55, %v6719_v32  ;;  %v885_v24 = vsel %vm879_vm10, %v5752_v52, %v6188_v15 }
 0xbc0   : > { %v683_v17 = vadd.f32 %v655_v20, %v550_v22  ;;  %v684_v28 = vadd.f32 %v656_v49, %v551_v50  ;;  %v886_v22 = vsel %vm879_vm10, %v6188_v15, %v5754_v56  ;;  %v2697_v50 = vmul.f32 %v2676_v8, %v6719_v32 }
 0xbc1   : > { %v1000_v18 = vsel %vm994_vm11, %v5806_v44, %v6220_v14  ;;  %v1001_v20 = vsel %vm994_vm11, %v6220_v14, %v5808_v45  ;;  %v1115_v56 = vsel %vm1109_vm12, %v5860_v62, %v6267_v46  ;;  %v1116_v15 = vsel %vm1109_vm12, %v6267_v46, %v5862_v3 }
 0xbc2   : > { %v798_v7 = vadd.f32 %v770_v19, %v683_v17  ;;  %v799_v25 = vadd.f32 %v771_v63, %v684_v28  ;;  %v1230_v14 = vsel %vm1224_vm13, %v5924_v5, %v6292_v29  ;;  %v1231_v63 = vsel %vm1224_vm13, %v6292_v29, %v5926_v11 }
 0xbc3   : > { %v2692_v3 = vmul.f32 %v2678_v55, %v6662_v53  ;;  %v1345_v46 = vsel %vm1339_vm14, %v5978_v12, %v6318_v35  ;;  %v1460_v11 = vsel %vm1454_vm15, %v6032_v39, %v6369_v2  ;;  %v1461_v29 = vsel %vm1454_vm15, %v6369_v2, %v6034_v40  ;;  %v10618_v39 = vld [vmem:[#allocation70_spill] sm:$0xff] }
 0xbc4   : > { %v913_v49 = vadd.f32 %v885_v24, %v798_v7  ;;  %v914_v6 = vadd.f32 %v886_v22, %v799_v25  ;;  %v1690_v40 = vsel %vm10192_vm2, %v6148_v36, %v6417_v61  ;;  %v1691_v2 = vsel %vm10192_vm2, %v6417_v61, %v6150_v37  ;;  %v10590_v36 = vld [vmem:[#allocation57_spill] sm:$0xff] }
 0xbc5   : > { %v2374_v37 = vmul.f32 %v6614_v54, %v6602_v27  ;;  %v1920_v61 = vsel %vm10193_vm0, %v6308_v43, %v6474_v51  ;;  %vm2144_vm2 = vcmask 236544   ;;  %v2575_v12 = vmul.f32 %v6693_v58, %v6602_v27 }
 0xbc6   : > { %2734 = vrot.lane.b32.xlu1 %v2698_v21, %s5172_s16  ;;  %v1028_v17 = vadd.f32 %v1000_v18, %v913_v49  ;;  %v1029_v28 = vadd.f32 %v1001_v20, %v914_v6  ;;  %2732 = vrot.lane.b32.xlu0 %v2697_v50, %s5172_s16  ;;  %v2691_v21 = vmul.f32 %v2677_v10, %v6662_v53 }
 0xbc7   : > { %2736 = vrot.lane.b32.xlu2 %v2699_v4, %s5172_s16  ;;  %v1346_v4 = vsel %vm1339_vm14, %v6318_v35, %v5980_v1  ;;  %v1575_v1 = vsel %vm1569_vm1, %v6086_v16, %v6382_v41  ;;  %v1576_v35 = vsel %vm1569_vm1, %v6382_v41, %v6088_v60  ;;  %v1805_v20 = vsel %vm10191_vm3, %v6222_v42, %v6460_v34  ;;  %v10587_v42 = vld [vmem:[#allocation291_spill] sm:$0xff] }
 0xbc8   : > { %v1143_v19 = vadd.f32 %v1115_v56, %v1028_v17  ;;  %v1144_v45 = vadd.f32 %v1116_v15, %v1029_v28  ;;  %v1806_v60 = vsel %vm10191_vm3, %v6460_v34, %v6224_v26  ;;  %v2690_v41 = vmul.f32 %v2676_v8, %v6662_v53  ;;  %v10515_v15 = vld [vmem:[#allocation196_spill] sm:$0xff]  ;;  %v10516_v8 = vld [vmem:[#allocation217_spill] sm:$0xff] }
 0xbc9   : > { %v2373_v17 = vmul.f32 %v6614_v54, %v6592_v9  ;;  %vm2029_vm3 = vcmask 244736   ;;  %v2471_v16 = vmul.f32 %v10587_v42, %v6602_v27 }
 0xbca   : > { %v1258_v7 = vadd.f32 %v1230_v14, %v1143_v19  ;;  %v1259_v25 = vadd.f32 %v1231_v63, %v1144_v45  ;;  %v1921_v19 = vsel %vm10193_vm0, %v6474_v51, %v10515_v15  ;;  %v2035_v45 = vsel %vm2029_vm3, %v10516_v8, %v6522_v57  ;;  %v10517_v14 = vld [vmem:[#allocation219_spill] sm:$0xff]  ;;  %v10578_v8 = vld [vmem:[#allocation42_spill] sm:$0xff] }
 0xbcb   : > { %v2036_v63 = vsel %vm2029_vm3, %v6522_v57, %v10517_v14  ;;  %vm2259_vm0 = vcmask 228352  }
 0xbcc   : > { %v1373_v24 = vadd.f32 %v1345_v46, %v1258_v7  ;;  %v1374_v22 = vadd.f32 %v1346_v4, %v1259_v25  ;;  %v10518_v7 = vld [vmem:[#allocation241_spill] sm:$0xff]  ;;  %v6826_v4 = vpop.permute.xlu0 %77 }
 0xbcd   : > { %v2150_v25 = vsel %vm2144_vm2, %v10518_v7, %v6554_v13  ;;  %v10577_v7 = vld [vmem:[#allocation54_spill] sm:$0xff] }
 0xbce   : > { %2720 = vrot.lane.b32.xlu1 %v2691_v21, %s5172_s16  ;;  %v1488_v10 = vadd.f32 %v1460_v11, %v1373_v24  ;;  %v1489_v55 = vadd.f32 %v1461_v29, %v1374_v22  ;;  %2718 = vrot.lane.b32.xlu0 %v2690_v41, %s5172_s16  ;;  %v10520_v11 = vld [vmem:[#allocation262_spill] sm:$0xff]  ;;  %v10521_v29 = vld [vmem:[#allocation280_spill] sm:$0xff] }
 0xbcf   : > { %2722 = vrot.lane.b32.xlu2 %v2692_v3, %s5172_s16  ;;  %v10519_v3 = vld [vmem:[#allocation242_spill] sm:$0xff]  ;;  %v2265_v57 = vsel %vm2259_vm0, %v10521_v29, %v10520_v11 }
 0xbd0   : > { %v1603_v50 = vadd.f32 %v1575_v1, %v1488_v10  ;;  %v1604_v49 = vadd.f32 %v1576_v35, %v1489_v55  ;;  %v2151_v46 = vsel %vm2144_vm2, %v6554_v13, %v10519_v3  ;;  %v10522_v10 = vld [vmem:[#allocation271_spill] sm:$0xff]  ;;  %v10523_v1 = vld [vmem:[#allocation268_spill] sm:$0xff]  ;;  %v10529_v41 = vld [vmem:[#allocation26_spill] sm:$0xff] }
 0xbd1   : > { %v2266_v55 = vsel %vm2259_vm0, %v10520_v11, %v10522_v10  ;;  %v2372_v35 = vmul.f32 %v6614_v54, %v10523_v1  ;;  %v10540_v3 = vld [vmem:[#allocation24_spill] sm:$0xff]  ;;  %v10545_v10 = vld [vmem:[#allocation50_spill] sm:$0xff]  ;;  %v2469_v33 = vmul.f32 %v10587_v42, %v10523_v1 }
 0xbd2   : > { %v1718_v6 = vadd.f32 %v1690_v40, %v1603_v50  ;;  %v1719_v18 = vadd.f32 %v1691_v2, %v1604_v49  ;;  %v2476_v50 = vmul.f32 %v6645_v31, %v10523_v1  ;;  %v10526_v40 = vld [vmem:[#allocation15_spill] sm:$0xff] }
 0xbd3   : > { %v107_v2 = vmul.f32 %v10526_v40, %v6826_v4  ;;  %v10546_v40 = vld [vmem:[#allocation47_spill] sm:$0xff] }
 0xbd4   : > { %v1833_v28 = vadd.f32 %v1805_v20, %v1718_v6  ;;  %v1834_v56 = vadd.f32 %v1806_v60, %v1719_v18  ;;  %v2477_v6 = vmul.f32 %v6645_v31, %v6592_v9  ;;  %v10527_v18 = vld [vmem:[#allocation14_spill] sm:$0xff]  ;;  %v10528_v60 = vld [vmem:[#allocation25_spill] sm:$0xff] }
 0xbd5   : > { %v108_v20 = vmul.f32 %v10527_v18, %v6826_v4 }
 0xbd6   : > { %2412 = vrot.lane.b32.xlu1 %v2373_v17, %s5167_s13  ;;  %v1948_v26 = vadd.f32 %v1920_v61, %v1833_v28  ;;  %v1949_v34 = vadd.f32 %v1921_v19, %v1834_v56  ;;  %2410 = vrot.lane.b32.xlu0 %v2372_v35, %s5167_s13  ;;  %v199_v17 = vsel %vm187_vm4, %v10529_v41, %v10528_v60  ;;  %v10530_v56 = vld [vmem:[#allocation19_spill] sm:$0xff]  ;;  %v10532_v19 = vld [vmem:[#allocation20_spill] sm:$0xff] }
 0xbd7   : > { %2414 = vrot.lane.b32.xlu2 %v2374_v37, %s5167_s13  ;;  %v226_v28 = vadd.f32 %v199_v17, %v107_v2  ;;  %v10531_v37 = vld [vmem:[#allocation18_spill] sm:$0xff]  ;;  %v227_v15 = vadd.f32 %v10528_v60, %v108_v20  ;;  %v2478_v35 = vmul.f32 %v6645_v31, %v6602_v27  ;;  %v10549_v20 = vld [vmem:[#allocation28_spill] sm:$0xff]  ;;  %v10550_v60 = vld [vmem:[#allocation27_spill] sm:$0xff] }
 0xbd8   : > { %v2063_v21 = vadd.f32 %v2035_v45, %v1948_v26  ;;  %v2064_v51 = vadd.f32 %v2036_v63, %v1949_v34  ;;  %v6857_v61 = vsel %vm187_vm4, %v10531_v37, %v10530_v56  ;;  %v10533_v26 = vld [vmem:[#allocation21_spill] sm:$0xff]  ;;  %v10535_v45 = vld [vmem:[#allocation43_spill] sm:$0xff]  ;;  %v6913_v17 = vsel %vm292_vm5, %v10550_v60, %v10549_v20 }
 0xbd9   : > { %v6863_v34 = vsel %vm187_vm4, %v10533_v26, %v10532_v19  ;;  %v6868_v14 = vsel %vm187_vm4, %v10530_v56, %v10535_v45  ;;  %v6873_v63 = vsel %vm187_vm4, %v10535_v45, %v10533_v26  ;;  %v10551_v56 = vld [vmem:[#allocation29_spill] sm:$0xff]  ;;  %v10552_v26 = vld [vmem:[#allocation6_spill] sm:$0xff]  ;;  %v10553_v45 = vld [vmem:[#allocation48_spill] sm:$0xff] }
 0xbda   : > { %v2178_v24 = vadd.f32 %v2150_v25, %v2063_v21  ;;  %v2179_v22 = vadd.f32 %v2151_v46, %v2064_v51  ;;  %10534 = vst [vmem:[#allocation242_spill] sm:$0xff] %v6863_v34  ;;  %v10537_v21 = vld [vmem:[#allocation45_spill] sm:$0xff]  ;;  %v10539_v25 = vld [vmem:[#allocation23_spill] sm:$0xff]  ;;  %v6918_v37 = vsel %vm292_vm5, %v10549_v20, %v10551_v56 }
 0xbdb   : > { %10536 = vst [vmem:[#allocation262_spill] sm:$0xff] %v6873_v63  ;;  %v6878_v51 = vsel %vm187_vm4, %v10532_v19, %v10537_v21  ;;  %v6883_v46 = vsel %vm187_vm4, %v10540_v3, %v10539_v25  ;;  %v6903_v2 = vsel %vm187_vm4, %v10539_v25, %v10546_v40  ;;  %v10564_v20 = vld [vmem:[#allocation35_spill] sm:$0xff] }
 0xbdc   : > { %v6838_v13 = vadd.f32 %v2265_v57, %v2178_v24  ;;  %v6840_v49 = vadd.f32 %v2266_v55, %v2179_v22  ;;  %10538 = vst [vmem:[#allocation271_spill] sm:$0xff] %v6878_v51  ;;  %v10542_v24 = vld [vmem:[#allocation46_spill] sm:$0xff]  ;;  %v10566_v60 = vld [vmem:[#allocation55_spill] sm:$0xff]  ;;  %v10634_v51 = vld [vmem:[#allocation80_spill] sm:$0xff] }
 0xbdd   : > { %10541 = vst [vmem:[#allocation15_spill] sm:$0xff] %v6883_v46  ;;  %v10543_v22 = vld [vmem:[#allocation22_spill] sm:$0xff] }
 0xbde   : > { %10524 = vst [vmem:[#allocation196_spill] sm:$0xff] %v6838_v13  ;;  %2514 = vrot.lane.b32.xlu1 %v2476_v50, %s5168_s14  ;;  %v6888_v11 = vsel %vm187_vm4, %v10543_v22, %v10542_v24  ;;  %v10544_v57 = vld [vmem:[#allocation34_spill] sm:$0xff]  ;;  %v6898_v50 = vsel %vm187_vm4, %v10542_v24, %v10540_v3  ;;  %2793 = vperm.xlu0 %5148, %v10552_v26   ;;  %v10559_v3 = vld [vmem:[#allocation31_spill] sm:$0xff]  ;;  %v10560_v22 = vld [vmem:[#allocation5_spill] sm:$0xff] }
 0xbdf   : > { %10525 = vst [vmem:[#allocation219_spill] sm:$0xff] %v6840_v49  ;;  %2516 = vrot.lane.b32.xlu2 %v2477_v6, %s5168_s14  ;;  %v304_v55 = vsel %vm292_vm5, %v10545_v10, %v10544_v57  ;;  %v6908_v6 = vsel %vm187_vm4, %v10546_v40, %v10529_v41  ;;  %v332_v19 = vadd.f32 %v10544_v57, %v227_v15  ;;  %v10558_v15 = vld [vmem:[#allocation32_spill] sm:$0xff]  ;;  %v10561_v57 = vld [vmem:[#allocation49_spill] sm:$0xff]  ;;  %v10574_v49 = vld [vmem:[#allocation38_spill] sm:$0xff] }
 0xbe0   : > { %10547 = vst [vmem:[#allocation14_spill] sm:$0xff] %v6903_v2  ;;  %v331_v18 = vadd.f32 %v304_v55, %v226_v28  ;;  %v6926_v41 = vsel %vm292_vm5, %v10551_v56, %v10553_v45  ;;  %v10555_v28 = vld [vmem:[#allocation30_spill] sm:$0xff]  ;;  %v6941_v24 = vsel %vm292_vm5, %v10559_v3, %v10558_v15  ;;  %v6947_v55 = vsel %vm292_vm5, %v10558_v15, %v10561_v57  ;;  %v10567_v56 = vld [vmem:[#allocation44_spill] sm:$0xff]  ;;  %v10651_v2 = vld [vmem:[#allocation89_spill] sm:$0xff] }
 0xbe1   : > { %10548 = vst [vmem:[#allocation25_spill] sm:$0xff] %v6908_v6  ;;  %v6931_v21 = vsel %vm292_vm5, %v10553_v45, %v10555_v28  ;;  %v6936_v25 = vsel %vm292_vm5, %v10555_v28, %v5452_v38  ;;  %v409_v26 = vsel %vm397_vm6, %v10567_v56, %v10566_v60  ;;  %v6965_v45 = vsel %vm292_vm5, %v10564_v20, %v10545_v10  ;;  %v10569_v28 = vld [vmem:[#allocation37_spill] sm:$0xff]  ;;  %v10570_v15 = vld [vmem:[#allocation36_spill] sm:$0xff] }
 0xbe2   : > { %10554 = vst [vmem:[#allocation26_spill] sm:$0xff] %v6926_v41  ;;  %v6970_v3 = vsel %vm397_vm6, %v10570_v15, %v10569_v28  ;;  %v6980_v29 = vsel %vm397_vm6, %v10569_v28, %v10574_v49  ;;  %v437_v15 = vadd.f32 %v10566_v60, %v332_v19  ;;  %v10581_v28 = vld [vmem:[#allocation52_spill] sm:$0xff]  ;;  %v10585_v60 = vld [vmem:[#allocation66_spill] sm:$0xff] }
 0xbe3   : > { %10556 = vst [vmem:[#allocation19_spill] sm:$0xff] %v6931_v21 }
 0xbe4   : > { %10557 = vst [vmem:[#allocation18_spill] sm:$0xff] %v6936_v25  ;;  %v10614_v25 = vld [vmem:[#allocation79_spill] sm:$0xff] }
 0xbe5   : > { %10568 = vst [vmem:[#allocation43_spill] sm:$0xff] %v6965_v45  ;;  %v10633_v45 = vld [vmem:[#allocation81_spill] sm:$0xff] }
 0xbe6   : > { %2518 = vrot.lane.b32.xlu1 %v2478_v35, %s5168_s14  ;;  %v10562_v35 = vld [vmem:[#allocation33_spill] sm:$0xff]  ;;  %2500 = vrot.lane.b32.xlu0 %v2469_v33, %s5168_s14  ;;  %v7162_v34 = vsel %vm10212_vm9, %v10634_v51, %v10633_v45 }
 0xbe7   : > { %2788 = vperm.xlu2 %5149, %v10560_v22   ;;  %v6952_v40 = vsel %vm292_vm5, %v10561_v57, %v10562_v35  ;;  %v6957_v38 = vsel %vm292_vm5, %v10562_v35, %v10564_v20  ;;  %v10571_v22 = vld [vmem:[#allocation51_spill] sm:$0xff]  ;;  %v436_v35 = vadd.f32 %v409_v26, %v331_v18  ;;  %v6996_v18 = vsel %vm397_vm6, %v10578_v8, %v10577_v7  ;;  %v10580_v26 = vld [vmem:[#allocation40_spill] sm:$0xff] }
 0xbe8   : > { %10563 = vst [vmem:[#allocation20_spill] sm:$0xff] %v6952_v40  ;;  %v10572_v57 = vld [vmem:[#allocation39_spill] sm:$0xff]  ;;  %v6990_v20 = vsel %vm397_vm6, %v10571_v22, %v5472_v48  ;;  %v7001_v43 = vsel %vm397_vm6, %v10581_v28, %v10580_v26  ;;  %v10619_v40 = vld [vmem:[#allocation77_spill] sm:$0xff] }
 0xbe9   : > { %10565 = vst [vmem:[#allocation21_spill] sm:$0xff] %v6957_v38  ;;  %v6975_v13 = vsel %vm397_vm6, %v10572_v57, %v10571_v22  ;;  %v6985_v10 = vsel %vm397_vm6, %v10574_v49, %v10572_v57  ;;  %v7006_v49 = vsel %vm397_vm6, %v10580_v26, %v10578_v8  ;;  %v10582_v57 = vld [vmem:[#allocation41_spill] sm:$0xff]  ;;  %v2470_v8 = vmul.f32 %v10587_v42, %v6592_v9 }
 0xbea   : > { %10573 = vst [vmem:[#allocation45_spill] sm:$0xff] %v6975_v13  ;;  %v7011_v48 = vsel %vm397_vm6, %v10577_v7, %v10582_v57  ;;  %v7016_v19 = vsel %vm397_vm6, %v10582_v57, %v10567_v56  ;;  %v10586_v22 = vld [vmem:[#allocation61_spill] sm:$0xff]  ;;  %v7033_v56 = vsel %vm10213_vm7, %v10590_v36, %v10589_v0 }
 0xbeb   : > { %10575 = vst [vmem:[#allocation23_spill] sm:$0xff] %v6985_v10  ;;  %v530_v28 = vsel %vm10213_vm7, %v10586_v22, %v10585_v60  ;;  %v10588_v26 = vld [vmem:[#allocation53_spill] sm:$0xff]  ;;  %v558_v10 = vadd.f32 %v10585_v60, %v437_v15  ;;  %v7070_v60 = vpop.permute.xlu2 %2404 }
 0xbec   : > { %10576 = vst [vmem:[#allocation24_spill] sm:$0xff] %v6990_v20  ;;  %v7028_v7 = vsel %vm10213_vm7, %v10589_v0, %v10588_v26  ;;  %v557_v57 = vadd.f32 %v530_v28, %v436_v35  ;;  %v10591_v20 = vld [vmem:[#allocation63_spill] sm:$0xff]  ;;  %v10596_v0 = vld [vmem:[#allocation56_spill] sm:$0xff]  ;;  %v10599_v15 = vld [vmem:[#allocation65_spill] sm:$0xff] }
 0xbed   : > { %10579 = vst [vmem:[#allocation46_spill] sm:$0xff] %v6996_v18  ;;  %v7040_v13 = vsel %vm10213_vm7, %v10591_v20, %v5559_v59  ;;  %v10597_v35 = vld [vmem:[#allocation64_spill] sm:$0xff] }
 0xbee   : > { %10583 = vst [vmem:[#allocation22_spill] sm:$0xff] %v7011_v48  ;;  %v10593_v48 = vld [vmem:[#allocation59_spill] sm:$0xff]  ;;  %2502 = vrot.lane.b32.xlu1 %v2470_v8, %s5168_s14  ;;  %v7058_v59 = vsel %vm10213_vm7, %v10597_v35, %v10596_v0  ;;  %v10598_v28 = vld [vmem:[#allocation60_spill] sm:$0xff] }
 0xbef   : > { %10584 = vst [vmem:[#allocation34_spill] sm:$0xff] %v7016_v19  ;;  %v7045_v18 = vsel %vm10213_vm7, %v10588_v26, %v10593_v48  ;;  %v7053_v36 = vsel %vm10213_vm7, %v10593_v48, %v10591_v20  ;;  %v7063_v26 = vsel %vm10213_vm7, %v10596_v0, %v10598_v28  ;;  %v7068_v33 = vsel %vm10213_vm7, %v10598_v28, %v10599_v15  ;;  %v10602_v20 = vld [vmem:[#allocation58_spill] sm:$0xff]  ;;  %v10606_v35 = vld [vmem:[#allocation72_spill] sm:$0xff]  ;;  %v10607_v28 = vld [vmem:[#allocation293_spill] sm:$0xff] }
 0xbf0   : > { %10592 = vst [vmem:[#allocation50_spill] sm:$0xff] %v7040_v13  ;;  %2504 = vrot.lane.b32.xlu2 %v2471_v16, %s5168_s14  ;;  %v7076_v48 = vsel %vm10213_vm7, %v10599_v15, %v10602_v20  ;;  %v7081_v8 = vsel %vm10213_vm7, %v10602_v20, %v10586_v22  ;;  %v10605_v0 = vld [vmem:[#allocation74_spill] sm:$0xff]  ;;  %v10612_v19 = vld [vmem:[#allocation75_spill] sm:$0xff] }
 0xbf1   : > { %10594 = vst [vmem:[#allocation47_spill] sm:$0xff] %v7045_v18  ;;  %v662_v13 = vsel %vm649_vm8, %v10606_v35, %v10605_v0  ;;  %v10610_v18 = vld [vmem:[#allocation76_spill] sm:$0xff]  ;;  %v10613_v15 = vld [vmem:[#allocation67_spill] sm:$0xff]  ;;  %v663_v22 = vsel %vm649_vm8, %v10605_v0, %v10614_v25 }
 0xbf2   : > { %10595 = vst [vmem:[#allocation28_spill] sm:$0xff] %v7053_v36  ;;  %v10608_v36 = vld [vmem:[#allocation13_spill] sm:$0xff]  ;;  %v690_v20 = vadd.f32 %v662_v13, %v557_v57  ;;  %v7119_v13 = vsel %vm649_vm8, %v10619_v40, %v10618_v39  ;;  %v10620_v25 = vld [vmem:[#allocation71_spill] sm:$0xff]  ;;  %v10621_v57 = vld [vmem:[#allocation78_spill] sm:$0xff] }
 0xbf3   : > { %10600 = vst [vmem:[#allocation27_spill] sm:$0xff] %v7068_v33  ;;  %v95_v33 = vmul.f32 %v10608_v36, %v10607_v28 }
 0xbf4   : > { %10601 = vst [vmem:[#allocation29_spill] sm:$0xff] %v7070_v60  ;;  %v10609_v60 = vld [vmem:[#allocation68_spill] sm:$0xff] }
 0xbf5   : > { %10603 = vst [vmem:[#allocation48_spill] sm:$0xff] %v7076_v48  ;;  %v7091_v16 = vsel %vm649_vm8, %v10610_v18, %v10609_v60  ;;  %v7096_v48 = vsel %vm649_vm8, %v10613_v15, %v10612_v19  ;;  %v7114_v15 = vsel %vm649_vm8, %v10609_v60, %v5632_v30  ;;  %v10626_v60 = vld [vmem:[#allocation86_spill] sm:$0xff] }
 0xbf6   : > { %10604 = vst [vmem:[#allocation30_spill] sm:$0xff] %v7081_v8  ;;  %v10615_v8 = vld [vmem:[#allocation69_spill] sm:$0xff] }
 0xbf7   : > { %10611 = vst [vmem:[#allocation32_spill] sm:$0xff] %v7091_v16  ;;  %v7104_v21 = vsel %vm649_vm8, %v10612_v19, %v10615_v8  ;;  %v7109_v38 = vsel %vm649_vm8, %v10615_v8, %v10610_v18  ;;  %v691_v16 = vadd.f32 %v663_v22, %v558_v10  ;;  %v7124_v19 = vsel %vm649_vm8, %v10620_v25, %v10619_v40  ;;  %v10623_v8 = vld [vmem:[#allocation73_spill] sm:$0xff]  ;;  %v10625_v10 = vld [vmem:[#allocation88_spill] sm:$0xff] }
 0xbf8   : > { %10616 = vst [vmem:[#allocation31_spill] sm:$0xff] %v7109_v38  ;;  %v7129_v18 = vsel %vm649_vm8, %v10621_v57, %v10606_v35  ;;  %v7134_v30 = vsel %vm649_vm8, %v10618_v39, %v10623_v8  ;;  %v777_v0 = vsel %vm10212_vm9, %v10626_v60, %v10625_v10  ;;  %v214_v22 = vadd.f32 %v6857_v61, %v95_v33  ;;  %v10629_v38 = vld [vmem:[#allocation159_spill] sm:$0xff]  ;;  %v10630_v61 = vld [vmem:[#allocation148_spill] sm:$0xff]  ;;  %v10631_v33 = vld [vmem:[#allocation82_spill] sm:$0xff] }
 0xbf9   : > { %10617 = vst [vmem:[#allocation49_spill] sm:$0xff] %v7114_v15  ;;  %v10627_v15 = vld [vmem:[#allocation292_spill] sm:$0xff]  ;;  %v7147_v35 = vsel %vm649_vm8, %v10623_v8, %v10621_v57  ;;  %v778_v39 = vsel %vm10212_vm9, %v10625_v10, %v10629_v38  ;;  %v7157_v41 = vsel %vm10212_vm9, %v10631_v33, %v10630_v61  ;;  %v7169_v38 = vsel %vm10212_vm9, %v10633_v45, %v10631_v33  ;;  %v10641_v45 = vld [vmem:[#allocation87_spill] sm:$0xff] }
 0xbfa   : > { %10622 = vst [vmem:[#allocation33_spill] sm:$0xff] %v7129_v18  ;;  %v2580_v40 = vmul.f32 %v10627_v15, %v10523_v1  ;;  %v2581_v25 = vmul.f32 %v10627_v15, %v6592_v9  ;;  %v2582_v18 = vmul.f32 %v10627_v15, %v6602_v27  ;;  %v806_v57 = vadd.f32 %v778_v39, %v691_v16  ;;  %v10638_v16 = vld [vmem:[#allocation149_spill] sm:$0xff]  ;;  %v10639_v10 = vld [vmem:[#allocation84_spill] sm:$0xff] }
 0xbfb   : > { %10624 = vst [vmem:[#allocation35_spill] sm:$0xff] %v7134_v30  ;;  %v805_v30 = vadd.f32 %v777_v0, %v690_v20  ;;  %v10635_v20 = vld [vmem:[#allocation83_spill] sm:$0xff]  ;;  %v7184_v0 = vsel %vm10212_vm9, %v10639_v10, %v10638_v16  ;;  %v10643_v39 = vld [vmem:[#allocation85_spill] sm:$0xff]  ;;  %v10644_v33 = vld [vmem:[#allocation96_spill] sm:$0xff]  ;;  %vm10678_vm8 = vcmask 490496  }
 0xbfc   : > { %10628 = vst [vmem:[#allocation55_spill] sm:$0xff] %v7147_v35  ;;  %2618 = vrot.lane.b32.xlu0 %v2580_v40, %s5169_s15  ;;  %2620 = vrot.lane.b32.xlu1 %v2581_v25, %s5169_s15  ;;  %v7174_v8 = vsel %vm10212_vm9, %v10630_v61, %v10635_v20  ;;  %v7179_v51 = vsel %vm10212_vm9, %v10635_v20, %v5698_v47  ;;  %v10640_v40 = vld [vmem:[#allocation150_spill] sm:$0xff] }
 0xbfd   : > { %10632 = vst [vmem:[#allocation44_spill] sm:$0xff] %v7157_v41  ;;  %2622 = vrot.lane.b32.xlu2 %v2582_v18, %s5169_s15  ;;  %v7190_v25 = vsel %vm10212_vm9, %v10641_v45, %v10640_v40  ;;  %v7195_v61 = vsel %vm10212_vm9, %v10638_v16, %v10643_v39  ;;  %v10645_v47 = vld [vmem:[#allocation94_spill] sm:$0xff]  ;;  %v7204_v18 = vsel %vm10212_vm9, %v10643_v39, %v10641_v45  ;;  %v10653_v39 = vld [vmem:[#allocation104_spill] sm:$0xff] }
 0xbfe   : > { %10636 = vst [vmem:[#allocation37_spill] sm:$0xff] %v7174_v8  ;;  %v892_v20 = vsel %vm879_vm10, %v10645_v47, %v10644_v33  ;;  %v7209_v10 = vsel %vm10212_vm9, %v10640_v40, %v10626_v60  ;;  %v10648_v8 = vld [vmem:[#allocation165_spill] sm:$0xff]  ;;  %v10650_v35 = vld [vmem:[#allocation90_spill] sm:$0xff]  ;;  %vm10680_vm9 = vmmov %vm10678_vm8 }
 0xbff   : > { %10637 = vst [vmem:[#allocation36_spill] sm:$0xff] %v7179_v51  ;;  %v319_v51 = vadd.f32 %v6913_v17, %v214_v22  ;;  %v893_v16 = vsel %vm879_vm10, %v10644_v33, %v10648_v8  ;;  %v920_v41 = vadd.f32 %v892_v20, %v805_v30  ;;  %v7219_v17 = vsel %vm879_vm10, %v10651_v2, %v10650_v35  ;;  %v10652_v22 = vld [vmem:[#allocation160_spill] sm:$0xff]  ;;  %v10654_v60 = vld [vmem:[#allocation102_spill] sm:$0xff] }
 0xc00   : > { %10642 = vst [vmem:[#allocation51_spill] sm:$0xff] %v7190_v25  ;;  %v7214_v25 = vpop.permute.xlu2 %2408  ;;  %v7224_v45 = vsel %vm879_vm10, %v10652_v22, %v10651_v2  ;;  %v1007_v40 = vsel %vm994_vm11, %v10654_v60, %v10653_v39  ;;  %v10656_v30 = vld [vmem:[#allocation112_spill] sm:$0xff]  ;;  %v10657_v33 = vld [vmem:[#allocation110_spill] sm:$0xff]  ;;  %v2573_v22 = vmul.f32 %v6693_v58, %v10523_v1 }
 0xc01   : > { %10646 = vst [vmem:[#allocation39_spill] sm:$0xff] %v7204_v18  ;;  %v921_v18 = vadd.f32 %v893_v16, %v806_v57  ;;  %v1122_v20 = vsel %vm1109_vm12, %v10657_v33, %v10656_v30  ;;  %v1035_v63 = vadd.f32 %v1007_v40, %v920_v41  ;;  %v424_v2 = vadd.f32 %v6970_v3, %v319_v51  ;;  %v10660_v41 = vld [vmem:[#allocation120_spill] sm:$0xff]  ;;  %v10661_v40 = vld [vmem:[#allocation118_spill] sm:$0xff]  ;;  %v10662_v51 = vld [vmem:[#allocation189_spill] sm:$0xff] }
 0xc02   : > { %10647 = vst [vmem:[#allocation38_spill] sm:$0xff] %v7209_v10  ;;  %v10655_v10 = vld [vmem:[#allocation178_spill] sm:$0xff]  ;;  %v2574_v57 = vmul.f32 %v6693_v58, %v6592_v9  ;;  %v1237_v3 = vsel %vm1224_vm13, %v10661_v40, %v10660_v41  ;;  %v10665_v9 = vld [vmem:[#allocation204_spill] sm:$0xff] }
 0xc03   : > { %10649 = vst [vmem:[#allocation54_spill] sm:$0xff] %v7214_v25  ;;  %v1008_v8 = vsel %vm994_vm11, %v10653_v39, %v10655_v10  ;;  %v10658_v25 = vld [vmem:[#allocation184_spill] sm:$0xff]  ;;  %v102_v10 = vmul.f32 %v10608_v36, %v6826_v4 }
 0xc04   : > { %v1123_v46 = vsel %vm1109_vm12, %v10656_v30, %v10658_v25  ;;  %v1036_v16 = vadd.f32 %v1008_v8, %v921_v18  ;;  %v10659_v39 = vld [vmem:[#allocation16_spill] sm:$0xff]  ;;  %v1150_v25 = vadd.f32 %v1122_v20, %v1035_v63  ;;  %v1238_v30 = vsel %vm1224_vm13, %v10660_v41, %v10662_v51  ;;  %2604 = vrot.lane.b32.xlu0 %v2573_v22, %s5169_s15  ;;  %v10663_v18 = vld [vmem:[#allocation129_spill] sm:$0xff]  ;;  %v10664_v8 = vld [vmem:[#allocation127_spill] sm:$0xff] }
 0xc05   : > { %v103_v6 = vmul.f32 %v10659_v39, %v6826_v4  ;;  %2606 = vrot.lane.b32.xlu1 %v2574_v57, %s5169_s15  ;;  %v1352_v1 = vsel %vm1339_vm14, %v10664_v8, %v10663_v18  ;;  %v1353_v63 = vsel %vm1339_vm14, %v10663_v18, %v10665_v9  ;;  %v96_v20 = vmul.f32 %v10659_v39, %v10607_v28  ;;  %v10667_v39 = vld [vmem:[#allocation91_spill] sm:$0xff] }
 0xc06   : > { %v1151_v36 = vadd.f32 %v1123_v46, %v1036_v16  ;;  %2608 = vrot.lane.b32.xlu2 %v2575_v12, %s5169_s15  ;;  %v1265_v27 = vadd.f32 %v1237_v3, %v1150_v25  ;;  %v545_v41 = vadd.f32 %v7033_v56, %v424_v2  ;;  %v2679_v22 = vperm.slane %v6704_v23, 3  ;;  %v10669_v56 = vld [vmem:[#allocation138_spill] sm:$0xff]  ;;  %v10670_v2 = vld [vmem:[#allocation136_spill] sm:$0xff]  ;;  %v10671_v3 = vld [vmem:[#allocation209_spill] sm:$0xff] }
 0xc07   : > { %v2680_v46 = vperm.slane %v6704_v23, 4  ;;  %v221_v16 = vadd.f32 %v6888_v11, %v102_v10  ;;  %v222_v51 = vadd.f32 %v6898_v50, %v103_v6  ;;  %v2681_v9 = vperm.slane %v6704_v23, 5  ;;  %v10672_v50 = vld [vmem:[#allocation147_spill] sm:$0xff]  ;;  %v10673_v6 = vld [vmem:[#allocation145_spill] sm:$0xff] }
 0xc08   : > { %v1266_v57 = vadd.f32 %v1238_v30, %v1151_v36  ;;  %v7271_v8 = vpop.permute.xlu2 %2512  ;;  %v1380_v18 = vadd.f32 %v1352_v1, %v1265_v27  ;;  %v7277_v12 = vsel %vm879_vm10, %v10667_v39, %v5752_v52  ;;  %v1467_v25 = vsel %vm1454_vm15, %v10670_v2, %v10669_v56  ;;  %v10674_v36 = vld [vmem:[#allocation218_spill] sm:$0xff] }
 0xc09   : > { %10666 = vst [vmem:[#allocation42_spill] sm:$0xff] %v7271_v8  ;;  %v1468_v11 = vsel %vm1454_vm15, %v10669_v56, %v10671_v3  ;;  %v1582_v30 = vsel %vm1569_vm1, %v10673_v6, %v10672_v50  ;;  %v1583_v27 = vsel %vm1569_vm1, %v10672_v50, %v10674_v36  ;;  %v215_v52 = vadd.f32 %v6868_v14, %v96_v20  ;;  %v10675_v6 = vld [vmem:[#allocation162_spill] sm:$0xff]  ;;  %v10676_v14 = vld [vmem:[#allocation161_spill] sm:$0xff] }
 0xc0a   : > { %10668 = vst [vmem:[#allocation40_spill] sm:$0xff] %v7277_v12  ;;  %v1381_v10 = vadd.f32 %v1353_v63, %v1266_v57  ;;  %v1495_v1 = vadd.f32 %v1467_v25, %v1380_v18  ;;  %v678_v8 = vadd.f32 %v7096_v48, %v545_v41  ;;  %v2700_v12 = vmul.f32 %v2679_v22, %v6719_v32  ;;  %v10677_v20 = vld [vmem:[#allocation157_spill] sm:$0xff]  ;;  %v10681_v18 = vld [vmem:[#allocation95_spill] sm:$0xff] }
 0xc0b   : > { %v2701_v2 = vmul.f32 %v2680_v46, %v6719_v32  ;;  %v326_v63 = vadd.f32 %v6941_v24, %v221_v16  ;;  %v327_v57 = vadd.f32 %v6947_v55, %v222_v51  ;;  %v2702_v56 = vmul.f32 %v2681_v9, %v6719_v32  ;;  %v10679_v55 = vld [vmem:[#allocation229_spill] sm:$0xff] }
 0xc0c   : > { %v1496_v28 = vadd.f32 %v1468_v11, %v1381_v10  ;;  %v1610_v3 = vadd.f32 %v1582_v30, %v1495_v1  ;;  %v7301_v50 = vsel %vm879_vm10, %v10650_v35, %v10675_v6  ;;  %v1697_v48 = vsel %vm10678_vm8, %v10677_v20, %v10676_v14  ;;  %2738 = vrot.lane.b32.xlu0 %v2700_v12, %s5172_s16  ;;  %v10682_v25 = vld [vmem:[#allocation93_spill] sm:$0xff]  ;;  %v7327_v10 = vpop.permute.xlu1 %2402  ;;  %v10687_v30 = vld [vmem:[#allocation234_spill] sm:$0xff]  ;;  %v10759_v20 = vld [vmem:[#allocation195_spill] sm:$0xff] }
 0xc0d   : > { %2740 = vrot.lane.b32.xlu1 %v2701_v2, %s5172_s16  ;;  %v7311_v24 = vsel %vm879_vm10, %v10675_v6, %v10667_v39  ;;  %v1698_v16 = vsel %vm10680_vm9, %v10676_v14, %v10679_v55  ;;  %v320_v35 = vadd.f32 %v6918_v37, %v215_v52  ;;  %v7321_v12 = vsel %vm879_vm10, %v10682_v25, %v10681_v18  ;;  %v10684_v2 = vld [vmem:[#allocation176_spill] sm:$0xff] }
 0xc0e   : > { %v1611_v41 = vadd.f32 %v1583_v27, %v1496_v28  ;;  %2742 = vrot.lane.b32.xlu2 %v2702_v56, %s5172_s16  ;;  %v1725_v51 = vadd.f32 %v1697_v48, %v1610_v3  ;;  %v10683_v28 = vld [vmem:[#allocation179_spill] sm:$0xff]  ;;  %vm10685_vm8 = vcmask 261120   ;;  %v793_v39 = vadd.f32 %v7162_v34, %v678_v8  ;;  %10686 = vst [vmem:[#allocation52_spill] sm:$0xff] %v7327_v10  ;;  %v10691_v3 = vld [vmem:[#allocation92_spill] sm:$0xff]  ;;  %v10692_v34 = vld [vmem:[#allocation202_spill] sm:$0xff] }
 0xc0f   : > { %v1812_v11 = vsel %vm10685_vm8, %v10684_v2, %v10683_v28  ;;  %vm10688_vm9 = vmmov %vm10685_vm8  ;;  %v431_v36 = vadd.f32 %v7001_v43, %v326_v63  ;;  %v432_v27 = vadd.f32 %v7006_v49, %v327_v57  ;;  %v10690_v56 = vld [vmem:[#allocation163_spill] sm:$0xff]  ;;  %vm10694_vm8 = vcmask 252928   ;;  %v10697_v43 = vld [vmem:[#allocation226_spill] sm:$0xff] }
 0xc10   : > { %v1726_v6 = vadd.f32 %v1698_v16, %v1611_v41  ;;  %v1813_v37 = vsel %vm10688_vm9, %v10683_v28, %v10687_v30  ;;  %v7334_v52 = vpop.permute.xlu2 %2498  ;;  %v1840_v1 = vadd.f32 %v1812_v11, %v1725_v51  ;;  %v7339_v14 = vsel %vm879_vm10, %v10691_v3, %v10690_v56  ;;  %v10693_v8 = vld [vmem:[#allocation199_spill] sm:$0xff]  ;;  %vm10696_vm7 = vmmov %vm10694_vm8  ;;  %v10699_v57 = vld [vmem:[#allocation254_spill] sm:$0xff] }
 0xc11   : > { %10689 = vst [vmem:[#allocation41_spill] sm:$0xff] %v7334_v52  ;;  %v1927_v48 = vsel %vm10694_vm8, %v10693_v8, %v10692_v34  ;;  %v10695_v41 = vld [vmem:[#allocation247_spill] sm:$0xff]  ;;  %v2043_v51 = vsel %vm2029_vm3, %v10697_v43, %v10699_v57  ;;  %v425_v28 = vadd.f32 %v6980_v29, %v320_v35  ;;  %v908_v30 = vadd.f32 %v7224_v45, %v793_v39  ;;  %v10700_v29 = vld [vmem:[#allocation250_spill] sm:$0xff] }
 0xc12   : > { %v1928_v55 = vsel %vm10696_vm7, %v10692_v34, %v10695_v41  ;;  %v1841_v16 = vadd.f32 %v1813_v37, %v1726_v6  ;;  %v10698_v63 = vld [vmem:[#allocation223_spill] sm:$0xff]  ;;  %v1955_v11 = vadd.f32 %v1927_v48, %v1840_v1  ;;  %v2693_v3 = vmul.f32 %v2679_v22, %v6662_v53  ;;  %v10701_v35 = vld [vmem:[#allocation246_spill] sm:$0xff] }
 0xc13   : > { %v2042_v49 = vsel %vm2029_vm3, %v10698_v63, %v10697_v43  ;;  %v2694_v10 = vmul.f32 %v2680_v46, %v6662_v53  ;;  %v552_v6 = vadd.f32 %v7058_v59, %v431_v36  ;;  %v553_v37 = vadd.f32 %v7063_v26, %v432_v27  ;;  %v10702_v46 = vld [vmem:[#allocation97_spill] sm:$0xff]  ;;  %v10703_v59 = vld [vmem:[#allocation166_spill] sm:$0xff]  ;;  %v10704_v39 = vld [vmem:[#allocation259_spill] sm:$0xff] }
 0xc14   : > { %v1956_v8 = vadd.f32 %v1928_v55, %v1841_v16  ;;  %v2695_v34 = vmul.f32 %v2681_v9, %v6662_v53  ;;  %v2070_v41 = vadd.f32 %v2042_v49, %v1955_v11  ;;  %v888_v43 = vsel %vm879_vm10, %v10690_v56, %v10682_v25  ;;  %2724 = vrot.lane.b32.xlu0 %v2693_v3, %s5172_s16  ;;  %v10705_v27 = vld [vmem:[#allocation164_spill] sm:$0xff]  ;;  %v7384_v48 = vpop.permute.xlu1 %2406  ;;  %v10709_v49 = vld [vmem:[#allocation267_spill] sm:$0xff]  ;;  %v10712_v3 = vld [vmem:[#allocation98_spill] sm:$0xff] }
 0xc15   : > { %v2157_v45 = vsel %vm2144_vm2, %v10701_v35, %v10700_v29  ;;  %2726 = vrot.lane.b32.xlu1 %v2694_v10, %s5172_s16  ;;  %v995_v26 = vsel %vm994_vm11, %v10703_v59, %v10702_v46  ;;  %v2158_v9 = vsel %vm2144_vm2, %v10700_v29, %v10704_v39  ;;  %v546_v36 = vadd.f32 %v7028_v7, %v425_v28  ;;  %v10706_v10 = vld [vmem:[#allocation283_spill] sm:$0xff]  ;;  %v10707_v56 = vld [vmem:[#allocation276_spill] sm:$0xff] }
 0xc16   : > { %v2071_v22 = vadd.f32 %v2043_v51, %v1956_v8  ;;  %2728 = vrot.lane.b32.xlu2 %v2695_v34, %s5172_s16  ;;  %v2185_v25 = vadd.f32 %v2157_v45, %v2070_v41  ;;  %v7379_v1 = vsel %vm879_vm10, %v10681_v18, %v10705_v27  ;;  %v2272_v8 = vsel %vm2259_vm0, %v10707_v56, %v10706_v10  ;;  %v10713_v34 = vld [vmem:[#allocation99_spill] sm:$0xff]  ;;  %v10717_v29 = vld [vmem:[#allocation180_spill] sm:$0xff] }
 0xc17   : > { %10708 = vst [vmem:[#allocation66_spill] sm:$0xff] %v7384_v48  ;;  %v1023_v55 = vadd.f32 %v995_v26, %v908_v30  ;;  %v2273_v7 = vsel %vm2259_vm0, %v10706_v10, %v10709_v49  ;;  %v685_v57 = vadd.f32 %v7124_v19, %v552_v6  ;;  %v686_v51 = vadd.f32 %v7119_v13, %v553_v37  ;;  %v10715_v13 = vld [vmem:[#allocation167_spill] sm:$0xff]  ;;  %v10716_v37 = vld [vmem:[#allocation105_spill] sm:$0xff]  ;;  %v10720_v26 = vld [vmem:[#allocation278_spill] sm:$0xff] }
 0xc18   : > { %v2186_v16 = vadd.f32 %v2158_v9, %v2071_v22  ;;  %v7391_v28 = vpop.permute.xlu2 %2616  ;;  %v7393_v18 = vadd.f32 %v2272_v8, %v2185_v25  ;;  %v7398_v11 = vsel %vm879_vm10, %v10705_v27, %v10645_v47  ;;  %v996_v30 = vsel %vm994_vm11, %v10702_v46, %v10712_v3  ;;  %v10719_v46 = vld [vmem:[#allocation101_spill] sm:$0xff]  ;;  %v10721_v27 = vld [vmem:[#allocation172_spill] sm:$0xff]  ;;  %v10755_v35 = vld [vmem:[#allocation123_spill] sm:$0xff] }
 0xc19   : > { %10710 = vst [vmem:[#allocation61_spill] sm:$0xff] %v7391_v28  ;;  %v7406_v41 = vsel %vm994_vm11, %v10713_v34, %v5806_v44  ;;  %v7413_v6 = vsel %vm994_vm11, %v10712_v3, %v10715_v13  ;;  %v7418_v47 = vsel %vm994_vm11, %v10715_v13, %v10713_v34  ;;  %v1110_v45 = vsel %vm1109_vm12, %v10717_v29, %v10716_v37  ;;  %v10718_v44 = vld [vmem:[#allocation103_spill] sm:$0xff]  ;;  %v10722_v10 = vld [vmem:[#allocation100_spill] sm:$0xff]  ;;  %v10728_v34 = vld [vmem:[#allocation181_spill] sm:$0xff] }
 0xc1a   : > { %10711 = vst [vmem:[#allocation291_spill] sm:$0xff] %v7393_v18  ;;  %v7408_v19 = vadd.f32 %v2273_v7, %v2186_v16  ;;  %v679_v22 = vadd.f32 %v7104_v21, %v546_v36  ;;  %v7427_v59 = vsel %vm994_vm11, %v10719_v46, %v10718_v44  ;;  %v2375_v39 = vmul.f32 %v6614_v54, %v10720_v26  ;;  %v10723_v54 = vld [vmem:[#allocation175_spill] sm:$0xff]  ;;  %v10730_v29 = vld [vmem:[#allocation109_spill] sm:$0xff]  ;;  %v10746_v56 = vld [vmem:[#allocation116_spill] sm:$0xff] }
 0xc1b   : > { %v2479_v9 = vmul.f32 %v6645_v31, %v10720_v26  ;;  %v1138_v25 = vadd.f32 %v1110_v45, %v1023_v55  ;;  %v1002_v8 = vsel %vm994_vm11, %v10722_v10, %v10721_v27  ;;  %v800_v16 = vadd.f32 %v7184_v0, %v685_v57  ;;  %v10724_v0 = vld [vmem:[#allocation106_spill] sm:$0xff]  ;;  %v10726_v57 = vld [vmem:[#allocation113_spill] sm:$0xff]  ;;  %v10769_v52 = vld [vmem:[#allocation15_spill] sm:$0xff] }
 0xc1c   : > { %10714 = vst [vmem:[#allocation53_spill] sm:$0xff] %v7408_v19  ;;  %v801_v21 = vadd.f32 %v7195_v61, %v686_v51  ;;  %v2472_v36 = vmul.f32 %v10587_v42, %v10720_v26  ;;  %v1003_v49 = vsel %vm994_vm11, %v10721_v27, %v10719_v46  ;;  %v7446_v31 = vsel %vm994_vm11, %v10718_v44, %v10723_v54  ;;  %v10725_v61 = vld [vmem:[#allocation107_spill] sm:$0xff]  ;;  %v10727_v51 = vld [vmem:[#allocation185_spill] sm:$0xff]  ;;  %v7483_v44 = vpop.permute.xlu0 %2508  ;;  %v10733_v46 = vld [vmem:[#allocation182_spill] sm:$0xff] }
 0xc1d   : > { %v7451_v55 = vsel %vm994_vm11, %v10723_v54, %v10654_v60  ;;  %2416 = vrot.lane.b32.xlu0 %v2375_v39, %s5167_s13  ;;  %2520 = vrot.lane.b32.xlu1 %v2479_v9, %s5168_s14  ;;  %v1111_v42 = vsel %vm1109_vm12, %v10716_v37, %v10724_v0  ;;  %v7461_v7 = vsel %vm1109_vm12, %v10725_v61, %v5860_v62  ;;  %v10729_v62 = vld [vmem:[#allocation111_spill] sm:$0xff]  ;;  %v10734_v39 = vld [vmem:[#allocation108_spill] sm:$0xff]  ;;  %v2682_v54 = vperm.slane %v6704_v23, 6  ;;  %v10771_v48 = vld [vmem:[#allocation125_spill] sm:$0xff]  ;;  %s5208_s13 = smov 66  }
 0xc1e   : > { %v1225_v3 = vsel %vm1224_vm13, %v10727_v51, %v10726_v57  ;;  %v794_v60 = vadd.f32 %v7169_v38, %v679_v22  ;;  %2506 = vrot.lane.b32.xlu2 %v2472_v36, %s5168_s14  ;;  %v7471_v13 = vsel %vm1109_vm12, %v10724_v0, %v10728_v34  ;;  %v7476_v37 = vsel %vm1109_vm12, %v10728_v34, %v10725_v61  ;;  %v7485_v38 = vpop.permute.xlu1 %2510  ;;  %v10736_v61 = vld [vmem:[#allocation183_spill] sm:$0xff]  ;;  %v10741_v34 = vld [vmem:[#allocation121_spill] sm:$0xff] }
 0xc1f   : > { %v7481_v45 = vsel %vm1109_vm12, %v10730_v29, %v10729_v62  ;;  %10731 = vst [vmem:[#allocation62_spill] sm:$0xff] %v7483_v44  ;;  %v1253_v22 = vadd.f32 %v1225_v3, %v1138_v25  ;;  %v1117_v9 = vsel %vm1109_vm12, %v10734_v39, %v10733_v46  ;;  %v915_v27 = vadd.f32 %v7339_v14, %v800_v16  ;;  %v10737_v14 = vld [vmem:[#allocation114_spill] sm:$0xff]  ;;  %v10738_v23 = vld [vmem:[#allocation115_spill] sm:$0xff] }
 0xc20   : > { %10732 = vst [vmem:[#allocation57_spill] sm:$0xff] %v7485_v38  ;;  %v916_v10 = vadd.f32 %v888_v43, %v801_v21  ;;  %v7491_v36 = vpop.permute.xlu2 %2602  ;;  %v1118_v0 = vsel %vm1109_vm12, %v10733_v46, %v10730_v29  ;;  %v7500_v51 = vsel %vm1109_vm12, %v10729_v62, %v10736_v61  ;;  %v7505_v25 = vsel %vm1109_vm12, %v10736_v61, %v10657_v33  ;;  %v10740_v21 = vld [vmem:[#allocation186_spill] sm:$0xff]  ;;  %v10742_v62 = vld [vmem:[#allocation192_spill] sm:$0xff]  ;;  %v10743_v61 = vld [vmem:[#allocation119_spill] sm:$0xff] }
 0xc21   : > { %10735 = vst [vmem:[#allocation63_spill] sm:$0xff] %v7491_v36  ;;  %v1226_v43 = vsel %vm1224_vm13, %v10726_v57, %v10737_v14  ;;  %v7513_v16 = vsel %vm1224_vm13, %v10738_v23, %v5924_v5  ;;  %v7518_v3 = vsel %vm1224_vm13, %v10737_v14, %v10740_v21  ;;  %v1340_v29 = vsel %vm1339_vm14, %v10742_v62, %v10741_v34  ;;  %v10744_v14 = vld [vmem:[#allocation117_spill] sm:$0xff]  ;;  %vm10799_vm12 = vmmov %vm10688_vm9 }
 0xc22   : > { %10739 = vst [vmem:[#allocation59_spill] sm:$0xff] %v7513_v16  ;;  %v909_v33 = vadd.f32 %v7219_v17, %v794_v60  ;;  %v7527_v57 = vsel %vm1224_vm13, %v10740_v21, %v10738_v23  ;;  %v2583_v5 = vmul.f32 %v10627_v15, %v10720_v26  ;;  %v2576_v46 = vmul.f32 %v6693_v58, %v10720_v26  ;;  %v10745_v60 = vld [vmem:[#allocation187_spill] sm:$0xff]  ;;  %v10747_v21 = vld [vmem:[#allocation188_spill] sm:$0xff] }
 0xc23   : > { %v1368_v39 = vadd.f32 %v1340_v29, %v1253_v22  ;;  %v7536_v18 = vsel %vm1224_vm13, %v10744_v14, %v10743_v61  ;;  %v1030_v62 = vadd.f32 %v1002_v8, %v915_v27  ;;  %v1031_v19 = vadd.f32 %v1003_v49, %v916_v10  ;;  %v10748_v8 = vld [vmem:[#allocation130_spill] sm:$0xff]  ;;  %v10750_v22 = vld [vmem:[#allocation17_spill] sm:$0xff]  ;;  %v10754_v26 = vld [vmem:[#allocation124_spill] sm:$0xff] }
 0xc24   : > { %v2703_v17 = vmul.f32 %v2682_v54, %v6719_v32  ;;  %v1232_v23 = vsel %vm1224_vm13, %v10746_v56, %v10745_v60  ;;  %v1233_v15 = vsel %vm1224_vm13, %v10745_v60, %v10744_v14  ;;  %v7548_v58 = vsel %vm1224_vm13, %v10743_v61, %v10747_v21  ;;  %v10749_v56 = vld [vmem:[#allocation205_spill] sm:$0xff]  ;;  %v10751_v29 = vld [vmem:[#allocation122_spill] sm:$0xff]  ;;  %v10753_v61 = vld [vmem:[#allocation12_spill] sm:$0xff]  ;;  %v7570_v60 = vpop.permute.xlu0 %2494 }
 0xc25   : > { %2624 = vrot.lane.b32.xlu0 %v2583_v5, %s5169_s15  ;;  %2610 = vrot.lane.b32.xlu1 %v2576_v46, %s5169_s15  ;;  %v7555_v32 = vsel %vm1224_vm13, %v10747_v21, %v10661_v40  ;;  %v1455_v49 = vsel %vm1454_vm15, %v10749_v56, %v10748_v8  ;;  %v106_v27 = vmul.f32 %v10750_v22, %v6826_v4  ;;  %v10752_v46 = vld [vmem:[#allocation293_spill] sm:$0xff]  ;;  %vm10779_vm7 = vcmask 490496   ;;  %vm10818_vm13 = vmmov %vm10694_vm8 }
 0xc26   : > { %2744 = vrot.lane.b32.xlu2 %v2703_v17, %s5172_s16  ;;  %v1024_v10 = vadd.f32 %v996_v30, %v909_v33  ;;  %v1341_v5 = vsel %vm1339_vm14, %v10741_v34, %v10751_v29  ;;  %v97_v14 = vmul.f32 %v10753_v61, %v10752_v46  ;;  %v104_v40 = vmul.f32 %v10753_v61, %v6826_v4  ;;  %v7572_v56 = vpop.permute.xlu1 %2496  ;;  %v10757_v30 = vld [vmem:[#allocation11_spill] sm:$0xff]  ;;  %vm10833_vm9 = vmmov %vm10779_vm7 }
 0xc27   : > { %v1483_v21 = vadd.f32 %v1455_v49, %v1368_v39  ;;  %v7577_v17 = vsel %vm1339_vm14, %v10755_v35, %v10754_v26  ;;  %v105_v33 = vmul.f32 %v10757_v30, %v6826_v4  ;;  %v1145_v34 = vadd.f32 %v1117_v9, %v1030_v62  ;;  %v10762_v49 = vld [vmem:[#allocation128_spill] sm:$0xff]  ;;  %v10763_v26 = vld [vmem:[#allocation126_spill] sm:$0xff]  ;;  %vm10840_vm8 = vmmov %vm10779_vm7 }
 0xc28   : > { %10756 = vst [vmem:[#allocation56_spill] sm:$0xff] %v7577_v17  ;;  %v1146_v63 = vadd.f32 %v1118_v0, %v1031_v19  ;;  %v7581_v2 = vpop.permute.xlu2 %2736  ;;  %v7586_v61 = vsel %vm1339_vm14, %v10751_v29, %v10759_v20  ;;  %v7591_v39 = vsel %vm1339_vm14, %v10759_v20, %v10755_v35  ;;  %v7596_v36 = vsel %vm1339_vm14, %v10763_v26, %v10762_v49  ;;  %v10765_v19 = vld [vmem:[#allocation139_spill] sm:$0xff]  ;;  %v10766_v9 = vld [vmem:[#allocation210_spill] sm:$0xff]  ;;  %v10767_v29 = vld [vmem:[#allocation25_spill] sm:$0xff] }
 0xc29   : > { %10758 = vst [vmem:[#allocation64_spill] sm:$0xff] %v7581_v2  ;;  %v98_v4 = vmul.f32 %v10757_v30, %v10752_v46  ;;  %v1570_v0 = vsel %vm1569_vm1, %v10766_v9, %v10765_v19  ;;  %v99_v62 = vmul.f32 %v10750_v22, %v10752_v46  ;;  %v225_v2 = vadd.f32 %v10767_v29, %v106_v27  ;;  %v10768_v20 = vld [vmem:[#allocation262_spill] sm:$0xff]  ;;  %v10787_v29 = vld [vmem:[#allocation132_spill] sm:$0xff] }
 0xc2a   : > { %10760 = vst [vmem:[#allocation60_spill] sm:$0xff] %v7586_v61  ;;  %v1139_v28 = vadd.f32 %v1111_v42, %v1024_v10  ;;  %v216_v35 = vadd.f32 %v10768_v20, %v97_v14  ;;  %v223_v44 = vadd.f32 %v10769_v52, %v104_v40  ;;  %v2696_v38 = vmul.f32 %v2682_v54, %v6662_v53  ;;  %v10772_v61 = vld [vmem:[#allocation14_spill] sm:$0xff]  ;;  %v10773_v42 = vld [vmem:[#allocation203_spill] sm:$0xff] }
 0xc2b   : > { %10761 = vst [vmem:[#allocation65_spill] sm:$0xff] %v7591_v39  ;;  %v1598_v17 = vadd.f32 %v1570_v0, %v1483_v21  ;;  %v10770_v39 = vld [vmem:[#allocation201_spill] sm:$0xff]  ;;  %v1260_v9 = vadd.f32 %v1232_v23, %v1145_v34  ;;  %v1261_v16 = vadd.f32 %v1233_v15, %v1146_v63  ;;  %v7619_v27 = vsel %vm1339_vm14, %v10762_v49, %v10773_v42  ;;  %v10775_v52 = vld [vmem:[#allocation127_spill] sm:$0xff]  ;;  %v10776_v54 = vld [vmem:[#allocation242_spill] sm:$0xff] }
 0xc2c   : > { %10764 = vst [vmem:[#allocation58_spill] sm:$0xff] %v7596_v36  ;;  %v1347_v30 = vsel %vm1339_vm14, %v10771_v48, %v10770_v39  ;;  %v224_v36 = vadd.f32 %v10772_v61, %v105_v33  ;;  %v1348_v22 = vsel %vm1339_vm14, %v10770_v39, %v10763_v26  ;;  %v7624_v53 = vsel %vm1339_vm14, %v10773_v42, %v10775_v52  ;;  %v10777_v23 = vld [vmem:[#allocation151_spill] sm:$0xff]  ;;  %v10778_v63 = vld [vmem:[#allocation220_spill] sm:$0xff]  ;;  %v10783_v61 = vld [vmem:[#allocation26_spill] sm:$0xff] }
 0xc2d   : > { %10774 = vst [vmem:[#allocation74_spill] sm:$0xff] %v7619_v27  ;;  %v217_v48 = vadd.f32 %v10776_v54, %v98_v4  ;;  %2730 = vrot.lane.b32.xlu0 %v2696_v38, %s5172_s16  ;;  %v1685_v15 = vsel %vm10779_vm7, %v10778_v63, %v10777_v23  ;;  %v10780_v10 = vld [vmem:[#allocation271_spill] sm:$0xff]  ;;  %v1254_v21 = vadd.f32 %v1226_v43, %v1139_v28  ;;  %v10784_v49 = vld [vmem:[#allocation20_spill] sm:$0xff]  ;;  %v10786_v38 = vld [vmem:[#allocation133_spill] sm:$0xff] }
 0xc2e   : > { %v218_v46 = vadd.f32 %v10780_v10, %v99_v62  ;;  %v10781_v14 = vld [vmem:[#allocation43_spill] sm:$0xff]  ;;  %v321_v39 = vadd.f32 %v10783_v61, %v216_v35  ;;  %v328_v26 = vadd.f32 %v10784_v49, %v223_v44  ;;  %v1713_v4 = vadd.f32 %v1685_v15, %v1598_v17  ;;  %v7638_v0 = vpop.permute.xlu1 %2614  ;;  %v10789_v62 = vld [vmem:[#allocation21_spill] sm:$0xff]  ;;  %v10790_v43 = vld [vmem:[#allocation206_spill] sm:$0xff]  ;;  %v7660_v15 = vpop.permute.xlu0 %2612 }
 0xc2f   : > { %v330_v40 = vadd.f32 %v10781_v14, %v225_v2  ;;  %v10782_v33 = vld [vmem:[#allocation131_spill] sm:$0xff]  ;;  %10785 = vst [vmem:[#allocation72_spill] sm:$0xff] %v7638_v0  ;;  %v7643_v20 = vsel %vm1454_vm15, %v10787_v29, %v10786_v38  ;;  %v329_v42 = vadd.f32 %v10789_v62, %v224_v36  ;;  %v1375_v2 = vadd.f32 %v1347_v30, %v1260_v9  ;;  %v10794_v35 = vld [vmem:[#allocation134_spill] sm:$0xff]  ;;  %v10797_v36 = vld [vmem:[#allocation168_spill] sm:$0xff] }
 0xc30   : > { %v1456_v34 = vsel %vm1454_vm15, %v10748_v8, %v10782_v33  ;;  %10788 = vst [vmem:[#allocation13_spill] sm:$0xff] %v7643_v20  ;;  %v1376_v28 = vadd.f32 %v1348_v22, %v1261_v16  ;;  %v7649_v8 = vsel %vm1454_vm15, %v10782_v33, %v10790_v43  ;;  %v7654_v44 = vsel %vm1454_vm15, %v10790_v43, %v10787_v29  ;;  %v10793_v17 = vld [vmem:[#allocation207_spill] sm:$0xff]  ;;  %v10798_v16 = vld [vmem:[#allocation230_spill] sm:$0xff]  ;;  %v7667_v61 = vpop.permute.xlu2 %2722 }
 0xc31   : > { %10791 = vst [vmem:[#allocation68_spill] sm:$0xff] %v7649_v8  ;;  %v1462_v52 = vsel %vm1454_vm15, %v10794_v35, %v10793_v17  ;;  %v10795_v54 = vld [vmem:[#allocation19_spill] sm:$0xff]  ;;  %v1800_v30 = vsel %vm10799_vm12, %v10798_v16, %v10797_v36  ;;  %v10800_v9 = vld [vmem:[#allocation18_spill] sm:$0xff]  ;;  %v1369_v33 = vadd.f32 %v1341_v5, %v1254_v21  ;;  %v10809_v21 = vld [vmem:[#allocation208_spill] sm:$0xff] }
 0xc32   : > { %10792 = vst [vmem:[#allocation76_spill] sm:$0xff] %v7654_v44  ;;  %v322_v63 = vadd.f32 %v10795_v54, %v217_v48  ;;  %v323_v22 = vadd.f32 %v10800_v9, %v218_v46  ;;  %v10801_v10 = vld [vmem:[#allocation34_spill] sm:$0xff]  ;;  %v10803_v49 = vld [vmem:[#allocation135_spill] sm:$0xff]  ;;  %v1828_v35 = vadd.f32 %v1800_v30, %v1713_v4  ;;  %v10806_v54 = vld [vmem:[#allocation137_spill] sm:$0xff] }
 0xc33   : > { %10796 = vst [vmem:[#allocation75_spill] sm:$0xff] %v7660_v15  ;;  %v435_v14 = vadd.f32 %v10801_v10, %v330_v40  ;;  %v1463_v38 = vsel %vm1454_vm15, %v10793_v17, %v10803_v49  ;;  %v10804_v29 = vld [vmem:[#allocation23_spill] sm:$0xff]  ;;  %v10805_v48 = vld [vmem:[#allocation46_spill] sm:$0xff]  ;;  %v7677_v16 = vsel %vm1454_vm15, %v10803_v49, %v10806_v54  ;;  %v1490_v40 = vadd.f32 %v1462_v52, %v1375_v2  ;;  %v10811_v17 = vld [vmem:[#allocation136_spill] sm:$0xff] }
 0xc34   : > { %10802 = vst [vmem:[#allocation67_spill] sm:$0xff] %v7667_v61  ;;  %v426_v62 = vadd.f32 %v10804_v29, %v321_v39  ;;  %v433_v43 = vadd.f32 %v10805_v48, %v328_v26  ;;  %v10808_v46 = vld [vmem:[#allocation22_spill] sm:$0xff]  ;;  %v1491_v5 = vadd.f32 %v1463_v38, %v1376_v28  ;;  %v7683_v10 = vsel %vm1454_vm15, %v10806_v54, %v10809_v21  ;;  %v10813_v26 = vld [vmem:[#allocation212_spill] sm:$0xff]  ;;  %v10814_v4 = vld [vmem:[#allocation143_spill] sm:$0xff] }
 0xc35   : > { %10807 = vst [vmem:[#allocation79_spill] sm:$0xff] %v7677_v16  ;;  %v434_v9 = vadd.f32 %v10808_v46, %v329_v42  ;;  %v7688_v39 = vsel %vm1454_vm15, %v10809_v21, %v10811_v17  ;;  %v1577_v30 = vsel %vm1569_vm1, %v10814_v4, %v10813_v26  ;;  %v10815_v49 = vld [vmem:[#allocation45_spill] sm:$0xff]  ;;  %v10816_v48 = vld [vmem:[#allocation190_spill] sm:$0xff]  ;;  %v10817_v42 = vld [vmem:[#allocation235_spill] sm:$0xff]  ;;  %v1484_v46 = vadd.f32 %v1456_v34, %v1369_v33 }
 0xc36   : > { %10810 = vst [vmem:[#allocation69_spill] sm:$0xff] %v7683_v10  ;;  %v427_v29 = vadd.f32 %v10815_v49, %v322_v63  ;;  %v1915_v2 = vsel %vm10818_vm13, %v10817_v42, %v10816_v48  ;;  %v10819_v28 = vld [vmem:[#allocation24_spill] sm:$0xff]  ;;  %v10820_v38 = vld [vmem:[#allocation30_spill] sm:$0xff]  ;;  %v10822_v17 = vld [vmem:[#allocation47_spill] sm:$0xff]  ;;  %v7704_v0 = vpop.permute.xlu1 %2600 }
 0xc37   : > { %10812 = vst [vmem:[#allocation70_spill] sm:$0xff] %v7688_v39  ;;  %v428_v52 = vadd.f32 %v10819_v28, %v323_v22  ;;  %v556_v54 = vadd.f32 %v10820_v38, %v435_v14  ;;  %v10821_v61 = vld [vmem:[#allocation144_spill] sm:$0xff]  ;;  %v547_v20 = vadd.f32 %v10822_v17, %v426_v62  ;;  %v10823_v44 = vld [vmem:[#allocation27_spill] sm:$0xff]  ;;  %v1943_v4 = vadd.f32 %v1915_v2, %v1828_v35  ;;  %v10826_v34 = vld [vmem:[#allocation142_spill] sm:$0xff]  ;;  %v7734_v39 = vpop.permute.xlu0 %2598 }
 0xc38   : > { %v1578_v21 = vsel %vm1569_vm1, %v10813_v26, %v10821_v61  ;;  %v554_v15 = vadd.f32 %v10823_v44, %v433_v43  ;;  %v10824_v63 = vld [vmem:[#allocation140_spill] sm:$0xff]  ;;  %v1605_v28 = vadd.f32 %v1577_v30, %v1490_v40  ;;  %v10827_v33 = vld [vmem:[#allocation141_spill] sm:$0xff]  ;;  %v10829_v26 = vld [vmem:[#allocation211_spill] sm:$0xff] }
 0xc39   : > { %v1571_v49 = vsel %vm1569_vm1, %v10765_v19, %v10824_v63  ;;  %v10825_v42 = vld [vmem:[#allocation48_spill] sm:$0xff]  ;;  %v1606_v14 = vadd.f32 %v1578_v21, %v1491_v5  ;;  %v7713_v38 = vsel %vm1569_vm1, %v10827_v33, %v10826_v34  ;;  %v7718_v44 = vsel %vm1569_vm1, %v10824_v63, %v10829_v26  ;;  %v10831_v62 = vld [vmem:[#allocation227_spill] sm:$0xff]  ;;  %v10835_v17 = vld [vmem:[#allocation213_spill] sm:$0xff] }
 0xc3a   : > { %v555_v22 = vadd.f32 %v10825_v42, %v434_v9  ;;  %10828 = vst [vmem:[#allocation77_spill] sm:$0xff] %v7713_v38  ;;  %v10832_v43 = vld [vmem:[#allocation155_spill] sm:$0xff]  ;;  %v10834_v2 = vld [vmem:[#allocation28_spill] sm:$0xff]  ;;  %v10836_v9 = vld [vmem:[#allocation249_spill] sm:$0xff]  ;;  %v1599_v34 = vadd.f32 %v1571_v49, %v1484_v46  ;;  %v7742_v49 = vpop.permute.xlu2 %2414 }
 0xc3b   : > { %10830 = vst [vmem:[#allocation71_spill] sm:$0xff] %v7718_v44  ;;  %v1692_v35 = vsel %vm10833_vm9, %v10832_v43, %v10831_v62  ;;  %v548_v19 = vadd.f32 %v10834_v2, %v427_v29  ;;  %v2030_v40 = vsel %vm2029_vm3, %v10836_v9, %v10835_v17  ;;  %v10837_v5 = vld [vmem:[#allocation50_spill] sm:$0xff]  ;;  %v10838_v21 = vld [vmem:[#allocation33_spill] sm:$0xff]  ;;  %v10839_v38 = vld [vmem:[#allocation156_spill] sm:$0xff]  ;;  %v7739_v29 = vsel %vm1569_vm1, %v10829_v26, %v10827_v33 }
 0xc3c   : > { %v549_v30 = vadd.f32 %v10837_v5, %v428_v52  ;;  %v689_v42 = vadd.f32 %v10838_v21, %v556_v54  ;;  %v1693_v63 = vsel %vm10840_vm8, %v10831_v62, %v10839_v38  ;;  %v10841_v44 = vld [vmem:[#allocation31_spill] sm:$0xff]  ;;  %v2058_v43 = vadd.f32 %v2030_v40, %v1943_v4  ;;  %10843 = vst [vmem:[#allocation78_spill] sm:$0xff] %v7739_v29  ;;  %v10846_v9 = vld [vmem:[#allocation146_spill] sm:$0xff]  ;;  %v10849_v4 = vld [vmem:[#allocation232_spill] sm:$0xff] }
 0xc3d   : > { %v680_v8 = vadd.f32 %v10841_v44, %v547_v20  ;;  %v10842_v10 = vld [vmem:[#allocation35_spill] sm:$0xff]  ;;  %v1720_v54 = vadd.f32 %v1692_v35, %v1605_v28  ;;  %v1721_v46 = vadd.f32 %v1693_v63, %v1606_v14  ;;  %10845 = vst [vmem:[#allocation73_spill] sm:$0xff] %v7742_v49  ;;  %v7747_v20 = vsel %vm1569_vm1, %v10821_v61, %v10846_v9  ;;  %v10850_v44 = vld [vmem:[#allocation173_spill] sm:$0xff]  ;;  %v10851_v26 = vld [vmem:[#allocation32_spill] sm:$0xff] }
 0xc3e   : > { %v687_v16 = vadd.f32 %v10842_v10, %v554_v15  ;;  %v10844_v52 = vld [vmem:[#allocation55_spill] sm:$0xff]  ;;  %10847 = vst [vmem:[#allocation88_spill] sm:$0xff] %v7747_v20  ;;  %v10848_v15 = vld [vmem:[#allocation152_spill] sm:$0xff]  ;;  %v1807_v33 = vsel %vm10799_vm12, %v10850_v44, %v10849_v4  ;;  %v681_v62 = vadd.f32 %v10851_v26, %v548_v19  ;;  %v10854_v35 = vld [vmem:[#allocation49_spill] sm:$0xff]  ;;  %v7766_v27 = vpop.permute.xlu1 %2734  ;;  %vm10867_vm8 = vcmask 252928  }
 0xc3f   : > { %v688_v2 = vadd.f32 %v10844_v52, %v555_v22  ;;  %v1686_v10 = vsel %vm10779_vm7, %v10777_v23, %v10848_v15  ;;  %v10852_v22 = vld [vmem:[#allocation237_spill] sm:$0xff]  ;;  %v10853_v28 = vld [vmem:[#allocation255_spill] sm:$0xff]  ;;  %v682_v40 = vadd.f32 %v10854_v35, %v549_v30  ;;  %v10855_v5 = vld [vmem:[#allocation38_spill] sm:$0xff] }
 0xc40   : > { %v2145_v14 = vsel %vm2144_vm2, %v10853_v28, %v10852_v22  ;;  %v804_v21 = vadd.f32 %v10855_v5, %v689_v42  ;;  %v1714_v61 = vadd.f32 %v1686_v10, %v1599_v34  ;;  %v10856_v63 = vld [vmem:[#allocation174_spill] sm:$0xff]  ;;  %vm10857_vm13 = vmmov %vm10799_vm12  ;;  %v10858_v23 = vld [vmem:[#allocation44_spill] sm:$0xff]  ;;  %v1835_v42 = vadd.f32 %v1807_v33, %v1720_v54 }
 0xc41   : > { %v1808_v52 = vsel %vm10857_vm13, %v10849_v4, %v10856_v63  ;;  %v795_v49 = vadd.f32 %v10858_v23, %v680_v8  ;;  %v10859_v29 = vld [vmem:[#allocation39_spill] sm:$0xff]  ;;  %v2173_v44 = vadd.f32 %v2145_v14, %v2058_v43  ;;  %v10862_v10 = vld [vmem:[#allocation145_spill] sm:$0xff]  ;;  %vm10864_vm9 = vmmov %vm10799_vm12  ;;  %vm10876_vm12 = vcmask 490496  }
 0xc42   : > { %v802_v20 = vadd.f32 %v10859_v29, %v687_v16  ;;  %v10860_v19 = vld [vmem:[#allocation215_spill] sm:$0xff]  ;;  %v1836_v34 = vadd.f32 %v1808_v52, %v1721_v46  ;;  %v10863_v8 = vld [vmem:[#allocation169_spill] sm:$0xff]  ;;  %v10865_v43 = vld [vmem:[#allocation240_spill] sm:$0xff]  ;;  %v919_v52 = vadd.f32 %v7398_v11, %v804_v21 }
 0xc43   : > { %v7771_v26 = vsel %vm1569_vm1, %v10846_v9, %v10860_v19  ;;  %v10861_v30 = vld [vmem:[#allocation51_spill] sm:$0xff]  ;;  %v7777_v4 = vsel %vm1569_vm1, %v10860_v19, %v10862_v10  ;;  %v1801_v16 = vsel %vm10864_vm9, %v10797_v36, %v10863_v8  ;;  %v10866_v29 = vld [vmem:[#allocation197_spill] sm:$0xff]  ;;  %v10869_v5 = vld [vmem:[#allocation264_spill] sm:$0xff]  ;;  %v910_v36 = vadd.f32 %v7301_v50, %v795_v49 }
 0xc44   : > { %v803_v28 = vadd.f32 %v10861_v30, %v688_v2  ;;  %v1922_v14 = vsel %vm10867_vm8, %v10866_v29, %v10865_v43  ;;  %v10868_v35 = vld [vmem:[#allocation37_spill] sm:$0xff]  ;;  %v10870_v23 = vld [vmem:[#allocation260_spill] sm:$0xff]  ;;  %v1829_v33 = vadd.f32 %v1801_v16, %v1714_v61  ;;  %v10872_v19 = vld [vmem:[#allocation198_spill] sm:$0xff]  ;;  %v917_v29 = vadd.f32 %v7321_v12, %v802_v20 }
 0xc45   : > { %v796_v9 = vadd.f32 %v10868_v35, %v681_v62  ;;  %v2260_v2 = vsel %vm2259_vm0, %v10870_v23, %v10869_v5  ;;  %v10871_v54 = vld [vmem:[#allocation36_spill] sm:$0xff]  ;;  %vm10873_vm7 = vmmov %vm10867_vm8  ;;  %v10874_v63 = vld [vmem:[#allocation154_spill] sm:$0xff]  ;;  %v1950_v23 = vadd.f32 %v1922_v14, %v1835_v42  ;;  %v1034_v14 = vadd.f32 %v7451_v55, %v919_v52 }
 0xc46   : > { %v797_v46 = vadd.f32 %v10871_v54, %v682_v40  ;;  %v1923_v30 = vsel %vm10873_vm7, %v10865_v43, %v10872_v19  ;;  %v2288_v10 = vadd.f32 %v2260_v2, %v2173_v44  ;;  %v10875_v62 = vld [vmem:[#allocation153_spill] sm:$0xff]  ;;  %v918_v40 = vadd.f32 %v7379_v1, %v803_v28  ;;  %v10877_v61 = vld [vmem:[#allocation224_spill] sm:$0xff]  ;;  %vm10878_vm13 = vmmov %vm10876_vm12 }
 0xc47   : > { %v7799_v35 = vsel %vm10876_vm12, %v10875_v62, %v10874_v63  ;;  %v1951_v8 = vadd.f32 %v1923_v30, %v1836_v34  ;;  %v7805_v11 = vsel %vm10878_vm13, %v10848_v15, %v10877_v61  ;;  %v10879_v21 = vld [vmem:[#allocation191_spill] sm:$0xff]  ;;  %vm10880_vm9 = vmmov %vm10873_vm7  ;;  %v911_v12 = vadd.f32 %v7311_v24, %v796_v9  ;;  %v10881_v49 = vld [vmem:[#allocation277_spill] sm:$0xff]  ;;  %v7813_v63 = vpop.permute.xlu0 %2732  ;;  %v7819_v15 = vpop.permute.xlu2 %2516 }
 0xc48   : > { %v1916_v50 = vsel %vm10880_vm9, %v10816_v48, %v10879_v21  ;;  %v10882_v20 = vld [vmem:[#allocation270_spill] sm:$0xff]  ;;  %v10883_v42 = vld [vmem:[#allocation252_spill] sm:$0xff]  ;;  %v10884_v34 = vld [vmem:[#allocation221_spill] sm:$0xff]  ;;  %v7825_v9 = vpop.permute.xlu1 %2720  ;;  %v1032_v54 = vadd.f32 %v7427_v59, %v917_v29  ;;  %v1025_v30 = vadd.f32 %v7413_v6, %v910_v36  ;;  %v1033_v55 = vadd.f32 %v7446_v31, %v918_v40 }
 0xc49   : > { %v2326_v44 = vmul.f32 %v10882_v20, %v10881_v49  ;;  %v2037_v1 = vsel %vm2029_vm3, %v10884_v34, %v10883_v42  ;;  %v10885_v28 = vld [vmem:[#allocation40_spill] sm:$0xff]  ;;  %v1944_v43 = vadd.f32 %v1916_v50, %v1829_v33  ;;  %v10886_v2 = vld [vmem:[#allocation222_spill] sm:$0xff]  ;;  %vm10887_vm8 = vmmov %vm10876_vm12  ;;  %v1026_v36 = vadd.f32 %v7418_v47, %v911_v12 }
 0xc4a   : > { %v912_v16 = vadd.f32 %v10885_v28, %v797_v46  ;;  %v2038_v24 = vsel %vm2029_vm3, %v10883_v42, %v10886_v2  ;;  %v7832_v46 = vsel %vm10887_vm8, %v10877_v61, %v10875_v62  ;;  %v2065_v33 = vadd.f32 %v2037_v1, %v1950_v23  ;;  %v10888_v52 = vld [vmem:[#allocation214_spill] sm:$0xff]  ;;  %v10891_v59 = vld [vmem:[#allocation287_spill] sm:$0xff]  ;;  %v10892_v29 = vld [vmem:[#allocation285_spill] sm:$0xff] }
 0xc4b   : > { %v2340_v48 = vadd.f32 %v2326_v44, %v2288_v10  ;;  %v2066_v50 = vadd.f32 %v2038_v24, %v1951_v8  ;;  %v2031_v42 = vsel %vm2029_vm3, %v10835_v17, %v10888_v52  ;;  %v10889_v10 = vld [vmem:[#allocation257_spill] sm:$0xff]  ;;  %v10890_v44 = vld [vmem:[#allocation244_spill] sm:$0xff]  ;;  %v2418_v6 = vsel %vm187_vm4, %v10892_v29, %v10891_v59  ;;  %vm10895_vm7 = vmmov %vm10887_vm8 }
 0xc4c   : > { %v2152_v34 = vsel %vm2144_vm2, %v10890_v44, %v10889_v10  ;;  %v2059_v62 = vadd.f32 %v2031_v42, %v1944_v43  ;;  %v2522_v8 = vsel %vm292_vm5, %v7570_v60, %v7572_v56  ;;  %v1149_v31 = vadd.f32 %v7505_v25, %v1034_v14  ;;  %v10893_v17 = vld [vmem:[#allocation245_spill] sm:$0xff]  ;;  %v10894_v25 = vld [vmem:[#allocation158_spill] sm:$0xff]  ;;  %v10897_v14 = vld [vmem:[#allocation263_spill] sm:$0xff] }
 0xc4d   : > { %v1027_v23 = vadd.f32 %v7406_v41, %v912_v16  ;;  %v2153_v40 = vsel %vm2144_vm2, %v10889_v10, %v10893_v17  ;;  %v2444_v61 = vadd.f32 %v2418_v6, %v2340_v48  ;;  %v1147_v1 = vadd.f32 %v7481_v45, %v1032_v54  ;;  %v10896_v16 = vld [vmem:[#allocation238_spill] sm:$0xff]  ;;  %v10898_v48 = vld [vmem:[#allocation281_spill] sm:$0xff]  ;;  %v10901_v29 = vld [vmem:[#allocation279_spill] sm:$0xff] }
 0xc4e   : > { %v1140_v28 = vadd.f32 %v7471_v13, %v1025_v30  ;;  %v2180_v24 = vadd.f32 %v2152_v34, %v2065_v33  ;;  %v2181_v47 = vadd.f32 %v2153_v40, %v2066_v50  ;;  %v2626_v12 = vsel %vm397_vm6, %v7734_v39, %v7704_v0  ;;  %v10899_v33 = vld [vmem:[#allocation274_spill] sm:$0xff] }
 0xc4f   : > { %v1148_v60 = vadd.f32 %v7500_v51, %v1033_v55  ;;  %v7862_v41 = vsel %vm10895_vm7, %v10839_v38, %v10894_v25  ;;  %v2146_v43 = vsel %vm2144_vm2, %v10852_v22, %v10896_v16  ;;  %v2548_v45 = vadd.f32 %v2522_v8, %v2444_v61  ;;  %v2719_v55 = vpop.permute.xlu0 %2718  ;;  %v10904_v61 = vld [vmem:[#allocation59_spill] sm:$0xff] }
 0xc50   : > { %v1141_v13 = vadd.f32 %v7476_v37, %v1026_v36  ;;  %v2267_v54 = vsel %vm2259_vm0, %v10898_v48, %v10897_v14  ;;  %v2174_v30 = vadd.f32 %v2146_v43, %v2059_v62  ;;  %v1264_v39 = vadd.f32 %v7555_v32, %v1149_v31  ;;  %v7876_v42 = vpop.permute.xlu1 %2412  ;;  %v7882_v32 = vpop.permute.xlu2 %2788  ;;  %v10902_v36 = vld [vmem:[#allocation284_spill] sm:$0xff]  ;;  %v10910_v48 = vld [vmem:[#allocation29_spill] sm:$0xff] }
 0xc51   : > { %v1142_v51 = vadd.f32 %v7461_v7, %v1027_v23  ;;  %v2268_v38 = vsel %vm2259_vm0, %v10897_v14, %v10899_v33  ;;  %v2652_v50 = vadd.f32 %v2626_v12, %v2548_v45  ;;  %v1262_v22 = vadd.f32 %v7536_v18, %v1147_v1  ;;  %v10908_v45 = vld [vmem:[#allocation60_spill] sm:$0xff]  ;;  %v10909_v14 = vld [vmem:[#allocation66_spill] sm:$0xff] }
 0xc52   : > { %v1255_v37 = vadd.f32 %v7518_v3, %v1140_v28  ;;  %v2295_v10 = vadd.f32 %v2267_v54, %v2180_v24  ;;  %v2296_v44 = vadd.f32 %v2268_v38, %v2181_v47  ;;  %vm10900_vm12 = vcmask 1014784   ;;  %v10903_v3 = vld [vmem:[#allocation269_spill] sm:$0xff]  ;;  %v10905_v28 = vld [vmem:[#allocation58_spill] sm:$0xff] }
 0xc53   : > { %v2746_v34 = vsel %vm10900_vm12, %v2719_v55, %v7825_v9  ;;  %v1263_v7 = vadd.f32 %v7548_v58, %v1148_v60  ;;  %v2261_v6 = vsel %vm2259_vm0, %v10869_v5, %v10901_v29  ;;  %v2333_v62 = vmul.f32 %v10882_v20, %v10902_v36  ;;  %v10906_v47 = vld [vmem:[#allocation10_spill] sm:$0xff]  ;;  %vm10930_vm13 = vmmov %vm10900_vm12 }
 0xc54   : > { %v2772_v8 = vadd.f32 %v2746_v34, %v2652_v50  ;;  %v1256_v18 = vadd.f32 %v7527_v57, %v1141_v13  ;;  %v2334_v31 = vmul.f32 %v10903_v3, %v10902_v36  ;;  %v2289_v23 = vadd.f32 %v2261_v6, %v2174_v30  ;;  %v10907_v57 = vld [vmem:[#allocation74_spill] sm:$0xff]  ;;  %v10913_v50 = vld [vmem:[#allocation288_spill] sm:$0xff]  ;;  %vm10931_vm9 = vmmov %vm10900_vm12 }
 0xc55   : > { %v1379_v40 = vadd.f32 %v7624_v53, %v1264_v39  ;;  %v1257_v1 = vadd.f32 %v10904_v61, %v1142_v51  ;;  %v2327_v58 = vmul.f32 %v10903_v3, %v10881_v49  ;;  %v1377_v24 = vadd.f32 %v10905_v28, %v1262_v22  ;;  %v10911_v54 = vld [vmem:[#allocation54_spill] sm:$0xff]  ;;  %v10912_v51 = vld [vmem:[#allocation65_spill] sm:$0xff]  ;;  %v10915_v34 = vld [vmem:[#allocation56_spill] sm:$0xff] }
 0xc56   : > { %v2796_v5 = vadd.f32 %v7882_v32, %v2772_v8  ;;  %v10225_v20 = vperm.slane %v10906_v47, 0  ;;  %v2347_v12 = vadd.f32 %v2333_v62, %v2295_v10  ;;  %v2348_v60 = vadd.f32 %v2334_v31, %v2296_v44  ;;  %v10914_v10 = vld [vmem:[#allocation70_spill] sm:$0xff]  ;;  %v10919_v31 = vld [vmem:[#allocation79_spill] sm:$0xff]  ;;  %vm10934_vm8 = vmmov %vm10931_vm9 }
 0xc57   : > { %v1378_v43 = vadd.f32 %v10907_v57, %v1263_v7  ;;  %v1370_v13 = vadd.f32 %v10908_v45, %v1255_v37  ;;  %v2424_v53 = vsel %vm187_vm4, %v10910_v48, %v10909_v14  ;;  %v2425_v30 = vsel %vm187_vm4, %v10909_v14, %v10911_v54  ;;  %v10916_v7 = vld [vmem:[#allocation57_spill] sm:$0xff]  ;;  %v10917_v6 = vld [vmem:[#allocation62_spill] sm:$0xff]  ;;  %vm10940_vm12 = vmmov %vm10895_vm7 }
 0xc58   : > { %v2810_v39 = vmax.f32 %v2796_v5, 0.0  ;;  %v1371_v38 = vadd.f32 %v10912_v51, %v1256_v18  ;;  %v2419_v55 = vsel %vm187_vm4, %v10891_v59, %v10913_v50  ;;  %v2341_v22 = vadd.f32 %v2327_v58, %v2289_v23  ;;  %v10918_v8 = vld [vmem:[#allocation42_spill] sm:$0xff]  ;;  %v7921_v18 = vpop.permute.xlu0 %2410  ;;  %v7925_v23 = vpop.permute.xlu1 %2514  ;;  %v10921_v5 = vld [vmem:[#allocation68_spill] sm:$0xff]  ;;  %v10922_v45 = vld [vmem:[#allocation41_spill] sm:$0xff] }
 0xc59   : > { %v1494_v44 = vadd.f32 %v10914_v10, %v1379_v40  ;;  %v1372_v37 = vadd.f32 %v10915_v34, %v1257_v1  ;;  %v2528_v62 = vsel %vm292_vm5, %v10917_v6, %v10916_v7  ;;  %v2529_v3 = vsel %vm292_vm5, %v10916_v7, %v10918_v8  ;;  %v10920_v1 = vld [vmem:[#allocation69_spill] sm:$0xff]  ;;  %v10924_v51 = vld [vmem:[#allocation72_spill] sm:$0xff]  ;;  %v10925_v10 = vld [vmem:[#allocation75_spill] sm:$0xff] }
 0xc5a   : > { %v1492_v61 = vadd.f32 %v10919_v31, %v1377_v24  ;;  %v2839_v59 = vmul.f32 %v10225_v20, %v2810_v39  ;;  %v2451_v40 = vadd.f32 %v2424_v53, %v2347_v12  ;;  %v2452_v58 = vadd.f32 %v2425_v30, %v2348_v60  ;;  %v10923_v48 = vld [vmem:[#allocation61_spill] sm:$0xff]  ;;  %v10926_v12 = vld [vmem:[#allocation76_spill] sm:$0xff]  ;;  %v7940_v30 = vpop.permute.xlu2 %2504  ;;  %v10928_v7 = vld [vmem:[#allocation63_spill] sm:$0xff] }
 0xc5b   : > { %v1493_v28 = vadd.f32 %v10920_v1, %v1378_v43  ;;  %v1485_v57 = vadd.f32 %v10921_v5, %v1370_v13  ;;  %v2523_v14 = vsel %vm292_vm5, %v7572_v56, %v10922_v45  ;;  %v2633_v24 = vsel %vm397_vm6, %v10924_v51, %v10923_v48  ;;  %v10927_v34 = vld [vmem:[#allocation13_spill] sm:$0xff]  ;;  %v10929_v31 = vld [vmem:[#allocation64_spill] sm:$0xff]  ;;  %v10935_v5 = vld [vmem:[#allocation71_spill] sm:$0xff] }
 0xc5c   : > { %v2632_v39 = vsel %vm397_vm6, %v10925_v10, %v10924_v51  ;;  %2867 = vrot.lane.b32.xlu0 %v2839_v59, %s5208_s13  ;;  %v1486_v60 = vadd.f32 %v10926_v12, %v1371_v38  ;;  %v2555_v43 = vadd.f32 %v2528_v62, %v2451_v40  ;;  %v2556_v53 = vadd.f32 %v2529_v3, %v2452_v58  ;;  %v10932_v3 = vld [vmem:[#allocation88_spill] sm:$0xff]  ;;  %v10936_v10 = vld [vmem:[#allocation78_spill] sm:$0xff] }
 0xc5d   : > { %v2445_v13 = vadd.f32 %v2419_v55, %v2341_v22  ;;  %v1487_v56 = vadd.f32 %v10927_v34, %v1372_v37  ;;  %v2627_v6 = vsel %vm397_vm6, %v7704_v0, %v10928_v7  ;;  %v2753_v1 = vsel %vm10930_vm13, %v7766_v27, %v10929_v31  ;;  %v10933_v37 = vld [vmem:[#allocation67_spill] sm:$0xff] }
 0xc5e   : > { %v2752_v59 = vsel %vm10931_vm9, %v7813_v63, %v7766_v27  ;;  %v1609_v38 = vadd.f32 %v7777_v4, %v1494_v44  ;;  %v2660_v55 = vadd.f32 %v2633_v24, %v2556_v53  ;;  %v2659_v22 = vadd.f32 %v2632_v39, %v2555_v43  ;;  %v10937_v63 = vld [vmem:[#allocation77_spill] sm:$0xff]  ;;  %v10938_v44 = vld [vmem:[#allocation228_spill] sm:$0xff]  ;;  %v10942_v39 = vld [vmem:[#allocation170_spill] sm:$0xff] }
 0xc5f   : > { %v2549_v62 = vadd.f32 %v2523_v14, %v2445_v13  ;;  %v1607_v40 = vadd.f32 %v10932_v3, %v1492_v61  ;;  %v2747_v58 = vsel %vm10934_vm8, %v7825_v9, %v10933_v37  ;;  %v1608_v0 = vadd.f32 %v7771_v26, %v1493_v28  ;;  %v10939_v61 = vld [vmem:[#allocation157_spill] sm:$0xff]  ;;  %v10941_v9 = vld [vmem:[#allocation171_spill] sm:$0xff] }
 0xc60   : > { %v1600_v51 = vadd.f32 %v10935_v5, %v1485_v57  ;;  %v1601_v12 = vadd.f32 %v10936_v10, %v1486_v60  ;;  %v2780_v20 = vadd.f32 %v2753_v1, %v2660_v55  ;;  %v2779_v27 = vadd.f32 %v2752_v59, %v2659_v22  ;;  %v10944_v28 = vld [vmem:[#allocation231_spill] sm:$0xff]  ;;  %v10945_v57 = vld [vmem:[#allocation169_spill] sm:$0xff]  ;;  %v7973_v43 = vpop.permute.xlu0 %2793  ;;  %v7975_v53 = vpop.permute.xlu1 %2518 }
 0xc61   : > { %v2653_v34 = vadd.f32 %v2627_v6, %v2549_v62  ;;  %v1602_v4 = vadd.f32 %v10937_v63, %v1487_v56  ;;  %v1695_v14 = vsel %vm10895_vm7, %v10894_v25, %v10938_v44  ;;  %v1696_v24 = vsel %vm10940_vm12, %v10938_v44, %v10939_v61 }
 0xc62   : > { %vm10943_vm13 = vcmask 261120   ;;  %v1724_v56 = vadd.f32 %v1696_v24, %v1609_v38  ;;  %v2803_v25 = vadd.f32 %v7973_v43, %v2779_v27  ;;  %v2804_v6 = vadd.f32 %v7973_v43, %v2780_v20 }
 0xc63   : > { %v1804_v26 = vsel %vm10943_vm13, %v10942_v39, %v10941_v9  ;;  %vm10946_vm9 = vmmov %vm10943_vm13  ;;  %v2773_v13 = vadd.f32 %v2747_v58, %v2653_v34  ;;  %v1722_v1 = vadd.f32 %v7862_v41, %v1607_v40  ;;  %v1723_v59 = vadd.f32 %v1695_v14, %v1608_v0  ;;  %v10948_v58 = vld [vmem:[#allocation177_spill] sm:$0xff]  ;;  %v10949_v34 = vld [vmem:[#allocation174_spill] sm:$0xff] }
 0xc64   : > { %v1802_v60 = vsel %vm10946_vm9, %v10945_v57, %v10944_v28  ;;  %v1715_v62 = vadd.f32 %v7805_v11, %v1600_v51  ;;  %v1716_v55 = vadd.f32 %v7832_v46, %v1601_v12  ;;  %v2817_v22 = vmax.f32 %v2803_v25, 0.0  ;;  %vm10947_vm8 = vmmov %vm10946_vm9  ;;  %v10951_v41 = vld [vmem:[#allocation233_spill] sm:$0xff]  ;;  %v10953_v40 = vld [vmem:[#allocation176_spill] sm:$0xff]  ;;  %v7996_v51 = vpop.permute.xlu2 %2622 }
 0xc65   : > { %v2818_v3 = vmax.f32 %v2804_v6, 0.0  ;;  %v2826_v5 = vperm.slane %v10906_v47, 1  ;;  %v1717_v10 = vadd.f32 %v7799_v35, %v1602_v4  ;;  %v1803_v38 = vsel %vm10947_vm8, %v10944_v28, %v10942_v39  ;;  %vm10950_vm7 = vmmov %vm10947_vm8  ;;  %v10956_v9 = vld [vmem:[#allocation194_spill] sm:$0xff]  ;;  %v10957_v39 = vld [vmem:[#allocation193_spill] sm:$0xff] }
 0xc66   : > { %v1809_v20 = vsel %vm10950_vm7, %v10949_v34, %v10948_v58  ;;  %vm10952_vm12 = vmmov %vm10950_vm7  ;;  %v10955_v35 = vperm.slane %v10906_v47, 0  ;;  %v2797_v63 = vadd.f32 %v7882_v32, %v2773_v13  ;;  %v1830_v14 = vadd.f32 %v1802_v60, %v1715_v62  ;;  %v10959_v57 = vld [vmem:[#allocation236_spill] sm:$0xff]  ;;  %v10962_v25 = vld [vmem:[#allocation199_spill] sm:$0xff] }
 0xc67   : > { %v1810_v11 = vsel %vm10952_vm12, %v10948_v58, %v10951_v41  ;;  %vm10954_vm13 = vmmov %vm10950_vm7  ;;  %v2847_v27 = vmul.f32 %v2826_v5, %v2818_v3  ;;  %v1837_v4 = vadd.f32 %v1809_v20, %v1722_v1  ;;  %v1831_v61 = vadd.f32 %v1803_v38, %v1716_v55  ;;  %v10963_v60 = vld [vmem:[#allocation243_spill] sm:$0xff]  ;;  %v10968_v20 = vld [vmem:[#allocation217_spill] sm:$0xff] }
 0xc68   : > { %v1811_v46 = vsel %vm10954_vm13, %v10951_v41, %v10953_v40  ;;  %v2846_v12 = vmul.f32 %v10955_v35, %v2817_v22  ;;  %v1838_v44 = vadd.f32 %v1810_v11, %v1723_v59  ;;  %v1832_v24 = vadd.f32 %v1804_v26, %v1717_v10  ;;  %v8015_v1 = vpop.permute.xlu0 %2500  ;;  %v8017_v59 = vpop.permute.xlu1 %2502  ;;  %v10965_v26 = vld [vmem:[#allocation200_spill] sm:$0xff]  ;;  %v10970_v40 = vld [vmem:[#allocation251_spill] sm:$0xff] }
 0xc69   : > { %v1839_v0 = vadd.f32 %v1811_v46, %v1724_v56  ;;  %2883 = vrot.lane.b32.xlu2 %v2847_v27, %s5208_s13  ;;  %vm10958_vm9 = vcmask 252928   ;;  %v2811_v22 = vmax.f32 %v2797_v63, 0.0  ;;  %v10969_v41 = vld [vmem:[#allocation216_spill] sm:$0xff]  ;;  %v2032_v46 = vsel %vm2029_vm3, %v10888_v52, %v10970_v40  ;;  %v10971_v35 = vld [vmem:[#allocation223_spill] sm:$0xff]  ;;  %v10973_v27 = vld [vmem:[#allocation225_spill] sm:$0xff] }
 0xc6a   : > { %2881 = vrot.lane.b32.xlu1 %v2846_v12, %s5208_s13  ;;  %v1919_v28 = vsel %vm10958_vm9, %v10957_v39, %v10956_v9  ;;  %vm10960_vm8 = vmmov %vm10958_vm9  ;;  %v2034_v11 = vsel %vm2029_vm3, %v10969_v41, %v10968_v20  ;;  %v2039_v63 = vsel %vm2029_vm3, %v10886_v2, %v10973_v27  ;;  %v10976_v2 = vld [vmem:[#allocation256_spill] sm:$0xff] }
 0xc6b   : > { %v1917_v56 = vsel %vm10960_vm8, %v10879_v21, %v10959_v57  ;;  %vm10961_vm7 = vmmov %vm10960_vm8  ;;  %v1947_v34 = vadd.f32 %v1919_v28, %v1832_v24 }
 0xc6c   : > { %v1918_v13 = vsel %vm10961_vm7, %v10959_v57, %v10957_v39  ;;  %vm10964_vm12 = vmmov %vm10961_vm7  ;;  %v1945_v38 = vadd.f32 %v1917_v56, %v1830_v14  ;;  %v2840_v14 = vmul.f32 %v2826_v5, %v2811_v22  ;;  %v8043_v39 = vpop.permute.xlu2 %2608  ;;  %v10974_v57 = vld [vmem:[#allocation241_spill] sm:$0xff]  ;;  %v10975_v56 = vld [vmem:[#allocation239_spill] sm:$0xff] }
 0xc6d   : > { %v1926_v6 = vsel %vm10964_vm12, %v10963_v60, %v10962_v25  ;;  %vm10966_vm13 = vmmov %vm10961_vm7  ;;  %v1946_v58 = vadd.f32 %v1918_v13, %v1831_v61  ;;  %v2062_v28 = vadd.f32 %v2034_v11, %v1947_v34  ;;  %v2149_v13 = vsel %vm2144_vm2, %v10975_v56, %v10974_v57  ;;  %v10981_v11 = vld [vmem:[#allocation266_spill] sm:$0xff] }
 0xc6e   : > { %v1924_v62 = vsel %vm10966_vm13, %v10872_v19, %v10965_v26  ;;  %vm10967_vm9 = vmmov %vm10961_vm7  ;;  %v1954_v55 = vadd.f32 %v1926_v6, %v1839_v0  ;;  %v2033_v19 = vsel %vm2029_vm3, %v10970_v40, %v10969_v41  ;;  %v10972_v0 = vld [vmem:[#allocation253_spill] sm:$0xff]  ;;  %v2060_v24 = vadd.f32 %v2032_v46, %v1945_v38  ;;  %v10978_v6 = vld [vmem:[#allocation258_spill] sm:$0xff] }
 0xc6f   : > { %v1925_v21 = vsel %vm10967_vm9, %v10965_v26, %v10963_v60  ;;  %v1952_v3 = vadd.f32 %v1924_v62, %v1837_v4  ;;  %v2041_v12 = vsel %vm2029_vm3, %v10972_v0, %v10971_v35  ;;  %v2040_v4 = vsel %vm2029_vm3, %v10973_v27, %v10972_v0  ;;  %v10977_v60 = vld [vmem:[#allocation246_spill] sm:$0xff]  ;;  %v10980_v41 = vld [vmem:[#allocation280_spill] sm:$0xff]  ;;  %v10982_v46 = vld [vmem:[#allocation261_spill] sm:$0xff] }
 0xc70   : > { %v1953_v10 = vadd.f32 %v1925_v21, %v1838_v44  ;;  %v2069_v44 = vadd.f32 %v2041_v12, %v1954_v55  ;;  %v2061_v9 = vadd.f32 %v2033_v19, %v1946_v58  ;;  %v2147_v25 = vsel %vm2144_vm2, %v10896_v16, %v10976_v2  ;;  %v2619_v26 = vpop.permute.xlu0 %2618  ;;  %v2621_v62 = vpop.permute.xlu1 %2620  ;;  %v10979_v55 = vld [vmem:[#allocation248_spill] sm:$0xff]  ;;  %v10985_v27 = vld [vmem:[#allocation282_spill] sm:$0xff] }
 0xc71   : > { %v2067_v61 = vadd.f32 %v2039_v63, %v1952_v3  ;;  %v2156_v5 = vsel %vm2144_vm2, %v10978_v6, %v10977_v60  ;;  %v2148_v21 = vsel %vm2144_vm2, %v10976_v2, %v10975_v56  ;;  %v2154_v22 = vsel %vm2144_vm2, %v10893_v17, %v10979_v55  ;;  %v10983_v35 = vld [vmem:[#allocation276_spill] sm:$0xff]  ;;  %v10984_v17 = vld [vmem:[#allocation265_spill] sm:$0xff] }
 0xc72   : > { %v2068_v52 = vadd.f32 %v2040_v4, %v1953_v10  ;;  %2869 = vrot.lane.b32.xlu1 %v2840_v14, %s5208_s13  ;;  %v2155_v3 = vsel %vm2144_vm2, %v10979_v55, %v10978_v6  ;;  %v2184_v10 = vadd.f32 %v2156_v5, %v2069_v44  ;;  %v2175_v58 = vadd.f32 %v2147_v25, %v2060_v24  ;;  %v10986_v24 = vld [vmem:[#allocation272_spill] sm:$0xff]  ;;  %v10989_v55 = vld [vmem:[#allocation73_spill] sm:$0xff] }
 0xc73   : > { %v2182_v16 = vadd.f32 %v2154_v22, %v2067_v61  ;;  %v2176_v34 = vadd.f32 %v2148_v21, %v2061_v9  ;;  %v2177_v20 = vadd.f32 %v2149_v13, %v2062_v28  ;;  %v2264_v40 = vsel %vm2259_vm0, %v10981_v11, %v10980_v41  ;;  %v10987_v28 = vld [vmem:[#allocation273_spill] sm:$0xff] }
 0xc74   : > { %v2183_v38 = vadd.f32 %v2155_v3, %v2068_v52  ;;  %v2262_v19 = vsel %vm2259_vm0, %v10901_v29, %v10982_v46  ;;  %v2271_v0 = vsel %vm2259_vm0, %v10984_v17, %v10983_v35  ;;  %v2263_v12 = vsel %vm2259_vm0, %v10982_v46, %v10981_v11 }
 0xc75   : > { %v2269_v63 = vsel %vm2259_vm0, %v10899_v33, %v10985_v27  ;;  %v2270_v4 = vsel %vm2259_vm0, %v10985_v27, %v10984_v17  ;;  %v2299_v44 = vadd.f32 %v2271_v0, %v2184_v10  ;;  %v2290_v29 = vadd.f32 %v2262_v19, %v2175_v58  ;;  %v10988_v33 = vld [vmem:[#allocation268_spill] sm:$0xff]  ;;  %v10991_v17 = vld [vmem:[#allocation289_spill] sm:$0xff] }
 0xc76   : > { %v2297_v14 = vadd.f32 %v2269_v63, %v2182_v16  ;;  %v2298_v61 = vadd.f32 %v2270_v4, %v2183_v38  ;;  %v2291_v52 = vadd.f32 %v2263_v12, %v2176_v34  ;;  %v2337_v9 = vmul.f32 %v10986_v24, %v10902_v36  ;;  %v8103_v16 = vpop.permute.xlu2 %2742  ;;  %v10992_v12 = vld [vmem:[#allocation290_spill] sm:$0xff] }
 0xc77   : > { %v2328_v57 = vmul.f32 %v10987_v28, %v10881_v49  ;;  %v2292_v56 = vadd.f32 %v2264_v40, %v2177_v20  ;;  %v2335_v13 = vmul.f32 %v10987_v28, %v10902_v36  ;;  %v2336_v2 = vmul.f32 %v10988_v33, %v10902_v36 }
 0xc78   : > { %v2329_v25 = vmul.f32 %v10988_v33, %v10881_v49  ;;  %v2330_v60 = vmul.f32 %v10986_v24, %v10881_v49  ;;  %v2605_v6 = vpop.permute.xlu0 %2604  ;;  %v2607_v5 = vpop.permute.xlu1 %2606  ;;  %v2351_v21 = vadd.f32 %v2337_v9, %v2299_v44  ;;  %v2428_v22 = vsel %vm187_vm4, %v7876_v42, %v10989_v55 }
 0xc79   : > { %v2426_v3 = vsel %vm187_vm4, %v10911_v54, %v7921_v18  ;;  %v2427_v10 = vsel %vm187_vm4, %v7921_v18, %v7876_v42  ;;  %v2349_v38 = vadd.f32 %v2335_v13, %v2297_v14  ;;  %v2350_v58 = vadd.f32 %v2336_v2, %v2298_v61  ;;  %v10990_v42 = vld [vmem:[#allocation286_spill] sm:$0xff] }
 0xc7a   : > { %v2342_v34 = vadd.f32 %v2328_v57, %v2290_v29  ;;  %v2343_v20 = vadd.f32 %v2329_v25, %v2291_v52  ;;  %v2530_v41 = vsel %vm292_vm5, %v10918_v8, %v7925_v23  ;;  %v2531_v11 = vsel %vm292_vm5, %v7925_v23, %v7819_v15 }
 0xc7b   : > { %v2532_v54 = vsel %vm292_vm5, %v7819_v15, %v7975_v53  ;;  %v2344_v40 = vadd.f32 %v2330_v60, %v2292_v56  ;;  %v2420_v18 = vsel %vm187_vm4, %v10913_v50, %v10990_v42  ;;  %v2455_v46 = vadd.f32 %v2428_v22, %v2351_v21 }
 0xc7c   : > { %v2453_v19 = vadd.f32 %v2426_v3, %v2349_v38  ;;  %v2454_v35 = vadd.f32 %v2427_v10, %v2350_v58  ;;  %v2421_v8 = vsel %vm187_vm4, %v10990_v42, %v10991_v17  ;;  %v2634_v0 = vsel %vm397_vm6, %v10923_v48, %v2619_v26 }
 0xc7d   : > { %v2635_v23 = vsel %vm397_vm6, %v2619_v26, %v2621_v62  ;;  %v2636_v15 = vsel %vm397_vm6, %v2621_v62, %v7996_v51  ;;  %v2422_v27 = vsel %vm187_vm4, %v10991_v17, %v10992_v12  ;;  %v2559_v4 = vadd.f32 %v2532_v54, %v2455_v46 }
 0xc7e   : > { %v2557_v50 = vadd.f32 %v2530_v41, %v2453_v19  ;;  %v2558_v63 = vadd.f32 %v2531_v11, %v2454_v35  ;;  %v2446_v44 = vadd.f32 %v2420_v18, %v2342_v34  ;;  %v2447_v14 = vadd.f32 %v2421_v8, %v2343_v20  ;;  %v8144_v60 = vpop.permute.xlu2 %2728 }
 0xc7f   : > { %v2448_v61 = vadd.f32 %v2422_v27, %v2344_v40  ;;  %v2524_v29 = vsel %vm292_vm5, %v10922_v45, %v8015_v1  ;;  %v2663_v26 = vadd.f32 %v2636_v15, %v2559_v4  ;;  %v2525_v62 = vsel %vm292_vm5, %v8015_v1, %v8017_v59 }
 0xc80   : > { %v2661_v48 = vadd.f32 %v2634_v0, %v2557_v50  ;;  %v2662_v52 = vadd.f32 %v2635_v23, %v2558_v63  ;;  %v2739_v24 = vpop.permute.xlu0 %2738  ;;  %v2741_v9 = vpop.permute.xlu1 %2740  ;;  %vm10993_vm0 = vcmask 1014784   ;;  %v2526_v45 = vsel %vm292_vm5, %v8017_v59, %v7940_v30 }
 0xc81   : > { %v2754_v28 = vsel %vm10993_vm0, %v10929_v31, %v2739_v24  ;;  %vm10994_vm8 = vmmov %vm10993_vm0  ;;  %v2628_v25 = vsel %vm397_vm6, %v10928_v7, %v2605_v6  ;;  %v2827_v1 = vperm.slane %v10906_v47, 2  ;;  %v2828_v31 = vperm.slane %v10906_v47, 3 }
 0xc82   : > { %v2755_v57 = vsel %vm10994_vm8, %v2739_v24, %v2741_v9  ;;  %vm10995_vm7 = vmmov %vm10993_vm0  ;;  %v2781_v13 = vadd.f32 %v2754_v28, %v2661_v48  ;;  %v2829_v21 = vperm.slane %v10906_v47, 4  ;;  %v2629_v22 = vsel %vm397_vm6, %v2605_v6, %v2607_v5  ;;  %v11000_v48 = vld [vmem:[#allocation275_spill] sm:$0xff] }
 0xc83   : > { %v2756_v56 = vsel %vm10995_vm7, %v2741_v9, %v8103_v16  ;;  %v2782_v33 = vadd.f32 %v2755_v57, %v2662_v52  ;;  %v2550_v38 = vadd.f32 %v2524_v29, %v2446_v44  ;;  %v2551_v58 = vadd.f32 %v2525_v62, %v2447_v14  ;;  %vm10996_vm12 = vmmov %vm10993_vm0  ;;  %v11001_v57 = vld [vmem:[#allocation53_spill] sm:$0xff] }
 0xc84   : > { %v2783_v2 = vadd.f32 %v2756_v56, %v2663_v26  ;;  %v2805_v3 = vadd.f32 %v7973_v43, %v2781_v13  ;;  %v2630_v7 = vsel %vm397_vm6, %v2607_v5, %v8043_v39  ;;  %v2552_v34 = vadd.f32 %v2526_v45, %v2448_v61  ;;  %vm10997_vm13 = vmmov %vm10993_vm0  ;;  %v10999_v61 = vld [vmem:[#allocation278_spill] sm:$0xff]  ;;  %v11002_v13 = vld [vmem:[#allocation291_spill] sm:$0xff] }
 0xc85   : > { %v2806_v59 = vadd.f32 %v7973_v43, %v2782_v33  ;;  %v2654_v54 = vadd.f32 %v2628_v25, %v2550_v38  ;;  %v2655_v40 = vadd.f32 %v2629_v22, %v2551_v58  ;;  %vm10998_vm9 = vmmov %vm10993_vm0  ;;  %v2339_v29 = vmul.f32 %v10999_v61, %v10902_v36  ;;  %v11005_v58 = vld [vmem:[#allocation52_spill] sm:$0xff] }
 0xc86   : > { %v2807_v10 = vadd.f32 %v7973_v43, %v2783_v2  ;;  %v2819_v20 = vmax.f32 %v2805_v3, 0.0  ;;  %v2656_v42 = vadd.f32 %v2630_v7, %v2552_v34  ;;  %v2507_v63 = vpop.permute.xlu2 %2506  ;;  %v2338_v52 = vmul.f32 %v11000_v48, %v10902_v36  ;;  %v11004_v3 = vld [vmem:[#allocation196_spill] sm:$0xff] }
 0xc87   : > { %v2820_v41 = vmax.f32 %v2806_v59, 0.0  ;;  %v2353_v56 = vadd.f32 %v2339_v29, %v11001_v57  ;;  %v2332_v2 = vmul.f32 %v10999_v61, %v10881_v49  ;;  %v2423_v7 = vsel %vm187_vm4, %v10992_v12, %v11005_v58 }
 0xc88   : > { %v2821_v11 = vmax.f32 %v2807_v10, 0.0  ;;  %v2725_v18 = vpop.permute.xlu0 %2724  ;;  %v2848_v6 = vmul.f32 %v2827_v1, %v2819_v20  ;;  %v2727_v46 = vpop.permute.xlu1 %2726  ;;  %v2352_v33 = vadd.f32 %v2338_v52, %v11002_v13  ;;  %vm11007_vm8 = vcmask 539648  }
 0xc89   : > { %v2849_v19 = vmul.f32 %v2828_v31, %v2820_v41  ;;  %v2748_v17 = vsel %vm10996_vm12, %v10933_v37, %v2725_v18  ;;  %v2749_v8 = vsel %vm10997_vm13, %v2725_v18, %v2727_v46  ;;  %v2750_v5 = vsel %vm10998_vm9, %v2727_v46, %v8144_v60  ;;  %vm11008_vm7 = vmmov %vm11007_vm8 }
 0xc8a   : > { %v2850_v35 = vmul.f32 %v2829_v21, %v2821_v11  ;;  %v2774_v0 = vadd.f32 %v2748_v17, %v2654_v54  ;;  %2885 = vrot.lane.b32.xlu2 %v2848_v6, %s5208_s13  ;;  %v2775_v23 = vadd.f32 %v2749_v8, %v2655_v40  ;;  %v2776_v15 = vadd.f32 %v2750_v5, %v2656_v42  ;;  %vm11009_vm13 = vmmov %vm11008_vm7 }
 0xc8b   : > { %2887 = vrot.lane.b32.xlu0 %v2849_v19, %s5208_s13  ;;  %v2527_v41 = vsel %vm292_vm5, %v7940_v30, %v2507_v63  ;;  %v2831_v30 = vperm.slane %v10906_v47, 6  ;;  %v2830_v5 = vperm.slane %v10906_v47, 5  ;;  %vm3347_vm12 = vcmask 1045504   ;;  %vm11010_vm9 = vmmov %vm11008_vm7 }
 0xc8c   : > { %2889 = vrot.lane.b32.xlu1 %v2850_v35, %s5208_s13  ;;  %v2798_v27 = vadd.f32 %v7882_v32, %v2774_v0  ;;  %v2799_v50 = vadd.f32 %v7882_v32, %v2775_v23  ;;  %v2800_v37 = vadd.f32 %v7882_v32, %v2776_v15 }
 0xc8e   : > { %v2812_v4 = vmax.f32 %v2798_v27, 0.0  ;;  %v2813_v44 = vmax.f32 %v2799_v50, 0.0  ;;  %v2814_v14 = vmax.f32 %v2800_v37, 0.0  ;;  %v2745_v38 = vpop.permute.xlu2 %2744 }
 0xc8f   : > { %v2757_v18 = vsel %vm10993_vm0, %v8103_v16, %v2745_v38 }
 0xc90   : > { %v2417_v26 = vpop.permute.xlu0 %2416  ;;  %v2841_v24 = vmul.f32 %v2827_v1, %v2812_v4  ;;  %v2521_v9 = vpop.permute.xlu1 %2520  ;;  %v2842_v62 = vmul.f32 %v2828_v31, %v2813_v44  ;;  %v2843_v28 = vmul.f32 %v2829_v21, %v2814_v14  ;;  %v2331_v1 = vmul.f32 %v11000_v48, %v10881_v49 }
 0xc91   : > { %v2429_v45 = vsel %vm187_vm4, %v10989_v55, %v2417_v26  ;;  %v2457_v36 = vadd.f32 %v2417_v26, %v2353_v56  ;;  %v2533_v25 = vsel %vm292_vm5, %v7975_v53, %v2521_v9  ;;  %v11003_v55 = vld [vmem:[#allocation219_spill] sm:$0xff]  ;;  %vm11006_vm4 = vmmov %vm10993_vm0  ;;  %vm2923_vm5 = vcmask 1048080  }
 0xc92   : > { %2871 = vrot.lane.b32.xlu2 %v2841_v24, %s5208_s13  ;;  %v2456_v31 = vadd.f32 %v2429_v45, %v2352_v33  ;;  %v2346_v21 = vadd.f32 %v2332_v2, %v11003_v55  ;;  %v2345_v59 = vadd.f32 %v2331_v1, %v11004_v3  ;;  %vm3214_vm0 = vcmask 1043456  }
 0xc93   : > { %2873 = vrot.lane.b32.xlu0 %v2842_v62, %s5208_s13  ;;  %v2561_v22 = vadd.f32 %v2521_v9, %v2457_v36 }
 0xc94   : > { %2875 = vrot.lane.b32.xlu1 %v2843_v28, %s5208_s13  ;;  %v2560_v10 = vadd.f32 %v2533_v25, %v2456_v31  ;;  %v2450_v53 = vadd.f32 %v11005_v58, %v2346_v21  ;;  %v2449_v54 = vadd.f32 %v2423_v7, %v2345_v59 }
 0xc96   : > { %v2554_v42 = vadd.f32 %v2507_v63, %v2450_v53  ;;  %v2553_v46 = vadd.f32 %v2527_v41, %v2449_v54 }
 0xc98   : > { %v2625_v34 = vpop.permute.xlu0 %2624  ;;  %v2611_v20 = vpop.permute.xlu1 %2610 }
 0xc99   : > { %v2637_v49 = vsel %vm397_vm6, %v7996_v51, %v2625_v34  ;;  %v2665_v11 = vadd.f32 %v2625_v34, %v2561_v22  ;;  %v2631_v12 = vsel %vm397_vm6, %v8043_v39, %v2611_v20  ;;  %v2658_v17 = vadd.f32 %v2611_v20, %v2554_v42 }
 0xc9a   : > { %v2664_v40 = vadd.f32 %v2637_v49, %v2560_v10  ;;  %v2657_v8 = vadd.f32 %v2631_v12, %v2553_v46  ;;  %vm2932_vm6 = vcmask 1041936  }
 0xc9b   : > { %v2785_v6 = vadd.f32 %v2745_v38, %v2665_v11 }
 0xc9c   : > { %v2784_v19 = vadd.f32 %v2757_v18, %v2664_v40 }
 0xc9d   : > { %v2809_v35 = vadd.f32 %v7973_v43, %v2785_v6 }
 0xc9e   : > { %v2808_v51 = vadd.f32 %v7973_v43, %v2784_v19 }
 0xc9f   : > { %v2823_v0 = vmax.f32 %v2809_v35, 0.0 }
 0xca0   : > { %v2822_v23 = vmax.f32 %v2808_v51, 0.0  ;;  %v2731_v15 = vpop.permute.xlu0 %2730 }
 0xca1   : > { %v2751_v16 = vsel %vm11006_vm4, %v8144_v60, %v2731_v15  ;;  %v2778_v27 = vadd.f32 %v2731_v15, %v2658_v17  ;;  %v2852_v39 = vmul.f32 %v2831_v30, %v2823_v0  ;;  %vm3081_vm4 = vcmask 1041408  }
 0xca2   : > { %v2777_v50 = vadd.f32 %v2751_v16, %v2657_v8  ;;  %v2851_v37 = vmul.f32 %v2830_v5, %v2822_v23 }
 0xca3   : > { %v2802_v63 = vadd.f32 %v7882_v32, %v2778_v27  ;;  %2893 = vrot.lane.b32.xlu1 %v2852_v39, %s5208_s13 }
 0xca4   : > { %v2801_v4 = vadd.f32 %v7882_v32, %v2777_v50  ;;  %2891 = vrot.lane.b32.xlu2 %v2851_v37, %s5208_s13 }
 0xca5   : > { %v2816_v44 = vmax.f32 %v2802_v63, 0.0 }
 0xca6   : > { %v2815_v43 = vmax.f32 %v2801_v4, 0.0 }
 0xca7   : > { %v2845_v61 = vmul.f32 %v2831_v30, %v2816_v44 }
 0xca8   : > { %v2844_v14 = vmul.f32 %v2830_v5, %v2815_v43 }
 0xcaa   : > { %2877 = vrot.lane.b32.xlu0 %v2844_v14, %s5208_s13 }
 0xcac   : > { %2879 = vrot.lane.b32.xlu2 %v2845_v61, %s5208_s13 }
 0xcc3   : > { %v2884_v32 = vpop.permute.xlu2 %2883 }
 0xcce   : > { %v2868_v60 = vpop.permute.xlu0 %2867 }
 0xccf   : > { %2924 = vst.msk [vmem:[#allocation2] sm:$0xff] %vm2923_vm5, %v2868_v60  ;;  %vm11011_vm5 = vmmov %vm11008_vm7 }
 0xcd6   : > { %v8209_v29 = vld [vmem:[#allocation2] sm:$0xff] }
 0xcd7   : > { %3975 = vrot.lane.b32.xlu2 %v8209_v29, %s5199_s11  ;;  %v8227_v25 = vrot.slane %v8209_v29, 2  ;;  %v8243_v58 = vrot.slane %v8209_v29, 4  ;;  %v8258_v54 = vrot.slane %v8209_v29, 6 }
 0xcdc   : > { %v2882_v48 = vpop.permute.xlu1 %2881 }
 0xcdd   : > { %v2901_v52 = vsel %vm11007_vm8, %v2882_v48, %v2884_v32  ;;  %2933 = vst.msk [vmem:[#allocation2 + $0x40] sm:$0x3] %vm2932_vm6, %v2882_v48  ;;  %vm11012_vm6 = vmmov %vm11011_vm5 }
 0xcde   : > { %2934 = vst [vmem:[#allocation2 + $0x48] sm:$0x3] %v2901_v52  ;;  %vm11013_vm8 = vmmov %vm11011_vm5 }
 0xce4   : > { %v2870_v26 = vpop.permute.xlu1 %2869  ;;  %v3951_v24 = vld [vmem:[#allocation2 + $0x40] sm:$0x3]  ;;  %v2886_v13 = vpop.permute.xlu2 %2885 }
 0xce5   : > { %v8215_v9 = vsel %vm11008_vm7, %v2868_v60, %v2870_v26  ;;  %3991 = vrot.lane.b32.xlu0 %v3951_v24, %s5199_s11  ;;  %v3952_v62 = vld [vmem:[#allocation2 + $0x48] sm:$0x3]  ;;  %v3821_v57 = vld [vmem:[#allocation2 + $0x40] sm:$0x3]  ;;  %v2902_v33 = vsel %vm11009_vm13, %v2884_v32, %v2886_v13  ;;  %vm11014_vm7 = vmmov %vm11011_vm5 }
 0xce6   : > { %v3822_v28 = vld [vmem:[#allocation2 + $0x48] sm:$0x3]  ;;  %3993 = vrot.lane.b32.xlu1 %v3952_v62, %s5199_s11  ;;  %v8220_v56 = vrot.slane %v8215_v9, 2  ;;  %2935 = vst [vmem:[#allocation2 + $0x50] sm:$0x3] %v2902_v33  ;;  %v3853_v36 = vrot.slane %v3821_v57, 2  ;;  %vm11015_vm13 = vmmov %vm11011_vm5 }
 0xce7   : > { %v3855_v45 = vrot.slane %v3822_v28, 2  ;;  %v3691_v31 = vld [vmem:[#allocation2 + $0x40] sm:$0x3]  ;;  %v3692_v55 = vld [vmem:[#allocation2 + $0x48] sm:$0x3]  ;;  %v8238_v59 = vrot.slane %v8215_v9, 4 }
 0xce8   : > { %v3854_v1 = vsel %vm3347_vm12, %v8227_v25, %v3853_v36  ;;  %v3723_v3 = vrot.slane %v3691_v31, 4  ;;  %v3725_v10 = vrot.slane %v3692_v55, 4  ;;  %v3562_v38 = vld [vmem:[#allocation2 + $0x48] sm:$0x3]  ;;  %v8248_v34 = vrot.slane %v8215_v9, 6 }
 0xce9   : > { %v3856_v2 = vsel %vm3347_vm12, %v8220_v56, %v3855_v45  ;;  %v3595_v20 = vrot.slane %v3562_v38, 6  ;;  %v3561_v41 = vld [vmem:[#allocation2 + $0x40] sm:$0x3]  ;;  %v3456_v16 = vld [vmem:[#allocation2 + $0x48] sm:$0x3] }
 0xcea   : > { %3887 = vrot.lane.b32.xlu2 %v3856_v2, %s5197_s30  ;;  %v3724_v7 = vsel %vm3214_vm0, %v8243_v58, %v3723_v3  ;;  %v3726_v53 = vsel %vm3214_vm0, %v8238_v59, %v3725_v10  ;;  %v3593_v11 = vrot.slane %v3561_v41, 6  ;;  %v3455_v8 = vld [vmem:[#allocation2 + $0x40] sm:$0x3]  ;;  %v3324_v36 = vld [vmem:[#allocation2 + $0x48] sm:$0x3] }
 0xceb   : > { %v3596_v49 = vsel %vm3081_vm4, %v8248_v34, %v3595_v20  ;;  %v3323_v61 = vld [vmem:[#allocation2 + $0x40] sm:$0x3]  ;;  %v3358_v31 = vrot.slane %v3324_v36, 2  ;;  %v3191_v41 = vld [vmem:[#allocation2 + $0x48] sm:$0x3] }
 0xcec   : > { %v2872_v21 = vpop.permute.xlu2 %2871  ;;  %v3594_v40 = vsel %vm3081_vm4, %v8258_v54, %v3593_v11  ;;  %v3356_v60 = vrot.slane %v3323_v61, 2 }
 0xced   : > { %3977 = vrot.lane.b32.xlu0 %v8215_v9, %s5199_s11  ;;  %v8235_v22 = vsel %vm11010_vm9, %v2870_v26, %v2872_v21  ;;  %v3953_v12 = vld [vmem:[#allocation2 + $0x50] sm:$0x3]  ;;  %vm2940_vm9 = vcmask 500736   ;;  %v3359_v10 = vsel %vm3347_vm12, %v8220_v56, %v3358_v31 }
 0xcee   : > { %3885 = vrot.lane.b32.xlu1 %v3854_v1, %s5197_s30  ;;  %v3823_v50 = vld [vmem:[#allocation2 + $0x50] sm:$0x3]  ;;  %v8292_v37 = vrot.slane %v8235_v22, 2  ;;  %v3357_v24 = vsel %vm3347_vm12, %v8227_v25, %v3356_v60 }
 0xcef   : > { %v3857_v63 = vrot.slane %v3823_v50, 2  ;;  %v3693_v1 = vld [vmem:[#allocation2 + $0x50] sm:$0x3] }
 0xcf0   : > { %v3727_v3 = vrot.slane %v3693_v1, 4 }
 0xcf1   : > { %v3858_v14 = vsel %vm3347_vm12, %v8292_v37, %v3857_v63 }
 0xcf2   : > { %3869 = vrot.lane.b32.xlu2 %v8227_v25, %s5197_s30 }
 0xcf5   : > { %3755 = vrot.lane.b32.xlu0 %v3724_v7, %s5195_s29 }
 0xcf6   : > { %3757 = vrot.lane.b32.xlu1 %v3726_v53, %s5195_s29 }
 0xcfa   : > { %3627 = vrot.lane.b32.xlu2 %v3596_v49, %s5189_s26 }
 0xcfd   : > { %3871 = vrot.lane.b32.xlu0 %v8220_v56, %s5197_s30  ;;  %v2888_v42 = vpop.permute.xlu0 %2887 }
 0xcfe   : > { %3625 = vrot.lane.b32.xlu1 %v3594_v40, %s5189_s26  ;;  %v2903_v18 = vsel %vm11011_vm5, %v2886_v13, %v2888_v42  ;;  %v2890_v6 = vpop.permute.xlu1 %2889  ;;  %v2892_v46 = vpop.permute.xlu2 %2891  ;;  %v3225_v40 = vrot.slane %v3191_v41, 4  ;;  %v3457_v41 = vld [vmem:[#allocation2 + $0x50] sm:$0x3] }
 0xcff   : > { %2936 = vst [vmem:[#allocation2 + $0x58] sm:$0x3] %v2903_v18  ;;  %v2904_v19 = vsel %vm11012_vm6, %v2888_v42, %v2890_v6  ;;  %v2905_v35 = vsel %vm11013_vm8, %v2890_v6, %v2892_v46  ;;  %vm11016_vm6 = vmmov %vm11011_vm5  ;;  %v3190_v42 = vld [vmem:[#allocation2 + $0x40] sm:$0x3] }
 0xd00   : > { %2937 = vst [vmem:[#allocation2 + $0x60] sm:$0x3] %v2904_v19  ;;  %vm11017_vm8 = vmmov %vm11011_vm5  ;;  %v3226_v18 = vsel %vm3214_vm0, %v8238_v59, %v3225_v40  ;;  %v3223_v6 = vrot.slane %v3190_v42, 4  ;;  %v8359_v19 = vrot.slane %v8235_v22, 6 }
 0xd01   : > { %2938 = vst [vmem:[#allocation2 + $0x68] sm:$0x3] %v2905_v35 }
 0xd02   : > { %3995 = vrot.lane.b32.xlu2 %v3953_v12, %s5199_s11  ;;  %v3563_v12 = vld [vmem:[#allocation2 + $0x50] sm:$0x3] }
 0xd03   : > { %v3597_v35 = vrot.slane %v3563_v12, 6 }
 0xd05   : > { %3739 = vrot.lane.b32.xlu0 %v8243_v58, %s5195_s29  ;;  %v2874_v17 = vpop.permute.xlu0 %2873 }
 0xd06   : > { %3741 = vrot.lane.b32.xlu1 %v8238_v59, %s5195_s29  ;;  %v8274_v30 = vsel %vm11014_vm7, %v2872_v21, %v2874_v17  ;;  %v2876_v51 = vpop.permute.xlu1 %2875  ;;  %v2880_v5 = vpop.permute.xlu2 %2879  ;;  %v3954_v23 = vld [vmem:[#allocation2 + $0x58] sm:$0x3]  ;;  %v8335_v21 = vrot.slane %v8235_v22, 4  ;;  %vm11018_vm7 = vcmask 252928  }
 0xd07   : > { %v8277_v0 = vsel %vm11015_vm13, %v2874_v17, %v2876_v51  ;;  %2931 = vst.msk [vmem:[#allocation2 + $0x38] sm:$0xff] %vm1454_vm15, %v2880_v5  ;;  %v3955_v15 = vld [vmem:[#allocation2 + $0x60] sm:$0x3]  ;;  %v3824_v32 = vld [vmem:[#allocation2 + $0x58] sm:$0x3]  ;;  %v8314_v52 = vrot.slane %v8274_v30, 2  ;;  %v3224_v17 = vsel %vm3214_vm0, %v8243_v58, %v3223_v6  ;;  %vm11019_vm13 = vmmov %vm11018_vm7 }
 0xd08   : > { %v3825_v48 = vld [vmem:[#allocation2 + $0x60] sm:$0x3]  ;;  %v3859_v26 = vrot.slane %v3824_v32, 2  ;;  %v8319_v62 = vrot.slane %v8277_v0, 2  ;;  %v3694_v57 = vld [vmem:[#allocation2 + $0x58] sm:$0x3]  ;;  %v3728_v38 = vsel %vm3214_vm0, %v8335_v21, %v3727_v3 }
 0xd09   : > { %v3861_v28 = vrot.slane %v3825_v48, 2  ;;  %v8325_v13 = vrot.slane %v8274_v30, 4  ;;  %v3729_v33 = vrot.slane %v3694_v57, 4  ;;  %v3695_v7 = vld [vmem:[#allocation2 + $0x60] sm:$0x3]  ;;  %v8344_v20 = vrot.slane %v8277_v0, 4 }
 0xd0a   : > { %3495 = vrot.lane.b32.xlu2 %v3455_v8, %s5187_s7  ;;  %v3860_v45 = vsel %vm3347_vm12, %v8314_v52, %v3859_v26  ;;  %v3731_v53 = vrot.slane %v3695_v7, 4  ;;  %v3057_v48 = vld [vmem:[#allocation2 + $0x40] sm:$0x3]  ;;  %v3058_v26 = vld [vmem:[#allocation2 + $0x48] sm:$0x3] }
 0xd0b   : > { %v3862_v2 = vsel %vm3347_vm12, %v8319_v62, %v3861_v28  ;;  %v3730_v55 = vsel %vm3214_vm0, %v8325_v13, %v3729_v33  ;;  %v3092_v36 = vrot.slane %v3058_v26, 6  ;;  %v3826_v26 = vld [vmem:[#allocation2 + $0x68] sm:$0x3] }
 0xd0c   : > { %v3732_v11 = vsel %vm3214_vm0, %v8344_v20, %v3731_v53 }
 0xd0d   : > { %3997 = vrot.lane.b32.xlu0 %v3954_v23, %s5199_s11  ;;  %v3565_v23 = vld [vmem:[#allocation2 + $0x60] sm:$0x3]  ;;  %v3093_v3 = vsel %vm3081_vm4, %v8248_v34, %v3092_v36 }
 0xd0e   : > { %3999 = vrot.lane.b32.xlu1 %v3955_v15, %s5199_s11  ;;  %v8374_v15 = vrot.slane %v8274_v30, 6 }
 0xd12   : > { %3611 = vrot.lane.b32.xlu2 %v8248_v34, %s5189_s26 }
 0xd15   : > { %3497 = vrot.lane.b32.xlu0 %v3456_v16, %s5187_s7  ;;  %v2894_v27 = vpop.permute.xlu1 %2893 }
 0xd16   : > { %3609 = vrot.lane.b32.xlu1 %v8258_v54, %s5189_s26  ;;  %v2906_v39 = vsel %vm11011_vm5, %v2892_v46, %v2894_v27  ;;  %2941 = vst.msk [vmem:[#allocation2 + $0x78] sm:$0x3] %vm2940_vm9, %v2894_v27  ;;  %v8377_v27 = vrot.slane %v8277_v0, 6  ;;  %vm11020_vm9 = vmmov %vm11018_vm7 }
 0xd17   : > { %2939 = vst [vmem:[#allocation2 + $0x70] sm:$0x3] %v2906_v39  ;;  %v3601_v39 = vrot.slane %v3565_v23, 6  ;;  %vm11021_vm5 = vmmov %vm11018_vm7 }
 0xd1a   : > { %3983 = vrot.lane.b32.xlu2 %v8277_v0, %s5199_s11 }
 0xd1c   : > { %v2878_v4 = vpop.permute.xlu0 %2877 }
 0xd1d   : > { %3979 = vrot.lane.b32.xlu0 %v8235_v22, %s5199_s11  ;;  %v8299_v43 = vsel %vm11016_vm6, %v2876_v51, %v2878_v4  ;;  %v8302_v44 = vsel %vm11017_vm8, %v2878_v4, %v2880_v5  ;;  %v3598_v51 = vsel %vm3081_vm4, %v8359_v19, %v3597_v35  ;;  %v3564_v5 = vld [vmem:[#allocation2 + $0x58] sm:$0x3]  ;;  %vm11022_vm6 = vmmov %vm11021_vm5 }
 0xd1e   : > { %3981 = vrot.lane.b32.xlu1 %v8274_v30, %s5199_s11  ;;  %2929 = vst [vmem:[#allocation2 + $0x28] sm:$0xff] %v8299_v43  ;;  %v3599_v16 = vrot.slane %v3564_v5, 6  ;;  %vm11023_vm8 = vmmov %vm11021_vm5 }
 0xd1f   : > { %2930 = vst [vmem:[#allocation2 + $0x30] sm:$0xff] %v8302_v44 }
 0xd22   : > { %3889 = vrot.lane.b32.xlu2 %v3858_v14, %s5197_s30  ;;  %v3956_v14 = vld [vmem:[#allocation2 + $0x68] sm:$0x3] }
 0xd25   : > { %3479 = vrot.lane.b32.xlu0 %v8209_v29, %s5187_s7 }
 0xd26   : > { %3481 = vrot.lane.b32.xlu1 %v8215_v9, %s5187_s7 }
 0xd2a   : > { %3388 = vrot.lane.b32.xlu2 %v3357_v24, %s5185_s6 }
 0xd2d   : > { %3891 = vrot.lane.b32.xlu0 %v3860_v45, %s5197_s30  ;;  %v3090_v45 = vrot.slane %v3057_v48, 6 }
 0xd2e   : > { %3893 = vrot.lane.b32.xlu1 %v3862_v2, %s5197_s30 }
 0xd2f   : > { %v3091_v31 = vsel %vm3081_vm4, %v8258_v54, %v3090_v45  ;;  %v8480_v45 = vrot.slane %v8299_v43, 2 }
 0xd31   : > { %v3976_v49 = vpop.permute.xlu2 %3975 }
 0xd32   : > { %3761 = vrot.lane.b32.xlu2 %v3730_v55, %s5195_s29 }
 0xd35   : > { %3390 = vrot.lane.b32.xlu0 %v3359_v10, %s5185_s6 }
 0xd36   : > { %3759 = vrot.lane.b32.xlu1 %v3728_v38, %s5195_s29  ;;  %v3458_v38 = vld [vmem:[#allocation2 + $0x58] sm:$0x3] }
 0xd3a   : > { %3875 = vrot.lane.b32.xlu2 %v8314_v52, %s5197_s30 }
 0xd3d   : > { %3763 = vrot.lane.b32.xlu0 %v3732_v11, %s5195_s29 }
 0xd3e   : > { %3873 = vrot.lane.b32.xlu1 %v8292_v37, %s5197_s30 }
 0xd42   : > { %3257 = vrot.lane.b32.xlu2 %v3226_v18, %s5179_s20 }
 0xd44   : > { %v8356_v46 = vpop.permute.xlu2 %3887 }
 0xd45   : > { %3877 = vrot.lane.b32.xlu0 %v8319_v62, %s5197_s30 }
 0xd46   : > { %3255 = vrot.lane.b32.xlu1 %v3224_v17, %s5179_s20  ;;  %v2950_v17 = vld [vmem:[#allocation2 + $0x40] sm:$0x3] }
 0xd4a   : > { %3629 = vrot.lane.b32.xlu2 %v3598_v51, %s5189_s26 }
 0xd4c   : > { %v3870_v8 = vpop.permute.xlu2 %3869 }
 0xd4d   : > { %3372 = vrot.lane.b32.xlu0 %v8227_v25, %s5185_s6  ;;  %v3600_v25 = vsel %vm3081_vm4, %v8374_v15, %v3599_v16 }
 0xd4e   : > { %3374 = vrot.lane.b32.xlu1 %v8220_v56, %s5185_s6  ;;  %v3602_v56 = vsel %vm3081_vm4, %v8377_v27, %v3601_v39 }
 0xd52   : > { %3743 = vrot.lane.b32.xlu2 %v8335_v21, %s5195_s29 }
 0xd54   : > { %v8381_v50 = vpop.permute.xlu2 %3627 }
 0xd55   : > { %3631 = vrot.lane.b32.xlu0 %v3600_v25, %s5189_s26 }
 0xd56   : > { %3633 = vrot.lane.b32.xlu1 %v3602_v56, %s5189_s26 }
 0xd57   : > { %v3992_v63 = vpop.permute.xlu0 %3991 }
 0xd58   : > { %v3994_v4 = vpop.permute.xlu1 %3993 }
 0xd59   : > { %v4014_v61 = vsel %vm2144_vm2, %v3992_v63, %v3994_v4  ;;  %v2951_v63 = vld [vmem:[#allocation2 + $0x48] sm:$0x3] }
 0xd5a   : > { %4001 = vrot.lane.b32.xlu2 %v3956_v14, %s5199_s11  ;;  %4042 = vst [vmem:[#allocation3 + $0x268] sm:$0x3] %v4014_v61 }
 0xd5c   : > { %v3996_v60 = vpop.permute.xlu2 %3995 }
 0xd5d   : > { %v4015_v32 = vsel %vm2144_vm2, %v3994_v4, %v3996_v60  ;;  %3745 = vrot.lane.b32.xlu0 %v8325_v13, %s5195_s29 }
 0xd5e   : > { %4043 = vst [vmem:[#allocation3 + $0x270] sm:$0x3] %v4015_v32  ;;  %3747 = vrot.lane.b32.xlu1 %v8344_v20, %s5195_s29 }
 0xd5f   : > { %v8396_v24 = vpop.permute.xlu0 %3977 }
 0xd60   : > { %v4007_v28 = vsel %vm2144_vm2, %v3976_v49, %v8396_v24  ;;  %v3886_v57 = vpop.permute.xlu1 %3885 }
 0xd61   : > { %v3908_v33 = vsel %vm2029_vm3, %v3886_v57, %v8356_v46  ;;  %v4128_v2 = vld [vmem:[#allocation3 + $0x268] sm:$0x3] }
 0xd62   : > { %3239 = vrot.lane.b32.xlu2 %v8243_v58, %s5179_s20  ;;  %5017 = vmatpush.msk.msra.mxu0 %vm3081_vm4, %v4128_v2 }
 0xd64   : > { %v3496_v1 = vpop.permute.xlu2 %3495  ;;  %4178 = vmatpush.msra.mxu0 %v4007_v28 }
 0xd65   : > { %v4129_v55 = vld [vmem:[#allocation3 + $0x270] sm:$0x3]  ;;  %3122 = vrot.lane.b32.xlu0 %v3091_v31, %s5177_s19  ;;  %v3863_v31 = vrot.slane %v3826_v26, 2 }
 0xd66   : > { %5020 = vmatpush.msk.msra.mxu1 %vm3081_vm4, %v4129_v55  ;;  %3124 = vrot.lane.b32.xlu1 %v3093_v3, %s5177_s19 }
 0xd67   : > { %4179 = vmatpush.msra.mxu0 %v3908_v33  ;;  %v3756_v10 = vpop.permute.xlu0 %3755 }
 0xd68   : > { %v8412_v58 = vpop.permute.xlu1 %3757 }
 0xd69   : > { %v3778_v7 = vsel %vm11018_vm7, %v3756_v10, %v8412_v58  ;;  %v3325_v10 = vld [vmem:[#allocation2 + $0x50] sm:$0x3]  ;;  %vm11024_vm7 = vmmov %vm11021_vm5 }
 0xd6a   : > { %3501 = vrot.lane.b32.xlu2 %v3458_v38, %s5187_s7  ;;  %3806 = vst [vmem:[#allocation3 + $0x1c0] sm:$0x3f] %v3778_v7 }
 0xd6c   : > { %v8417_v53 = vpop.permute.xlu2 %3611 }
 0xd6d   : > { %3241 = vrot.lane.b32.xlu0 %v8238_v59, %s5179_s20  ;;  %v3459_v59 = vld [vmem:[#allocation2 + $0x60] sm:$0x3] }
 0xd6e   : > { %3499 = vrot.lane.b32.xlu1 %v3457_v41, %s5187_s7 }
 0xd6f   : > { %v8422_v49 = vpop.permute.xlu0 %3871 }
 0xd70   : > { %v3901_v11 = vsel %vm2029_vm3, %v3870_v8, %v8422_v49  ;;  %v3626_v40 = vpop.permute.xlu1 %3625 }
 0xd71   : > { %3929 = vst [vmem:[#allocation3 + $0x1c0] sm:$0xc0] %v3901_v11  ;;  %v3648_v42 = vsel %vm1569_vm1, %v3626_v40, %v8381_v50  ;;  %v3360_v11 = vrot.slane %v3325_v10, 2 }
 0xd72   : > { %3615 = vrot.lane.b32.xlu2 %v8374_v15, %s5189_s26  ;;  %3676 = vst [vmem:[#allocation3 + $0x188] sm:$0xf] %v3648_v42 }
 0xd74   : > { %v8430_v18 = vpop.permute.xlu2 %3983 }
 0xd75   : > { %3503 = vrot.lane.b32.xlu0 %v3459_v59, %s5187_s7  ;;  %v3192_v59 = vld [vmem:[#allocation2 + $0x50] sm:$0x3] }
 0xd76   : > { %3613 = vrot.lane.b32.xlu1 %v8359_v19, %s5189_s26 }
 0xd77   : > { %v3740_v6 = vpop.permute.xlu0 %3739 }
 0xd78   : > { %v8435_v12 = vpop.permute.xlu1 %3741  ;;  %v4107_v35 = vld [vmem:[#allocation3 + $0x1c0] sm:$0xff] }
 0xd79   : > { %v3771_v51 = vsel %vm11019_vm13, %v3740_v6, %v8435_v12  ;;  %4180 = vmatpush.msra.mxu0 %v4107_v35  ;;  %v3227_v35 = vrot.slane %v3192_v59, 4  ;;  %vm11025_vm13 = vmmov %vm11021_vm5 }
 0xd7a   : > { %2990 = vrot.lane.b32.xlu2 %v2950_v17, %s5175_s18  ;;  %3799 = vst [vmem:[#allocation3 + $0x188] sm:$0xf0] %v3771_v51 }
 0xd7c   : > { %v8440_v8 = vpop.permute.xlu2 %3889 }
 0xd7d   : > { %v3909_v5 = vsel %vm2029_vm3, %v8356_v46, %v8440_v8  ;;  %3617 = vrot.lane.b32.xlu0 %v8377_v27, %s5189_s26 }
 0xd7e   : > { %3985 = vrot.lane.b32.xlu1 %v8299_v43, %s5199_s11 }
 0xd7f   : > { %v3998_v23 = vpop.permute.xlu0 %3997 }
 0xd80   : > { %v8449_v16 = vpop.permute.xlu1 %3999  ;;  %v4016_v39 = vsel %vm2144_vm2, %v3996_v60, %v3998_v23 }
 0xd81   : > { %v4100_v25 = vld [vmem:[#allocation3 + $0x188] sm:$0xff]  ;;  %v4017_v56 = vsel %vm2144_vm2, %v3998_v23, %v8449_v16  ;;  %4044 = vst [vmem:[#allocation3 + $0x278] sm:$0x3] %v4016_v39 }
 0xd82   : > { %3108 = vrot.lane.b32.xlu2 %v8248_v34, %s5177_s19  ;;  %4181 = vmatpush.msra.mxu0 %v4100_v25  ;;  %4045 = vst [vmem:[#allocation3 + $0x280] sm:$0x3] %v4017_v56  ;;  %v3228_v25 = vsel %vm3214_vm0, %v8335_v21, %v3227_v35  ;;  %v8516_v56 = vrot.slane %v8299_v43, 4 }
 0xd84   : > { %v8456_v46 = vpop.permute.xlu2 %3388 }
 0xd85   : > { %2992 = vrot.lane.b32.xlu0 %v2951_v63, %s5175_s18 }
 0xd86   : > { %3106 = vrot.lane.b32.xlu1 %v8258_v54, %s5177_s19 }
 0xd87   : > { %v8461_v4 = vpop.permute.xlu0 %3497 }
 0xd88   : > { %v3610_v14 = vpop.permute.xlu1 %3609  ;;  %v3518_v61 = vsel %vm1454_vm15, %v3496_v1, %v8461_v4  ;;  %v4130_v60 = vld [vmem:[#allocation3 + $0x278] sm:$0x3]  ;;  %v3327_v1 = vld [vmem:[#allocation2 + $0x60] sm:$0x3] }
 0xd89   : > { %v3641_v34 = vsel %vm1569_vm1, %v3610_v14, %v8417_v53  ;;  %3546 = vst [vmem:[#allocation3 + $0x150] sm:$0x3] %v3518_v61  ;;  %5023 = vmatpush.msk.msra.mxu2 %vm3081_vm4, %v4130_v60  ;;  %v4131_v32 = vld [vmem:[#allocation3 + $0x280] sm:$0x3]  ;;  %v3364_v3 = vrot.slane %v3327_v1, 2 }
 0xd8a   : > { %3487 = vrot.lane.b32.xlu2 %v8277_v0, %s5187_s7  ;;  %3669 = vst [vmem:[#allocation3 + $0x150] sm:$0xfc] %v3641_v34  ;;  %5026 = vmatpush.msk.msra.mxu3 %vm3081_vm4, %v4131_v32  ;;  %v3193_v34 = vld [vmem:[#allocation2 + $0x58] sm:$0x3]  ;;  %v3194_v32 = vld [vmem:[#allocation2 + $0x60] sm:$0x3] }
 0xd8b   : > { %v3365_v41 = vsel %vm3347_vm12, %v8319_v62, %v3364_v3  ;;  %v3566_v1 = vld [vmem:[#allocation2 + $0x68] sm:$0x3] }
 0xd8c   : > { %v8471_v54 = vpop.permute.xlu2 %3761 }
 0xd8d   : > { %3483 = vrot.lane.b32.xlu0 %v8235_v22, %s5187_s7 }
 0xd8e   : > { %3485 = vrot.lane.b32.xlu1 %v8274_v30, %s5187_s7 }
 0xd8f   : > { %v3980_v48 = vpop.permute.xlu0 %3979 }
 0xd90   : > { %v3982_v28 = vpop.permute.xlu1 %3981  ;;  %v4008_v57 = vsel %vm2144_vm2, %v8396_v24, %v3980_v48  ;;  %v3864_v24 = vsel %vm3347_vm12, %v8480_v45, %v3863_v31  ;;  %v3590_v31 = vrot.slane %v8299_v43, 6 }
 0xd91   : > { %v4010_v33 = vsel %vm2144_vm2, %v3982_v28, %v8430_v18  ;;  %v4009_v2 = vsel %vm2144_vm2, %v3980_v48, %v3982_v28  ;;  %v4093_v36 = vld [vmem:[#allocation3 + $0x150] sm:$0xff]  ;;  %4201 = vmatpush.msra.mxu1 %v4008_v57  ;;  %v3229_v57 = vrot.slane %v3193_v34, 4 }
 0xd92   : > { %2976 = vrot.lane.b32.xlu2 %v8215_v9, %s5175_s18  ;;  %4182 = vmatpush.msra.mxu0 %v4093_v36  ;;  %v3326_v9 = vld [vmem:[#allocation2 + $0x58] sm:$0x3] }
 0xd93   : > { %4224 = vmatpush.msra.mxu2 %v4009_v2  ;;  %4247 = vmatpush.msra.mxu3 %v4010_v33  ;;  %v3362_v42 = vrot.slane %v3326_v9, 2  ;;  %v3231_v2 = vrot.slane %v3194_v32, 4 }
 0xd94   : > { %v8487_v55 = vpop.permute.xlu2 %3875  ;;  %4202 = vmatpush.msra.mxu1 %v3909_v5  ;;  %v3696_v5 = vld [vmem:[#allocation2 + $0x68] sm:$0x3] }
 0xd95   : > { %3895 = vrot.lane.b32.xlu0 %v3864_v24, %s5197_s30  ;;  %v3363_v17 = vsel %vm3347_vm12, %v8314_v52, %v3362_v42  ;;  %v3733_v14 = vrot.slane %v3696_v5, 4  ;;  %v3232_v24 = vsel %vm3214_vm0, %v8344_v20, %v3231_v2  ;;  %v3957_v5 = vld [vmem:[#allocation2 + $0x70] sm:$0x3]  ;;  %v3460_v2 = vld [vmem:[#allocation2 + $0x68] sm:$0x3] }
 0xd96   : > { %2974 = vrot.lane.b32.xlu1 %v8209_v29, %s5175_s18  ;;  %v3361_v29 = vsel %vm3347_vm12, %v8292_v37, %v3360_v11  ;;  %v3059_v11 = vld [vmem:[#allocation2 + $0x50] sm:$0x3] }
 0xd97   : > { %v3480_v38 = vpop.permute.xlu0 %3479  ;;  %v3734_v60 = vsel %vm3214_vm0, %v8516_v56, %v3733_v14  ;;  %v3094_v42 = vrot.slane %v3059_v11, 6  ;;  %v2954_v11 = vld [vmem:[#allocation2 + $0x60] sm:$0x3] }
 0xd98   : > { %v8494_v7 = vpop.permute.xlu1 %3481 }
 0xd99   : > { %v3511_v40 = vsel %vm1454_vm15, %v3480_v38, %v8494_v7  ;;  %v3095_v35 = vsel %vm3081_vm4, %v8359_v19, %v3094_v42 }
 0xd9a   : > { %3396 = vrot.lane.b32.xlu2 %v3365_v41, %s5185_s6  ;;  %4183 = vmatpush.msra.mxu0 %v3511_v40 }
 0xd9c   : > { %v8501_v6 = vpop.permute.xlu2 %3257 }
 0xd9d   : > { %3392 = vrot.lane.b32.xlu0 %v3361_v29, %s5185_s6 }
 0xd9e   : > { %3394 = vrot.lane.b32.xlu1 %v3363_v17, %s5185_s6 }
 0xd9f   : > { %v3892_v51 = vpop.permute.xlu0 %3891 }
 0xda0   : > { %v8509_v23 = vpop.permute.xlu1 %3893  ;;  %v3910_v39 = vsel %vm2029_vm3, %v8440_v8, %v3892_v51 }
 0xda1   : > { %v3911_v63 = vsel %vm2029_vm3, %v3892_v51, %v8509_v23  ;;  %4225 = vmatpush.msra.mxu2 %v3910_v39  ;;  %v3061_v39 = vld [vmem:[#allocation2 + $0x60] sm:$0x3] }
 0xda2   : > { %3259 = vrot.lane.b32.xlu2 %v3228_v25, %s5179_s20  ;;  %4248 = vmatpush.msra.mxu3 %v3911_v63  ;;  %v3098_v34 = vrot.slane %v3061_v39, 6 }
 0xda4   : > { %v8521_v61 = vpop.permute.xlu2 %3629 }
 0xda5   : > { %v3649_v8 = vsel %vm1569_vm1, %v8381_v50, %v8521_v61  ;;  %3765 = vrot.lane.b32.xlu0 %v3734_v60, %s5195_s29 }
 0xda6   : > { %3677 = vst [vmem:[#allocation3 + $0x190] sm:$0xf] %v3649_v8  ;;  %3879 = vrot.lane.b32.xlu1 %v8480_v45, %s5197_s30 }
 0xda7   : > { %v8531_v48 = vpop.permute.xlu0 %3390 }
 0xda8   : > { %v3411_v26 = vsel %vm1339_vm14, %v8456_v46, %v8531_v48  ;;  %v3760_v28 = vpop.permute.xlu1 %3759  ;;  %v3230_v46 = vsel %vm3214_vm0, %v8325_v13, %v3229_v57 }
 0xda9   : > { %v3779_v33 = vsel %vm11020_vm9, %v8412_v58, %v3760_v28  ;;  %v3780_v50 = vsel %vm11021_vm5, %v3760_v28, %v8471_v54  ;;  %4184 = vmatpush.msra.mxu0 %v3411_v26  ;;  %v3099_v28 = vsel %vm3081_vm4, %v8377_v27, %v3098_v34  ;;  %vm11026_vm9 = vcmask 777216  }
 0xdaa   : > { %3376 = vrot.lane.b32.xlu2 %v8292_v37, %s5185_s6  ;;  %3807 = vst [vmem:[#allocation3 + $0x1c8] sm:$0x3f] %v3779_v33  ;;  %v3603_v37 = vrot.slane %v3566_v1, 6  ;;  %vm11027_vm5 = vmmov %vm11026_vm9 }
 0xdab   : > { %3808 = vst [vmem:[#allocation3 + $0x1d0] sm:$0x3f] %v3780_v50 }
 0xdac   : > { %v8542_v36 = vpop.permute.xlu2 %3743 }
 0xdad   : > { %v3772_v58 = vsel %vm11022_vm6, %v8435_v12, %v8542_v36  ;;  %3261 = vrot.lane.b32.xlu0 %v3230_v46, %s5179_s20  ;;  %v3604_v12 = vsel %vm3081_vm4, %v3590_v31, %v3603_v37  ;;  %v2952_v37 = vld [vmem:[#allocation2 + $0x50] sm:$0x3] }
 0xdae   : > { %3800 = vst [vmem:[#allocation3 + $0x190] sm:$0xf0] %v3772_v58  ;;  %3263 = vrot.lane.b32.xlu1 %v3232_v24, %s5179_s20 }
 0xdaf   : > { %v8554_v3 = vpop.permute.xlu0 %3763 }
 0xdb0   : > { %v3781_v10 = vsel %vm11023_vm8, %v8471_v54, %v8554_v3  ;;  %v3874_v9 = vpop.permute.xlu1 %3873  ;;  %vm11028_vm8 = vmmov %vm11027_vm5 }
 0xdb1   : > { %3809 = vst [vmem:[#allocation3 + $0x1d8] sm:$0x3f] %v3781_v10  ;;  %v3902_v38 = vsel %vm2029_vm3, %v8422_v49, %v3874_v9  ;;  %v3903_v41 = vsel %vm2029_vm3, %v3874_v9, %v8487_v55 }
 0xdb2   : > { %3635 = vrot.lane.b32.xlu2 %v3604_v12, %s5189_s26  ;;  %3930 = vst [vmem:[#allocation3 + $0x1c8] sm:$0xc0] %v3902_v38 }
 0xdb3   : > { %3931 = vst [vmem:[#allocation3 + $0x1d0] sm:$0xc0] %v3903_v41 }
 0xdb4   : > { %v8567_v40 = vpop.permute.xlu2 %4001 }
 0xdb5   : > { %v4018_v54 = vsel %vm2144_vm2, %v8449_v16, %v8567_v40  ;;  %3378 = vrot.lane.b32.xlu0 %v8314_v52, %s5185_s6 }
 0xdb6   : > { %4046 = vst [vmem:[#allocation3 + $0x288] sm:$0x3] %v4018_v54  ;;  %3380 = vrot.lane.b32.xlu1 %v8319_v62, %s5185_s6  ;;  %v4101_v62 = vld [vmem:[#allocation3 + $0x190] sm:$0xff] }
 0xdb7   : > { %v8576_v49 = vpop.permute.xlu0 %3877 }
 0xdb8   : > { %v3904_v59 = vsel %vm2029_vm3, %v8487_v55, %v8576_v49  ;;  %v3256_v29 = vpop.permute.xlu1 %3255  ;;  %v3060_v55 = vld [vmem:[#allocation2 + $0x58] sm:$0x3] }
 0xdb9   : > { %3932 = vst [vmem:[#allocation3 + $0x1d8] sm:$0xc0] %v3904_v59  ;;  %v3278_v16 = vsel %vm994_vm11, %v3256_v29, %v8501_v6  ;;  %v4108_v17 = vld [vmem:[#allocation3 + $0x1c8] sm:$0xff]  ;;  %v3096_v60 = vrot.slane %v3060_v55, 6 }
 0xdba   : > { %3126 = vrot.lane.b32.xlu2 %v3095_v35, %s5177_s19  ;;  %3307 = vst [vmem:[#allocation3 + $0xa8] sm:$0x3f] %v3278_v16  ;;  %4203 = vmatpush.msra.mxu1 %v4108_v17  ;;  %v4109_v52 = vld [vmem:[#allocation3 + $0x1d0] sm:$0xff]  ;;  %v3328_v55 = vld [vmem:[#allocation2 + $0x68] sm:$0x3] }
 0xdbb   : > { %4226 = vmatpush.msra.mxu2 %v4109_v52  ;;  %v3097_v26 = vsel %vm3081_vm4, %v8374_v15, %v3096_v60  ;;  %v3827_v16 = vld [vmem:[#allocation2 + $0x70] sm:$0x3] }
 0xdbc   : > { %v3240_v51 = vpop.permute.xlu2 %3239  ;;  %4204 = vmatpush.msra.mxu1 %v4101_v62 }
 0xdbd   : > { %3749 = vrot.lane.b32.xlu0 %v8516_v56, %s5195_s29 }
 0xdbe   : > { %4003 = vrot.lane.b32.xlu1 %v3957_v5, %s5199_s11 }
 0xdbf   : > { %v3373_v25 = vpop.permute.xlu0 %3372 }
 0xdc0   : > { %v8589_v63 = vpop.permute.xlu1 %3374  ;;  %v4110_v14 = vld [vmem:[#allocation3 + $0x1d8] sm:$0xff] }
 0xdc1   : > { %v3404_v8 = vsel %vm1339_vm14, %v3373_v25, %v8589_v63  ;;  %4249 = vmatpush.msra.mxu3 %v4110_v14  ;;  %v3958_v25 = vld [vmem:[#allocation2 + $0x78] sm:$0x3] }
 0xdc2   : > { %3243 = vrot.lane.b32.xlu2 %v8335_v21, %s5179_s20  ;;  %3432 = vst [vmem:[#allocation3 + $0xa8] sm:$0xc0] %v3404_v8 }
 0xdc4   : > { %v3502_v32 = vpop.permute.xlu2 %3501 }
 0xdc5   : > { %3128 = vrot.lane.b32.xlu0 %v3097_v26, %s5177_s19 }
 0xdc6   : > { %3130 = vrot.lane.b32.xlu1 %v3099_v28, %s5177_s19 }
 0xdc7   : > { %v3632_v57 = vpop.permute.xlu0 %3631 }
 0xdc8   : > { %v3650_v33 = vsel %vm1569_vm1, %v8521_v61, %v3632_v57  ;;  %v8603_v50 = vpop.permute.xlu1 %3633 }
 0xdc9   : > { %3678 = vst [vmem:[#allocation3 + $0x198] sm:$0xf] %v3650_v33  ;;  %v3651_v21 = vsel %vm1569_vm1, %v3632_v57, %v8603_v50  ;;  %v4072_v1 = vld [vmem:[#allocation3 + $0xa8] sm:$0xff]  ;;  %v3697_v57 = vld [vmem:[#allocation2 + $0x70] sm:$0x3] }
 0xdca   : > { %3505 = vrot.lane.b32.xlu2 %v3460_v2, %s5187_s7  ;;  %3679 = vst [vmem:[#allocation3 + $0x1a0] sm:$0xf] %v3651_v21  ;;  %4185 = vmatpush.msra.mxu0 %v4072_v1  ;;  %v8695_v1 = vld [vmem:[#allocation2 + $0x38] sm:$0xff] }
 0xdcc   : > { %v8608_v46 = vpop.permute.xlu2 %3615 }
 0xdcd   : > { %3245 = vrot.lane.b32.xlu0 %v8325_v13, %s5179_s20 }
 0xdce   : > { %3247 = vrot.lane.b32.xlu1 %v8344_v20, %s5179_s20 }
 0xdcf   : > { %v3746_v61 = vpop.permute.xlu0 %3745 }
 0xdd0   : > { %v3773_v58 = vsel %vm11024_vm7, %v8542_v36, %v3746_v61  ;;  %v8616_v24 = vpop.permute.xlu1 %3747  ;;  %vm11029_vm7 = vmmov %vm11022_vm6 }
 0xdd1   : > { %3801 = vst [vmem:[#allocation3 + $0x198] sm:$0xf0] %v3773_v58  ;;  %v3774_v10 = vsel %vm11025_vm13, %v3746_v61, %v8616_v24  ;;  %v3735_v61 = vrot.slane %v3697_v57, 4  ;;  %vm4145_vm13 = vcmask 736256  }
 0xdd2   : > { %2994 = vrot.lane.b32.xlu2 %v2952_v37, %s5175_s18  ;;  %3802 = vst [vmem:[#allocation3 + $0x1a0] sm:$0xf0] %v3774_v10 }
 0xdd4   : > { %v8621_v9 = vpop.permute.xlu2 %2990 }
 0xdd5   : > { %3619 = vrot.lane.b32.xlu0 %v3590_v31, %s5189_s26  ;;  %v2953_v31 = vld [vmem:[#allocation2 + $0x58] sm:$0x3] }
 0xdd6   : > { %3987 = vrot.lane.b32.xlu1 %v8302_v44, %s5199_s11 }
 0xdd7   : > { %v3123_v13 = vpop.permute.xlu0 %3122 }
 0xdd8   : > { %v8628_v20 = vpop.permute.xlu1 %3124  ;;  %v4102_v36 = vld [vmem:[#allocation3 + $0x198] sm:$0xff] }
 0xdd9   : > { %v3145_v12 = vsel %vm879_vm10, %v3123_v13, %v8628_v20  ;;  %4227 = vmatpush.msra.mxu2 %v4102_v36  ;;  %v4103_v38 = vld [vmem:[#allocation3 + $0x1a0] sm:$0xff] }
 0xdda   : > { %3110 = vrot.lane.b32.xlu2 %v8359_v19, %s5177_s19  ;;  %3174 = vst [vmem:[#allocation3 + $0x70] sm:$0xf] %v3145_v12  ;;  %4250 = vmatpush.msra.mxu3 %v4103_v38  ;;  %v3195_v12 = vld [vmem:[#allocation2 + $0x68] sm:$0x3] }
 0xddc   : > { %v8634_v41 = vpop.permute.xlu2 %3108 }
 0xddd   : > { %2996 = vrot.lane.b32.xlu0 %v2953_v31, %s5175_s18 }
 0xdde   : > { %2998 = vrot.lane.b32.xlu1 %v2954_v11, %s5175_s18 }
 0xddf   : > { %v8638_v54 = vpop.permute.xlu0 %3241 }
 0xde0   : > { %v3271_v42 = vsel %vm994_vm11, %v3240_v51, %v8638_v54  ;;  %v3500_v59 = vpop.permute.xlu1 %3499  ;;  %v3865_v51 = vrot.slane %v3827_v16, 2 }
 0xde1   : > { %3299 = vst [vmem:[#allocation3 + $0x70] sm:$0xf0] %v3271_v42  ;;  %v3519_v19 = vsel %vm1454_vm15, %v8461_v4, %v3500_v59  ;;  %v3520_v29 = vsel %vm1454_vm15, %v3500_v59, %v3502_v32  ;;  %v8718_v59 = vld [vmem:[#allocation2 + $0x28] sm:$0xff] }
 0xde2   : > { %3489 = vrot.lane.b32.xlu2 %v8299_v43, %s5187_s7  ;;  %3547 = vst [vmem:[#allocation3 + $0x158] sm:$0x3] %v3519_v19  ;;  %v3851_v43 = vrot.slane %v8302_v44, 2  ;;  %v3233_v19 = vrot.slane %v3195_v12, 4 }
 0xde3   : > { %3548 = vst [vmem:[#allocation3 + $0x160] sm:$0x3] %v3520_v29 }
 0xde4   : > { %v8647_v35 = vpop.permute.xlu2 %3487  ;;  %v3866_v39 = vsel %vm3347_vm12, %v3851_v43, %v3865_v51  ;;  %v3234_v16 = vsel %vm3214_vm0, %v8516_v56, %v3233_v19  ;;  %v3329_v19 = vld [vmem:[#allocation2 + $0x70] sm:$0x3] }
 0xde5   : > { %3112 = vrot.lane.b32.xlu0 %v8374_v15, %s5177_s19 }
 0xde6   : > { %3114 = vrot.lane.b32.xlu1 %v8377_v27, %s5177_s19 }
 0xde7   : > { %v8653_v17 = vpop.permute.xlu0 %3503 }
 0xde8   : > { %v3521_v4 = vsel %vm1454_vm15, %v3502_v32, %v8653_v17  ;;  %v3614_v52 = vpop.permute.xlu1 %3613  ;;  %v4065_v62 = vld [vmem:[#allocation3 + $0x70] sm:$0xff] }
 0xde9   : > { %3549 = vst [vmem:[#allocation3 + $0x168] sm:$0x3] %v3521_v4  ;;  %v3642_v5 = vsel %vm1569_vm1, %v8417_v53, %v3614_v52  ;;  %v3643_v15 = vsel %vm1569_vm1, %v3614_v52, %v8608_v46  ;;  %4186 = vmatpush.msra.mxu0 %v4065_v62  ;;  %v3366_v53 = vrot.slane %v3328_v55, 2  ;;  %v3087_v52 = vrot.slane %v8718_v59, 6  ;;  %v3828_v62 = vld [vmem:[#allocation2 + $0x78] sm:$0x3] }
 0xdea   : > { %2978 = vrot.lane.b32.xlu2 %v8235_v22, %s5175_s18  ;;  %3670 = vst [vmem:[#allocation3 + $0x158] sm:$0xfc] %v3642_v5 }
 0xdeb   : > { %3671 = vst [vmem:[#allocation3 + $0x160] sm:$0xfc] %v3643_v15  ;;  %v3367_v8 = vsel %vm3347_vm12, %v8480_v45, %v3366_v53 }
 0xdec   : > { %v8664_v27 = vpop.permute.xlu2 %2976 }
 0xded   : > { %3897 = vrot.lane.b32.xlu0 %v3866_v39, %s5197_s30  ;;  %v3867_v39 = vrot.slane %v3828_v62, 2 }
 0xdee   : > { %4005 = vrot.lane.b32.xlu1 %v3958_v25, %s5199_s11  ;;  %v8743_v25 = vrot.slane %v8695_v1, 2 }
 0xdef   : > { %v8669_v14 = vpop.permute.xlu0 %3617 }
 0xdf0   : > { %v3644_v60 = vsel %vm1569_vm1, %v8608_v46, %v8669_v14  ;;  %v8674_v22 = vpop.permute.xlu1 %3985  ;;  %v3721_v46 = vrot.slane %v8302_v44, 4 }
 0xdf1   : > { %3672 = vst [vmem:[#allocation3 + $0x168] sm:$0xfc] %v3644_v60  ;;  %v8681_v34 = vsel %vm2144_vm2, %v8430_v18, %v8674_v22  ;;  %v4094_v32 = vld [vmem:[#allocation3 + $0x158] sm:$0xff]  ;;  %v3868_v60 = vsel %vm3347_vm12, %v8743_v25, %v3867_v39 }
 0xdf2   : > { %3398 = vrot.lane.b32.xlu2 %v3367_v8, %s5185_s6  ;;  %4205 = vmatpush.msra.mxu1 %v4094_v32  ;;  %v4095_v26 = vld [vmem:[#allocation3 + $0x160] sm:$0xff]  ;;  %v3736_v37 = vsel %vm3214_vm0, %v3721_v46, %v3735_v61 }
 0xdf3   : > { %4228 = vmatpush.msra.mxu2 %v4095_v26 }
 0xdf4   : > { %v8684_v28 = vpop.permute.xlu2 %3396 }
 0xdf5   : > { %2980 = vrot.lane.b32.xlu0 %v8274_v30, %s5175_s18 }
 0xdf6   : > { %2982 = vrot.lane.b32.xlu1 %v8277_v0, %s5175_s18  ;;  %v3567_v0 = vld [vmem:[#allocation2 + $0x70] sm:$0x3] }
 0xdf7   : > { %v8690_v33 = vpop.permute.xlu0 %2992  ;;  %v3605_v13 = vrot.slane %v3567_v0, 6 }
 0xdf8   : > { %v3013_v18 = vsel %vm11026_vm9, %v8621_v9, %v8690_v33  ;;  %v3107_v2 = vpop.permute.xlu1 %3106  ;;  %v4096_v21 = vld [vmem:[#allocation3 + $0x168] sm:$0xff]  ;;  %v3591_v9 = vrot.slane %v8302_v44, 6  ;;  %vm11030_vm9 = vmmov %vm11027_vm5 }
 0xdf9   : > { %3041 = vst [vmem:[#allocation3 + $0x38] sm:$0x3] %v3013_v18  ;;  %v3138_v30 = vsel %vm879_vm10, %v3107_v2, %v8634_v41  ;;  %4251 = vmatpush.msra.mxu3 %v4096_v21  ;;  %v3461_v21 = vld [vmem:[#allocation2 + $0x70] sm:$0x3] }
 0xdfa   : > { %3989 = vrot.lane.b32.xlu2 %v8695_v1, %s5199_s11  ;;  %3166 = vst [vmem:[#allocation3 + $0x38] sm:$0xfc] %v3138_v30  ;;  %v3606_v11 = vsel %vm3081_vm4, %v3591_v9, %v3605_v13 }
 0xdfc   : > { %v8702_v58 = vpop.permute.xlu2 %3259 }
 0xdfd   : > { %v3279_v10 = vsel %vm994_vm11, %v8501_v6, %v8702_v58  ;;  %3767 = vrot.lane.b32.xlu0 %v3736_v37, %s5195_s29  ;;  %v2955_v37 = vld [vmem:[#allocation2 + $0x68] sm:$0x3] }
 0xdfe   : > { %3308 = vst [vmem:[#allocation3 + $0xb0] sm:$0x3f] %v3279_v10  ;;  %3881 = vrot.lane.b32.xlu1 %v3851_v43, %s5197_s30  ;;  %v8782_v10 = vrot.slane %v8695_v1, 4 }
 0xdff   : > { %v3484_v36 = vpop.permute.xlu0 %3483 }
 0xe00   : > { %v3486_v38 = vpop.permute.xlu1 %3485  ;;  %v3512_v31 = vsel %vm1454_vm15, %v8494_v7, %v3484_v36  ;;  %v3062_v7 = vld [vmem:[#allocation2 + $0x68] sm:$0x3] }
 0xe01   : > { %v3514_v42 = vsel %vm1454_vm15, %v3486_v38, %v8647_v35  ;;  %v3513_v6 = vsel %vm1454_vm15, %v3484_v36, %v3486_v38  ;;  %v4058_v44 = vld [vmem:[#allocation3 + $0x38] sm:$0xff]  ;;  %4206 = vmatpush.msra.mxu1 %v3512_v31  ;;  %v3100_v43 = vrot.slane %v3062_v7, 6 }
 0xe02   : > { %3637 = vrot.lane.b32.xlu2 %v3606_v11, %s5189_s26  ;;  %4187 = vmatpush.msra.mxu0 %v4058_v44 }
 0xe03   : > { %4229 = vmatpush.msra.mxu2 %v3513_v6  ;;  %4252 = vmatpush.msra.mxu3 %v3514_v42  ;;  %v8806_v6 = vld [vmem:[#allocation2 + $0x30] sm:$0xff] }
 0xe04   : > { %v8720_v29 = vpop.permute.xlu2 %3376  ;;  %v3221_v39 = vrot.slane %v8806_v6, 4 }
 0xe05   : > { %v3405_v4 = vsel %vm1339_vm14, %v8589_v63, %v8720_v29  ;;  %3265 = vrot.lane.b32.xlu0 %v3234_v16, %s5179_s20  ;;  %v3101_v63 = vsel %vm3081_vm4, %v3087_v52, %v3100_v43  ;;  %v3354_v16 = vrot.slane %v8806_v6, 2 }
 0xe06   : > { %3433 = vst [vmem:[#allocation3 + $0xb0] sm:$0xc0] %v3405_v4  ;;  %3382 = vrot.lane.b32.xlu1 %v8480_v45, %s5185_s6  ;;  %v4132_v45 = vld [vmem:[#allocation3 + $0x288] sm:$0x3]  ;;  %v3368_v4 = vrot.slane %v3329_v19, 2 }
 0xe07   : > { %v8731_v51 = vpop.permute.xlu0 %3895 }
 0xe08   : > { %v2975_v5 = vpop.permute.xlu1 %2974  ;;  %v3912_v15 = vsel %vm2029_vm3, %v8509_v23, %v8731_v51 }
 0xe09   : > { %v3006_v55 = vsel %vm11027_vm5, %v2975_v5, %v8664_v27 }
 0xe0a   : > { %3132 = vrot.lane.b32.xlu2 %v3101_v63, %s5177_s19  ;;  %4188 = vmatpush.msra.mxu0 %v3006_v55  ;;  %v3196_v63 = vld [vmem:[#allocation2 + $0x70] sm:$0x3] }
 0xe0c   : > { %v8745_v53 = vpop.permute.xlu2 %3635  ;;  %5029 = vmatpush.msk.msrb.mxu0 %vm3081_vm4, %v4132_v45 }
 0xe0d   : > { %v3652_v23 = vsel %vm1569_vm1, %v8603_v50, %v8745_v53  ;;  %3751 = vrot.lane.b32.xlu0 %v3721_v46, %s5195_s29  ;;  %v4073_v18 = vld [vmem:[#allocation3 + $0xb0] sm:$0xff] }
 0xe0e   : > { %3680 = vst [vmem:[#allocation3 + $0x1a8] sm:$0xf] %v3652_v23  ;;  %4270 = vmatpush.msrb.mxu0 %v8681_v34  ;;  %3899 = vrot.lane.b32.xlu1 %v3868_v60, %s5197_s30 }
 0xe0f   : > { %v3393_v8 = vpop.permute.xlu0 %3392 }
 0xe10   : > { %4271 = vmatpush.msrb.mxu0 %v3912_v15  ;;  %v3395_v32 = vpop.permute.xlu1 %3394  ;;  %v3412_v26 = vsel %vm1339_vm14, %v8531_v48, %v3393_v8  ;;  %v3698_v48 = vld [vmem:[#allocation2 + $0x78] sm:$0x3] }
 0xe11   : > { %v3414_v57 = vsel %vm1339_vm14, %v3395_v32, %v8684_v28  ;;  %v3413_v50 = vsel %vm1339_vm14, %v3393_v8, %v3395_v32  ;;  %4207 = vmatpush.msra.mxu1 %v3412_v26  ;;  %v3737_v0 = vrot.slane %v3698_v48, 4 }
 0xe12   : > { %3621 = vrot.lane.b32.xlu2 %v3591_v9, %s5189_s26  ;;  %4230 = vmatpush.msra.mxu2 %v3413_v50  ;;  %v3462_v50 = vld [vmem:[#allocation2 + $0x78] sm:$0x3] }
 0xe13   : > { %4253 = vmatpush.msra.mxu3 %v3414_v57  ;;  %4208 = vmatpush.msra.mxu1 %v4073_v18  ;;  %v3738_v13 = vsel %vm3214_vm0, %v8782_v10, %v3737_v0  ;;  %v3063_v57 = vld [vmem:[#allocation2 + $0x70] sm:$0x3]  ;;  %v3088_v18 = vrot.slane %v8806_v6, 6 }
 0xe14   : > { %v8762_v34 = vpop.permute.xlu2 %3126 }
 0xe15   : > { %v3146_v2 = vsel %vm879_vm10, %v8628_v20, %v8762_v34  ;;  %3249 = vrot.lane.b32.xlu0 %v8516_v56, %s5179_s20  ;;  %v3568_v56 = vld [vmem:[#allocation2 + $0x78] sm:$0x3] }
 0xe16   : > { %3175 = vst [vmem:[#allocation3 + $0x78] sm:$0xf] %v3146_v2  ;;  %3507 = vrot.lane.b32.xlu1 %v3461_v21, %s5187_s7  ;;  %v3607_v36 = vrot.slane %v3568_v56, 6 }
 0xe17   : > { %v8770_v46 = vpop.permute.xlu0 %3765 }
 0xe18   : > { %v8772_v61 = vpop.permute.xlu1 %3879  ;;  %v3782_v30 = vsel %vm11022_vm6, %v8554_v3, %v8770_v46  ;;  %vm11031_vm6 = vmmov %vm11027_vm5 }
 0xe19   : > { %v3905_v20 = vsel %vm2029_vm3, %v8576_v49, %v8772_v61  ;;  %3810 = vst [vmem:[#allocation3 + $0x1e0] sm:$0x3f] %v3782_v30  ;;  %v8795_v49 = vrot.slane %v8695_v1, 6 }
 0xe1a   : > { %3000 = vrot.lane.b32.xlu2 %v2955_v37, %s5175_s18  ;;  %3933 = vst [vmem:[#allocation3 + $0x1e0] sm:$0xc0] %v3905_v20  ;;  %v8869_v37 = vld [vmem:[%s9955_s3] sm:$0xff] }
 0xe1b   : > { %v3608_v11 = vsel %vm3081_vm4, %v8795_v49, %v3607_v36  ;;  %5018 = vmatmul.msk.f32.vlgmr.msra.gmra.mxu0 %vm4145_vm13, %v8869_v37 }
 0xe1c   : > { %v8784_v9 = vpop.permute.xlu2 %3243 }
 0xe1d   : > { %v3272_v3 = vsel %vm994_vm11, %v8638_v54, %v8784_v9  ;;  %3769 = vrot.lane.b32.xlu0 %v3738_v13, %s5195_s29  ;;  %v3330_v13 = vld [vmem:[#allocation2 + $0x78] sm:$0x3] }
 0xe1e   : > { %3300 = vst [vmem:[#allocation3 + $0x78] sm:$0xf0] %v3272_v3  ;;  %3883 = vrot.lane.b32.xlu1 %v8743_v25, %s5197_s30 }
 0xe1f   : > { %v3262_v12 = vpop.permute.xlu0 %3261 }
 0xe20   : > { %v8797_v38 = vpop.permute.xlu1 %3263  ;;  %v3280_v31 = vsel %vm994_vm11, %v8702_v58, %v3262_v12 }
 0xe21   : > { %v3281_v54 = vsel %vm994_vm11, %v3262_v12, %v8797_v38  ;;  %3309 = vst [vmem:[#allocation3 + $0xb8] sm:$0x3f] %v3280_v31  ;;  %v4111_v42 = vld [vmem:[#allocation3 + $0x1e0] sm:$0xff]  ;;  %v2956_v31 = vld [vmem:[#allocation2 + $0x70] sm:$0x3] }
 0xe22   : > { %3639 = vrot.lane.b32.xlu2 %v3608_v11, %s5189_s26  ;;  %3310 = vst [vmem:[#allocation3 + $0xc0] sm:$0x3f] %v3281_v54  ;;  %4272 = vmatpush.msrb.mxu0 %v4111_v42 }
 0xe24   : > { %v8808_v44 = vpop.permute.xlu2 %3505 }
 0xe25   : > { %v3522_v58 = vsel %vm1454_vm15, %v8653_v17, %v8808_v44  ;;  %v4066_v7 = vld [vmem:[#allocation3 + $0x78] sm:$0xff]  ;;  %3116 = vrot.lane.b32.xlu0 %v3087_v52, %s5177_s19  ;;  %v3369_v17 = vsel %vm3347_vm12, %v3354_v16, %v3368_v4 }
 0xe26   : > { %3550 = vst [vmem:[#allocation3 + $0x170] sm:$0x3] %v3522_v58  ;;  %4209 = vmatpush.msra.mxu1 %v4066_v7  ;;  %3491 = vrot.lane.b32.xlu1 %v8806_v6, %s5187_s7  ;;  %v3197_v58 = vld [vmem:[#allocation2 + $0x78] sm:$0x3] }
 0xe27   : > { %v3379_v62 = vpop.permute.xlu0 %3378 }
 0xe28   : > { %v8819_v43 = vpop.permute.xlu1 %3380  ;;  %v3406_v5 = vsel %vm1339_vm14, %v8720_v29, %v3379_v62  ;;  %v3235_v29 = vrot.slane %v3196_v63, 4 }
 0xe29   : > { %v3407_v15 = vsel %vm1339_vm14, %v3379_v62, %v8819_v43  ;;  %3434 = vst [vmem:[#allocation3 + $0xb8] sm:$0xc0] %v3406_v5 }
 0xe2a   : > { %3400 = vrot.lane.b32.xlu2 %v3369_v17, %s5185_s6  ;;  %3435 = vst [vmem:[#allocation3 + $0xc0] sm:$0xc0] %v3407_v15  ;;  %v3237_v17 = vrot.slane %v3197_v58, 4 }
 0xe2c   : > { %v8827_v52 = vpop.permute.xlu2 %2994  ;;  %v3238_v63 = vsel %vm3214_vm0, %v8782_v10, %v3237_v17 }
 0xe2d   : > { %v3014_v55 = vsel %vm11028_vm8, %v8690_v33, %v8827_v52  ;;  %3753 = vrot.lane.b32.xlu0 %v8782_v10, %s5195_s29  ;;  %v3236_v33 = vsel %vm3214_vm0, %v3221_v39, %v3235_v29  ;;  %vm11032_vm8 = vcmask 1014784  }
 0xe2e   : > { %3042 = vst [vmem:[#allocation3 + $0x40] sm:$0x3] %v3014_v55  ;;  %2984 = vrot.lane.b32.xlu1 %v8718_v59, %s5175_s18 }
 0xe2f   : > { %v8837_v45 = vpop.permute.xlu0 %3749 }
 0xe30   : > { %v8839_v23 = vpop.permute.xlu1 %4003  ;;  %v3775_v60 = vsel %vm11029_vm7, %v8616_v24, %v8837_v45  ;;  %v4074_v8 = vld [vmem:[#allocation3 + $0xb8] sm:$0xff]  ;;  %vm3047_vm7 = vcmask 1008640  }
 0xe31   : > { %v4019_v32 = vsel %vm2144_vm2, %v8567_v40, %v8839_v23  ;;  %3803 = vst [vmem:[#allocation3 + $0x1a8] sm:$0xf0] %v3775_v60  ;;  %4231 = vmatpush.msra.mxu2 %v4074_v8  ;;  %v4075_v26 = vld [vmem:[#allocation3 + $0xc0] sm:$0xff]  ;;  %v3102_v40 = vrot.slane %v3063_v57, 6 }
 0xe32   : > { %3267 = vrot.lane.b32.xlu2 %v3236_v33, %s5179_s20  ;;  %4047 = vst [vmem:[#allocation3 + $0x290] sm:$0x3] %v4019_v32  ;;  %4254 = vmatpush.msra.mxu3 %v4075_v26 }
 0xe33   : > { %v3103_v0 = vsel %vm3081_vm4, %v3088_v18, %v3102_v40 }
 0xe34   : > { %v8849_v59 = vpop.permute.xlu2 %3110 }
 0xe35   : > { %v3139_v24 = vsel %vm879_vm10, %v8634_v41, %v8849_v59  ;;  %3509 = vrot.lane.b32.xlu0 %v3462_v50, %s5187_s7  ;;  %v2957_v50 = vld [vmem:[#allocation2 + $0x78] sm:$0x3] }
 0xe36   : > { %3167 = vst [vmem:[#allocation3 + $0x40] sm:$0xfc] %v3139_v24  ;;  %3623 = vrot.lane.b32.xlu1 %v8795_v49, %s5189_s26 }
 0xe37   : > { %v3129_v2 = vpop.permute.xlu0 %3128 }
 0xe38   : > { %v8858_v21 = vpop.permute.xlu1 %3130  ;;  %v3147_v48 = vsel %vm879_vm10, %v8762_v34, %v3129_v2  ;;  %v4104_v30 = vld [vmem:[#allocation3 + $0x1a8] sm:$0xff] }
 0xe39   : > { %v3148_v41 = vsel %vm879_vm10, %v3129_v2, %v8858_v21  ;;  %3176 = vst [vmem:[#allocation3 + $0x80] sm:$0xf] %v3147_v48  ;;  %4273 = vmatpush.msrb.mxu0 %v4104_v30  ;;  %v11033_v30 = vld [vmem:[#allocation7_spill] sm:$0xff] }
 0xe3a   : > { %3134 = vrot.lane.b32.xlu2 %v3103_v0, %s5177_s19  ;;  %3177 = vst [vmem:[#allocation3 + $0x88] sm:$0xf] %v3148_v41 }
 0xe3c   : > { %v8871_v20 = vpop.permute.xlu2 %3489 }
 0xe3d   : > { %v3515_v34 = vsel %vm1454_vm15, %v8647_v35, %v8871_v20  ;;  %v4059_v56 = vld [vmem:[#allocation3 + $0x40] sm:$0xff]  ;;  %3384 = vrot.lane.b32.xlu0 %v3354_v16, %s5185_s6  ;;  %v3370_v35 = vrot.slane %v3330_v13, 2  ;;  %v8974_v13 = vld [vmem:[%s9955_s3 + $0x8] sm:$0x7f] }
 0xe3e   : > { %4210 = vmatpush.msra.mxu1 %v4059_v56  ;;  %3493 = vrot.lane.b32.xlu1 %v8695_v1, %s5187_s7 }
 0xe3f   : > { %v3246_v3 = vpop.permute.xlu0 %3245  ;;  %v3371_v19 = vsel %vm3347_vm12, %v8743_v25, %v3370_v35  ;;  %5019 = vmatmul.msk.f32.gmra.mxu0 %vm4145_vm13, %v8974_v13 }
 0xe40   : > { %v8881_v36 = vpop.permute.xlu1 %3247  ;;  %v3273_v12 = vsel %vm994_vm11, %v8784_v9, %v3246_v3  ;;  %v4133_v9 = vld [vmem:[#allocation3 + $0x290] sm:$0x3] }
 0xe41   : > { %v3274_v11 = vsel %vm994_vm11, %v3246_v3, %v8881_v36  ;;  %3301 = vst [vmem:[#allocation3 + $0x80] sm:$0xf0] %v3273_v12 }
 0xe42   : > { %3002 = vrot.lane.b32.xlu2 %v2956_v31, %s5175_s18  ;;  %3302 = vst [vmem:[#allocation3 + $0x88] sm:$0xf0] %v3274_v11 }
 0xe44   : > { %v8888_v54 = vpop.permute.xlu2 %2978 }
 0xe45   : > { %v3007_v42 = vsel %vm11030_vm9, %v8664_v27, %v8888_v54  ;;  %3251 = vrot.lane.b32.xlu0 %v3221_v39, %s5179_s20 }
 0xe46   : > { %4211 = vmatpush.msra.mxu1 %v3007_v42  ;;  %3402 = vrot.lane.b32.xlu1 %v3371_v19, %s5185_s6 }
 0xe47   : > { %v8898_v7 = vpop.permute.xlu0 %3619  ;;  %5021 = vmatmul.msk.f32.vlgmr.msra.gmra.mxu1 %vm4145_vm13, %v8869_v37 }
 0xe48   : > { %5032 = vmatpush.msk.msrb.mxu1 %vm3081_vm4, %v4133_v9  ;;  %v3645_v27 = vsel %vm1569_vm1, %v8669_v14, %v8898_v7  ;;  %v3988_v16 = vpop.permute.xlu1 %3987  ;;  %v4067_v4 = vld [vmem:[#allocation3 + $0x80] sm:$0xff] }
 0xe49   : > { %3673 = vst [vmem:[#allocation3 + $0x170] sm:$0xfc] %v3645_v27  ;;  %v4012_v62 = vsel %vm2144_vm2, %v8674_v22, %v3988_v16  ;;  %4232 = vmatpush.msra.mxu2 %v4067_v4  ;;  %v4068_v5 = vld [vmem:[#allocation3 + $0x88] sm:$0xff]  ;;  %v3064_v22 = vld [vmem:[#allocation2 + $0x78] sm:$0x3] }
 0xe4a   : > { %3386 = vrot.lane.b32.xlu2 %v8743_v25, %s5185_s6  ;;  %4255 = vmatpush.msra.mxu3 %v4068_v5 }
 0xe4b   : > { %4293 = vmatpush.msrb.mxu1 %v4012_v62 }
 0xe4c   : > { %v8909_v15 = vpop.permute.xlu2 %3398 }
 0xe4d   : > { %v3415_v14 = vsel %vm1339_vm14, %v8684_v28, %v8909_v15  ;;  %3118 = vrot.lane.b32.xlu0 %v3088_v18, %s5177_s19  ;;  %v3104_v28 = vrot.slane %v3064_v22, 6 }
 0xe4e   : > { %3269 = vrot.lane.b32.xlu1 %v3238_v63, %s5179_s20 }
 0xe4f   : > { %v2997_v55 = vpop.permute.xlu0 %2996  ;;  %5022 = vmatmul.msk.f32.gmra.mxu1 %vm4145_vm13, %v8974_v13 }
 0xe50   : > { %v3015_v25 = vsel %vm11027_vm5, %v8827_v52, %v2997_v55  ;;  %v8920_v39 = vpop.permute.xlu1 %2998  ;;  %v4097_v29 = vld [vmem:[#allocation3 + $0x170] sm:$0xff]  ;;  %v3105_v52 = vsel %vm3081_vm4, %v8795_v49, %v3104_v28 }
 0xe51   : > { %3043 = vst [vmem:[#allocation3 + $0x48] sm:$0x3] %v3015_v25  ;;  %v3016_v60 = vsel %vm11031_vm6, %v2997_v55, %v8920_v39  ;;  %4274 = vmatpush.msrb.mxu0 %v4097_v29  ;;  %vm3180_vm6 = vcmask 1010688  }
 0xe52   : > { %3253 = vrot.lane.b32.xlu2 %v8782_v10, %s5179_s20  ;;  %3044 = vst [vmem:[#allocation3 + $0x50] sm:$0x3] %v3016_v60 }
 0xe53   : > { %4275 = vmatpush.msrb.mxu0 %v3515_v34 }
 0xe54   : > { %v3990_v8 = vpop.permute.xlu2 %3989 }
 0xe55   : > { %v4013_v33 = vsel %vm2144_vm2, %v3988_v16, %v3990_v8  ;;  %2986 = vrot.lane.b32.xlu0 %v8806_v6, %s5175_s18  ;;  %4276 = vmatpush.msrb.mxu0 %v3415_v14 }
 0xe56   : > { %4041 = vst.msk [vmem:[#allocation3 + $0x260] sm:$0xff] %vm11032_vm8, %v4013_v33  ;;  %3136 = vrot.lane.b32.xlu1 %v3105_v52, %s5177_s19 }
 0xe57   : > { %v3113_v32 = vpop.permute.xlu0 %3112 }
 0xe58   : > { %v3140_v10 = vsel %vm879_vm10, %v8849_v59, %v3113_v32  ;;  %v8935_v26 = vpop.permute.xlu1 %3114 }
 0xe59   : > { %3168 = vst [vmem:[#allocation3 + $0x48] sm:$0xfc] %v3140_v10  ;;  %v3141_v57 = vsel %vm879_vm10, %v3113_v32, %v8935_v26 }
 0xe5a   : > { %2988 = vrot.lane.b32.xlu2 %v8695_v1, %s5175_s18  ;;  %3169 = vst [vmem:[#allocation3 + $0x50] sm:$0xfc] %v3141_v57 }
 0xe5c   : > { %v3638_v6 = vpop.permute.xlu2 %3637 }
 0xe5d   : > { %v3653_v24 = vsel %vm1569_vm1, %v8745_v53, %v3638_v6  ;;  %3004 = vrot.lane.b32.xlu0 %v2957_v50, %s5175_s18  ;;  %v4127_v12 = vld [vmem:[#allocation3 + $0x260] sm:$0xff] }
 0xe5e   : > { %3681 = vst [vmem:[#allocation3 + $0x1b0] sm:$0xf] %v3653_v24  ;;  %3120 = vrot.lane.b32.xlu1 %v8795_v49, %s5177_s19 }
 0xe5f   : > { %v3898_v59 = vpop.permute.xlu0 %3897 }
 0xe60   : > { %v4006_v18 = vpop.permute.xlu1 %4005  ;;  %v3913_v40 = vsel %vm2029_vm3, %v8731_v51, %v3898_v59  ;;  %v4060_v2 = vld [vmem:[#allocation3 + $0x48] sm:$0xff]  ;;  %v11034_v51 = vld [vmem:[#allocation8_spill] sm:$0xff] }
 0xe61   : > { %v4020_v1 = vsel %vm2144_vm2, %v8839_v23, %v4006_v18  ;;  %4233 = vmatpush.msra.mxu2 %v4060_v2  ;;  %v4061_v48 = vld [vmem:[#allocation3 + $0x50] sm:$0xff]  ;;  %4294 = vmatpush.msrb.mxu1 %v3913_v40  ;;  %vm11035_vm2 = vmmov %vm11027_vm5 }
 0xe62   : > { %4048 = vst.msk [vmem:[#allocation3 + $0x298] sm:$0x3] %vm3047_vm7, %v4020_v1  ;;  %4256 = vmatpush.msra.mxu3 %v4061_v48  ;;  %vm11036_vm9 = vmmov %vm11035_vm2  ;;  %v4378_v18 = vld [vmem:[%s9957_s5 + $0xf0] sm:$0xff] }
 0xe63   : > { %vm11038_vm5 = vmmov %vm11035_vm2 }
 0xe64   : > { %v8951_v53 = vpop.permute.xlu2 %3132 }
 0xe65   : > { %v3149_v49 = vsel %vm879_vm10, %v8858_v21, %v8951_v53  ;;  %4137 = vperm.xlu0 %5148, %v11033_v30   ;;  %v4374_v30 = vld [vmem:[%s9957_s5 + $0xd0] sm:$0xff] }
 0xe66   : > { %3178 = vst [vmem:[#allocation3 + $0x90] sm:$0xf] %v3149_v49  ;;  %4142 = vperm.xlu1 %5150, %v11034_v51   ;;  %v4376_v49 = vld [vmem:[%s9957_s5 + $0xe0] sm:$0xff] }
 0xe67   : > { %v2981_v0 = vpop.permute.xlu0 %2980  ;;  %v4408_v51 = vld [vmem:[%s9957_s5 + $0x1e0] sm:$0xff] }
 0xe68   : > { %v8958_v41 = vpop.permute.xlu1 %2982  ;;  %v3008_v23 = vsel %vm11035_vm2, %v8888_v54, %v2981_v0  ;;  %vm11040_vm2 = vcmask 1014784  }
 0xe69   : > { %v3009_v34 = vsel %vm11036_vm9, %v2981_v0, %v8958_v41  ;;  %4234 = vmatpush.msra.mxu2 %v3008_v23  ;;  %v4134_v56 = vld [vmem:[#allocation3 + $0x298] sm:$0x3]  ;;  %vm3313_vm9 = vcmask 1012736   ;;  %v4372_v0 = vld [vmem:[%s9957_s5 + $0xc0] sm:$0xff] }
 0xe6a   : > { %4257 = vmatpush.msra.mxu3 %v3009_v34  ;;  %5024 = vmatmul.msk.f32.vlgmr.msra.gmra.mxu2 %vm4145_vm13, %v8869_v37  ;;  %v4370_v34 = vld [vmem:[%s9957_s5 + $0xb0] sm:$0xff] }
 0xe6b   : > { %5027 = vmatmul.msk.f32.vlgmr.msra.gmra.mxu3 %vm4145_vm13, %v8869_v37  ;;  %5035 = vmatpush.msk.msrb.mxu2 %vm3081_vm4, %v4134_v56  ;;  %vm11037_vm4 = vcmask 252928  }
 0xe6c   : > { %v8966_v21 = vpop.permute.xlu2 %3621  ;;  %vm11039_vm8 = vmmov %vm11037_vm4  ;;  %4584 = vmatpush.msrb.mxu3 %v4378_v18 }
 0xe6d   : > { %v3646_v3 = vsel %vm1569_vm1, %v8898_v7, %v8966_v21  ;;  %4316 = vmatpush.msrb.mxu2 %v4127_v12 }
 0xe6e   : > { %3674 = vst [vmem:[#allocation3 + $0x178] sm:$0xfc] %v3646_v3  ;;  %4585 = vmatpush.msrb.mxu3 %v4376_v49 }
 0xe6f   : > { %v3768_v31 = vpop.permute.xlu0 %3767 }
 0xe70   : > { %v3882_v11 = vpop.permute.xlu1 %3881  ;;  %v3783_v35 = vsel %vm11037_vm4, %v8770_v46, %v3768_v31  ;;  %vm3438_vm4 = vcmask 1014790   ;;  %4586 = vmatpush.msrb.mxu3 %v4374_v30 }
 0xe71   : > { %v3906_v54 = vsel %vm2029_vm3, %v8772_v61, %v3882_v11  ;;  %3811 = vst [vmem:[#allocation3 + $0x1e8] sm:$0x3f] %v3783_v35  ;;  %v4402_v35 = vld [vmem:[%s9957_s5 + $0x1b0] sm:$0xff] }
 0xe72   : > { %3934 = vst [vmem:[#allocation3 + $0x1e8] sm:$0xc0] %v3906_v54  ;;  %5025 = vmatmul.msk.f32.gmra.mxu2 %vm4145_vm13, %v8974_v13  ;;  %4587 = vmatpush.msrb.mxu3 %v4372_v0  ;;  %v4368_v54 = vld [vmem:[%s9957_s5 + $0xa0] sm:$0xff] }
 0xe73   : > { %5028 = vmatmul.msk.f32.gmra.mxu3 %vm4145_vm13, %v8974_v13 }
 0xe74   : > { %v8989_v42 = vpop.permute.xlu2 %3000  ;;  %4588 = vmatpush.msrb.mxu3 %v4370_v34  ;;  %v4442_v34 = vld [vmem:[%s9957_s5 + $0x2f0] sm:$0xff] }
 0xe75   : > { %v3017_v19 = vsel %vm11038_vm5, %v8920_v39, %v8989_v42  ;;  %vm11041_vm5 = vmmov %vm11039_vm8 }
 0xe76   : > { %3045 = vst [vmem:[#allocation3 + $0x58] sm:$0x3] %v3017_v19  ;;  %4589 = vmatpush.msrb.mxu3 %v4368_v54  ;;  %v4434_v54 = vld [vmem:[%s9957_s5 + $0x2b0] sm:$0xff] }
 0xe77   : > { %v3266_v9 = vpop.permute.xlu0 %3265 }
 0xe78   : > { %v8996_v46 = vpop.permute.xlu1 %3382  ;;  %v3282_v61 = vsel %vm994_vm11, %v8797_v38, %v3266_v9 }
 0xe79   : > { %v3408_v58 = vsel %vm1339_vm14, %v8819_v43, %v8996_v46  ;;  %3311 = vst [vmem:[#allocation3 + $0xc8] sm:$0x3f] %v3282_v61  ;;  %v4112_v7 = vld [vmem:[#allocation3 + $0x1e8] sm:$0xff]  ;;  %v4398_v61 = vld [vmem:[%s9957_s5 + $0x190] sm:$0xff] }
 0xe7a   : > { %3436 = vst [vmem:[#allocation3 + $0xc8] sm:$0xc0] %v3408_v58  ;;  %4295 = vmatpush.msrb.mxu1 %v4112_v7  ;;  %v4362_v7 = vld [vmem:[%s9957_s5 + $0x70] sm:$0xff] }
 0xe7c   : > { %v3640_v27 = vpop.permute.xlu2 %3639 }
 0xe7d   : > { %v3654_v16 = vsel %vm1569_vm1, %v3638_v6, %v3640_v27 }
 0xe7e   : > { %3682 = vst.msk [vmem:[#allocation3 + $0x1b8] sm:$0xf] %vm3180_vm6, %v3654_v16 }
 0xe7f   : > { %v3752_v4 = vpop.permute.xlu0 %3751 }
 0xe80   : > { %v3900_v62 = vpop.permute.xlu1 %3899  ;;  %v3776_v5 = vsel %vm11039_vm8, %v8837_v45, %v3752_v4  ;;  %vm3305_vm8 = vcmask 1014788  }
 0xe81   : > { %v3914_v38 = vsel %vm2029_vm3, %v3898_v59, %v3900_v62  ;;  %3804 = vst [vmem:[#allocation3 + $0x1b0] sm:$0xf0] %v3776_v5  ;;  %v4076_v17 = vld [vmem:[#allocation3 + $0xc8] sm:$0xff]  ;;  %v4396_v62 = vld [vmem:[%s9957_s5 + $0x180] sm:$0xff] }
 0xe82   : > { %3942 = vst.msk [vmem:[#allocation3 + $0x228] sm:$0xff] %vm11040_vm2, %v3914_v38  ;;  %4277 = vmatpush.msrb.mxu0 %v4076_v17  ;;  %vm11043_vm2 = vmmov %vm11041_vm5  ;;  %v4360_v17 = vld [vmem:[%s9957_s5 + $0x60] sm:$0xff] }
 0xe84   : > { %v9009_v43 = vpop.permute.xlu2 %3400 }
 0xe85   : > { %v3416_v14 = vsel %vm1339_vm14, %v8909_v15, %v9009_v43 }
 0xe87   : > { %v9014_v63 = vpop.permute.xlu0 %3249 }
 0xe88   : > { %v9016_v22 = vpop.permute.xlu1 %3507  ;;  %v3275_v45 = vsel %vm994_vm11, %v8881_v36, %v9014_v63  ;;  %v4105_v55 = vld [vmem:[#allocation3 + $0x1b0] sm:$0xff] }
 0xe89   : > { %v3523_v25 = vsel %vm1454_vm15, %v8808_v44, %v9016_v22  ;;  %3303 = vst [vmem:[#allocation3 + $0x90] sm:$0xf0] %v3275_v45  ;;  %4296 = vmatpush.msrb.mxu1 %v4105_v55  ;;  %v4120_v39 = vld [vmem:[#allocation3 + $0x228] sm:$0xff]  ;;  %v4356_v45 = vld [vmem:[%s9957_s5 + $0x40] sm:$0xff]  ;;  %v4390_v55 = vld [vmem:[%s9957_s5 + $0x150] sm:$0xff] }
 0xe8a   : > { %3551 = vst [vmem:[#allocation3 + $0x178] sm:$0x3] %v3523_v25  ;;  %4317 = vmatpush.msrb.mxu2 %v4120_v39 }
 0xe8c   : > { %v9024_v29 = vpop.permute.xlu2 %3267 }
 0xe8d   : > { %v3283_v15 = vsel %vm994_vm11, %v3266_v9, %v9024_v29  ;;  %v4364_v9 = vld [vmem:[%s9957_s5 + $0x80] sm:$0xff] }
 0xe8e   : > { %3312 = vst [vmem:[#allocation3 + $0xd0] sm:$0x3f] %v3283_v15  ;;  %v4354_v15 = vld [vmem:[%s9957_s5 + $0x30] sm:$0xff] }
 0xe8f   : > { %v3770_v60 = vpop.permute.xlu0 %3769 }
 0xe90   : > { %v3884_v36 = vpop.permute.xlu1 %3883  ;;  %v3784_v28 = vsel %vm11041_vm5, %v3768_v31, %v3770_v60  ;;  %v4069_v8 = vld [vmem:[#allocation3 + $0x90] sm:$0xff]  ;;  %v4404_v31 = vld [vmem:[%s9957_s5 + $0x1c0] sm:$0xff] }
 0xe91   : > { %v3907_v44 = vsel %vm2029_vm3, %v3882_v11, %v3884_v36  ;;  %3812 = vst.msk [vmem:[#allocation3 + $0x1f0] sm:$0x3f] %vm3313_vm9, %v3784_v28  ;;  %4278 = vmatpush.msrb.mxu0 %v4069_v8  ;;  %v4098_v33 = vld [vmem:[#allocation3 + $0x178] sm:$0xff]  ;;  %vm11042_vm3 = vcmask 777216  }
 0xe92   : > { %3935 = vst.msk [vmem:[#allocation3 + $0x1f0] sm:$0xc0] %vm3438_vm4, %v3907_v44  ;;  %4297 = vmatpush.msrb.mxu1 %v4098_v33  ;;  %vm11044_vm5 = vmmov %vm11042_vm3  ;;  %v4388_v44 = vld [vmem:[%s9957_s5 + $0x140] sm:$0xff] }
 0xe94   : > { %v9032_v52 = vpop.permute.xlu2 %3134 }
 0xe95   : > { %v3150_v32 = vsel %vm879_vm10, %v8951_v53, %v9032_v52  ;;  %v4410_v53 = vld [vmem:[%s9957_s5 + $0x1f0] sm:$0xff] }
 0xe96   : > { %3179 = vst [vmem:[#allocation3 + $0x98] sm:$0xf] %v3150_v32 }
 0xe97   : > { %v9037_v10 = vpop.permute.xlu0 %3116 }
 0xe98   : > { %v3142_v57 = vsel %vm879_vm10, %v8935_v26, %v9037_v10  ;;  %v9042_v6 = vpop.permute.xlu1 %3491 }
 0xe99   : > { %3170 = vst [vmem:[#allocation3 + $0x58] sm:$0xfc] %v3142_v57  ;;  %v3516_v50 = vsel %vm1454_vm15, %v8871_v20, %v9042_v6  ;;  %v4113_v24 = vld [vmem:[#allocation3 + $0x1f0] sm:$0xff]  ;;  %v4352_v57 = vld [vmem:[%s9957_s5 + $0x20] sm:$0xff] }
 0xe9a   : > { %4318 = vmatpush.msrb.mxu2 %v4113_v24  ;;  %4298 = vmatpush.msrb.mxu1 %v3516_v50  ;;  %v4348_v50 = vld [vmem:[%s9957_s5] sm:$0xff]  ;;  %v4382_v24 = vld [vmem:[%s9957_s5 + $0x110] sm:$0xff] }
 0xe9c   : > { %v9047_v59 = vpop.permute.xlu2 %3002  ;;  %4299 = vmatpush.msrb.mxu1 %v3416_v14  ;;  %v4358_v14 = vld [vmem:[%s9957_s5 + $0x50] sm:$0xff] }
 0xe9d   : > { %v3018_v26 = vsel %vm11042_vm3, %v8989_v42, %v9047_v59  ;;  %vm3172_vm3 = vcmask 1014786   ;;  %v4366_v42 = vld [vmem:[%s9957_s5 + $0x90] sm:$0xff] }
 0xe9e   : > { %3046 = vst [vmem:[#allocation3 + $0x60] sm:$0x3] %v3018_v26  ;;  %4590 = vmatpush.msrb.mxu3 %v4366_v42  ;;  %v4190_v42 = vpop.f32.mrf.mxu0 }
 0xe9f   : > { %v3754_v40 = vpop.permute.xlu0 %3753 }
 0xea0   : > { %v3777_v20 = vsel %vm11043_vm2, %v3752_v4, %v3754_v40  ;;  %v9056_v2 = vpop.permute.xlu1 %2984  ;;  %v4062_v1 = vld [vmem:[#allocation3 + $0x58] sm:$0xff]  ;;  %4591 = vmatpush.msrb.mxu3 %v4364_v9  ;;  %vm5000_vm2 = vcmask 73728  }
 0xea1   : > { %3805 = vst.msk [vmem:[#allocation3 + $0x1b8] sm:$0xf0] %vm3305_vm8, %v3777_v20  ;;  %v3010_v48 = vsel %vm11044_vm5, %v8958_v41, %v9056_v2  ;;  %4279 = vmatpush.msrb.mxu0 %v4062_v1  ;;  %v4406_v41 = vld [vmem:[%s9957_s5 + $0x1d0] sm:$0xff]  ;;  %v4380_v1 = vld [vmem:[%s9957_s5 + $0x100] sm:$0xff] }
 0xea2   : > { %4592 = vmatpush.msrb.mxu3 %v4362_v7  ;;  %v4428_v7 = vld [vmem:[%s9957_s5 + $0x280] sm:$0xff] }
 0xea3   : > { %4280 = vmatpush.msrb.mxu0 %v3010_v48 }
 0xea4   : > { %5030 = vmatmul.msk.f32.vlgmr.msrb.gmra.mxu0 %vm4145_vm13, %v8869_v37  ;;  %v3387_v19 = vpop.permute.xlu2 %3386  ;;  %4593 = vmatpush.msrb.mxu3 %v4360_v17  ;;  %v4426_v17 = vld [vmem:[%s9957_s5 + $0x270] sm:$0xff] }
 0xea5   : > { %4607 = vmatpush.msra.mxu0 %v4410_v53 }
 0xea6   : > { %4594 = vmatpush.msrb.mxu3 %v4358_v14  ;;  %v4472_v14 = vld [vmem:[%s9957_s5 + $0x3e0] sm:$0xff] }
 0xea7   : > { %v3510_v23 = vpop.permute.xlu0 %3509  ;;  %4608 = vmatpush.msra.mxu0 %v4408_v51 }
 0xea8   : > { %v3524_v56 = vsel %vm1454_vm15, %v9016_v22, %v3510_v23  ;;  %v3624_v3 = vpop.permute.xlu1 %3623  ;;  %v4106_v12 = vld [vmem:[#allocation3 + $0x1b8] sm:$0xff]  ;;  %v4392_v22 = vld [vmem:[%s9957_s5 + $0x160] sm:$0xff]  ;;  %4595 = vmatpush.msrb.mxu3 %v4356_v45  ;;  %v4502_v45 = vld [vmem:[%s9957_s5 + $0x4d0] sm:$0xff] }
 0xea9   : > { %3552 = vst.msk [vmem:[#allocation3 + $0x180] sm:$0x3] %vm3047_vm7, %v3524_v56  ;;  %v3647_v11 = vsel %vm1569_vm1, %v8966_v21, %v3624_v3  ;;  %4319 = vmatpush.msrb.mxu2 %v4106_v12  ;;  %4609 = vmatpush.msra.mxu0 %v4406_v41  ;;  %v4400_v21 = vld [vmem:[%s9957_s5 + $0x1a0] sm:$0xff]  ;;  %vm11045_vm1 = vcmask 1014784  }
 0xeaa   : > { %3675 = vst.msk [vmem:[#allocation3 + $0x180] sm:$0xfc] %vm3172_vm3, %v3647_v11  ;;  %4596 = vmatpush.msrb.mxu3 %v4354_v15  ;;  %v4468_v15 = vld [vmem:[%s9957_s5 + $0x3c0] sm:$0xff] }
 0xeab   : > { %4610 = vmatpush.msra.mxu0 %v4404_v31  ;;  %v4436_v31 = vld [vmem:[%s9957_s5 + $0x2c0] sm:$0xff] }
 0xeac   : > { %5031 = vmatmul.msk.f32.gmra.mxu0 %vm4145_vm13, %v8974_v13  ;;  %v3254_v25 = vpop.permute.xlu2 %3253  ;;  %4597 = vmatpush.msrb.mxu3 %v4352_v57  ;;  %v4462_v57 = vld [vmem:[%s9957_s5 + $0x390] sm:$0xff] }
 0xead   : > { %4611 = vmatpush.msra.mxu0 %v4402_v35 }
 0xeaf   : > { %v3385_v58 = vpop.permute.xlu0 %3384  ;;  %4612 = vmatpush.msra.mxu0 %v4400_v21 }
 0xeb0   : > { %v3494_v27 = vpop.permute.xlu1 %3493  ;;  %v3409_v16 = vsel %vm1339_vm14, %v8996_v46, %v3385_v58  ;;  %v3410_v4 = vsel %vm1339_vm14, %v3385_v58, %v3387_v19  ;;  %v4394_v46 = vld [vmem:[%s9957_s5 + $0x170] sm:$0xff] }
 0xeb1   : > { %v3517_v5 = vsel %vm1454_vm15, %v9042_v6, %v3494_v27  ;;  %3437 = vst [vmem:[#allocation3 + $0xd0] sm:$0xc0] %v3409_v16  ;;  %v4099_v38 = vld [vmem:[#allocation3 + $0x180] sm:$0xff]  ;;  %4613 = vmatpush.msra.mxu0 %v4398_v61  ;;  %vm11046_vm15 = vmmov %vm11045_vm1  ;;  %v4430_v19 = vld [vmem:[%s9957_s5 + $0x290] sm:$0xff] }
 0xeb2   : > { %3545 = vst.msk [vmem:[#allocation3 + $0x148] sm:$0xff] %vm11045_vm1, %v3517_v5  ;;  %4320 = vmatpush.msrb.mxu2 %v4099_v38  ;;  %v4384_v6 = vld [vmem:[%s9957_s5 + $0x120] sm:$0xff]  ;;  %v4506_v27 = vld [vmem:[%s9957_s5 + $0x4f0] sm:$0xff] }
 0xeb3   : > { %3439 = vst.msk [vmem:[#allocation3 + $0xd8] sm:$0xc0] %vm3438_vm4, %v3410_v4  ;;  %4614 = vmatpush.msra.mxu0 %v4396_v62  ;;  %vm11048_vm4 = vmmov %vm11044_vm5  ;;  %v4504_v5 = vld [vmem:[%s9957_s5 + $0x4e0] sm:$0xff] }
 0xeb4   : > { %v2989_v49 = vpop.permute.xlu2 %2988 }
 0xeb5   : > { %4615 = vmatpush.msra.mxu0 %v4394_v46  ;;  %v4474_v46 = vld [vmem:[%s9957_s5 + $0x3f0] sm:$0xff] }
 0xeb7   : > { %v3252_v39 = vpop.permute.xlu0 %3251  ;;  %4616 = vmatpush.msra.mxu0 %v4392_v22  ;;  %v4424_v22 = vld [vmem:[%s9957_s5 + $0x260] sm:$0xff] }
 0xeb8   : > { %v3403_v60 = vpop.permute.xlu1 %3402  ;;  %v3276_v36 = vsel %vm994_vm11, %v9014_v63, %v3252_v39  ;;  %v3277_v28 = vsel %vm994_vm11, %v3252_v39, %v3254_v25  ;;  %v4077_v8 = vld [vmem:[#allocation3 + $0xd0] sm:$0xff] }
 0xeb9   : > { %v3417_v33 = vsel %vm1339_vm14, %v9009_v43, %v3403_v60  ;;  %3304 = vst [vmem:[#allocation3 + $0x98] sm:$0xf0] %v3276_v36  ;;  %4300 = vmatpush.msrb.mxu1 %v4077_v8  ;;  %v4092_v32 = vld [vmem:[#allocation3 + $0x148] sm:$0xff]  ;;  %4617 = vmatpush.msra.mxu0 %v4390_v55  ;;  %v4386_v63 = vld [vmem:[%s9957_s5 + $0x130] sm:$0xff]  ;;  %vm11047_vm14 = vmmov %vm11044_vm5 }
 0xeba   : > { %3446 = vst.msk [vmem:[#allocation3 + $0x110] sm:$0xff] %vm11046_vm15, %v3417_v33  ;;  %4321 = vmatpush.msrb.mxu2 %v4092_v32  ;;  %v4350_v43 = vld [vmem:[%s9957_s5 + $0x10] sm:$0xff]  ;;  %v4420_v60 = vld [vmem:[%s9957_s5 + $0x240] sm:$0xff] }
 0xebb   : > { %3306 = vst.msk [vmem:[#allocation3 + $0xa0] sm:$0xf0] %vm3305_vm8, %v3277_v28  ;;  %4618 = vmatpush.msra.mxu0 %v4388_v44  ;;  %4598 = vmatpush.msrb.mxu3 %v4350_v43  ;;  %v4470_v55 = vld [vmem:[%s9957_s5 + $0x3d0] sm:$0xff]  ;;  %v4496_v36 = vld [vmem:[%s9957_s5 + $0x4a0] sm:$0xff]  ;;  %vm4925_vm8 = vcmask 178176  }
 0xebc   : > { %v4422_v25 = vld [vmem:[%s9957_s5 + $0x250] sm:$0xff]  ;;  %v4464_v33 = vld [vmem:[%s9957_s5 + $0x3a0] sm:$0xff] }
 0xebd   : > { %4619 = vmatpush.msra.mxu0 %v4386_v63  ;;  %4599 = vmatpush.msrb.mxu3 %v4348_v50  ;;  %v4498_v39 = vld [vmem:[%s9957_s5 + $0x4b0] sm:$0xff]  ;;  %v4416_v32 = vld [vmem:[%s9957_s5 + $0x220] sm:$0xff] }
 0xebe   : > { %v4466_v28 = vld [vmem:[%s9957_s5 + $0x3b0] sm:$0xff]  ;;  %v4492_v63 = vld [vmem:[%s9957_s5 + $0x480] sm:$0xff] }
 0xebf   : > { %v3119_v18 = vpop.permute.xlu0 %3118  ;;  %4620 = vmatpush.msra.mxu0 %v4384_v6  ;;  %4676 = vmatpush.msra.mxu3 %v4506_v27  ;;  %v4418_v8 = vld [vmem:[%s9957_s5 + $0x230] sm:$0xff]  ;;  %v4460_v6 = vld [vmem:[%s9957_s5 + $0x380] sm:$0xff] }
 0xec0   : > { %v3270_v26 = vpop.permute.xlu1 %3269  ;;  %v3143_v40 = vsel %vm879_vm10, %v9037_v10, %v3119_v18  ;;  %v4070_v20 = vld [vmem:[#allocation3 + $0x98] sm:$0xff]  ;;  %v4494_v44 = vld [vmem:[%s9957_s5 + $0x490] sm:$0xff]  ;;  %v4412_v50 = vld [vmem:[%s9957_s5 + $0x200] sm:$0xff] }
 0xec1   : > { %v3284_v48 = vsel %vm994_vm11, %v9024_v29, %v3270_v26  ;;  %3171 = vst [vmem:[#allocation3 + $0x60] sm:$0xfc] %v3143_v40  ;;  %4301 = vmatpush.msrb.mxu1 %v4070_v20  ;;  %v4085_v53 = vld [vmem:[#allocation3 + $0x110] sm:$0xff]  ;;  %4621 = vmatpush.msra.mxu0 %v4382_v24  ;;  %vm11049_vm11 = vmmov %vm11045_vm1  ;;  %v4488_v24 = vld [vmem:[%s9957_s5 + $0x460] sm:$0xff] }
 0xec2   : > { %3314 = vst.msk [vmem:[#allocation3 + $0xd8] sm:$0x3f] %vm3313_vm9, %v3284_v48  ;;  %4322 = vmatpush.msrb.mxu2 %v4085_v53  ;;  %4677 = vmatpush.msra.mxu3 %v4504_v5  ;;  %v4490_v43 = vld [vmem:[%s9957_s5 + $0x470] sm:$0xff]  ;;  %v4456_v40 = vld [vmem:[%s9957_s5 + $0x360] sm:$0xff]  ;;  %v4375_v5 = vld [vmem:[%s9957_s5 + $0xd8] sm:$0xff]  ;;  %vm4914_vm9 = vcmask 1046528  }
 0xec3   : > { %4622 = vmatpush.msra.mxu0 %v4380_v1  ;;  %v4486_v26 = vld [vmem:[%s9957_s5 + $0x450] sm:$0xff]  ;;  %v4484_v48 = vld [vmem:[%s9957_s5 + $0x440] sm:$0xff] }
 0xec4   : > { %v4213_v21 = vpop.f32.mrf.mxu1  ;;  %4678 = vmatpush.msra.mxu3 %v4502_v45  ;;  %v4454_v53 = vld [vmem:[%s9957_s5 + $0x350] sm:$0xff] }
 0xec5   : > { %v4534_v27 = vld [vmem:[%s9957_s5 + $0x5d0] sm:$0xff] }
 0xec6   : > { %v4530_v45 = vld [vmem:[%s9957_s5 + $0x5b0] sm:$0xff] }
 0xec7   : > { %v2987_v30 = vpop.permute.xlu0 %2986 }
 0xec8   : > { %v3137_v10 = vpop.permute.xlu1 %3136  ;;  %v3011_v51 = vsel %vm11047_vm14, %v9056_v2, %v2987_v30  ;;  %v3012_v0 = vsel %vm11048_vm4, %v2987_v30, %v2989_v49  ;;  %v4063_v41 = vld [vmem:[#allocation3 + $0x60] sm:$0xff]  ;;  %v4482_v30 = vld [vmem:[%s9957_s5 + $0x430] sm:$0xff] }
 0xec9   : > { %v3151_v29 = vsel %vm879_vm10, %v9032_v52, %v3137_v10  ;;  %4302 = vmatpush.msrb.mxu1 %v4063_v41  ;;  %v4078_v23 = vld [vmem:[#allocation3 + $0xd8] sm:$0xff]  ;;  %3040 = vst.msk [vmem:[#allocation3 + $0x30] sm:$0xff] %vm11049_vm11, %v3012_v0  ;;  %v4440_v2 = vld [vmem:[%s9957_s5 + $0x2e0] sm:$0xff]  ;;  %v4438_v52 = vld [vmem:[%s9957_s5 + $0x2d0] sm:$0xff] }
 0xeca   : > { %3181 = vst.msk [vmem:[#allocation3 + $0xa0] sm:$0xf] %vm3180_vm6, %v3151_v29  ;;  %4323 = vmatpush.msrb.mxu2 %v4078_v23  ;;  %vm11050_vm6 = vmmov %vm11048_vm4  ;;  %v4452_v10 = vld [vmem:[%s9957_s5 + $0x340] sm:$0xff]  ;;  %v4450_v41 = vld [vmem:[%s9957_s5 + $0x330] sm:$0xff] }
 0xecb   : > { %4303 = vmatpush.msrb.mxu1 %v3011_v51  ;;  %v4480_v0 = vld [vmem:[%s9957_s5 + $0x420] sm:$0xff]  ;;  %v4478_v29 = vld [vmem:[%s9957_s5 + $0x410] sm:$0xff] }
 0xecc   : > { %5033 = vmatmul.msk.f32.vlgmr.msrb.gmra.mxu1 %vm4145_vm13, %v8869_v37  ;;  %v4448_v23 = vld [vmem:[%s9957_s5 + $0x320] sm:$0xff] }
 0xecd   : > { %4630 = vmatpush.msra.mxu1 %v4442_v34  ;;  %v4476_v34 = vld [vmem:[%s9957_s5 + $0x400] sm:$0xff] }
 0xecf   : > { %v3005_v56 = vpop.permute.xlu0 %3004  ;;  %4631 = vmatpush.msra.mxu1 %v4440_v2 }
 0xed0   : > { %v3121_v3 = vpop.permute.xlu1 %3120  ;;  %v3019_v12 = vsel %vm11050_vm6, %v9047_v59, %v3005_v56  ;;  %v4432_v59 = vld [vmem:[%s9957_s5 + $0x2a0] sm:$0xff]  ;;  %v4057_v38 = vld [vmem:[#allocation3 + $0x30] sm:$0xff]  ;;  %v4411_v56 = vld [vmem:[%s9957_s5 + $0x1f8] sm:$0xff] }
 0xed1   : > { %v3144_v11 = vsel %vm879_vm10, %v3119_v18, %v3121_v3  ;;  %3048 = vst.msk [vmem:[#allocation3 + $0x68] sm:$0x3] %vm3047_vm7, %v3019_v12  ;;  %v4071_v35 = vld [vmem:[#allocation3 + $0xa0] sm:$0xff]  ;;  %4632 = vmatpush.msra.mxu1 %v4438_v52  ;;  %v4458_v18 = vld [vmem:[%s9957_s5 + $0x370] sm:$0xff]  ;;  %vm11051_vm10 = vmmov %vm11045_vm1 }
 0xed2   : > { %3173 = vst.msk [vmem:[#allocation3 + $0x68] sm:$0xfc] %vm3172_vm3, %v3144_v11  ;;  %4324 = vmatpush.msrb.mxu2 %v4071_v35  ;;  %v4446_v52 = vld [vmem:[%s9957_s5 + $0x310] sm:$0xff]  ;;  %v4444_v12 = vld [vmem:[%s9957_s5 + $0x300] sm:$0xff]  ;;  %v4409_v35 = vld [vmem:[%s9957_s5 + $0x1e8] sm:$0xff] }
 0xed3   : > { %4633 = vmatpush.msra.mxu1 %v4436_v31  ;;  %v4538_v3 = vld [vmem:[%s9957_s5 + $0x5f0] sm:$0xff] }
 0xed4   : > { %5034 = vmatmul.msk.f32.gmra.mxu1 %vm4145_vm13, %v8974_v13  ;;  %4699 = vmatpush.msrb.mxu0 %v4538_v3  ;;  %v4570_v3 = vld [vmem:[%s9957_s5 + $0x6f0] sm:$0xf] }
 0xed5   : > { %4634 = vmatpush.msra.mxu1 %v4434_v54  ;;  %v4536_v54 = vld [vmem:[%s9957_s5 + $0x5e0] sm:$0xff] }
 0xed6   : > { %4700 = vmatpush.msrb.mxu0 %v4536_v54  ;;  %v4441_v54 = vld [vmem:[%s9957_s5 + $0x2e8] sm:$0xff] }
 0xed7   : > { %v9221_v9 = vpop.permute.xlu0 %4137  ;;  %4635 = vmatpush.msra.mxu1 %v4432_v59 }
 0xed8   : > { %v9224_v61 = vadd.f32 %v4190_v42, %v9221_v9  ;;  %v9227_v58 = vadd.f32 %v4213_v21, %v9221_v9  ;;  %v9377_v31 = vpop.permute.xlu1 %4142  ;;  %v4379_v42 = vld [vmem:[%s9957_s5 + $0xf8] sm:$0xff]  ;;  %v4377_v21 = vld [vmem:[%s9957_s5 + $0xe8] sm:$0xff]  ;;  %4701 = vmatpush.msrb.mxu0 %v4534_v27 }
 0xed9   : > { %v4064_v16 = vld [vmem:[#allocation3 + $0x68] sm:$0xff]  ;;  %4636 = vmatpush.msra.mxu1 %v4430_v19  ;;  %v4439_v27 = vld [vmem:[%s9957_s5 + $0x2d8] sm:$0xff] }
 0xeda   : > { %v4334_v4 = vmax.f32 %v9224_v61, 0.0  ;;  %v4335_v62 = vmax.f32 %v9227_v58, 0.0  ;;  %4325 = vmatpush.msrb.mxu2 %v4064_v16  ;;  %v4405_v16 = vld [vmem:[%s9957_s5 + $0x1c8] sm:$0xff]  ;;  %v4564_v61 = vld [vmem:[%s9957_s5 + $0x6c0] sm:$0xff]  ;;  %v4519_v58 = vld [vmem:[%s9957_s5 + $0x558] sm:$0xff] }
 0xedb   : > { %4637 = vmatpush.msra.mxu1 %v4428_v7  ;;  %v4407_v7 = vld [vmem:[%s9957_s5 + $0x1d8] sm:$0xff] }
 0xedc   : > { %4326 = vmatpush.msrb.mxu2 %v4057_v38  ;;  %4600 = vmatmul.f32.vlgmr.msrb.gmra.mxu3 %v4334_v4  ;;  %v4532_v38 = vld [vmem:[%s9957_s5 + $0x5c0] sm:$0xff] }
 0xedd   : > { %5036 = vmatmul.msk.f32.vlgmr.msrb.gmra.mxu2 %vm4145_vm13, %v8869_v37  ;;  %4623 = vmatmul.f32.vlgmr.msra.gmra.mxu0 %v4335_v62  ;;  %v4500_v37 = vld [vmem:[%s9957_s5 + $0x4c0] sm:$0xff] }
 0xede   : > { %4653 = vmatpush.msra.mxu2 %v4474_v46  ;;  %4638 = vmatpush.msra.mxu1 %v4426_v17  ;;  %v4403_v46 = vld [vmem:[%s9957_s5 + $0x1b8] sm:$0xff]  ;;  %v4373_v17 = vld [vmem:[%s9957_s5 + $0xc8] sm:$0xff] }
 0xedf   : > { %4679 = vmatpush.msra.mxu3 %v4500_v37  ;;  %4702 = vmatpush.msrb.mxu0 %v4532_v38  ;;  %v4401_v37 = vld [vmem:[%s9957_s5 + $0x1a8] sm:$0xff]  ;;  %v4503_v38 = vld [vmem:[%s9957_s5 + $0x4d8] sm:$0xff] }
 0xee0   : > { %4654 = vmatpush.msra.mxu2 %v4472_v14  ;;  %4639 = vmatpush.msra.mxu1 %v4424_v22  ;;  %v4193_v22 = vpop.f32.mrf.mxu0 }
 0xee1   : > { %4680 = vmatpush.msra.mxu3 %v4498_v39  ;;  %4703 = vmatpush.msrb.mxu0 %v4530_v45  ;;  %v4528_v39 = vld [vmem:[%s9957_s5 + $0x5a0] sm:$0xff]  ;;  %v4501_v45 = vld [vmem:[%s9957_s5 + $0x4c8] sm:$0xff] }
 0xee2   : > { %4655 = vmatpush.msra.mxu2 %v4470_v55  ;;  %4640 = vmatpush.msra.mxu1 %v4422_v25  ;;  %v4371_v55 = vld [vmem:[%s9957_s5 + $0xb8] sm:$0xff]  ;;  %v9429_v25 = vadd.f32 %v4193_v22, %v9377_v31 }
 0xee3   : > { %4681 = vmatpush.msra.mxu3 %v4496_v36  ;;  %4704 = vmatpush.msrb.mxu0 %v4528_v39 }
 0xee4   : > { %4656 = vmatpush.msra.mxu2 %v4468_v15  ;;  %4641 = vmatpush.msra.mxu1 %v4420_v60  ;;  %v4399_v15 = vld [vmem:[%s9957_s5 + $0x198] sm:$0xff]  ;;  %v4369_v60 = vld [vmem:[%s9957_s5 + $0xa8] sm:$0xff]  ;;  %v4341_v36 = vmax.f32 %v9429_v25, 0.0  ;;  %v4556_v25 = vld [vmem:[%s9957_s5 + $0x680] sm:$0xff] }
 0xee5   : > { %5037 = vmatmul.msk.f32.gmra.mxu2 %vm4145_vm13, %v8974_v13  ;;  %v4414_v13 = vld [vmem:[%s9957_s5 + $0x210] sm:$0xff]  ;;  %4682 = vmatpush.msra.mxu3 %v4494_v44  ;;  %v4367_v44 = vld [vmem:[%s9957_s5 + $0x98] sm:$0xff] }
 0xee6   : > { %4657 = vmatpush.msra.mxu2 %v4466_v28  ;;  %4642 = vmatpush.msra.mxu1 %v4418_v8  ;;  %v4526_v28 = vld [vmem:[%s9957_s5 + $0x590] sm:$0xff]  ;;  %v4397_v8 = vld [vmem:[%s9957_s5 + $0x188] sm:$0xff] }
 0xee7   : > { %4683 = vmatpush.msra.mxu3 %v4492_v63  ;;  %4705 = vmatpush.msrb.mxu0 %v4526_v28  ;;  %v4365_v63 = vld [vmem:[%s9957_s5 + $0x88] sm:$0xff]  ;;  %v4499_v28 = vld [vmem:[%s9957_s5 + $0x4b8] sm:$0xff] }
 0xee8   : > { %4658 = vmatpush.msra.mxu2 %v4464_v33  ;;  %4643 = vmatpush.msra.mxu1 %v4416_v32  ;;  %v4524_v33 = vld [vmem:[%s9957_s5 + $0x580] sm:$0xff]  ;;  %v4395_v32 = vld [vmem:[%s9957_s5 + $0x178] sm:$0xff] }
 0xee9   : > { %4684 = vmatpush.msra.mxu3 %v4490_v43  ;;  %4706 = vmatpush.msrb.mxu0 %v4524_v33  ;;  %v4363_v43 = vld [vmem:[%s9957_s5 + $0x78] sm:$0xff]  ;;  %v4558_v33 = vld [vmem:[%s9957_s5 + $0x690] sm:$0xff] }
 0xeea   : > { %4659 = vmatpush.msra.mxu2 %v4462_v57  ;;  %4644 = vmatpush.msra.mxu1 %v4414_v13  ;;  %v4522_v57 = vld [vmem:[%s9957_s5 + $0x570] sm:$0xff]  ;;  %v4393_v13 = vld [vmem:[%s9957_s5 + $0x168] sm:$0xff] }
 0xeeb   : > { %4685 = vmatpush.msra.mxu3 %v4488_v24  ;;  %4707 = vmatpush.msrb.mxu0 %v4522_v57  ;;  %v4361_v24 = vld [vmem:[%s9957_s5 + $0x68] sm:$0xff] }
 0xeec   : > { %4660 = vmatpush.msra.mxu2 %v4460_v6  ;;  %4645 = vmatpush.msra.mxu1 %v4412_v50  ;;  %v4520_v6 = vld [vmem:[%s9957_s5 + $0x560] sm:$0xff]  ;;  %v4391_v50 = vld [vmem:[%s9957_s5 + $0x158] sm:$0xff] }
 0xeed   : > { %v4236_v20 = vpop.f32.mrf.mxu2  ;;  %4686 = vmatpush.msra.mxu3 %v4486_v26  ;;  %4708 = vmatpush.msrb.mxu0 %v4520_v6  ;;  %v4389_v26 = vld [vmem:[%s9957_s5 + $0x148] sm:$0xff]  ;;  %v4535_v6 = vld [vmem:[%s9957_s5 + $0x5d8] sm:$0xff] }
 0xeee   : > { %4661 = vmatpush.msra.mxu2 %v4458_v18  ;;  %v9330_v1 = vadd.f32 %v4236_v20, %v9221_v9  ;;  %v4259_v51 = vpop.f32.mrf.mxu3  ;;  %4603 = vmatmul.f32.gmra.mxu3 %v4341_v36  ;;  %v4518_v18 = vld [vmem:[%s9957_s5 + $0x550] sm:$0xff]  ;;  %v4516_v20 = vld [vmem:[%s9957_s5 + $0x540] sm:$0xff] }
 0xeef   : > { %4687 = vmatpush.msra.mxu3 %v4484_v48  ;;  %v9363_v2 = vadd.f32 %v4259_v51, %v9221_v9  ;;  %4709 = vmatpush.msrb.mxu0 %v4518_v18  ;;  %v4387_v48 = vld [vmem:[%s9957_s5 + $0x138] sm:$0xff] }
 0xef0   : > { %4662 = vmatpush.msra.mxu2 %v4456_v40  ;;  %v4336_v49 = vmax.f32 %v9330_v1, 0.0  ;;  %v4359_v40 = vld [vmem:[%s9957_s5 + $0x58] sm:$0xff]  ;;  %5038 = vmatpush.msk.msrb.mxu1 %vm3214_vm0, %v4570_v3  ;;  %v4548_v3 = vld [vmem:[%s9957_s5 + $0x640] sm:$0xff] }
 0xef1   : > { %4688 = vmatpush.msra.mxu3 %v4482_v30  ;;  %v4337_v59 = vmax.f32 %v9363_v2, 0.0  ;;  %4710 = vmatpush.msrb.mxu0 %v4516_v20  ;;  %v4514_v30 = vld [vmem:[%s9957_s5 + $0x530] sm:$0xff]  ;;  %v4355_v51 = vld [vmem:[%s9957_s5 + $0x38] sm:$0xff] }
 0xef2   : > { %4663 = vmatpush.msra.mxu2 %v4454_v53  ;;  %4646 = vmatmul.f32.vlgmr.msra.gmra.mxu1 %v4336_v49  ;;  %v4357_v53 = vld [vmem:[%s9957_s5 + $0x48] sm:$0xff] }
 0xef3   : > { %4689 = vmatpush.msra.mxu3 %v4480_v0  ;;  %4711 = vmatpush.msrb.mxu0 %v4514_v30  ;;  %v4512_v0 = vld [vmem:[%s9957_s5 + $0x520] sm:$0xff] }
 0xef4   : > { %4664 = vmatpush.msra.mxu2 %v4452_v10  ;;  %v4385_v10 = vld [vmem:[%s9957_s5 + $0x128] sm:$0xff] }
 0xef5   : > { %4690 = vmatpush.msra.mxu3 %v4478_v29  ;;  %v4353_v29 = vld [vmem:[%s9957_s5 + $0x28] sm:$0xff]  ;;  %4712 = vmatpush.msrb.mxu0 %v4512_v0 }
 0xef6   : > { %4665 = vmatpush.msra.mxu2 %v4450_v41  ;;  %v4262_v11 = vpop.f32.mrf.mxu3  ;;  %v4383_v41 = vld [vmem:[%s9957_s5 + $0x118] sm:$0xff]  ;;  %v4489_v0 = vld [vmem:[%s9957_s5 + $0x468] sm:$0xff] }
 0xef7   : > { %4691 = vmatpush.msra.mxu3 %v4476_v34  ;;  %v9395_v19 = vadd.f32 %v4262_v11, %v9377_v31  ;;  %v4381_v34 = vld [vmem:[%s9957_s5 + $0x108] sm:$0xff]  ;;  %v4443_v11 = vld [vmem:[%s9957_s5 + $0x2f8] sm:$0xff] }
 0xef8   : > { %4666 = vmatpush.msra.mxu2 %v4448_v23  ;;  %v4510_v23 = vld [vmem:[%s9957_s5 + $0x510] sm:$0xff] }
 0xef9   : > { %4768 = vmatpush.msrb.mxu3 %v4411_v56  ;;  %v4344_v14 = vmax.f32 %v9395_v19, 0.0  ;;  %4713 = vmatpush.msrb.mxu0 %v4510_v23  ;;  %v4508_v56 = vld [vmem:[%s9957_s5 + $0x500] sm:$0xff]  ;;  %v4550_v23 = vld [vmem:[%s9957_s5 + $0x650] sm:$0xff] }
 0xefa   : > { %4667 = vmatpush.msra.mxu2 %v4446_v52  ;;  %v4351_v52 = vld [vmem:[%s9957_s5 + $0x18] sm:$0xff]  ;;  %v4946_v19 = vld [vmem:[%s9961_s9 + $0x60] sm:$0xff] }
 0xefb   : > { %4769 = vmatpush.msrb.mxu3 %v4409_v35  ;;  %4714 = vmatpush.msrb.mxu0 %v4508_v56  ;;  %v4568_v35 = vld [vmem:[%s9957_s5 + $0x6e0] sm:$0xff]  ;;  %v4527_v56 = vld [vmem:[%s9957_s5 + $0x598] sm:$0xff] }
 0xefc   : > { %4668 = vmatpush.msra.mxu2 %v4444_v12  ;;  %v4349_v12 = vld [vmem:[%s9957_s5 + $0x8] sm:$0xff]  ;;  %4723 = vmatpush.msrb.mxu1 %v4568_v35 }
 0xefd   : > { %4669 = vmatmul.f32.vlgmr.msra.gmra.mxu2 %v4337_v59  ;;  %4770 = vmatpush.msrb.mxu3 %v4407_v7  ;;  %v4566_v7 = vld [vmem:[%s9957_s5 + $0x6d0] sm:$0xff]  ;;  %v4525_v35 = vld [vmem:[%s9957_s5 + $0x588] sm:$0xff] }
 0xefe   : > { %4745 = vmatpush.msrb.mxu2 %v4379_v42  ;;  %4791 = vmatpush.msra.mxu0 %v4443_v11  ;;  %v4507_v42 = vld [vmem:[%s9957_s5 + $0x4f8] sm:$0xff]  ;;  %v4421_v11 = vld [vmem:[%s9957_s5 + $0x248] sm:$0xff] }
 0xeff   : > { %4771 = vmatpush.msrb.mxu3 %v4405_v16  ;;  %v4239_v16 = vpop.f32.mrf.mxu2  ;;  %4724 = vmatpush.msrb.mxu1 %v4566_v7  ;;  %v4419_v7 = vld [vmem:[%s9957_s5 + $0x238] sm:$0xff] }
 0xf00   : > { %4746 = vmatpush.msrb.mxu2 %v4377_v21  ;;  %4792 = vmatpush.msra.mxu0 %v4441_v54  ;;  %v4505_v21 = vld [vmem:[%s9957_s5 + $0x4e8] sm:$0xff]  ;;  %v4546_v54 = vld [vmem:[%s9957_s5 + $0x630] sm:$0xff] }
 0xf01   : > { %4772 = vmatpush.msrb.mxu3 %v4403_v46  ;;  %v4562_v46 = vld [vmem:[%s9957_s5 + $0x6b0] sm:$0xff]  ;;  %4725 = vmatpush.msrb.mxu1 %v4564_v61  ;;  %v4521_v61 = vld [vmem:[%s9957_s5 + $0x568] sm:$0xff] }
 0xf02   : > { %4747 = vmatpush.msrb.mxu2 %v4375_v5  ;;  %v9566_v5 = vadd.f32 %v4239_v16, %v9377_v31  ;;  %4793 = vmatpush.msra.mxu0 %v4439_v27  ;;  %v4481_v27 = vld [vmem:[%s9957_s5 + $0x428] sm:$0xff]  ;;  %v4544_v16 = vld [vmem:[%s9957_s5 + $0x620] sm:$0xff] }
 0xf03   : > { %4773 = vmatpush.msrb.mxu3 %v4401_v37  ;;  %4726 = vmatpush.msrb.mxu1 %v4562_v46  ;;  %v4542_v46 = vld [vmem:[%s9957_s5 + $0x610] sm:$0xff] }
 0xf04   : > { %4748 = vmatpush.msrb.mxu2 %v4373_v17  ;;  %v4435_v17 = vld [vmem:[%s9957_s5 + $0x2b8] sm:$0xff]  ;;  %v4343_v22 = vmax.f32 %v9566_v5, 0.0  ;;  %v4948_v5 = vld [vmem:[%s9961_s9 + $0x70] sm:$0xff] }
 0xf05   : > { %4672 = vmatmul.f32.gmra.mxu2 %v4344_v14  ;;  %4774 = vmatpush.msrb.mxu3 %v4399_v15  ;;  %v4433_v15 = vld [vmem:[%s9957_s5 + $0x2a8] sm:$0xff] }
 0xf06   : > { %4749 = vmatpush.msrb.mxu2 %v4371_v55  ;;  %v4560_v55 = vld [vmem:[%s9957_s5 + $0x6a0] sm:$0xff]  ;;  %4649 = vmatmul.f32.gmra.mxu1 %v4343_v22 }
 0xf07   : > { %4775 = vmatpush.msrb.mxu3 %v4397_v8  ;;  %4727 = vmatpush.msrb.mxu1 %v4560_v55  ;;  %v4413_v55 = vld [vmem:[%s9957_s5 + $0x208] sm:$0xff] }
 0xf08   : > { %4750 = vmatpush.msrb.mxu2 %v4369_v60  ;;  %v4216_v60 = vpop.f32.mrf.mxu1 }
 0xf09   : > { %4776 = vmatpush.msrb.mxu3 %v4395_v32  ;;  %v4497_v32 = vld [vmem:[%s9957_s5 + $0x4a8] sm:$0xff]  ;;  %v9611_v57 = vadd.f32 %v4216_v60, %v9377_v31  ;;  %4728 = vmatpush.msrb.mxu1 %v4558_v33  ;;  %v4475_v60 = vld [vmem:[%s9957_s5 + $0x3f8] sm:$0xff] }
 0xf0a   : > { %4751 = vmatpush.msrb.mxu2 %v4367_v44  ;;  %v4539_v44 = vld [vmem:[%s9957_s5 + $0x5f8] sm:$0xff]  ;;  %v4509_v33 = vld [vmem:[%s9957_s5 + $0x508] sm:$0xff] }
 0xf0b   : > { %4777 = vmatpush.msrb.mxu3 %v4393_v13  ;;  %v4537_v13 = vld [vmem:[%s9957_s5 + $0x5e8] sm:$0xff]  ;;  %4729 = vmatpush.msrb.mxu1 %v4556_v25  ;;  %v4463_v25 = vld [vmem:[%s9957_s5 + $0x398] sm:$0xff] }
 0xf0c   : > { %4752 = vmatpush.msrb.mxu2 %v4365_v63  ;;  %v4431_v63 = vld [vmem:[%s9957_s5 + $0x298] sm:$0xff] }
 0xf0d   : > { %4778 = vmatpush.msrb.mxu3 %v4391_v50  ;;  %v4554_v50 = vld [vmem:[%s9957_s5 + $0x670] sm:$0xff] }
 0xf0e   : > { %4753 = vmatpush.msrb.mxu2 %v4363_v43  ;;  %v4429_v43 = vld [vmem:[%s9957_s5 + $0x288] sm:$0xff]  ;;  %4730 = vmatpush.msrb.mxu1 %v4554_v50 }
 0xf0f   : > { %4779 = vmatpush.msrb.mxu3 %v4389_v26  ;;  %v4342_v26 = vmax.f32 %v9611_v57, 0.0  ;;  %v4465_v57 = vld [vmem:[%s9957_s5 + $0x3a8] sm:$0xff] }
 0xf10   : > { %4754 = vmatpush.msrb.mxu2 %v4361_v24  ;;  %v4493_v24 = vld [vmem:[%s9957_s5 + $0x488] sm:$0xff] }
 0xf11   : > { %4780 = vmatpush.msrb.mxu3 %v4387_v48  ;;  %v4533_v48 = vld [vmem:[%s9957_s5 + $0x5c8] sm:$0xff]  ;;  %4626 = vmatmul.f32.gmra.mxu0 %v4342_v26 }
 0xf12   : > { %4755 = vmatpush.msrb.mxu2 %v4359_v40  ;;  %v4427_v40 = vld [vmem:[%s9957_s5 + $0x278] sm:$0xff]  ;;  %v4461_v50 = vld [vmem:[%s9957_s5 + $0x388] sm:$0xff] }
 0xf13   : > { %4781 = vmatpush.msrb.mxu3 %v4385_v10  ;;  %v4531_v10 = vld [vmem:[%s9957_s5 + $0x5b8] sm:$0xff] }
 0xf14   : > { %4756 = vmatpush.msrb.mxu2 %v4357_v53  ;;  %v4491_v53 = vld [vmem:[%s9957_s5 + $0x478] sm:$0xff] }
 0xf15   : > { %4782 = vmatpush.msrb.mxu3 %v4383_v41  ;;  %v4425_v41 = vld [vmem:[%s9957_s5 + $0x268] sm:$0xff] }
 0xf16   : > { %4757 = vmatpush.msrb.mxu2 %v4355_v51  ;;  %v4552_v51 = vld [vmem:[%s9957_s5 + $0x660] sm:$0xff] }
 0xf17   : > { %4783 = vmatpush.msrb.mxu3 %v4381_v34  ;;  %v4487_v34 = vld [vmem:[%s9957_s5 + $0x458] sm:$0xff]  ;;  %4731 = vmatpush.msrb.mxu1 %v4552_v51 }
 0xf18   : > { %4758 = vmatpush.msrb.mxu2 %v4353_v29  ;;  %v4529_v29 = vld [vmem:[%s9957_s5 + $0x5a8] sm:$0xff]  ;;  %v4563_v51 = vld [vmem:[%s9957_s5 + $0x6b8] sm:$0xff] }
 0xf19   : > { %4732 = vmatpush.msrb.mxu1 %v4550_v23  ;;  %v4559_v23 = vld [vmem:[%s9957_s5 + $0x698] sm:$0xff] }
 0xf1a   : > { %4759 = vmatpush.msrb.mxu2 %v4351_v52  ;;  %v4423_v52 = vld [vmem:[%s9957_s5 + $0x258] sm:$0xff] }
 0xf1b   : > { %4733 = vmatpush.msrb.mxu1 %v4548_v3  ;;  %v4555_v3 = vld [vmem:[%s9957_s5 + $0x678] sm:$0xff] }
 0xf1c   : > { %4760 = vmatpush.msrb.mxu2 %v4349_v12  ;;  %v4485_v12 = vld [vmem:[%s9957_s5 + $0x448] sm:$0xff] }
 0xf1d   : > { %4761 = vmatmul.f32.vlgmr.msrb.gmra.mxu2 %v4334_v4  ;;  %v4437_v4 = vld [vmem:[%s9957_s5 + $0x2c8] sm:$0xff]  ;;  %4734 = vmatpush.msrb.mxu1 %v4546_v54  ;;  %v4551_v54 = vld [vmem:[%s9957_s5 + $0x658] sm:$0xff] }
 0xf1e   : > { %4837 = vmatpush.msra.mxu2 %v4507_v42  ;;  %4794 = vmatpush.msra.mxu0 %v4437_v4  ;;  %v4483_v42 = vld [vmem:[%s9957_s5 + $0x438] sm:$0xff]  ;;  %v4417_v4 = vld [vmem:[%s9957_s5 + $0x228] sm:$0xff] }
 0xf1f   : > { %4735 = vmatpush.msrb.mxu1 %v4544_v16 }
 0xf20   : > { %4838 = vmatpush.msra.mxu2 %v4505_v21  ;;  %4795 = vmatpush.msra.mxu0 %v4435_v17  ;;  %v4523_v21 = vld [vmem:[%s9957_s5 + $0x578] sm:$0xff]  ;;  %v4477_v17 = vld [vmem:[%s9957_s5 + $0x408] sm:$0xff] }
 0xf21   : > { %v4282_v37 = vpop.f32.mrf.mxu0  ;;  %4736 = vmatpush.msrb.mxu1 %v4542_v46 }
 0xf22   : > { %4839 = vmatpush.msra.mxu2 %v4503_v38  ;;  %v9585_v39 = vadd.f32 %v4282_v37, %v9221_v9  ;;  %4796 = vmatpush.msra.mxu0 %v4433_v15  ;;  %v4479_v38 = vld [vmem:[%s9957_s5 + $0x418] sm:$0xff]  ;;  %v4517_v37 = vld [vmem:[%s9957_s5 + $0x548] sm:$0xff] }
 0xf23   : > { %v4515_v15 = vld [vmem:[%s9957_s5 + $0x538] sm:$0xff] }
 0xf24   : > { %4840 = vmatpush.msra.mxu2 %v4501_v45  ;;  %v4338_v8 = vmax.f32 %v9585_v39, 0.0  ;;  %4797 = vmatpush.msra.mxu0 %v4431_v63  ;;  %v4540_v45 = vld [vmem:[%s9957_s5 + $0x600] sm:$0xff]  ;;  %v4511_v39 = vld [vmem:[%s9957_s5 + $0x518] sm:$0xff] }
 0xf25   : > { %4764 = vmatmul.f32.gmra.mxu2 %v4341_v36  ;;  %v4495_v36 = vld [vmem:[%s9957_s5 + $0x498] sm:$0xff]  ;;  %4737 = vmatpush.msrb.mxu1 %v4540_v45 }
 0xf26   : > { %4841 = vmatpush.msra.mxu2 %v4499_v28  ;;  %4692 = vmatmul.f32.vlgmr.msra.gmra.mxu3 %v4338_v8  ;;  %v4513_v28 = vld [vmem:[%s9957_s5 + $0x528] sm:$0xff]  ;;  %v4467_v63 = vld [vmem:[%s9957_s5 + $0x3b8] sm:$0xff] }
 0xf27   : > { %4860 = vmatpush.msra.mxu3 %v4539_v44  ;;  %4798 = vmatpush.msra.mxu0 %v4429_v43  ;;  %v4473_v44 = vld [vmem:[%s9957_s5 + $0x3e8] sm:$0xff] }
 0xf28   : > { %4842 = vmatpush.msra.mxu2 %v4497_v32  ;;  %4814 = vmatpush.msra.mxu1 %v4475_v60  ;;  %v4469_v32 = vld [vmem:[%s9957_s5 + $0x3c8] sm:$0xff] }
 0xf29   : > { %v4285_v18 = vpop.f32.mrf.mxu0  ;;  %4861 = vmatpush.msra.mxu3 %v4537_v13  ;;  %4799 = vmatpush.msra.mxu0 %v4427_v40  ;;  %v4457_v40 = vld [vmem:[%s9957_s5 + $0x368] sm:$0xff] }
 0xf2a   : > { %4843 = vmatpush.msra.mxu2 %v4495_v36  ;;  %v9641_v20 = vadd.f32 %v4285_v18, %v9377_v31  ;;  %4815 = vmatpush.msra.mxu1 %v4473_v44  ;;  %v4459_v18 = vld [vmem:[%s9957_s5 + $0x378] sm:$0xff] }
 0xf2b   : > { %4862 = vmatpush.msra.mxu3 %v4535_v6  ;;  %4800 = vmatpush.msra.mxu0 %v4425_v41  ;;  %v4571_v6 = vld [vmem:[%s9957_s5 + $0x6f8] sm:$0xf]  ;;  %v4561_v41 = vld [vmem:[%s9957_s5 + $0x6a8] sm:$0xff] }
 0xf2c   : > { %4844 = vmatpush.msra.mxu2 %v4493_v24  ;;  %v4345_v30 = vmax.f32 %v9641_v20, 0.0  ;;  %v4569_v24 = vld [vmem:[%s9957_s5 + $0x6e8] sm:$0xff] }
 0xf2d   : > { %4863 = vmatpush.msra.mxu3 %v4533_v48  ;;  %4801 = vmatpush.msra.mxu0 %v4423_v52  ;;  %v4557_v52 = vld [vmem:[%s9957_s5 + $0x688] sm:$0xff] }
 0xf2e   : > { %4845 = vmatpush.msra.mxu2 %v4491_v53  ;;  %4695 = vmatmul.f32.gmra.mxu3 %v4345_v30  ;;  %v4565_v53 = vld [vmem:[%s9957_s5 + $0x6c8] sm:$0xff] }
 0xf2f   : > { %4864 = vmatpush.msra.mxu3 %v4531_v10  ;;  %4802 = vmatpush.msra.mxu0 %v4421_v11  ;;  %v4553_v11 = vld [vmem:[%s9957_s5 + $0x668] sm:$0xff] }
 0xf30   : > { %4846 = vmatpush.msra.mxu2 %v4489_v0  ;;  %v4453_v0 = vld [vmem:[%s9957_s5 + $0x348] sm:$0xff] }
 0xf31   : > { %4865 = vmatpush.msra.mxu3 %v4529_v29  ;;  %4803 = vmatpush.msra.mxu0 %v4419_v7  ;;  %v4451_v29 = vld [vmem:[%s9957_s5 + $0x338] sm:$0xff] }
 0xf32   : > { %4847 = vmatpush.msra.mxu2 %v4487_v34  ;;  %v4449_v34 = vld [vmem:[%s9957_s5 + $0x328] sm:$0xff] }
 0xf33   : > { %4866 = vmatpush.msra.mxu3 %v4527_v56  ;;  %4804 = vmatpush.msra.mxu0 %v4417_v4  ;;  %v4447_v56 = vld [vmem:[%s9957_s5 + $0x318] sm:$0xff] }
 0xf34   : > { %4848 = vmatpush.msra.mxu2 %v4485_v12  ;;  %v4445_v12 = vld [vmem:[%s9957_s5 + $0x308] sm:$0xff] }
 0xf35   : > { %4867 = vmatpush.msra.mxu3 %v4525_v35 }
 0xf36   : > { %4849 = vmatpush.msra.mxu2 %v4483_v42  ;;  %4784 = vmatmul.f32.vlgmr.msrb.gmra.mxu3 %v4335_v62  ;;  %v4415_v62 = vld [vmem:[%s9957_s5 + $0x218] sm:$0xff] }
 0xf37   : > { %4868 = vmatpush.msra.mxu3 %v4523_v21  ;;  %4805 = vmatpush.msra.mxu0 %v4415_v62  ;;  %v4549_v21 = vld [vmem:[%s9957_s5 + $0x648] sm:$0xff] }
 0xf38   : > { %4850 = vmatpush.msra.mxu2 %v4481_v27  ;;  %v4543_v27 = vld [vmem:[%s9957_s5 + $0x618] sm:$0xff] }
 0xf39   : > { %4869 = vmatpush.msra.mxu3 %v4521_v61  ;;  %4806 = vmatpush.msra.mxu0 %v4413_v55  ;;  %v4541_v61 = vld [vmem:[%s9957_s5 + $0x608] sm:$0xff] }
 0xf3a   : > { %4851 = vmatpush.msra.mxu2 %v4479_v38  ;;  %v4943_v55 = vld [vmem:[%s9961_s9 + $0x48] sm:$0xff] }
 0xf3b   : > { %4870 = vmatpush.msra.mxu3 %v4519_v58  ;;  %v4944_v58 = vld [vmem:[%s9961_s9 + $0x50] sm:$0xff] }
 0xf3c   : > { %4852 = vmatpush.msra.mxu2 %v4477_v17 }
 0xf3d   : > { %4853 = vmatmul.f32.vlgmr.msra.gmra.mxu2 %v4338_v8  ;;  %4871 = vmatpush.msra.mxu3 %v4517_v37  ;;  %v4471_v8 = vld [vmem:[%s9957_s5 + $0x3d8] sm:$0xff] }
 0xf3e   : > { %4787 = vmatmul.f32.gmra.mxu3 %v4342_v26  ;;  %4816 = vmatpush.msra.mxu1 %v4471_v8  ;;  %v4567_v26 = vld [vmem:[%s9957_s5 + $0x6d8] sm:$0xff] }
 0xf3f   : > { %4872 = vmatpush.msra.mxu3 %v4515_v15  ;;  %v4942_v15 = vld [vmem:[%s9961_s9 + $0x40] sm:$0xff] }
 0xf40   : > { %4817 = vmatpush.msra.mxu1 %v4469_v32 }
 0xf41   : > { %4873 = vmatpush.msra.mxu3 %v4513_v28 }
 0xf42   : > { %4818 = vmatpush.msra.mxu1 %v4467_v63  ;;  %v4939_v63 = vld [vmem:[%s9961_s9 + $0x28] sm:$0xff] }
 0xf43   : > { %4874 = vmatpush.msra.mxu3 %v4511_v39  ;;  %v4941_v39 = vld [vmem:[%s9961_s9 + $0x38] sm:$0xff] }
 0xf44   : > { %4819 = vmatpush.msra.mxu1 %v4465_v57  ;;  %v4938_v57 = vld [vmem:[%s9961_s9 + $0x20] sm:$0xff] }
 0xf45   : > { %4856 = vmatmul.f32.gmra.mxu2 %v4345_v30  ;;  %4875 = vmatpush.msra.mxu3 %v4509_v33  ;;  %v4455_v30 = vld [vmem:[%s9957_s5 + $0x358] sm:$0xff]  ;;  %v4940_v33 = vld [vmem:[%s9961_s9 + $0x30] sm:$0xff] }
 0xf46   : > { %4820 = vmatpush.msra.mxu1 %v4463_v25 }
 0xf48   : > { %4821 = vmatpush.msra.mxu1 %v4461_v50 }
 0xf49   : > { %v4305_v13 = vpop.f32.mrf.mxu1 }
 0xf4a   : > { %v4306_v36 = vadd.f32 %v4305_v13, %v9221_v9  ;;  %4822 = vmatpush.msra.mxu1 %v4459_v18 }
 0xf4c   : > { %v4339_v43 = vmax.f32 %v4306_v36, 0.0  ;;  %4823 = vmatpush.msra.mxu1 %v4457_v40  ;;  %v4937_v36 = vld [vmem:[%s9961_s9 + $0x18] sm:$0xff] }
 0xf4e   : > { %4715 = vmatmul.f32.vlgmr.msrb.gmra.mxu0 %v4339_v43  ;;  %4876 = vmatmul.f32.vlgmr.msra.gmra.mxu3 %v4339_v43 }
 0xf4f   : > { %5041 = vmatpush.msk.msrb.mxu0 %vm3214_vm0, %v4571_v6  ;;  %4824 = vmatpush.msra.mxu1 %v4455_v30  ;;  %vm11052_vm0 = vmmov %vm11045_vm1 }
 0xf50   : > { %vm11053_vm13 = vmmov %vm11052_vm0 }
 0xf51   : > { %v4308_v20 = vpop.f32.mrf.mxu1  ;;  %4884 = vmatpush.msrb.mxu0 %v4569_v24  ;;  %4825 = vmatpush.msra.mxu1 %v4453_v0  ;;  %vm11054_vm7 = vmmov %vm11052_vm0 }
 0xf52   : > { %v4309_v48 = vadd.f32 %v4308_v20, %v9377_v31 }
 0xf53   : > { %4885 = vmatpush.msrb.mxu0 %v4567_v26  ;;  %4826 = vmatpush.msra.mxu1 %v4451_v29  ;;  %v4936_v26 = vld [vmem:[%s9961_s9 + $0x10] sm:$0xff] }
 0xf54   : > { %v4346_v10 = vmax.f32 %v4309_v48, 0.0 }
 0xf55   : > { %4886 = vmatpush.msrb.mxu0 %v4565_v53  ;;  %4827 = vmatpush.msra.mxu1 %v4449_v34  ;;  %v4906_v34 = vld [vmem:[%s9960_s8] sm:$0xff] }
 0xf56   : > { %4718 = vmatmul.f32.gmra.mxu0 %v4346_v10  ;;  %4879 = vmatmul.f32.gmra.mxu3 %v4346_v10 }
 0xf57   : > { %4887 = vmatpush.msrb.mxu0 %v4563_v51  ;;  %4828 = vmatpush.msra.mxu1 %v4447_v56 }
 0xf59   : > { %4888 = vmatpush.msrb.mxu0 %v4561_v41  ;;  %4829 = vmatpush.msra.mxu1 %v4445_v12 }
 0xf5a   : > { %v4624_v38 = vpop.f32.mrf.mxu0 }
 0xf5b   : > { %4889 = vmatpush.msrb.mxu0 %v4559_v23  ;;  %v4908_v23 = vld [vmem:[%s9960_s8 + $0x10] sm:$0x7f] }
 0xf5d   : > { %4890 = vmatpush.msrb.mxu0 %v4557_v52 }
 0xf5e   : > { %4807 = vmatmul.f32.vlgmr.msra.gmra.mxu0 %v4336_v49  ;;  %v4547_v49 = vld [vmem:[%s9957_s5 + $0x638] sm:$0xff] }
 0xf5f   : > { %4891 = vmatpush.msrb.mxu0 %v4555_v3 }
 0xf60   : > { %v4328_v35 = vpop.f32.mrf.mxu2 }
 0xf61   : > { %v4329_v42 = vadd.f32 %v4328_v35, %v9221_v9  ;;  %4892 = vmatpush.msrb.mxu0 %v4553_v11  ;;  %v4545_v9 = vld [vmem:[%s9957_s5 + $0x628] sm:$0xff] }
 0xf63   : > { %v4340_v1 = vmax.f32 %v4329_v42, 0.0  ;;  %4893 = vmatpush.msrb.mxu0 %v4551_v54 }
 0xf65   : > { %5039 = vmatmul.msk.f32.vlgmr.msrb.gmra.mxu1 %vm11051_vm10, %v4340_v1  ;;  %4894 = vmatpush.msrb.mxu0 %v4549_v21 }
 0xf66   : > { %4810 = vmatmul.f32.gmra.mxu0 %v4343_v22  ;;  %v4601_v22 = vpop.f32.mrf.mxu3 }
 0xf67   : > { %4895 = vmatpush.msrb.mxu0 %v4547_v49  ;;  %v4625_v25 = vadd.f32 %v4624_v38, %v4601_v22  ;;  %v4935_v49 = vld [vmem:[%s9961_s9 + $0x8] sm:$0xff] }
 0xf68   : > { %v4331_v7 = vpop.f32.mrf.mxu2 }
 0xf69   : > { %v4332_v16 = vadd.f32 %v4331_v7, %v9377_v31  ;;  %4896 = vmatpush.msrb.mxu0 %v4545_v9  ;;  %v4949_v31 = vld [vmem:[%s9961_s9 + $0x78] sm:$0xff]  ;;  %v4934_v9 = vld [vmem:[%s9961_s9] sm:$0xff]  ;;  %v4952_v7 = vld [vmem:[%s9961_s9 + $0x90] sm:$0x3f] }
 0xf6a   : > { %4959 = vmatpush.msrb.mxu1 %v4949_v31  ;;  %5044 = vmatpush.msk.msrb.mxu2 %vm3347_vm12, %v4952_v7  ;;  %vm4923_vm12 = vcmask 179200  }
 0xf6b   : > { %v4347_v4 = vmax.f32 %v4332_v16, 0.0  ;;  %4897 = vmatpush.msrb.mxu0 %v4543_v27  ;;  %v4951_v16 = vld [vmem:[%s9961_s9 + $0x88] sm:$0xff] }
 0xf6c   : > { %4960 = vmatpush.msrb.mxu1 %v4948_v5  ;;  %v4950_v5 = vld [vmem:[%s9961_s9 + $0x80] sm:$0xff]  ;;  %4993 = vmatpush.msrb.mxu2 %v4951_v16 }
 0xf6d   : > { %5040 = vmatmul.msk.f32.gmra.mxu1 %vm11052_vm0, %v4347_v4  ;;  %4898 = vmatpush.msrb.mxu0 %v4541_v61 }
 0xf6e   : > { %5042 = vmatmul.msk.f32.vlgmr.msrb.gmra.mxu0 %vm11053_vm13, %v4340_v1  ;;  %4994 = vmatpush.msrb.mxu2 %v4950_v5 }
 0xf6f   : > { %v4647_v37 = vpop.f32.mrf.mxu1 }
 0xf70   : > { %v4648_v50 = vadd.f32 %v4647_v37, %v4625_v25 }
 0xf71   : > { %v4604_v46 = vpop.f32.mrf.mxu3 }
 0xf75   : > { %4830 = vmatmul.f32.vlgmr.msra.gmra.mxu1 %v4337_v59  ;;  %v4947_v59 = vld [vmem:[%s9961_s9 + $0x68] sm:$0xff] }
 0xf76   : > { %5043 = vmatmul.msk.f32.gmra.mxu0 %vm11054_vm7, %v4347_v4  ;;  %4961 = vmatpush.msrb.mxu1 %v4947_v59 }
 0xf78   : > { %4962 = vmatpush.msrb.mxu1 %v4946_v19 }
 0xf7d   : > { %4833 = vmatmul.f32.gmra.mxu1 %v4344_v14  ;;  %v4945_v14 = vld [vmem:[%s9961_s9 + $0x58] sm:$0xff] }
 0xf7e   : > { %4963 = vmatpush.msrb.mxu1 %v4945_v14 }
 0xf80   : > { %4964 = vmatpush.msrb.mxu1 %v4944_v58  ;;  %v4670_v45 = vpop.f32.mrf.mxu2 }
 0xf81   : > { %v4671_v20 = vadd.f32 %v4670_v45, %v4648_v50 }
 0xf82   : > { %4965 = vmatpush.msrb.mxu1 %v4943_v55 }
 0xf83   : > { %v4650_v8 = vpop.f32.mrf.mxu1 }
 0xf84   : > { %4966 = vmatpush.msrb.mxu1 %v4942_v15 }
 0xf86   : > { %4967 = vmatpush.msrb.mxu1 %v4941_v39 }
 0xf88   : > { %v4673_v60 = vpop.f32.mrf.mxu2  ;;  %4968 = vmatpush.msrb.mxu1 %v4940_v33 }
 0xf8a   : > { %4969 = vmatpush.msrb.mxu1 %v4939_v63 }
 0xf8c   : > { %4970 = vmatpush.msrb.mxu1 %v4938_v57 }
 0xf8e   : > { %v4627_v2 = vpop.f32.mrf.mxu0  ;;  %4971 = vmatpush.msrb.mxu1 %v4937_v36 }
 0xf8f   : > { %v4628_v32 = vadd.f32 %v4627_v2, %v4604_v46 }
 0xf90   : > { %4972 = vmatpush.msrb.mxu1 %v4936_v26 }
 0xf91   : > { %v4651_v13 = vadd.f32 %v4650_v8, %v4628_v32  ;;  %v4909_v8 = vld [vmem:[%s9960_s8 + $0x18] sm:$0x7f] }
 0xf92   : > { %4973 = vmatpush.msrb.mxu1 %v4935_v49 }
 0xf93   : > { %v4674_v40 = vadd.f32 %v4673_v60, %v4651_v13 }
 0xf94   : > { %4974 = vmatpush.msrb.mxu1 %v4934_v9 }
 0xfa0   : > { %v4762_v43 = vpop.f32.mrf.mxu2 }
 0xfa8   : > { %v4765_v10 = vpop.f32.mrf.mxu2 }
 0xfa9   : > { %v4693_v62 = vpop.f32.mrf.mxu3 }
 0xfaa   : > { %v4694_v48 = vadd.f32 %v4693_v62, %v4671_v20 }
 0xfb1   : > { %v4696_v28 = vpop.f32.mrf.mxu3 }
 0xfb2   : > { %v4697_v53 = vadd.f32 %v4696_v28, %v4674_v40  ;;  %v4907_v28 = vld [vmem:[%s9960_s8 + $0x8] sm:$0xff] }
 0xfb3   : > { %v11055_v40 = vld [vmem:[#allocation9_spill] sm:$0xff] }
 0xfb9   : > { %v4785_v6 = vpop.f32.mrf.mxu3 }
 0xfba   : > { %v4786_v11 = vadd.f32 %v4785_v6, %v4762_v43 }
 0xfc0   : > { %v4854_v61 = vpop.f32.mrf.mxu2 }
 0xfc1   : > { %v4788_v0 = vpop.f32.mrf.mxu3 }
 0xfc2   : > { %v4789_v2 = vadd.f32 %v4788_v0, %v4765_v10 }
 0xfc8   : > { %v4857_v45 = vpop.f32.mrf.mxu2 }
 0xfcb   : > { %v4716_v17 = vpop.f32.mrf.mxu0 }
 0xfcc   : > { %v4717_v30 = vadd.f32 %v4716_v17, %v4694_v48 }
 0xfd1   : > { %v4877_v4 = vpop.f32.mrf.mxu3 }
 0xfd3   : > { %v4719_v44 = vpop.f32.mrf.mxu0 }
 0xfd4   : > { %v4720_v51 = vadd.f32 %v4719_v44, %v4697_v53 }
 0xfd9   : > { %v4880_v60 = vpop.f32.mrf.mxu3 }
 0xfdb   : > { %v4808_v18 = vpop.f32.mrf.mxu0 }
 0xfdc   : > { %v4809_v42 = vadd.f32 %v4808_v18, %v4786_v11 }
 0xfe2   : > { %v4739_v24 = vpop.f32.mrf.mxu1 }
 0xfe3   : > { %v4740_v41 = vadd.f32 %v4739_v24, %v4717_v30  ;;  %v4811_v56 = vpop.f32.mrf.mxu0 }
 0xfe4   : > { %v4812_v19 = vadd.f32 %v4811_v56, %v4789_v2 }
 0xfe5   : > { %v4910_v12 = vmul.f32 %v4906_v34, %v4740_v41 }
 0xfea   : > { %v4742_v29 = vpop.f32.mrf.mxu1 }
 0xfeb   : > { %v4743_v52 = vadd.f32 %v4742_v29, %v4720_v51  ;;  %v4900_v46 = vpop.f32.mrf.mxu0 }
 0xfed   : > { %v4912_v3 = vmul.f32 %v4908_v23, %v4743_v52 }
 0xfef   : > { %v4915_v35 = vsel %vm4914_vm9, %v4912_v3, 0.0 }
 0xff0   : > { %v4916_v54 = vadd.f32 %v4915_v35, %v4910_v12 }
 0xff2   : > { %v4917_v21 = vrot.slane %v4916_v54, 4  ;;  %v4831_v1 = vpop.f32.mrf.mxu1 }
 0xff3   : > { %v4832_v27 = vadd.f32 %v4831_v1, %v4809_v42  ;;  %v4903_v39 = vpop.f32.mrf.mxu0 }
 0xff4   : > { %v4918_v31 = vadd.f32 %v4917_v21, %v4916_v54 }
 0xff5   : > { %v4855_v22 = vadd.f32 %v4854_v61, %v4832_v27 }
 0xff6   : > { %v4919_v38 = vrot.slane %v4918_v31, 2 }
 0xff7   : > { %v4878_v14 = vadd.f32 %v4877_v4, %v4855_v22 }
 0xff8   : > { %v4920_v59 = vadd.f32 %v4919_v38, %v4918_v31 }
 0xff9   : > { %v4901_v55 = vadd.f32 %v4900_v46, %v4878_v14 }
 0xffa   : > { %v4834_v58 = vpop.f32.mrf.mxu1  ;;  %v4921_v62 = vrot.slane %v4920_v59, 1 }
 0xffb   : > { %v4835_v17 = vadd.f32 %v4834_v58, %v4812_v19  ;;  %v4911_v33 = vmul.f32 %v4907_v28, %v4901_v55 }
 0xffc   : > { %v4922_v37 = vadd.f32 %v4921_v62, %v4920_v59 }
 0xffd   : > { %v4858_v15 = vadd.f32 %v4857_v45, %v4835_v17  ;;  %v4924_v57 = vsel %vm4923_vm12, %v4911_v33, 0.0 }
 0xffe   : > { %4975 = vmatmul.f32.vlgmr.msrb.gmra.mxu1 %v4922_v37 }
 0xfff   : > { %v4881_v44 = vadd.f32 %v4880_v60, %v4858_v15 }
0x1001   : > { %v4904_v32 = vadd.f32 %v4903_v39, %v4881_v44 }
0x1003   : > { %v4913_v63 = vmul.f32 %v4909_v8, %v4904_v32 }
0x1005   : > { %v4926_v13 = vsel %vm4925_vm8, %v4913_v63, 0.0 }
0x1006   : > { %v4927_v25 = vadd.f32 %v4926_v13, %v4924_v57 }
0x1008   : > { %v4928_v36 = vrot.slane %v4927_v25, 4 }
0x100a   : > { %v4929_v43 = vadd.f32 %v4928_v36, %v4927_v25 }
0x100c   : > { %v4930_v6 = vrot.slane %v4929_v43, 2 }
0x100e   : > { %v4931_v50 = vadd.f32 %v4930_v6, %v4929_v43 }
0x1010   : > { %v4932_v24 = vrot.slane %v4931_v50, 1 }
0x1012   : > { %v4933_v18 = vadd.f32 %v4932_v24, %v4931_v50 }
0x1014   : > { %5045 = vmatmul.msk.f32.vlgmr.msrb.gmra.mxu2 %vm4923_vm12, %v4933_v18 }
0x107b   : > { %v4976_v26 = vpop.f32.mrf.mxu1 }
0x107c   : > { %v4977_v20 = vadd.f32 %v4976_v26, %v11055_v40 }
0x1096   :  { %53 = sbr.rel (!%p51_p0) target bundleno = 11 (0xb), region = 69 }
0x1097   : > { %v4996_v48 = vpop.f32.mrf.mxu2 }
0x1098   : > { %v4997_v53 = vadd.f32 %v4996_v48, %v4977_v20 }
0x109a   : > { %5001 = vst.msk [vmem:[%s4999_s12] sm:$0x1] %vm5000_vm2, %v4997_v53 }

</bundles_post_ra>
